<compile_context>
chip_gen: v7x
topology: tpu7x:2x2x1
jax: 0.10.0
libtpu: 0.0.40
codegen_flags: <defaults>
</compile_context>

<pallas_src>
import functools

import numpy as np

import jax
import jax.numpy as jnp
from jax.experimental import pallas as pl
from jax.experimental.pallas import tpu as pltpu


# Architecture constants of AFCI_Detector.
C1, C2, C3 = 16, 32, 64          # channel counts of the three stages
K1, K2, K3 = 15, 11, 7           # depthwise kernel sizes
P1, P2 = 4, 4                    # MaxPool1d factors

# Column assignments inside the packed "column" weight array (64 x 9).
_DB1, _PB1, _PW1, _DB2, _PB2, _DB3, _PB3, _WCLS, _BCLS = range(9)
_NCOL = 9


# ----------------------------------------------------------------------------
# In-kernel building blocks
# ----------------------------------------------------------------------------
def _tree_sum(parts):
    """Pairwise tree reduction -> multiple independent accumulators (VALU ILP)."""
    parts = list(parts)
    while len(parts) > 1:
        nxt = [parts[i] + parts[i + 1] for i in range(0, len(parts) - 1, 2)]
        if len(parts) % 2:
            nxt.append(parts[-1])
        parts = nxt
    return parts[0]


def _depthwise_same(h, dw, db, *, K, seg=None):
    """'same'-padded depthwise Conv1d along the lane axis of an (R, W) tile.

    h  : (R, W) activations.  Each row is an independent sequence; when `seg`
         is given, the lane axis is a concatenation of W//seg independent
         length-`seg` segments (one per batch element).
    dw : (R, K) or (1, K) per-row tap weights.
    db : (R, 1) or (1, 1) bias.

    Shifted taps are lane-slices of a zero-widened *register* value (no VMEM
    pad scratch); per-tap masks stop taps from leaking across segment (batch)
    boundaries.  Tap partials are tree-summed for ILP.
    """
    R, W = h.shape
    pad = K // 2
    zeros = jnp.zeros((R, pad), dtype=h.dtype)
    xp = jnp.concatenate([zeros, h, zeros], axis=-1)            # (R, W + K - 1)

    local = None
    if seg is not None and seg != W:
        nseg = W // seg
        iota_seg = jax.lax.broadcasted_iota(jnp.int32, (1, seg), 1)
        local = jnp.concatenate([iota_seg] * nseg, axis=-1)     # (1, W) position-in-segment

    parts = []
    for k in range(K):                                          # static -> unrolled
        tap = xp[:, k:k + W]                                    # == h[l + k - pad]
        if local is not None:
            s = pad - k
            if s > 0:                                           # left edge of each segment
                tap = jnp.where(local >= s, tap, 0.0)
            elif s < 0:                                         # right edge of each segment
                tap = jnp.where(local < seg + s, tap, 0.0)
        parts.append(tap * dw[:, k:k + 1])
    return _tree_sum(parts) + db


def _maxpool_lanes(z, pool):
    c, w = z.shape
    return jnp.max(z.reshape(c, w // pool, pool), axis=-1)


# ----------------------------------------------------------------------------
# Fused kernel: 3 conv stages + classifier, one batch *block* per grid step
# ----------------------------------------------------------------------------
def _afci_kernel(x_ref, dwp_ref, col_ref, pwp_ref, out_ref, *, Bblk, L):
    L1, L2 = L // P1, L // (P1 * P2)

    dwp = dwp_ref[...]        # (32, K1+K2+K3) packed depthwise weights
    col = col_ref[...]        # (64, 9)        packed column vectors (biases, ...)
    pwp = pwp_ref[...]        # (64, 48)       packed pointwise (BN-folded) weights

    # ---- Stage 1: DWConv(K1) -> pointwise 1->16 (+BN) -> ReLU -> MaxPool(4) ----
    # Depthwise with batch rows on the sublane axis (fills vregs for the 15-tap chain).
    a = _depthwise_same(x_ref[...], dwp[0:1, 0:K1], col[0:1, _DB1:_DB1 + 1], K=K1)  # (Bblk, L)
    if Bblk > 1:
        # Flatten batch rows onto the lane axis (lane-aligned concat): (Bblk, L) -> (1, Bblk*L)
        a = jnp.concatenate([a[b:b + 1, :] for b in range(Bblk)], axis=-1)
    # Cin=1 pointwise conv (+ folded BN) is an outer product -> VPU broadcast multiply.
    z = jnp.maximum(col[0:C1, _PW1:_PW1 + 1] * a + col[0:C1, _PB1:_PB1 + 1], 0.0)   # (16, Bblk*L)
    h = _maxpool_lanes(z, P1)                                                        # (16, Bblk*L1)

    # ---- Stage 2: DWConv(K2) -> pointwise 16->32 (+BN) -> ReLU -> MaxPool(4) ----
    a = _depthwise_same(h, dwp[0:C1, K1:K1 + K2], col[0:C1, _DB2:_DB2 + 1], K=K2, seg=L1)
    z = jnp.dot(pwp[0:C2, C2:C2 + C1], a, preferred_element_type=jnp.float32)        # (32, Bblk*L1)
    z = jnp.maximum(z + col[0:C2, _PB2:_PB2 + 1], 0.0)
    h = _maxpool_lanes(z, P2)                                                        # (32, Bblk*L2)

    # ---- Stage 3: DWConv(K3) -> pointwise 32->64 (+BN) -> ReLU -> AvgPool(1) ----
    a = _depthwise_same(h, dwp[0:C2, K1 + K2:K1 + K2 + K3], col[0:C2, _DB3:_DB3 + 1],
                        K=K3, seg=L2)
    z = jnp.dot(pwp[0:C3, 0:C2], a, preferred_element_type=jnp.float32)              # (64, Bblk*L2)
    z = jnp.maximum(z + col[0:C3, _PB3:_PB3 + 1], 0.0)
    feat = jnp.mean(z.reshape(C3, Bblk, L2), axis=-1)                                # (64, Bblk)

    # ---- Classifier: Linear(64,32) -> Dropout(identity) -> Linear(32,1),
    #      folded on the host into a single (64,) vector + scalar -> XLU reduction.
    logit = jnp.sum(col[0:C3, _WCLS:_WCLS + 1] * feat, axis=0, keepdims=True)        # (1, Bblk)
    out_ref[...] = (logit + col[0:1, _BCLS:_BCLS + 1]).astype(out_ref.dtype)


# ----------------------------------------------------------------------------
# Host-side folding + operand packing
# ----------------------------------------------------------------------------
def _fold_bn(stage, eps=1e-5):
    """Fold eval-mode BatchNorm1d into the 1x1 pointwise conv weight/bias."""
    dww, dwb, pww, pwb, gamma, beta, mean, var = stage
    scale = gamma * jax.lax.rsqrt(var + eps)                    # (Cout, 1)
    shift = beta - mean * scale
    return dww, dwb, pww * scale, pwb * scale + shift


def _pack_params(params):
    """Pack the 16 tiny weight/bias tensors into 3 operands (3 DMAs, not 16)."""
    s1 = _fold_bn(params["stage1"])
    s2 = _fold_bn(params["stage2"])
    s3 = _fold_bn(params["stage3"])
    w1, b1, w2, b2 = params["cls"]

    # The two classifier Linears have no nonlinearity between them -> exact fold.
    hp = jax.lax.Precision.HIGHEST
    wc = jnp.dot(w2, w1, precision=hp).T                        # (64, 1)
    bc = jnp.dot(w2, b1, precision=hp) + b2                     # (1, 1)

    dwpack = jnp.zeros((C2, K1 + K2 + K3), jnp.float32)
    dwpack = dwpack.at[0:1, 0:K1].set(s1[0])
    dwpack = dwpack.at[0:C1, K1:K1 + K2].set(s2[0])
    dwpack = dwpack.at[0:C2, K1 + K2:K1 + K2 + K3].set(s3[0])

    colpack = jnp.zeros((C3, _NCOL), jnp.float32)
    colpack = colpack.at[0:1, _DB1:_DB1 + 1].set(s1[1])
    colpack = colpack.at[0:C1, _PB1:_PB1 + 1].set(s1[3])
    colpack = colpack.at[0:C1, _PW1:_PW1 + 1].set(s1[2])
    colpack = colpack.at[0:C1, _DB2:_DB2 + 1].set(s2[1])
    colpack = colpack.at[0:C2, _PB2:_PB2 + 1].set(s2[3])
    colpack = colpack.at[0:C2, _DB3:_DB3 + 1].set(s3[1])
    colpack = colpack.at[0:C3, _PB3:_PB3 + 1].set(s3[3])
    colpack = colpack.at[0:C3, _WCLS:_WCLS + 1].set(wc)
    colpack = colpack.at[0:1, _BCLS:_BCLS + 1].set(bc)

    pwpack = jnp.zeros((C3, C2 + C1), jnp.float32)
    pwpack = pwpack.at[0:C3, 0:C2].set(s3[2])                   # pw3 (64, 32)
    pwpack = pwpack.at[0:C2, C2:C2 + C1].set(s2[2])             # pw2 (32, 16)
    return dwpack, colpack, pwpack


def afci_forward(x, params, *, bblk=None):
    """x: (B, L) float32 -> logits (B, 1) float32 (eval-mode semantics)."""
    B, L = x.shape
    assert L % (P1 * P2) == 0, "sequence length must be divisible by 16"
    if bblk is None:
        # Two grid steps (one batch chunk per v7x TensorCore) only when each
        # chunk is still a full multiple of 8 sublanes; otherwise a single step
        # so the ~0.35us per-grid-step pipeline overhead is paid once.
        bblk = B // 2 if (B % 16 == 0) else B
    assert B % bblk == 0
    grid_steps = B // bblk

    dwp, col, pwp = _pack_params(params)

    kern = functools.partial(_afci_kernel, Bblk=bblk, L=L)
    out = pl.pallas_call(
        kern,
        out_shape=jax.ShapeDtypeStruct((grid_steps, bblk), jnp.float32),
        grid=(grid_steps,),
        in_specs=[
            pl.BlockSpec((bblk, L), lambda i: (i, 0)),          # batch block
            pl.BlockSpec(dwp.shape, lambda i: (0, 0)),          # packed dw weights
            pl.BlockSpec(col.shape, lambda i: (0, 0)),          # packed column vectors
            pl.BlockSpec(pwp.shape, lambda i: (0, 0)),          # packed pointwise weights
        ],
        out_specs=pl.BlockSpec((1, bblk), lambda i: (i, 0)),    # one logit row per step
        compiler_params=pltpu.CompilerParams(
            dimension_semantics=("parallel",)),                 # batch blocks -> both TCs on v7x
    )(x, dwp, col, pwp)
    return out.reshape(B, 1)


# ----------------------------------------------------------------------------
# Pure-JAX reference (independent path: lax convolutions) for verification
# ----------------------------------------------------------------------------
def _ref_stage(h, stage, pool, eps=1e-5):
    dww, dwb, pww, pwb, gamma, beta, mean, var = stage
    cin = h.shape[1]
    k = dww.shape[-1]
    hp = jax.lax.Precision.HIGHEST
    h = jax.lax.conv_general_dilated(
        h, dww[:, None, :], window_strides=(1,), padding=[(k // 2, k // 2)],
        feature_group_count=cin, dimension_numbers=("NCH", "OIH", "NCH"),
        precision=hp)
    h = h + dwb[None]
    h = jax.lax.conv_general_dilated(
        h, pww[:, :, None], window_strides=(1,), padding=[(0, 0)],
        dimension_numbers=("NCH", "OIH", "NCH"), precision=hp)
    h = h + pwb[None]
    h = (h - mean[None]) * (gamma[None] * jax.lax.rsqrt(var[None] + eps)) + beta[None]
    h = jnp.maximum(h, 0.0)
    if pool is None:
        return jnp.mean(h, axis=-1, keepdims=True)
    b, c, l = h.shape
    return jnp.max(h.reshape(b, c, l // pool, pool), axis=-1)


def afci_reference(x, params):
    hp = jax.lax.Precision.HIGHEST
    h = x[:, None, :]
    h = _ref_stage(h, params["stage1"], P1)
    h = _ref_stage(h, params["stage2"], P2)
    h = _ref_stage(h, params["stage3"], None)                   # (B, 64, 1)
    feat = h[:, :, 0]
    w1, b1, w2, b2 = params["cls"]
    hid = jnp.dot(feat, w1.T, precision=hp) + b1[:, 0]
    return jnp.dot(hid, w2.T, precision=hp) + b2[:, 0]


# ----------------------------------------------------------------------------
# Deterministic parameter construction (synthetic, matches PyTorch shapes)
# ----------------------------------------------------------------------------
def init_params(key):
    keys = iter(jax.random.split(key, 40))

    def nrm(shape, scale=0.1):
        return scale * jax.random.normal(next(keys), shape, dtype=jnp.float32)

    def conv_stage(cin, cout, k):
        dww = nrm((cin, k))                 # depthwise Conv1d weight (groups=cin)
        dwb = nrm((cin, 1))                 # depthwise bias
        pww = nrm((cout, cin))              # pointwise Conv1d (1x1) weight
        pwb = nrm((cout, 1))                # pointwise bias
        gamma = 1.0 + nrm((cout, 1))        # BatchNorm1d affine + running stats
        beta = nrm((cout, 1))
        run_mean = nrm((cout, 1))
        run_var = jnp.abs(nrm((cout, 1))) + 1.0
        return (dww, dwb, pww, pwb, gamma, beta, run_mean, run_var)

    return {
        "stage1": conv_stage(1, C1, K1),
        "stage2": conv_stage(C1, C2, K2),
        "stage3": conv_stage(C2, C3, K3),
        "cls": (
            nrm((32, 64)),                  # Linear(64, 32) weight (out, in)
            nrm((32, 1)),                   # Linear(64, 32) bias
            nrm((1, 32)),                   # Linear(32, 1) weight
            nrm((1, 1)),                    # Linear(32, 1) bias
        ),
    }


if __name__ == "__main__":
    B, L = 2, 128                           # L divisible by 16 (two MaxPool1d(4))
    key = jax.random.PRNGKey(0)
    k_x, k_p = jax.random.split(key)
    x = jax.random.normal(k_x, (B, L), dtype=jnp.float32)
    params = init_params(k_p)

    out = jax.block_until_ready(jax.jit(afci_forward)(x, params))
    assert out.shape == (B, 1) and out.dtype == jnp.float32

    ref = jax.block_until_ready(afci_reference(x, params))
    np.testing.assert_allclose(np.asarray(out), np.asarray(ref), rtol=5e-3, atol=5e-3)
    print("KERNEL_OK")
</pallas_src>

<mosaic_0001>
module attributes {stable_mosaic.version = 11 : i64} {
  func.func @_afci_kernel(%arg0: i32, %arg1: memref<2x128xf32, #tpu.memory_space<vmem>>, %arg2: memref<32x33xf32, #tpu.memory_space<vmem>>, %arg3: memref<64x9xf32, #tpu.memory_space<vmem>>, %arg4: memref<64x48xf32, #tpu.memory_space<vmem>>, %arg5: memref<1x2xf32, #tpu.memory_space<vmem>>) attributes {dimension_semantics = [#tpu.dimension_semantics<parallel>], iteration_bounds = array<i64: 1>, scalar_prefetch = 0 : i64, scratch_operands = 0 : i64, tpu.core_type = #tpu.core_type<tc>, window_params = [{transform_indices = @transform_0, window_bounds = array<i64: 2, 128>}, {pipeline_mode = #tpu.pipeline_mode<synchronous>, transform_indices = @transform_1, window_bounds = array<i64: 32, 33>}, {pipeline_mode = #tpu.pipeline_mode<synchronous>, transform_indices = @transform_2, window_bounds = array<i64: 64, 9>}, {pipeline_mode = #tpu.pipeline_mode<synchronous>, transform_indices = @transform_3, window_bounds = array<i64: 64, 48>}, {transform_indices = @transform_4, window_bounds = array<i64: 1, 2>}]} {
    %c0 = arith.constant 0 : index
    %c0_0 = arith.constant 0 : index
    %0 = vector.load %arg2[%c0, %c0_0] : memref<32x33xf32, #tpu.memory_space<vmem>>, vector<32x33xf32>
    %c0_1 = arith.constant 0 : index
    %c0_2 = arith.constant 0 : index
    %1 = vector.load %arg3[%c0_1, %c0_2] : memref<64x9xf32, #tpu.memory_space<vmem>>, vector<64x9xf32>
    %c0_3 = arith.constant 0 : index
    %c0_4 = arith.constant 0 : index
    %2 = vector.load %arg4[%c0_3, %c0_4] : memref<64x48xf32, #tpu.memory_space<vmem>>, vector<64x48xf32>
    %c0_5 = arith.constant 0 : index
    %c0_6 = arith.constant 0 : index
    %3 = vector.load %arg1[%c0_5, %c0_6] : memref<2x128xf32, #tpu.memory_space<vmem>>, vector<2x128xf32>
    %4 = vector.extract_strided_slice %0 {offsets = [0, 0], sizes = [1, 15], strides = [1, 1]} : vector<32x33xf32> to vector<1x15xf32>
    %5 = vector.extract_strided_slice %1 {offsets = [0, 0], sizes = [1, 1], strides = [1, 1]} : vector<64x9xf32> to vector<1x1xf32>
    %cst = arith.constant 0.000000e+00 : f32
    %6 = vector.broadcast %cst : f32 to vector<2x7xf32>
    %7 = tpu.concatenate %6, %3, %6 in 1 : vector<2x7xf32>, vector<2x128xf32>, vector<2x7xf32> -> vector<2x142xf32>
    %8 = vector.extract_strided_slice %7 {offsets = [0, 0], sizes = [2, 128], strides = [1, 1]} : vector<2x142xf32> to vector<2x128xf32>
    %9 = vector.extract_strided_slice %4 {offsets = [0, 0], sizes = [1, 1], strides = [1, 1]} : vector<1x15xf32> to vector<1x1xf32>
    %10 = vector.broadcast %9 : vector<1x1xf32> to vector<2x128xf32>
    %11 = arith.mulf %8, %10 : vector<2x128xf32>
    %12 = vector.extract_strided_slice %7 {offsets = [0, 1], sizes = [2, 128], strides = [1, 1]} : vector<2x142xf32> to vector<2x128xf32>
    %13 = vector.extract_strided_slice %4 {offsets = [0, 1], sizes = [1, 1], strides = [1, 1]} : vector<1x15xf32> to vector<1x1xf32>
    %14 = vector.broadcast %13 : vector<1x1xf32> to vector<2x128xf32>
    %15 = arith.mulf %12, %14 : vector<2x128xf32>
    %16 = vector.extract_strided_slice %7 {offsets = [0, 2], sizes = [2, 128], strides = [1, 1]} : vector<2x142xf32> to vector<2x128xf32>
    %17 = vector.extract_strided_slice %4 {offsets = [0, 2], sizes = [1, 1], strides = [1, 1]} : vector<1x15xf32> to vector<1x1xf32>
    %18 = vector.broadcast %17 : vector<1x1xf32> to vector<2x128xf32>
    %19 = arith.mulf %16, %18 : vector<2x128xf32>
    %20 = vector.extract_strided_slice %7 {offsets = [0, 3], sizes = [2, 128], strides = [1, 1]} : vector<2x142xf32> to vector<2x128xf32>
    %21 = vector.extract_strided_slice %4 {offsets = [0, 3], sizes = [1, 1], strides = [1, 1]} : vector<1x15xf32> to vector<1x1xf32>
    %22 = vector.broadcast %21 : vector<1x1xf32> to vector<2x128xf32>
    %23 = arith.mulf %20, %22 : vector<2x128xf32>
    %24 = vector.extract_strided_slice %7 {offsets = [0, 4], sizes = [2, 128], strides = [1, 1]} : vector<2x142xf32> to vector<2x128xf32>
    %25 = vector.extract_strided_slice %4 {offsets = [0, 4], sizes = [1, 1], strides = [1, 1]} : vector<1x15xf32> to vector<1x1xf32>
    %26 = vector.broadcast %25 : vector<1x1xf32> to vector<2x128xf32>
    %27 = arith.mulf %24, %26 : vector<2x128xf32>
    %28 = vector.extract_strided_slice %7 {offsets = [0, 5], sizes = [2, 128], strides = [1, 1]} : vector<2x142xf32> to vector<2x128xf32>
    %29 = vector.extract_strided_slice %4 {offsets = [0, 5], sizes = [1, 1], strides = [1, 1]} : vector<1x15xf32> to vector<1x1xf32>
    %30 = vector.broadcast %29 : vector<1x1xf32> to vector<2x128xf32>
    %31 = arith.mulf %28, %30 : vector<2x128xf32>
    %32 = vector.extract_strided_slice %7 {offsets = [0, 6], sizes = [2, 128], strides = [1, 1]} : vector<2x142xf32> to vector<2x128xf32>
    %33 = vector.extract_strided_slice %4 {offsets = [0, 6], sizes = [1, 1], strides = [1, 1]} : vector<1x15xf32> to vector<1x1xf32>
    %34 = vector.broadcast %33 : vector<1x1xf32> to vector<2x128xf32>
    %35 = arith.mulf %32, %34 : vector<2x128xf32>
    %36 = vector.extract_strided_slice %7 {offsets = [0, 7], sizes = [2, 128], strides = [1, 1]} : vector<2x142xf32> to vector<2x128xf32>
    %37 = vector.extract_strided_slice %4 {offsets = [0, 7], sizes = [1, 1], strides = [1, 1]} : vector<1x15xf32> to vector<1x1xf32>
    %38 = vector.broadcast %37 : vector<1x1xf32> to vector<2x128xf32>
    %39 = arith.mulf %36, %38 : vector<2x128xf32>
    %40 = vector.extract_strided_slice %7 {offsets = [0, 8], sizes = [2, 128], strides = [1, 1]} : vector<2x142xf32> to vector<2x128xf32>
    %41 = vector.extract_strided_slice %4 {offsets = [0, 8], sizes = [1, 1], strides = [1, 1]} : vector<1x15xf32> to vector<1x1xf32>
    %42 = vector.broadcast %41 : vector<1x1xf32> to vector<2x128xf32>
    %43 = arith.mulf %40, %42 : vector<2x128xf32>
    %44 = vector.extract_strided_slice %7 {offsets = [0, 9], sizes = [2, 128], strides = [1, 1]} : vector<2x142xf32> to vector<2x128xf32>
    %45 = vector.extract_strided_slice %4 {offsets = [0, 9], sizes = [1, 1], strides = [1, 1]} : vector<1x15xf32> to vector<1x1xf32>
    %46 = vector.broadcast %45 : vector<1x1xf32> to vector<2x128xf32>
    %47 = arith.mulf %44, %46 : vector<2x128xf32>
    %48 = vector.extract_strided_slice %7 {offsets = [0, 10], sizes = [2, 128], strides = [1, 1]} : vector<2x142xf32> to vector<2x128xf32>
    %49 = vector.extract_strided_slice %4 {offsets = [0, 10], sizes = [1, 1], strides = [1, 1]} : vector<1x15xf32> to vector<1x1xf32>
    %50 = vector.broadcast %49 : vector<1x1xf32> to vector<2x128xf32>
    %51 = arith.mulf %48, %50 : vector<2x128xf32>
    %52 = vector.extract_strided_slice %7 {offsets = [0, 11], sizes = [2, 128], strides = [1, 1]} : vector<2x142xf32> to vector<2x128xf32>
    %53 = vector.extract_strided_slice %4 {offsets = [0, 11], sizes = [1, 1], strides = [1, 1]} : vector<1x15xf32> to vector<1x1xf32>
    %54 = vector.broadcast %53 : vector<1x1xf32> to vector<2x128xf32>
    %55 = arith.mulf %52, %54 : vector<2x128xf32>
    %56 = vector.extract_strided_slice %7 {offsets = [0, 12], sizes = [2, 128], strides = [1, 1]} : vector<2x142xf32> to vector<2x128xf32>
    %57 = vector.extract_strided_slice %4 {offsets = [0, 12], sizes = [1, 1], strides = [1, 1]} : vector<1x15xf32> to vector<1x1xf32>
    %58 = vector.broadcast %57 : vector<1x1xf32> to vector<2x128xf32>
    %59 = arith.mulf %56, %58 : vector<2x128xf32>
    %60 = vector.extract_strided_slice %7 {offsets = [0, 13], sizes = [2, 128], strides = [1, 1]} : vector<2x142xf32> to vector<2x128xf32>
    %61 = vector.extract_strided_slice %4 {offsets = [0, 13], sizes = [1, 1], strides = [1, 1]} : vector<1x15xf32> to vector<1x1xf32>
    %62 = vector.broadcast %61 : vector<1x1xf32> to vector<2x128xf32>
    %63 = arith.mulf %60, %62 : vector<2x128xf32>
    %64 = vector.extract_strided_slice %7 {offsets = [0, 14], sizes = [2, 128], strides = [1, 1]} : vector<2x142xf32> to vector<2x128xf32>
    %65 = vector.extract_strided_slice %4 {offsets = [0, 14], sizes = [1, 1], strides = [1, 1]} : vector<1x15xf32> to vector<1x1xf32>
    %66 = vector.broadcast %65 : vector<1x1xf32> to vector<2x128xf32>
    %67 = arith.mulf %64, %66 : vector<2x128xf32>
    %68 = arith.addf %11, %15 : vector<2x128xf32>
    %69 = arith.addf %19, %23 : vector<2x128xf32>
    %70 = arith.addf %27, %31 : vector<2x128xf32>
    %71 = arith.addf %35, %39 : vector<2x128xf32>
    %72 = arith.addf %43, %47 : vector<2x128xf32>
    %73 = arith.addf %51, %55 : vector<2x128xf32>
    %74 = arith.addf %59, %63 : vector<2x128xf32>
    %75 = arith.addf %68, %69 : vector<2x128xf32>
    %76 = arith.addf %70, %71 : vector<2x128xf32>
    %77 = arith.addf %72, %73 : vector<2x128xf32>
    %78 = arith.addf %74, %67 : vector<2x128xf32>
    %79 = arith.addf %75, %76 : vector<2x128xf32>
    %80 = arith.addf %77, %78 : vector<2x128xf32>
    %81 = arith.addf %79, %80 : vector<2x128xf32>
    %82 = vector.broadcast %5 : vector<1x1xf32> to vector<2x128xf32>
    %83 = arith.addf %81, %82 : vector<2x128xf32>
    %84 = vector.extract_strided_slice %83 {offsets = [0, 0], sizes = [1, 128], strides = [1, 1]} : vector<2x128xf32> to vector<1x128xf32>
    %85 = vector.extract_strided_slice %83 {offsets = [1, 0], sizes = [1, 128], strides = [1, 1]} : vector<2x128xf32> to vector<1x128xf32>
    %86 = tpu.concatenate %84, %85 in 1 : vector<1x128xf32>, vector<1x128xf32> -> vector<1x256xf32>
    %87 = vector.extract_strided_slice %1 {offsets = [0, 2], sizes = [16, 1], strides = [1, 1]} : vector<64x9xf32> to vector<16x1xf32>
    %88 = vector.broadcast %87 : vector<16x1xf32> to vector<16x256xf32>
    %89 = vector.broadcast %86 : vector<1x256xf32> to vector<16x256xf32>
    %90 = arith.mulf %88, %89 : vector<16x256xf32>
    %91 = vector.extract_strided_slice %1 {offsets = [0, 1], sizes = [16, 1], strides = [1, 1]} : vector<64x9xf32> to vector<16x1xf32>
    %92 = vector.broadcast %91 : vector<16x1xf32> to vector<16x256xf32>
    %93 = arith.addf %90, %92 : vector<16x256xf32>
    %cst_7 = arith.constant 0.000000e+00 : f32
    %94 = vector.broadcast %cst_7 : f32 to vector<16x256xf32>
    %95 = arith.maximumf %93, %94 : vector<16x256xf32>
    %96 = vector.shape_cast %95 : vector<16x256xf32> to vector<16x64x4xf32>
    %cst_8 = arith.constant dense<0xFF800000> : vector<16x64xf32>
    %97 = vector.multi_reduction <maximumf>, %96, %cst_8 [2] : vector<16x64x4xf32> to vector<16x64xf32>
    %98 = vector.extract_strided_slice %0 {offsets = [0, 15], sizes = [16, 11], strides = [1, 1]} : vector<32x33xf32> to vector<16x11xf32>
    %99 = vector.extract_strided_slice %1 {offsets = [0, 3], sizes = [16, 1], strides = [1, 1]} : vector<64x9xf32> to vector<16x1xf32>
    %cst_9 = arith.constant 0.000000e+00 : f32
    %100 = vector.broadcast %cst_9 : f32 to vector<16x5xf32>
    %101 = tpu.concatenate %100, %97, %100 in 1 : vector<16x5xf32>, vector<16x64xf32>, vector<16x5xf32> -> vector<16x74xf32>
    %102 = tpu.iota {dimensions = array<i32: 1>} : vector<1x32xi32>
    %103 = tpu.concatenate %102, %102 in 1 : vector<1x32xi32>, vector<1x32xi32> -> vector<1x64xi32>
    %104 = vector.extract_strided_slice %101 {offsets = [0, 0], sizes = [16, 64], strides = [1, 1]} : vector<16x74xf32> to vector<16x64xf32>
    %c5_i32 = arith.constant 5 : i32
    %105 = vector.broadcast %c5_i32 : i32 to vector<1x64xi32>
    %106 = arith.cmpi sge, %103, %105 : vector<1x64xi32>
    %cst_10 = arith.constant 0.000000e+00 : f32
    %107 = vector.shape_cast %106 : vector<1x64xi1> to vector<1x64xi1>
    %108 = vector.broadcast %107 : vector<1x64xi1> to vector<16x64xi1>
    %109 = vector.broadcast %cst_10 : f32 to vector<16x64xf32>
    %110 = arith.select %108, %104, %109 : vector<16x64xi1>, vector<16x64xf32>
    %111 = vector.extract_strided_slice %98 {offsets = [0, 0], sizes = [16, 1], strides = [1, 1]} : vector<16x11xf32> to vector<16x1xf32>
    %112 = vector.broadcast %111 : vector<16x1xf32> to vector<16x64xf32>
    %113 = arith.mulf %110, %112 : vector<16x64xf32>
    %114 = vector.extract_strided_slice %101 {offsets = [0, 1], sizes = [16, 64], strides = [1, 1]} : vector<16x74xf32> to vector<16x64xf32>
    %c4_i32 = arith.constant 4 : i32
    %115 = vector.broadcast %c4_i32 : i32 to vector<1x64xi32>
    %116 = arith.cmpi sge, %103, %115 : vector<1x64xi32>
    %cst_11 = arith.constant 0.000000e+00 : f32
    %117 = vector.shape_cast %116 : vector<1x64xi1> to vector<1x64xi1>
    %118 = vector.broadcast %117 : vector<1x64xi1> to vector<16x64xi1>
    %119 = vector.broadcast %cst_11 : f32 to vector<16x64xf32>
    %120 = arith.select %118, %114, %119 : vector<16x64xi1>, vector<16x64xf32>
    %121 = vector.extract_strided_slice %98 {offsets = [0, 1], sizes = [16, 1], strides = [1, 1]} : vector<16x11xf32> to vector<16x1xf32>
    %122 = vector.broadcast %121 : vector<16x1xf32> to vector<16x64xf32>
    %123 = arith.mulf %120, %122 : vector<16x64xf32>
    %124 = vector.extract_strided_slice %101 {offsets = [0, 2], sizes = [16, 64], strides = [1, 1]} : vector<16x74xf32> to vector<16x64xf32>
    %c3_i32 = arith.constant 3 : i32
    %125 = vector.broadcast %c3_i32 : i32 to vector<1x64xi32>
    %126 = arith.cmpi sge, %103, %125 : vector<1x64xi32>
    %cst_12 = arith.constant 0.000000e+00 : f32
    %127 = vector.shape_cast %126 : vector<1x64xi1> to vector<1x64xi1>
    %128 = vector.broadcast %127 : vector<1x64xi1> to vector<16x64xi1>
    %129 = vector.broadcast %cst_12 : f32 to vector<16x64xf32>
    %130 = arith.select %128, %124, %129 : vector<16x64xi1>, vector<16x64xf32>
    %131 = vector.extract_strided_slice %98 {offsets = [0, 2], sizes = [16, 1], strides = [1, 1]} : vector<16x11xf32> to vector<16x1xf32>
    %132 = vector.broadcast %131 : vector<16x1xf32> to vector<16x64xf32>
    %133 = arith.mulf %130, %132 : vector<16x64xf32>
    %134 = vector.extract_strided_slice %101 {offsets = [0, 3], sizes = [16, 64], strides = [1, 1]} : vector<16x74xf32> to vector<16x64xf32>
    %c2_i32 = arith.constant 2 : i32
    %135 = vector.broadcast %c2_i32 : i32 to vector<1x64xi32>
    %136 = arith.cmpi sge, %103, %135 : vector<1x64xi32>
    %cst_13 = arith.constant 0.000000e+00 : f32
    %137 = vector.shape_cast %136 : vector<1x64xi1> to vector<1x64xi1>
    %138 = vector.broadcast %137 : vector<1x64xi1> to vector<16x64xi1>
    %139 = vector.broadcast %cst_13 : f32 to vector<16x64xf32>
    %140 = arith.select %138, %134, %139 : vector<16x64xi1>, vector<16x64xf32>
    %141 = vector.extract_strided_slice %98 {offsets = [0, 3], sizes = [16, 1], strides = [1, 1]} : vector<16x11xf32> to vector<16x1xf32>
    %142 = vector.broadcast %141 : vector<16x1xf32> to vector<16x64xf32>
    %143 = arith.mulf %140, %142 : vector<16x64xf32>
    %144 = vector.extract_strided_slice %101 {offsets = [0, 4], sizes = [16, 64], strides = [1, 1]} : vector<16x74xf32> to vector<16x64xf32>
    %c1_i32 = arith.constant 1 : i32
    %145 = vector.broadcast %c1_i32 : i32 to vector<1x64xi32>
    %146 = arith.cmpi sge, %103, %145 : vector<1x64xi32>
    %cst_14 = arith.constant 0.000000e+00 : f32
    %147 = vector.shape_cast %146 : vector<1x64xi1> to vector<1x64xi1>
    %148 = vector.broadcast %147 : vector<1x64xi1> to vector<16x64xi1>
    %149 = vector.broadcast %cst_14 : f32 to vector<16x64xf32>
    %150 = arith.select %148, %144, %149 : vector<16x64xi1>, vector<16x64xf32>
    %151 = vector.extract_strided_slice %98 {offsets = [0, 4], sizes = [16, 1], strides = [1, 1]} : vector<16x11xf32> to vector<16x1xf32>
    %152 = vector.broadcast %151 : vector<16x1xf32> to vector<16x64xf32>
    %153 = arith.mulf %150, %152 : vector<16x64xf32>
    %154 = vector.extract_strided_slice %101 {offsets = [0, 5], sizes = [16, 64], strides = [1, 1]} : vector<16x74xf32> to vector<16x64xf32>
    %155 = vector.extract_strided_slice %98 {offsets = [0, 5], sizes = [16, 1], strides = [1, 1]} : vector<16x11xf32> to vector<16x1xf32>
    %156 = vector.broadcast %155 : vector<16x1xf32> to vector<16x64xf32>
    %157 = arith.mulf %154, %156 : vector<16x64xf32>
    %158 = vector.extract_strided_slice %101 {offsets = [0, 6], sizes = [16, 64], strides = [1, 1]} : vector<16x74xf32> to vector<16x64xf32>
    %c31_i32 = arith.constant 31 : i32
    %159 = vector.broadcast %c31_i32 : i32 to vector<1x64xi32>
    %160 = arith.cmpi slt, %103, %159 : vector<1x64xi32>
    %cst_15 = arith.constant 0.000000e+00 : f32
    %161 = vector.shape_cast %160 : vector<1x64xi1> to vector<1x64xi1>
    %162 = vector.broadcast %161 : vector<1x64xi1> to vector<16x64xi1>
    %163 = vector.broadcast %cst_15 : f32 to vector<16x64xf32>
    %164 = arith.select %162, %158, %163 : vector<16x64xi1>, vector<16x64xf32>
    %165 = vector.extract_strided_slice %98 {offsets = [0, 6], sizes = [16, 1], strides = [1, 1]} : vector<16x11xf32> to vector<16x1xf32>
    %166 = vector.broadcast %165 : vector<16x1xf32> to vector<16x64xf32>
    %167 = arith.mulf %164, %166 : vector<16x64xf32>
    %168 = vector.extract_strided_slice %101 {offsets = [0, 7], sizes = [16, 64], strides = [1, 1]} : vector<16x74xf32> to vector<16x64xf32>
    %c30_i32 = arith.constant 30 : i32
    %169 = vector.broadcast %c30_i32 : i32 to vector<1x64xi32>
    %170 = arith.cmpi slt, %103, %169 : vector<1x64xi32>
    %cst_16 = arith.constant 0.000000e+00 : f32
    %171 = vector.shape_cast %170 : vector<1x64xi1> to vector<1x64xi1>
    %172 = vector.broadcast %171 : vector<1x64xi1> to vector<16x64xi1>
    %173 = vector.broadcast %cst_16 : f32 to vector<16x64xf32>
    %174 = arith.select %172, %168, %173 : vector<16x64xi1>, vector<16x64xf32>
    %175 = vector.extract_strided_slice %98 {offsets = [0, 7], sizes = [16, 1], strides = [1, 1]} : vector<16x11xf32> to vector<16x1xf32>
    %176 = vector.broadcast %175 : vector<16x1xf32> to vector<16x64xf32>
    %177 = arith.mulf %174, %176 : vector<16x64xf32>
    %178 = vector.extract_strided_slice %101 {offsets = [0, 8], sizes = [16, 64], strides = [1, 1]} : vector<16x74xf32> to vector<16x64xf32>
    %c29_i32 = arith.constant 29 : i32
    %179 = vector.broadcast %c29_i32 : i32 to vector<1x64xi32>
    %180 = arith.cmpi slt, %103, %179 : vector<1x64xi32>
    %cst_17 = arith.constant 0.000000e+00 : f32
    %181 = vector.shape_cast %180 : vector<1x64xi1> to vector<1x64xi1>
    %182 = vector.broadcast %181 : vector<1x64xi1> to vector<16x64xi1>
    %183 = vector.broadcast %cst_17 : f32 to vector<16x64xf32>
    %184 = arith.select %182, %178, %183 : vector<16x64xi1>, vector<16x64xf32>
    %185 = vector.extract_strided_slice %98 {offsets = [0, 8], sizes = [16, 1], strides = [1, 1]} : vector<16x11xf32> to vector<16x1xf32>
    %186 = vector.broadcast %185 : vector<16x1xf32> to vector<16x64xf32>
    %187 = arith.mulf %184, %186 : vector<16x64xf32>
    %188 = vector.extract_strided_slice %101 {offsets = [0, 9], sizes = [16, 64], strides = [1, 1]} : vector<16x74xf32> to vector<16x64xf32>
    %c28_i32 = arith.constant 28 : i32
    %189 = vector.broadcast %c28_i32 : i32 to vector<1x64xi32>
    %190 = arith.cmpi slt, %103, %189 : vector<1x64xi32>
    %cst_18 = arith.constant 0.000000e+00 : f32
    %191 = vector.shape_cast %190 : vector<1x64xi1> to vector<1x64xi1>
    %192 = vector.broadcast %191 : vector<1x64xi1> to vector<16x64xi1>
    %193 = vector.broadcast %cst_18 : f32 to vector<16x64xf32>
    %194 = arith.select %192, %188, %193 : vector<16x64xi1>, vector<16x64xf32>
    %195 = vector.extract_strided_slice %98 {offsets = [0, 9], sizes = [16, 1], strides = [1, 1]} : vector<16x11xf32> to vector<16x1xf32>
    %196 = vector.broadcast %195 : vector<16x1xf32> to vector<16x64xf32>
    %197 = arith.mulf %194, %196 : vector<16x64xf32>
    %198 = vector.extract_strided_slice %101 {offsets = [0, 10], sizes = [16, 64], strides = [1, 1]} : vector<16x74xf32> to vector<16x64xf32>
    %c27_i32 = arith.constant 27 : i32
    %199 = vector.broadcast %c27_i32 : i32 to vector<1x64xi32>
    %200 = arith.cmpi slt, %103, %199 : vector<1x64xi32>
    %cst_19 = arith.constant 0.000000e+00 : f32
    %201 = vector.shape_cast %200 : vector<1x64xi1> to vector<1x64xi1>
    %202 = vector.broadcast %201 : vector<1x64xi1> to vector<16x64xi1>
    %203 = vector.broadcast %cst_19 : f32 to vector<16x64xf32>
    %204 = arith.select %202, %198, %203 : vector<16x64xi1>, vector<16x64xf32>
    %205 = vector.extract_strided_slice %98 {offsets = [0, 10], sizes = [16, 1], strides = [1, 1]} : vector<16x11xf32> to vector<16x1xf32>
    %206 = vector.broadcast %205 : vector<16x1xf32> to vector<16x64xf32>
    %207 = arith.mulf %204, %206 : vector<16x64xf32>
    %208 = arith.addf %113, %123 : vector<16x64xf32>
    %209 = arith.addf %133, %143 : vector<16x64xf32>
    %210 = arith.addf %153, %157 : vector<16x64xf32>
    %211 = arith.addf %167, %177 : vector<16x64xf32>
    %212 = arith.addf %187, %197 : vector<16x64xf32>
    %213 = arith.addf %208, %209 : vector<16x64xf32>
    %214 = arith.addf %210, %211 : vector<16x64xf32>
    %215 = arith.addf %212, %207 : vector<16x64xf32>
    %216 = arith.addf %213, %214 : vector<16x64xf32>
    %217 = arith.addf %216, %215 : vector<16x64xf32>
    %218 = vector.broadcast %99 : vector<16x1xf32> to vector<16x64xf32>
    %219 = arith.addf %217, %218 : vector<16x64xf32>
    %220 = vector.extract_strided_slice %2 {offsets = [0, 32], sizes = [32, 16], strides = [1, 1]} : vector<64x48xf32> to vector<32x16xf32>
    %cst_20 = arith.constant dense<0.000000e+00> : vector<32x64xf32>
    %221 = tpu.matmul %220, %219, %cst_20 {dimension_numbers = #tpu.dot_dimension_numbers<[1], [0], [0], [1], [0, 0, 1, 1], [], []>} : vector<32x16xf32>, vector<16x64xf32>, vector<32x64xf32> -> vector<32x64xf32>
    %222 = vector.extract_strided_slice %1 {offsets = [0, 4], sizes = [32, 1], strides = [1, 1]} : vector<64x9xf32> to vector<32x1xf32>
    %223 = vector.broadcast %222 : vector<32x1xf32> to vector<32x64xf32>
    %224 = arith.addf %221, %223 : vector<32x64xf32>
    %cst_21 = arith.constant 0.000000e+00 : f32
    %225 = vector.broadcast %cst_21 : f32 to vector<32x64xf32>
    %226 = arith.maximumf %224, %225 : vector<32x64xf32>
    %227 = vector.shape_cast %226 : vector<32x64xf32> to vector<32x16x4xf32>
    %cst_22 = arith.constant dense<0xFF800000> : vector<32x16xf32>
    %228 = vector.multi_reduction <maximumf>, %227, %cst_22 [2] : vector<32x16x4xf32> to vector<32x16xf32>
    %229 = vector.extract_strided_slice %0 {offsets = [0, 26], sizes = [32, 7], strides = [1, 1]} : vector<32x33xf32> to vector<32x7xf32>
    %230 = vector.extract_strided_slice %1 {offsets = [0, 5], sizes = [32, 1], strides = [1, 1]} : vector<64x9xf32> to vector<32x1xf32>
    %cst_23 = arith.constant 0.000000e+00 : f32
    %231 = vector.broadcast %cst_23 : f32 to vector<32x3xf32>
    %232 = tpu.concatenate %231, %228, %231 in 1 : vector<32x3xf32>, vector<32x16xf32>, vector<32x3xf32> -> vector<32x22xf32>
    %233 = tpu.iota {dimensions = array<i32: 1>} : vector<1x8xi32>
    %234 = tpu.concatenate %233, %233 in 1 : vector<1x8xi32>, vector<1x8xi32> -> vector<1x16xi32>
    %235 = vector.extract_strided_slice %232 {offsets = [0, 0], sizes = [32, 16], strides = [1, 1]} : vector<32x22xf32> to vector<32x16xf32>
    %c3_i32_24 = arith.constant 3 : i32
    %236 = vector.broadcast %c3_i32_24 : i32 to vector<1x16xi32>
    %237 = arith.cmpi sge, %234, %236 : vector<1x16xi32>
    %cst_25 = arith.constant 0.000000e+00 : f32
    %238 = vector.shape_cast %237 : vector<1x16xi1> to vector<1x16xi1>
    %239 = vector.broadcast %238 : vector<1x16xi1> to vector<32x16xi1>
    %240 = vector.broadcast %cst_25 : f32 to vector<32x16xf32>
    %241 = arith.select %239, %235, %240 : vector<32x16xi1>, vector<32x16xf32>
    %242 = vector.extract_strided_slice %229 {offsets = [0, 0], sizes = [32, 1], strides = [1, 1]} : vector<32x7xf32> to vector<32x1xf32>
    %243 = vector.broadcast %242 : vector<32x1xf32> to vector<32x16xf32>
    %244 = arith.mulf %241, %243 : vector<32x16xf32>
    %245 = vector.extract_strided_slice %232 {offsets = [0, 1], sizes = [32, 16], strides = [1, 1]} : vector<32x22xf32> to vector<32x16xf32>
    %c2_i32_26 = arith.constant 2 : i32
    %246 = vector.broadcast %c2_i32_26 : i32 to vector<1x16xi32>
    %247 = arith.cmpi sge, %234, %246 : vector<1x16xi32>
    %cst_27 = arith.constant 0.000000e+00 : f32
    %248 = vector.shape_cast %247 : vector<1x16xi1> to vector<1x16xi1>
    %249 = vector.broadcast %248 : vector<1x16xi1> to vector<32x16xi1>
    %250 = vector.broadcast %cst_27 : f32 to vector<32x16xf32>
    %251 = arith.select %249, %245, %250 : vector<32x16xi1>, vector<32x16xf32>
    %252 = vector.extract_strided_slice %229 {offsets = [0, 1], sizes = [32, 1], strides = [1, 1]} : vector<32x7xf32> to vector<32x1xf32>
    %253 = vector.broadcast %252 : vector<32x1xf32> to vector<32x16xf32>
    %254 = arith.mulf %251, %253 : vector<32x16xf32>
    %255 = vector.extract_strided_slice %232 {offsets = [0, 2], sizes = [32, 16], strides = [1, 1]} : vector<32x22xf32> to vector<32x16xf32>
    %c1_i32_28 = arith.constant 1 : i32
    %256 = vector.broadcast %c1_i32_28 : i32 to vector<1x16xi32>
    %257 = arith.cmpi sge, %234, %256 : vector<1x16xi32>
    %cst_29 = arith.constant 0.000000e+00 : f32
    %258 = vector.shape_cast %257 : vector<1x16xi1> to vector<1x16xi1>
    %259 = vector.broadcast %258 : vector<1x16xi1> to vector<32x16xi1>
    %260 = vector.broadcast %cst_29 : f32 to vector<32x16xf32>
    %261 = arith.select %259, %255, %260 : vector<32x16xi1>, vector<32x16xf32>
    %262 = vector.extract_strided_slice %229 {offsets = [0, 2], sizes = [32, 1], strides = [1, 1]} : vector<32x7xf32> to vector<32x1xf32>
    %263 = vector.broadcast %262 : vector<32x1xf32> to vector<32x16xf32>
    %264 = arith.mulf %261, %263 : vector<32x16xf32>
    %265 = vector.extract_strided_slice %232 {offsets = [0, 3], sizes = [32, 16], strides = [1, 1]} : vector<32x22xf32> to vector<32x16xf32>
    %266 = vector.extract_strided_slice %229 {offsets = [0, 3], sizes = [32, 1], strides = [1, 1]} : vector<32x7xf32> to vector<32x1xf32>
    %267 = vector.broadcast %266 : vector<32x1xf32> to vector<32x16xf32>
    %268 = arith.mulf %265, %267 : vector<32x16xf32>
    %269 = vector.extract_strided_slice %232 {offsets = [0, 4], sizes = [32, 16], strides = [1, 1]} : vector<32x22xf32> to vector<32x16xf32>
    %c7_i32 = arith.constant 7 : i32
    %270 = vector.broadcast %c7_i32 : i32 to vector<1x16xi32>
    %271 = arith.cmpi slt, %234, %270 : vector<1x16xi32>
    %cst_30 = arith.constant 0.000000e+00 : f32
    %272 = vector.shape_cast %271 : vector<1x16xi1> to vector<1x16xi1>
    %273 = vector.broadcast %272 : vector<1x16xi1> to vector<32x16xi1>
    %274 = vector.broadcast %cst_30 : f32 to vector<32x16xf32>
    %275 = arith.select %273, %269, %274 : vector<32x16xi1>, vector<32x16xf32>
    %276 = vector.extract_strided_slice %229 {offsets = [0, 4], sizes = [32, 1], strides = [1, 1]} : vector<32x7xf32> to vector<32x1xf32>
    %277 = vector.broadcast %276 : vector<32x1xf32> to vector<32x16xf32>
    %278 = arith.mulf %275, %277 : vector<32x16xf32>
    %279 = vector.extract_strided_slice %232 {offsets = [0, 5], sizes = [32, 16], strides = [1, 1]} : vector<32x22xf32> to vector<32x16xf32>
    %c6_i32 = arith.constant 6 : i32
    %280 = vector.broadcast %c6_i32 : i32 to vector<1x16xi32>
    %281 = arith.cmpi slt, %234, %280 : vector<1x16xi32>
    %cst_31 = arith.constant 0.000000e+00 : f32
    %282 = vector.shape_cast %281 : vector<1x16xi1> to vector<1x16xi1>
    %283 = vector.broadcast %282 : vector<1x16xi1> to vector<32x16xi1>
    %284 = vector.broadcast %cst_31 : f32 to vector<32x16xf32>
    %285 = arith.select %283, %279, %284 : vector<32x16xi1>, vector<32x16xf32>
    %286 = vector.extract_strided_slice %229 {offsets = [0, 5], sizes = [32, 1], strides = [1, 1]} : vector<32x7xf32> to vector<32x1xf32>
    %287 = vector.broadcast %286 : vector<32x1xf32> to vector<32x16xf32>
    %288 = arith.mulf %285, %287 : vector<32x16xf32>
    %289 = vector.extract_strided_slice %232 {offsets = [0, 6], sizes = [32, 16], strides = [1, 1]} : vector<32x22xf32> to vector<32x16xf32>
    %c5_i32_32 = arith.constant 5 : i32
    %290 = vector.broadcast %c5_i32_32 : i32 to vector<1x16xi32>
    %291 = arith.cmpi slt, %234, %290 : vector<1x16xi32>
    %cst_33 = arith.constant 0.000000e+00 : f32
    %292 = vector.shape_cast %291 : vector<1x16xi1> to vector<1x16xi1>
    %293 = vector.broadcast %292 : vector<1x16xi1> to vector<32x16xi1>
    %294 = vector.broadcast %cst_33 : f32 to vector<32x16xf32>
    %295 = arith.select %293, %289, %294 : vector<32x16xi1>, vector<32x16xf32>
    %296 = vector.extract_strided_slice %229 {offsets = [0, 6], sizes = [32, 1], strides = [1, 1]} : vector<32x7xf32> to vector<32x1xf32>
    %297 = vector.broadcast %296 : vector<32x1xf32> to vector<32x16xf32>
    %298 = arith.mulf %295, %297 : vector<32x16xf32>
    %299 = arith.addf %244, %254 : vector<32x16xf32>
    %300 = arith.addf %264, %268 : vector<32x16xf32>
    %301 = arith.addf %278, %288 : vector<32x16xf32>
    %302 = arith.addf %299, %300 : vector<32x16xf32>
    %303 = arith.addf %301, %298 : vector<32x16xf32>
    %304 = arith.addf %302, %303 : vector<32x16xf32>
    %305 = vector.broadcast %230 : vector<32x1xf32> to vector<32x16xf32>
    %306 = arith.addf %304, %305 : vector<32x16xf32>
    %307 = vector.extract_strided_slice %2 {offsets = [0, 0], sizes = [64, 32], strides = [1, 1]} : vector<64x48xf32> to vector<64x32xf32>
    %cst_34 = arith.constant dense<0.000000e+00> : vector<64x16xf32>
    %308 = tpu.matmul %307, %306, %cst_34 {dimension_numbers = #tpu.dot_dimension_numbers<[1], [0], [0], [1], [0, 0, 1, 1], [], []>} : vector<64x32xf32>, vector<32x16xf32>, vector<64x16xf32> -> vector<64x16xf32>
    %309 = vector.extract_strided_slice %1 {offsets = [0, 6], sizes = [64, 1], strides = [1, 1]} : vector<64x9xf32> to vector<64x1xf32>
    %310 = vector.broadcast %309 : vector<64x1xf32> to vector<64x16xf32>
    %311 = arith.addf %308, %310 : vector<64x16xf32>
    %cst_35 = arith.constant 0.000000e+00 : f32
    %312 = vector.broadcast %cst_35 : f32 to vector<64x16xf32>
    %313 = arith.maximumf %311, %312 : vector<64x16xf32>
    %314 = vector.shape_cast %313 : vector<64x16xf32> to vector<64x2x8xf32>
    %cst_36 = arith.constant dense<0.000000e+00> : vector<64x2xf32>
    %315 = vector.multi_reduction <add>, %314, %cst_36 [2] : vector<64x2x8xf32> to vector<64x2xf32>
    %cst_37 = arith.constant 8.000000e+00 : f32
    %316 = vector.broadcast %cst_37 : f32 to vector<64x2xf32>
    %317 = arith.divf %315, %316 : vector<64x2xf32>
    %318 = vector.extract_strided_slice %1 {offsets = [0, 7], sizes = [64, 1], strides = [1, 1]} : vector<64x9xf32> to vector<64x1xf32>
    %319 = vector.broadcast %318 : vector<64x1xf32> to vector<64x2xf32>
    %320 = arith.mulf %319, %317 : vector<64x2xf32>
    %cst_38 = arith.constant dense<0.000000e+00> : vector<2xf32>
    %321 = vector.multi_reduction <add>, %320, %cst_38 [0] : vector<64x2xf32> to vector<2xf32>
    %322 = vector.shape_cast %321 : vector<2xf32> to vector<1x2xf32>
    %323 = vector.extract_strided_slice %1 {offsets = [0, 8], sizes = [1, 1], strides = [1, 1]} : vector<64x9xf32> to vector<1x1xf32>
    %324 = vector.broadcast %323 : vector<1x1xf32> to vector<1x2xf32>
    %325 = arith.addf %322, %324 : vector<1x2xf32>
    %c0_39 = arith.constant 0 : index
    %c0_40 = arith.constant 0 : index
    %326 = vector.load %arg5[%c0_39, %c0_40] : memref<1x2xf32, #tpu.memory_space<vmem>>, vector<1x2xf32>
    tpu.vector_store %arg5[%c0_39, %c0_40], %325 {strides = array<i32>} : memref<1x2xf32, #tpu.memory_space<vmem>>, vector<1x2xf32>,
    return
  }
  func.func @transform_0(%arg0: i32) -> (i32, i32) {
    %c0_i32 = arith.constant 0 : i32
    %c0_i32_0 = arith.constant 0 : i32
    return %arg0, %c0_i32 : i32, i32
  }
  func.func @transform_1(%arg0: i32) -> (i32, i32) {
    %c0_i32 = arith.constant 0 : i32
    %c0_i32_0 = arith.constant 0 : i32
    %c0_i32_1 = arith.constant 0 : i32
    return %c0_i32, %c0_i32_0 : i32, i32
  }
  func.func @transform_2(%arg0: i32) -> (i32, i32) {
    %c0_i32 = arith.constant 0 : i32
    %c0_i32_0 = arith.constant 0 : i32
    %c0_i32_1 = arith.constant 0 : i32
    return %c0_i32, %c0_i32_0 : i32, i32
  }
  func.func @transform_3(%arg0: i32) -> (i32, i32) {
    %c0_i32 = arith.constant 0 : i32
    %c0_i32_0 = arith.constant 0 : i32
    %c0_i32_1 = arith.constant 0 : i32
    return %c0_i32, %c0_i32_0 : i32, i32
  }
  func.func @transform_4(%arg0: i32) -> (i32, i32) {
    %c0_i32 = arith.constant 0 : i32
    %c0_i32_0 = arith.constant 0 : i32
    return %arg0, %c0_i32 : i32, i32
  }
}

</mosaic_0001>

<bundles_post_ra>
// kernel: afci_forward.1
= control target key start
LH: loop header
LB: loop body
LE: loop exit
PB: predicated region body
PF: predicated region fallthrough
CT: control target
= control target key end

     0   :  { %s8426_s19 = smov 7   ;;  %s13179_s20 = smov 126   ;;  %s13160_s0 = inlined_call_operand.vmem [shape: f32[2,128], index: 0, kind: input, shape index: {}]   ;;  %s13161_s1 = inlined_call_operand.vmem [shape: f32[32,33], index: 1, kind: input, shape index: {}]   ;;  %s13162_s2 = inlined_call_operand.vmem [shape: f32[64,9], index: 2, kind: input, shape index: {}]   ;;  %s13163_s3 = inlined_call_operand.vmem [shape: f32[64,48], index: 3, kind: input, shape index: {}]   ;;  %s13164_s4 = inlined_call_operand.hbm [shape: f32[1,2], index: 4, kind: output, shape index: {}]  }
   0x1   :  { %v38_v0 = vld [vmem:[%s13160_s0] sm:$0x3] }
   0x2   :  { %v18_v1 = vld [vmem:[%s13161_s1] sm:$0xff]  ;;  %40 = vrot.lane.b32.xlu0 %v38_v0, %s8426_s19 }
   0x3   :  { %58 = vrot.lane.b32.xlu1 %v18_v1, %s13179_s20  ;;  %8233 = vpush %v18_v1 }
   0x4   :  { %9 = vsyncpa [#allocation3], 0  ;;  %s13175_s21 = smov 125   ;;  %s13177_s22 = smov 127   ;;  %v8432_v2 = vmov 2   ;;  %v22_v3 = vld [vmem:[%s13162_s2] sm:$0xff] }
   0x5   :  { %s13165_s23 = smov 123   ;;  %s8431_s0 = smov 124   ;;  %8339 = vset.pattern.permute.xlu1 %v8432_v2  ;;  %8340 = vset.pattern.permute.xlu0 %v8432_v2  ;;  %v23_v4 = vld [vmem:[%s13162_s2 + $0x8] sm:$0xff]  ;;  %v8442_v5 = vmov 1   ;;  %v8443_v6 = vmov 20   ;;  %vm43_vm0 = vcmask 56320  }
   0x6   :  { %51 = vrot.lane.b32.xlu0 %v18_v1, %s13177_s22  ;;  %s13171_s24 = smov 121   ;;  %s13173_s25 = smov 122   ;;  %vm155_vm1 = vcmask 1039360   ;;  %vm231_vm2 = vcmask 1031168   ;;  %vm274_vm3 = vcmask 1014784   ;;  %vm295_vm4 = vcmask 982016  }
   0x7   :  { %65 = vrot.lane.b32.xlu1 %v18_v1, %s13175_s21  ;;  %s13169_s26 = smov 119   ;;  %s8436_s27 = smov 120   ;;  %vm2896_vm5 = vcmask 31744   ;;  %vm3421_vm6 = vcmask 171112   ;;  %vm3428_vm7 = vcmask 236712   ;;  %vm3435_vm8 = vcmask 302312  }
   0x8   :  { %s8437_s28 = smov 117   ;;  %s13167_s29 = smov 118   ;;  %vm3442_vm9 = vcmask 367912   ;;  %vm3449_vm10 = vcmask 433512   ;;  %vm3456_vm11 = vcmask 499112   ;;  %vm3463_vm12 = vcmask 564712  }
   0x9   :  { %s8439_s30 = smov 115   ;;  %s8440_s5 = smov 116   ;;  %vm4050_vm13 = vcmask 1041409   ;;  %vm4052_vm14 = vcmask 1042434   ;;  %vm4054_vm15 = vcmask 1043459  }
   0xa   :  { %72 = vrot.lane.b32.xlu0 %v18_v1, %s8431_s0  ;;  %s8441_s8 = smov 114   ;;  %s13183_s21 = smov 28  }
   0xb   :  { %79 = vrot.lane.b32.xlu1 %v18_v1, %s13165_s23  ;;  %s8460_s23 = smov 48  }
   0xe   :  { %86 = vrot.lane.b32.xlu0 %v18_v1, %s13173_s25  ;;  %s13181_s25 = smov 32  }
   0xf   :  { %93 = vrot.lane.b32.xlu1 %v18_v1, %s13171_s24  ;;  %s8463_s24 = smov 36  }
  0x12   :  { %100 = vrot.lane.b32.xlu0 %v18_v1, %s8436_s27 }
  0x13   :  { %107 = vrot.lane.b32.xlu1 %v18_v1, %s13169_s26  ;;  %s8462_s26 = smov 40  }
  0x16   :  { %114 = vrot.lane.b32.xlu0 %v18_v1, %s13167_s29  ;;  %s8461_s29 = smov 44  }
  0x17   :  { %121 = vrot.lane.b32.xlu1 %v18_v1, %s8437_s28 }
  0x1a   :  { %128 = vrot.lane.b32.xlu0 %v18_v1, %s8440_s5 }
  0x1b   :  { %135 = vrot.lane.b32.xlu1 %v18_v1, %s8439_s30 }
  0x1e   :  { %142 = vrot.lane.b32.xlu0 %v18_v1, %s8441_s8 }
  0x1f   :  { %308 = vperm.xlu1 %8339, %v22_v3  }
  0x22   :  { %313 = vperm.xlu0 %8340, %v23_v4  }
  0x23   :  { %8341 = vset.pattern.permute.xlu1 %v8442_v5 }
  0x24   :  { %329 = vperm.xlu1 %8341, %v22_v3  }
  0x26   :  { %8343 = vset.pattern.permute.xlu0 %v8443_v6 }
  0x28   :  { %333 = vperm.xlu1 %8341, %v23_v4  }
  0x2c   :  { %8342 = vset.pattern.permute.xlu1 %v8443_v6 }
  0x2d   :  { %4206 = vperm.xlu1 %8342, %v18_v1  }
  0x34   :  { %s8548_s11 = spop %8233 }
  0x74   :  { %v41_v7 = vpop.permute.xlu0 %40 }
  0x75   :  { %v59_v8 = vpop.permute.xlu1 %58  ;;  %v8550_v22 = vsel %vm43_vm0, 0.0, %v41_v7  ;;  %v8552_v23 = vsel %vm43_vm0, %v41_v7, 0.0  ;;  %vm4056_vm0 = vcmask 1044484  }
  0x78   :  { %v52_v10 = vpop.permute.xlu0 %51 }
  0x79   :  { %v66_v9 = vpop.permute.xlu1 %65  ;;  %8235 = vpush %v52_v10 }
  0x7a   :  { %8237 = vpush %v59_v8 }
  0x7b   :  { %8239 = vpush %v66_v9 }
  0x7c   :  { %v73_v12 = vpop.permute.xlu0 %72 }
  0x7d   :  { %v80_v11 = vpop.permute.xlu1 %79  ;;  %8241 = vpush %v73_v12 }
  0x7e   :  { %8243 = vpush %v80_v11 }
  0x80   :  { %v87_v14 = vpop.permute.xlu0 %86 }
  0x81   :  { %v94_v13 = vpop.permute.xlu1 %93  ;;  %8245 = vpush %v87_v14 }
  0x82   :  { %8247 = vpush %v94_v13 }
  0x84   :  { %v101_v16 = vpop.permute.xlu0 %100 }
  0x85   :  { %v108_v15 = vpop.permute.xlu1 %107  ;;  %8249 = vpush %v101_v16 }
  0x86   :  { %8251 = vpush %v108_v15 }
  0x88   :  { %v115_v18 = vpop.permute.xlu0 %114 }
  0x89   :  { %v122_v17 = vpop.permute.xlu1 %121  ;;  %8253 = vpush %v115_v18 }
  0x8a   :  { %8255 = vpush %v122_v17 }
  0x8c   :  { %v129_v20 = vpop.permute.xlu0 %128 }
  0x8d   :  { %v136_v19 = vpop.permute.xlu1 %135  ;;  %8257 = vpush %v129_v20 }
  0x8e   :  { %8259 = vpush %v136_v19 }
  0x90   :  { %v143_v21 = vpop.permute.xlu0 %142 }
  0x91   :  { %8261 = vpush %v143_v21 }
  0x92   :  { %8263 = vpush %v22_v3 }
  0x9e   :  { %v8628_v60 = vpop.permute.xlu1 %308 }
  0xa1   :  { %v8636_v0 = vpop.permute.xlu0 %313 }
  0xa3   :  { %v8630_v61 = vpop.permute.xlu1 %329 }
  0xa7   :  { %v8632_v62 = vpop.permute.xlu1 %333 }
  0xaa   :  { %s8236_s12 = spop %8235 }
  0xab   :  { %v54_v24 = vstv %s8236_s12  ;;  %s8554_s13 = spop %8237  ;;  %s8445_s12 = smov 108  }
  0xac   :  { %v56_v25 = vmul.f32 %v54_v24, %v8550_v22  ;;  %v57_v26 = vmul.f32 %v54_v24, %v8552_v23  ;;  %v61_v27 = vstv %s8554_s13  ;;  %s8240_s14 = spop %8239  ;;  %v8634_v63 = vpop.permute.xlu1 %4206  ;;  %s8446_s13 = smov 104  }
  0xad   :  { %v8562_v28 = vmul.f32 %v61_v27, %v8552_v23  ;;  %v68_v29 = vstv %s8240_s14  ;;  %13332 = vst [vmem:[#allocation5_spill] sm:$0xff] %v8634_v63  ;;  %v63_v3 = vmul.f32 %v61_v27, %v8550_v22  ;;  %s13326_s14 = smov 100  }
  0xae   :  { %s8564_s15 = spop %8241  ;;  %153 = vrot.lane.b32.xlu0 %v57_v26, %s13177_s22  ;;  %151 = vrot.lane.b32.xlu1 %v56_v25, %s13177_s22  ;;  %v70_v31 = vmul.f32 %v68_v29, %v8550_v22  ;;  %v71_v32 = vmul.f32 %v68_v29, %v8552_v23 }
  0xaf   :  { %v75_v30 = vstv %s8564_s15  ;;  %s8244_s16 = spop %8243  ;;  %s8448_s15 = smov 96  }
  0xb0   :  { %v8574_v33 = vmul.f32 %v75_v30, %v8552_v23  ;;  %v82_v34 = vstv %s8244_s16  ;;  %v77_v9 = vmul.f32 %v75_v30, %v8550_v22  ;;  %s8449_s16 = smov 92  }
  0xb1   :  { %v84_v36 = vmul.f32 %v82_v34, %v8550_v22  ;;  %v85_v37 = vmul.f32 %v82_v34, %v8552_v23 }
  0xb2   :  { %s8576_s17 = spop %8245  ;;  %163 = vrot.lane.b32.xlu0 %v71_v32, %s13177_s22  ;;  %161 = vrot.lane.b32.xlu1 %v70_v31, %s13177_s22 }
  0xb3   :  { %v89_v35 = vstv %s8576_s17  ;;  %s8248_s18 = spop %8247  ;;  %s8450_s17 = smov 88  }
  0xb4   :  { %v8586_v38 = vmul.f32 %v89_v35, %v8552_v23  ;;  %v96_v39 = vstv %s8248_s18  ;;  %v91_v14 = vmul.f32 %v89_v35, %v8550_v22  ;;  %s8451_s18 = smov 84  }
  0xb5   :  { %v98_v41 = vmul.f32 %v96_v39, %v8550_v22  ;;  %v99_v42 = vmul.f32 %v96_v39, %v8552_v23 }
  0xb6   :  { %s8588_s19 = spop %8249  ;;  %174 = vrot.lane.b32.xlu0 %v85_v37, %s13177_s22  ;;  %172 = vrot.lane.b32.xlu1 %v84_v36, %s13177_s22 }
  0xb7   :  { %v103_v40 = vstv %s8588_s19  ;;  %s8252_s28 = spop %8251  ;;  %s8452_s19 = smov 80  }
  0xb8   :  { %v8598_v43 = vmul.f32 %v103_v40, %v8552_v23  ;;  %v110_v44 = vstv %s8252_s28  ;;  %v105_v20 = vmul.f32 %v103_v40, %v8550_v22  ;;  %s8453_s28 = smov 76  }
  0xb9   :  { %v112_v46 = vmul.f32 %v110_v44, %v8550_v22  ;;  %v113_v47 = vmul.f32 %v110_v44, %v8552_v23 }
  0xba   :  { %s8600_s30 = spop %8253  ;;  %185 = vrot.lane.b32.xlu0 %v99_v42, %s13177_s22  ;;  %183 = vrot.lane.b32.xlu1 %v98_v41, %s13177_s22 }
  0xbb   :  { %v117_v45 = vstv %s8600_s30  ;;  %s8256_s6 = spop %8255  ;;  %s8454_s30 = smov 72  }
  0xbc   :  { %v120_v48 = vmul.f32 %v117_v45, %v8552_v23  ;;  %v124_v49 = vstv %s8256_s6  ;;  %v119_v26 = vmul.f32 %v117_v45, %v8550_v22  ;;  %s13324_s6 = smov 68  }
  0xbd   :  { %v126_v51 = vmul.f32 %v124_v49, %v8550_v22  ;;  %v127_v52 = vmul.f32 %v124_v49, %v8552_v23 }
  0xbe   :  { %s8608_s7 = spop %8257  ;;  %196 = vrot.lane.b32.xlu0 %v113_v47, %s13177_s22  ;;  %194 = vrot.lane.b32.xlu1 %v112_v46, %s13177_s22 }
  0xbf   :  { %v131_v50 = vstv %s8608_s7  ;;  %s8260_s8 = spop %8259  ;;  %s8456_s7 = smov 64  }
  0xc0   :  { %v134_v53 = vmul.f32 %v131_v50, %v8552_v23  ;;  %v138_v54 = vstv %s8260_s8  ;;  %v133_v36 = vmul.f32 %v131_v50, %v8550_v22  ;;  %s8457_s8 = smov 60  }
  0xc1   :  { %v140_v55 = vmul.f32 %v138_v54, %v8550_v22  ;;  %v141_v56 = vmul.f32 %v138_v54, %v8552_v23 }
  0xc2   :  { %s8262_s9 = spop %8261  ;;  %207 = vrot.lane.b32.xlu0 %v127_v52, %s13177_s22  ;;  %205 = vrot.lane.b32.xlu1 %v126_v51, %s13177_s22 }
  0xc3   :  { %v145_v57 = vstv %s8262_s9  ;;  %s8264_s10 = spop %8263  ;;  %s8458_s9 = smov 56  }
  0xc4   :  { %v147_v58 = vmul.f32 %v145_v57, %v8550_v22  ;;  %v148_v59 = vmul.f32 %v145_v57, %v8552_v23 }
  0xc6   :  { %218 = vrot.lane.b32.xlu0 %v141_v56, %s13177_s22  ;;  %216 = vrot.lane.b32.xlu1 %v140_v55, %s13177_s22  ;;  %s8466_s22 = smov 24  }
  0xca   :  { %261 = vrot.lane.b32.xlu0 %v148_v59, %s13179_s20  ;;  %259 = vrot.lane.b32.xlu1 %v147_v58, %s13179_s20 }
 0x120   :  { %v8638_v1 = vpop.permute.xlu0 %153  ;;  %v8640_v2 = vpop.permute.xlu1 %151 }
 0x124   :  { %v164_v4 = vpop.permute.xlu0 %163  ;;  %v162_v5 = vpop.permute.xlu1 %161 }
 0x125   :  { %v169_v6 = vadd.f32 %v164_v4, %v8562_v28  ;;  %v165_v7 = vsel %vm155_vm1, %v162_v5, %v164_v4 }
 0x126   :  { %v168_v8 = vadd.f32 %v165_v7, %v63_v3 }
 0x127   :  { %229 = vrot.lane.b32.xlu0 %v169_v6, %s13179_s20  ;;  %v48_v6 = vstv %s8548_s11  ;;  %s8444_s11 = smov 112  }
 0x128   :  { %v175_v10 = vpop.permute.xlu0 %174  ;;  %227 = vrot.lane.b32.xlu1 %v168_v8, %s13179_s20  ;;  %v173_v11 = vpop.permute.xlu1 %172  ;;  %v50_v7 = vmul.f32 %v48_v6, %v8550_v22 }
 0x129   :  { %v176_v12 = vsel %vm155_vm1, %v173_v11, %v175_v10  ;;  %v180_v47 = vadd.f32 %v175_v10, %v8574_v33 }
 0x12a   :  { %v179_v13 = vadd.f32 %v176_v12, %v77_v9  ;;  %v13189_v9 = vlaneseq }
 0x12c   :  { %v186_v15 = vpop.permute.xlu0 %185  ;;  %v184_v16 = vpop.permute.xlu1 %183 }
 0x12d   :  { %v191_v17 = vadd.f32 %v186_v15, %v8586_v38  ;;  %v187_v18 = vsel %vm155_vm1, %v184_v16, %v186_v15  ;;  %v8692_v15 = vshrl.u32 %v13189_v9, 7 }
 0x12e   :  { %v190_v19 = vadd.f32 %v187_v18, %v91_v14 }
 0x12f   :  { %239 = vrot.lane.b32.xlu0 %v191_v17, %s13179_s20  ;;  %13333 = vst [vmem:[#allocation6_spill] sm:$0xff] %v8692_v15 }
 0x130   :  { %v197_v21 = vpop.permute.xlu0 %196  ;;  %237 = vrot.lane.b32.xlu1 %v190_v19, %s13179_s20  ;;  %v195_v23 = vpop.permute.xlu1 %194  ;;  %v8695_v19 = vsub.s32 0, %v8692_v15 }
 0x131   :  { %v198_v24 = vsel %vm155_vm1, %v195_v23, %v197_v21  ;;  %v202_v55 = vadd.f32 %v197_v21, %v8598_v43  ;;  %v156_v43 = vsel %vm155_vm1, %v8640_v2, %v8638_v1  ;;  %v301_v2 = vstv %s8264_s10  ;;  %s8459_s10 = smov 52  }
 0x132   :  { %v201_v25 = vadd.f32 %v198_v24, %v105_v20  ;;  %v158_v11 = vadd.f32 %v156_v43, %v50_v7  ;;  %13334 = vst [vmem:[#allocation7_spill] sm:$0xff] %v8695_v19 }
 0x134   :  { %v208_v27 = vpop.permute.xlu0 %207  ;;  %v206_v28 = vpop.permute.xlu1 %205 }
 0x135   :  { %v213_v29 = vadd.f32 %v208_v27, %v120_v48  ;;  %v209_v30 = vsel %vm155_vm1, %v206_v28, %v208_v27 }
 0x136   :  { %v212_v31 = vadd.f32 %v209_v30, %v119_v26 }
 0x137   :  { %250 = vrot.lane.b32.xlu0 %v213_v29, %s13179_s20 }
 0x138   :  { %v219_v32 = vpop.permute.xlu0 %218  ;;  %248 = vrot.lane.b32.xlu1 %v212_v31, %s13179_s20  ;;  %v217_v34 = vpop.permute.xlu1 %216  ;;  %s13185_s20 = smov 20  }
 0x139   :  { %v220_v35 = vsel %vm155_vm1, %v217_v34, %v219_v32  ;;  %v224_v37 = vadd.f32 %v219_v32, %v134_v53  ;;  %vm4058_vm1 = vcmask 1045509  }
 0x13a   :  { %v223_v38 = vadd.f32 %v220_v35, %v133_v36 }
 0x13c   :  { %v262_v39 = vpop.permute.xlu0 %261  ;;  %v260_v40 = vpop.permute.xlu1 %259 }
 0x13d   :  { %v267_v41 = vadd.f32 %v262_v39, %v224_v37  ;;  %v263_v42 = vsel %vm231_vm2, %v260_v40, %v262_v39 }
 0x13e   :  { %v266_v44 = vadd.f32 %v263_v42, %v223_v38 }
 0x13f   :  { %282 = vrot.lane.b32.xlu0 %v267_v41, %s8431_s0 }
 0x140   :  { %280 = vrot.lane.b32.xlu1 %v266_v44, %s8431_s0 }
 0x199   :  { %v230_v45 = vpop.permute.xlu0 %229 }
 0x19a   :  { %v228_v46 = vpop.permute.xlu1 %227 }
 0x19b   :  { %v232_v10 = vsel %vm231_vm2, %v228_v46, %v230_v45  ;;  %v8472_v45 = vmov 1983009808  }
 0x19c   :  { %v234_v14 = vadd.f32 %v232_v10, %v158_v11  ;;  %v723_v46 = vunpack.c.l.s4 %v8472_v45 }
 0x1a1   :  { %v240_v48 = vpop.permute.xlu0 %239 }
 0x1a2   :  { %v245_v49 = vadd.f32 %v240_v48, %v180_v47  ;;  %v238_v50 = vpop.permute.xlu1 %237 }
 0x1a3   :  { %v241_v51 = vsel %vm231_vm2, %v238_v50, %v240_v48 }
 0x1a4   :  { %v244_v52 = vadd.f32 %v241_v51, %v179_v13  ;;  %272 = vrot.lane.b32.xlu0 %v245_v49, %s8431_s0  ;;  %v724_v49 = vunpack.c.0.s8 %v723_v46 }
 0x1a6   :  { %270 = vrot.lane.b32.xlu1 %v244_v52, %s8431_s0 }
 0x1a9   :  { %v251_v53 = vpop.permute.xlu0 %250 }
 0x1aa   :  { %v249_v54 = vpop.permute.xlu1 %248  ;;  %v256_v57 = vadd.f32 %v251_v53, %v202_v55 }
 0x1ab   :  { %v252_v56 = vsel %vm231_vm2, %v249_v54, %v251_v53  ;;  %v8894_v53 = vsub.s32 %v724_v49, %v8692_v15  ;;  %vm4081_vm2 = vcmask 261120  }
 0x1ac   :  { %v255_v58 = vadd.f32 %v252_v56, %v201_v25 }
 0x1ad   :  { %13341 = vst [vmem:[#allocation14_spill] sm:$0xff] %v8894_v53 }
 0x1b1   :  { %v283_v33 = vpop.permute.xlu0 %282 }
 0x1b2   :  { %v288_v59 = vadd.f32 %v283_v33, %v256_v57  ;;  %v281_v3 = vpop.permute.xlu1 %280 }
 0x1b3   :  { %v284_v4 = vsel %vm274_vm3, %v281_v3, %v283_v33  ;;  %v8473_v33 = vmov 1934713408  }
 0x1b4   :  { %v287_v5 = vadd.f32 %v284_v4, %v255_v58  ;;  %293 = vrot.lane.b32.xlu0 %v288_v59, %s8436_s27  ;;  %v787_v58 = vunpack.c.l.s4 %v8473_v33 }
 0x1b6   :  { %291 = vrot.lane.b32.xlu1 %v287_v5, %s8436_s27  ;;  %v788_v7 = vunpack.c.0.s8 %v787_v58 }
 0x216   :  { %v273_v12 = vpop.permute.xlu0 %272 }
 0x218   :  { %v271_v8 = vpop.permute.xlu1 %270 }
 0x219   :  { %v275_v13 = vsel %vm274_vm3, %v271_v8, %v273_v12  ;;  %vm4060_vm3 = vcmask 1046534  }
 0x21a   :  { %v277_v16 = vadd.f32 %v275_v13, %v234_v14  ;;  %v8939_v14 = vsub.s32 %v788_v7, %v8692_v15 }
 0x21c   :  { %13345 = vst [vmem:[#allocation18_spill] sm:$0xff] %v8939_v14 }
 0x226   :  { %v294_v17 = vpop.permute.xlu0 %293 }
 0x228   :  { %v292_v18 = vpop.permute.xlu1 %291 }
 0x229   :  { %v296_v1 = vsel %vm295_vm4, %v292_v18, %v294_v17  ;;  %vm13328_vm4 = vcmask 1047559  }
 0x22a   :  { %v298_v22 = vadd.f32 %v296_v1, %v277_v16 }
 0x22c   :  { %v8697_v20 = vadd.f32 %v301_v2, %v298_v22 }
 0x22e   :  { %v319_v21 = vrot.slane %v8697_v20, %v8695_v19  ;;  %v305_v29 = vrot.slane %v8697_v20, 1 }
 0x230   :  { %v324_v23 = vmul.f32 %v319_v21, %v8628_v60  ;;  %v326_v24 = vmul.f32 %v319_v21, %v8636_v0  ;;  %v323_v30 = vrot.slane %v305_v29, %v8695_v19 }
 0x232   :  { %v336_v25 = vadd.f32 %v8630_v61, %v324_v23  ;;  %v338_v26 = vadd.f32 %v8632_v62, %v326_v24  ;;  %v325_v31 = vmul.f32 %v323_v30, %v8628_v60  ;;  %v327_v32 = vmul.f32 %v323_v30, %v8636_v0 }
 0x234   :  { %v8705_v27 = vmax.f32 %v336_v25, 0.0  ;;  %v8707_v28 = vmax.f32 %v338_v26, 0.0  ;;  %v337_v36 = vadd.f32 %v8630_v61, %v325_v31  ;;  %v339_v37 = vadd.f32 %v8632_v62, %v327_v32 }
 0x236   :  { %13335 = vst [vmem:[#allocation8_spill] sm:$0xff] %v8707_v28  ;;  %348 = vrot.lane.b32.xlu1 %v8707_v28, %s8431_s0  ;;  %346 = vrot.lane.b32.xlu0 %v8705_v27, %s8431_s0  ;;  %v8847_v0 = vmax.f32 %v337_v36, 0.0  ;;  %v8849_v39 = vmax.f32 %v339_v37, 0.0 }
 0x238   :  { %13337 = vst [vmem:[#allocation10_spill] sm:$0xff] %v8847_v0  ;;  %13338 = vst [vmem:[#allocation11_spill] sm:$0xff] %v8849_v39 }
 0x23a   :  { %354 = vrot.lane.b32.xlu1 %v8707_v28, %s8436_s27  ;;  %352 = vrot.lane.b32.xlu0 %v8705_v27, %s8436_s27 }
 0x23e   :  { %360 = vrot.lane.b32.xlu1 %v8707_v28, %s8440_s5  ;;  %358 = vrot.lane.b32.xlu0 %v8705_v27, %s8440_s5 }
 0x242   :  { %366 = vrot.lane.b32.xlu1 %v8707_v28, %s8444_s11  ;;  %364 = vrot.lane.b32.xlu0 %v8705_v27, %s8444_s11 }
 0x246   :  { %372 = vrot.lane.b32.xlu1 %v8707_v28, %s8445_s12  ;;  %370 = vrot.lane.b32.xlu0 %v8705_v27, %s8445_s12 }
 0x24a   :  { %378 = vrot.lane.b32.xlu1 %v8707_v28, %s8446_s13  ;;  %376 = vrot.lane.b32.xlu0 %v8705_v27, %s8446_s13 }
 0x24e   :  { %384 = vrot.lane.b32.xlu1 %v8707_v28, %s13326_s14  ;;  %382 = vrot.lane.b32.xlu0 %v8705_v27, %s13326_s14 }
 0x252   :  { %390 = vrot.lane.b32.xlu1 %v8707_v28, %s8448_s15  ;;  %388 = vrot.lane.b32.xlu0 %v8705_v27, %s8448_s15 }
 0x256   :  { %396 = vrot.lane.b32.xlu1 %v8707_v28, %s8449_s16  ;;  %394 = vrot.lane.b32.xlu0 %v8705_v27, %s8449_s16 }
 0x25a   :  { %402 = vrot.lane.b32.xlu1 %v8707_v28, %s8450_s17  ;;  %400 = vrot.lane.b32.xlu0 %v8705_v27, %s8450_s17 }
 0x25e   :  { %408 = vrot.lane.b32.xlu1 %v8707_v28, %s8451_s18  ;;  %406 = vrot.lane.b32.xlu0 %v8705_v27, %s8451_s18 }
 0x262   :  { %414 = vrot.lane.b32.xlu1 %v8707_v28, %s8452_s19  ;;  %412 = vrot.lane.b32.xlu0 %v8705_v27, %s8452_s19 }
 0x266   :  { %420 = vrot.lane.b32.xlu1 %v8707_v28, %s8453_s28  ;;  %418 = vrot.lane.b32.xlu0 %v8705_v27, %s8453_s28 }
 0x26a   :  { %426 = vrot.lane.b32.xlu1 %v8707_v28, %s8454_s30  ;;  %424 = vrot.lane.b32.xlu0 %v8705_v27, %s8454_s30 }
 0x26e   :  { %432 = vrot.lane.b32.xlu1 %v8707_v28, %s13324_s6  ;;  %430 = vrot.lane.b32.xlu0 %v8705_v27, %s13324_s6 }
 0x272   :  { %438 = vrot.lane.b32.xlu1 %v8707_v28, %s8456_s7  ;;  %436 = vrot.lane.b32.xlu0 %v8705_v27, %s8456_s7 }
 0x276   :  { %444 = vrot.lane.b32.xlu1 %v8707_v28, %s8457_s8  ;;  %442 = vrot.lane.b32.xlu0 %v8705_v27, %s8457_s8 }
 0x27a   :  { %450 = vrot.lane.b32.xlu1 %v8707_v28, %s8458_s9  ;;  %448 = vrot.lane.b32.xlu0 %v8705_v27, %s8458_s9 }
 0x27e   :  { %456 = vrot.lane.b32.xlu1 %v8707_v28, %s8459_s10  ;;  %454 = vrot.lane.b32.xlu0 %v8705_v27, %s8459_s10 }
 0x282   :  { %462 = vrot.lane.b32.xlu1 %v8707_v28, %s8460_s23  ;;  %460 = vrot.lane.b32.xlu0 %v8705_v27, %s8460_s23 }
 0x286   :  { %468 = vrot.lane.b32.xlu1 %v8707_v28, %s8461_s29  ;;  %466 = vrot.lane.b32.xlu0 %v8705_v27, %s8461_s29 }
 0x28a   :  { %474 = vrot.lane.b32.xlu1 %v8707_v28, %s8462_s26  ;;  %472 = vrot.lane.b32.xlu0 %v8705_v27, %s8462_s26 }
 0x28e   :  { %480 = vrot.lane.b32.xlu1 %v8707_v28, %s8463_s24  ;;  %478 = vrot.lane.b32.xlu0 %v8705_v27, %s8463_s24 }
 0x292   :  { %486 = vrot.lane.b32.xlu1 %v8707_v28, %s13181_s25  ;;  %484 = vrot.lane.b32.xlu0 %v8705_v27, %s13181_s25  ;;  %s8468_s25 = smov 16  }
 0x296   :  { %492 = vrot.lane.b32.xlu1 %v8707_v28, %s13183_s21  ;;  %490 = vrot.lane.b32.xlu0 %v8705_v27, %s13183_s21  ;;  %s13187_s21 = smov 12  }
 0x29a   :  { %498 = vrot.lane.b32.xlu1 %v8707_v28, %s8466_s22  ;;  %496 = vrot.lane.b32.xlu0 %v8705_v27, %s8466_s22 }
 0x29e   :  { %504 = vrot.lane.b32.xlu1 %v8707_v28, %s13185_s20  ;;  %502 = vrot.lane.b32.xlu0 %v8705_v27, %s13185_s20  ;;  %s8470_s20 = smov 8  }
 0x2a2   :  { %510 = vrot.lane.b32.xlu1 %v8707_v28, %s8468_s25  ;;  %508 = vrot.lane.b32.xlu0 %v8705_v27, %s8468_s25 }
 0x2a6   :  { %516 = vrot.lane.b32.xlu1 %v8707_v28, %s13187_s21  ;;  %514 = vrot.lane.b32.xlu0 %v8705_v27, %s13187_s21  ;;  %s8471_s21 = smov 4  }
 0x2a8   :  { %v8829_v34 = vpop.permute.xlu1 %348  ;;  %v8831_v35 = vpop.permute.xlu0 %346 }
 0x2aa   :  { %522 = vrot.lane.b32.xlu1 %v8707_v28, %s8470_s20  ;;  %520 = vrot.lane.b32.xlu0 %v8705_v27, %s8470_s20 }
 0x2ac   :  { %v8839_v38 = vpop.permute.xlu1 %354  ;;  %v8841_v60 = vpop.permute.xlu0 %352 }
 0x2ad   :  { %13336 = vst [vmem:[#allocation9_spill] sm:$0xff] %v8839_v38  ;;  %v721_v59 = vcombine.high %v8705_v27, %v8841_v60 }
 0x2ae   :  { %528 = vrot.lane.b32.xlu1 %v8707_v28, %s8471_s21  ;;  %526 = vrot.lane.b32.xlu0 %v8705_v27, %s8471_s21 }
 0x2af   :  { %v8924_v8 = vrot.slane %v721_v59, %v8894_v53 }
 0x2b0   :  { %v8851_v40 = vpop.permute.xlu1 %360  ;;  %v8853_v61 = vpop.permute.xlu0 %358 }
 0x2b1   :  { %v737_v54 = vcombine.high %v8831_v35, %v8853_v61 }
 0x2b2   :  { %536 = vrot.lane.b32.xlu1 %v8849_v39, %s8431_s0  ;;  %534 = vrot.lane.b32.xlu0 %v8847_v0, %s8431_s0 }
 0x2b3   :  { %v8914_v4 = vrot.slane %v737_v54, %v8894_v53 }
 0x2b4   :  { %v8859_v62 = vpop.permute.xlu1 %366  ;;  %v8861_v41 = vpop.permute.xlu0 %364 }
 0x2b5   :  { %13339 = vst [vmem:[#allocation12_spill] sm:$0xff] %v8859_v62  ;;  %v801_v11 = vcombine.high %v8924_v8, %v8914_v4 }
 0x2b6   :  { %542 = vrot.lane.b32.xlu1 %v8849_v39, %s8436_s27  ;;  %540 = vrot.lane.b32.xlu0 %v8847_v0, %s8436_s27 }
 0x2b7   :  { %v8953_v1 = vrot.slane %v801_v11, %v8939_v14 }
 0x2b8   :  { %v8867_v42 = vpop.permute.xlu1 %372  ;;  %v8869_v44 = vpop.permute.xlu0 %370 }
 0x2b9   :  { %13348 = vst [vmem:[#allocation21_spill] sm:$0xff] %v8953_v1 }
 0x2ba   :  { %548 = vrot.lane.b32.xlu1 %v8849_v39, %s8440_s5  ;;  %546 = vrot.lane.b32.xlu0 %v8847_v0, %s8440_s5 }
 0x2bc   :  { %v8875_v47 = vpop.permute.xlu1 %378  ;;  %v8877_v48 = vpop.permute.xlu0 %376 }
 0x2bd   :  { %13340 = vst [vmem:[#allocation13_spill] sm:$0xff] %v8875_v47  ;;  %v753_v55 = vcombine.high %v8861_v41, %v8877_v48 }
 0x2be   :  { %554 = vrot.lane.b32.xlu1 %v8849_v39, %s8444_s11  ;;  %552 = vrot.lane.b32.xlu0 %v8847_v0, %s8444_s11 }
 0x2bf   :  { %v8917_v5 = vrot.slane %v753_v55, %v8894_v53 }
 0x2c0   :  { %v8883_v50 = vpop.permute.xlu1 %384  ;;  %v8885_v51 = vpop.permute.xlu0 %382 }
 0x2c1   :  { %v769_v52 = vcombine.high %v8869_v44, %v8885_v51 }
 0x2c2   :  { %560 = vrot.lane.b32.xlu1 %v8849_v39, %s8445_s12  ;;  %558 = vrot.lane.b32.xlu0 %v8847_v0, %s8445_s12 }
 0x2c3   :  { %v8907_v3 = vrot.slane %v769_v52, %v8894_v53 }
 0x2c4   :  { %v8900_v56 = vpop.permute.xlu1 %390  ;;  %v8902_v57 = vpop.permute.xlu0 %388 }
 0x2c5   :  { %13342 = vst [vmem:[#allocation15_spill] sm:$0xff] %v8900_v56  ;;  %v833_v10 = vcombine.high %v8917_v5, %v8907_v3 }
 0x2c6   :  { %566 = vrot.lane.b32.xlu1 %v8849_v39, %s8446_s13  ;;  %564 = vrot.lane.b32.xlu0 %v8847_v0, %s8446_s13 }
 0x2c7   :  { %v8944_v16 = vrot.slane %v833_v10, %v8939_v14 }
 0x2c8   :  { %v8919_v6 = vpop.permute.xlu1 %396  ;;  %v8921_v43 = vpop.permute.xlu0 %394 }
 0x2c9   :  { %13343 = vst [vmem:[#allocation16_spill] sm:$0xff] %v8919_v6  ;;  %13346 = vst [vmem:[#allocation19_spill] sm:$0xff] %v8944_v16 }
 0x2ca   :  { %572 = vrot.lane.b32.xlu1 %v8849_v39, %s13326_s14  ;;  %570 = vrot.lane.b32.xlu0 %v8847_v0, %s13326_s14 }
 0x2cc   :  { %v8934_v12 = vpop.permute.xlu1 %402  ;;  %v8936_v13 = vpop.permute.xlu0 %400 }
 0x2cd   :  { %13344 = vst [vmem:[#allocation17_spill] sm:$0xff] %v8934_v12 }
 0x2ce   :  { %578 = vrot.lane.b32.xlu1 %v8849_v39, %s8448_s15  ;;  %576 = vrot.lane.b32.xlu0 %v8847_v0, %s8448_s15 }
 0x2d0   :  { %v8948_v17 = vpop.permute.xlu1 %408  ;;  %v8950_v18 = vpop.permute.xlu0 %406 }
 0x2d1   :  { %13347 = vst [vmem:[#allocation20_spill] sm:$0xff] %v8948_v17 }
 0x2d2   :  { %584 = vrot.lane.b32.xlu1 %v8849_v39, %s8449_s16  ;;  %582 = vrot.lane.b32.xlu0 %v8847_v0, %s8449_s16 }
 0x2d4   :  { %v8961_v22 = vpop.permute.xlu1 %414  ;;  %v8963_v20 = vpop.permute.xlu0 %412 }
 0x2d5   :  { %13349 = vst [vmem:[#allocation22_spill] sm:$0xff] %v8961_v22 }
 0x2d6   :  { %590 = vrot.lane.b32.xlu1 %v8849_v39, %s8450_s17  ;;  %588 = vrot.lane.b32.xlu0 %v8847_v0, %s8450_s17 }
 0x2d8   :  { %v8969_v21 = vpop.permute.xlu1 %420  ;;  %v8971_v23 = vpop.permute.xlu0 %418 }
 0x2da   :  { %596 = vrot.lane.b32.xlu1 %v8849_v39, %s8451_s18  ;;  %594 = vrot.lane.b32.xlu0 %v8847_v0, %s8451_s18 }
 0x2dc   :  { %v8977_v24 = vpop.permute.xlu1 %426  ;;  %v8979_v25 = vpop.permute.xlu0 %424 }
 0x2dd   :  { %13350 = vst [vmem:[#allocation23_spill] sm:$0xff] %v8977_v24 }
 0x2de   :  { %602 = vrot.lane.b32.xlu1 %v8849_v39, %s8452_s19  ;;  %600 = vrot.lane.b32.xlu0 %v8847_v0, %s8452_s19 }
 0x2e0   :  { %v8985_v26 = vpop.permute.xlu1 %432  ;;  %v8987_v29 = vpop.permute.xlu0 %430 }
 0x2e2   :  { %608 = vrot.lane.b32.xlu1 %v8849_v39, %s8453_s28  ;;  %606 = vrot.lane.b32.xlu0 %v8847_v0, %s8453_s28 }
 0x2e4   :  { %v8993_v30 = vpop.permute.xlu1 %438  ;;  %v8995_v31 = vpop.permute.xlu0 %436 }
 0x2e5   :  { %13351 = vst [vmem:[#allocation24_spill] sm:$0xff] %v8993_v30 }
 0x2e6   :  { %614 = vrot.lane.b32.xlu1 %v8849_v39, %s8454_s30  ;;  %612 = vrot.lane.b32.xlu0 %v8847_v0, %s8454_s30 }
 0x2e8   :  { %v9001_v32 = vpop.permute.xlu1 %444  ;;  %v9003_v36 = vpop.permute.xlu0 %442 }
 0x2e9   :  { %13352 = vst [vmem:[#allocation25_spill] sm:$0xff] %v9001_v32 }
 0x2ea   :  { %620 = vrot.lane.b32.xlu1 %v8849_v39, %s13324_s6  ;;  %618 = vrot.lane.b32.xlu0 %v8847_v0, %s13324_s6 }
 0x2ec   :  { %v9009_v37 = vpop.permute.xlu1 %450  ;;  %v9011_v45 = vpop.permute.xlu0 %448 }
 0x2ed   :  { %13353 = vst [vmem:[#allocation26_spill] sm:$0xff] %v9009_v37  ;;  %v993_v15 = vcombine.high %v8995_v31, %v9011_v45 }
 0x2ee   :  { %626 = vrot.lane.b32.xlu1 %v8849_v39, %s8456_s7  ;;  %624 = vrot.lane.b32.xlu0 %v8847_v0, %s8456_s7 }
 0x2ef   :  { %v9087_v32 = vrot.slane %v993_v15, %v8894_v53 }
 0x2f0   :  { %v9017_v46 = vpop.permute.xlu1 %456  ;;  %v9019_v49 = vpop.permute.xlu0 %454 }
 0x2f1   :  { %13354 = vst [vmem:[#allocation27_spill] sm:$0xff] %v9017_v46  ;;  %v1009_v9 = vcombine.high %v9003_v36, %v9019_v49 }
 0x2f2   :  { %632 = vrot.lane.b32.xlu1 %v8849_v39, %s8457_s8  ;;  %630 = vrot.lane.b32.xlu0 %v8847_v0, %s8457_s8 }
 0x2f3   :  { %v9077_v37 = vrot.slane %v1009_v9, %v8894_v53 }
 0x2f4   :  { %v9025_v52 = vpop.permute.xlu1 %462  ;;  %v9027_v54 = vpop.permute.xlu0 %460 }
 0x2f5   :  { %13355 = vst [vmem:[#allocation28_spill] sm:$0xff] %v9025_v52  ;;  %v1073_v9 = vcombine.high %v9087_v32, %v9077_v37 }
 0x2f6   :  { %638 = vrot.lane.b32.xlu1 %v8849_v39, %s8458_s9  ;;  %636 = vrot.lane.b32.xlu0 %v8847_v0, %s8458_s9 }
 0x2f7   :  { %v9113_v16 = vrot.slane %v1073_v9, %v8939_v14 }
 0x2f8   :  { %v9033_v55 = vpop.permute.xlu1 %468  ;;  %v9035_v33 = vpop.permute.xlu0 %466 }
 0x2f9   :  { %13356 = vst [vmem:[#allocation29_spill] sm:$0xff] %v9033_v55  ;;  %13365 = vst [vmem:[#allocation37_spill] sm:$0xff] %v9113_v16 }
 0x2fa   :  { %644 = vrot.lane.b32.xlu1 %v8849_v39, %s8459_s10  ;;  %642 = vrot.lane.b32.xlu0 %v8847_v0, %s8459_s10  ;;  %s13609_s10 = smov 126  }
 0x2fc   :  { %v9041_v58 = vpop.permute.xlu1 %474  ;;  %v9043_v59 = vpop.permute.xlu0 %472 }
 0x2fd   :  { %13357 = vst [vmem:[#allocation30_spill] sm:$0xff] %v9041_v58  ;;  %v1025_v2 = vcombine.high %v9027_v54, %v9043_v59 }
 0x2fe   :  { %650 = vrot.lane.b32.xlu1 %v8849_v39, %s8460_s23  ;;  %648 = vrot.lane.b32.xlu0 %v8847_v0, %s8460_s23  ;;  %s13362_s23 = smov 32  }
 0x2ff   :  { %v9080_v52 = vrot.slane %v1025_v2, %v8894_v53 }
 0x300   :  { %v9049_v7 = vpop.permute.xlu1 %480  ;;  %v9051_v10 = vpop.permute.xlu0 %478 }
 0x301   :  { %13358 = vst [vmem:[#allocation31_spill] sm:$0xff] %v9049_v7  ;;  %v1041_v11 = vcombine.high %v9035_v33, %v9051_v10 }
 0x302   :  { %656 = vrot.lane.b32.xlu1 %v8849_v39, %s8461_s29  ;;  %654 = vrot.lane.b32.xlu0 %v8847_v0, %s8461_s29  ;;  %s13617_s29 = smov 123  }
 0x303   :  { %v9070_v30 = vrot.slane %v1041_v11, %v8894_v53 }
 0x304   :  { %v9063_v19 = vpop.permute.xlu1 %486  ;;  %v9065_v63 = vpop.permute.xlu0 %484 }
 0x305   :  { %13359 = vst [vmem:[#allocation32_spill] sm:$0xff] %v9063_v19  ;;  %v1105_v11 = vcombine.high %v9080_v52, %v9070_v30 }
 0x306   :  { %662 = vrot.lane.b32.xlu1 %v8849_v39, %s8462_s26  ;;  %660 = vrot.lane.b32.xlu0 %v8847_v0, %s8462_s26  ;;  %s13369_s26 = smov 20  }
 0x307   :  { %v9104_v15 = vrot.slane %v1105_v11, %v8939_v14 }
 0x308   :  { %v9082_v19 = vpop.permute.xlu1 %492  ;;  %v9084_v58 = vpop.permute.xlu0 %490 }
 0x309   :  { %13360 = vst [vmem:[#allocation33_spill] sm:$0xff] %v9082_v19  ;;  %13363 = vst [vmem:[#allocation35_spill] sm:$0xff] %v9104_v15 }
 0x30a   :  { %668 = vrot.lane.b32.xlu1 %v8849_v39, %s8463_s24  ;;  %666 = vrot.lane.b32.xlu0 %v8847_v0, %s8463_s24  ;;  %s13366_s24 = smov 28  }
 0x30c   :  { %v9097_v2 = vpop.permute.xlu1 %498  ;;  %v9099_v19 = vpop.permute.xlu0 %496 }
 0x30d   :  { %13361 = vst [vmem:[#allocation34_spill] sm:$0xff] %v9097_v2 }
 0x30e   :  { %674 = vrot.lane.b32.xlu1 %v8849_v39, %s13362_s23  ;;  %672 = vrot.lane.b32.xlu0 %v8847_v0, %s13362_s23 }
 0x310   :  { %v9108_v46 = vpop.permute.xlu1 %504  ;;  %v9110_v1 = vpop.permute.xlu0 %502 }
 0x311   :  { %13364 = vst [vmem:[#allocation36_spill] sm:$0xff] %v9108_v46 }
 0x312   :  { %680 = vrot.lane.b32.xlu1 %v8849_v39, %s13366_s24  ;;  %678 = vrot.lane.b32.xlu0 %v8847_v0, %s13366_s24  ;;  %s13611_s24 = smov 125  }
 0x314   :  { %v9121_v11 = vpop.permute.xlu1 %510  ;;  %v9123_v55 = vpop.permute.xlu0 %508 }
 0x315   :  { %13367 = vst [vmem:[#allocation38_spill] sm:$0xff] %v9121_v11 }
 0x316   :  { %686 = vrot.lane.b32.xlu1 %v8849_v39, %s8466_s22  ;;  %684 = vrot.lane.b32.xlu0 %v8847_v0, %s8466_s22  ;;  %s13372_s22 = smov 12  }
 0x318   :  { %v9129_v9 = vpop.permute.xlu1 %516  ;;  %v9131_v46 = vpop.permute.xlu0 %514 }
 0x319   :  { %13368 = vst [vmem:[#allocation39_spill] sm:$0xff] %v9129_v9 }
 0x31a   :  { %692 = vrot.lane.b32.xlu1 %v8849_v39, %s13369_s26  ;;  %690 = vrot.lane.b32.xlu0 %v8847_v0, %s13369_s26  ;;  %s13612_s26 = smov 122  }
 0x31c   :  { %v9137_v2 = vpop.permute.xlu1 %522  ;;  %v9139_v11 = vpop.permute.xlu0 %520 }
 0x31d   :  { %13370 = vst [vmem:[#allocation40_spill] sm:$0xff] %v9137_v2  ;;  %v1161_v28 = vcombine.high %v9123_v55, %v9139_v11 }
 0x31e   :  { %698 = vrot.lane.b32.xlu1 %v8849_v39, %s8468_s25  ;;  %696 = vrot.lane.b32.xlu0 %v8847_v0, %s8468_s25  ;;  %s13615_s25 = smov 118  }
 0x31f   :  { %v9182_v62 = vrot.slane %v1161_v28, %v8894_v53 }
 0x320   :  { %v9145_v16 = vpop.permute.xlu1 %528  ;;  %v9147_v9 = vpop.permute.xlu0 %526 }
 0x321   :  { %13371 = vst [vmem:[#allocation41_spill] sm:$0xff] %v9145_v16  ;;  %v1177_v7 = vcombine.high %v9131_v46, %v9147_v9  ;;  %v1145_v16 = vcombine.high %v9084_v58, %v9110_v1 }
 0x322   :  { %704 = vrot.lane.b32.xlu1 %v8849_v39, %s13372_s22  ;;  %702 = vrot.lane.b32.xlu0 %v8847_v0, %s13372_s22  ;;  %s13613_s22 = smov 121  }
 0x323   :  { %v9179_v12 = vrot.slane %v1145_v16, %v8894_v53 }
 0x324   :  { %v9153_v15 = vpop.permute.xlu1 %536  ;;  %v9155_v2 = vpop.permute.xlu0 %534 }
 0x325   :  { %13373 = vst [vmem:[#allocation42_spill] sm:$0xff] %v9153_v15  ;;  %13374 = vst [vmem:[#allocation43_spill] sm:$0xff] %v9155_v2  ;;  %v1129_v15 = vcombine.high %v9065_v63, %v9099_v19  ;;  %v9170_v2 = vrot.slane %v1177_v7, %v8894_v53 }
 0x326   :  { %710 = vrot.lane.b32.xlu1 %v8849_v39, %s8470_s20  ;;  %708 = vrot.lane.b32.xlu0 %v8847_v0, %s8470_s20 }
 0x327   :  { %v9187_v47 = vrot.slane %v1129_v15, %v8894_v53  ;;  %v1241_v7 = vcombine.high %v9182_v62, %v9170_v2  ;;  %v768_v15 = vcombine.low %v8869_v44, %v8885_v51  ;;  %v904_v44 = vcombine.low %v8971_v23, %v8987_v29 }
 0x328   :  { %v9172_v38 = vpop.permute.xlu1 %542  ;;  %v9174_v56 = vpop.permute.xlu0 %540  ;;  %v1040_v51 = vcombine.low %v9035_v33, %v9051_v10  ;;  %v856_v10 = vcombine.low %v8902_v57, %v8936_v13 }
 0x329   :  { %13375 = vst [vmem:[#allocation44_spill] sm:$0xff] %v9172_v38  ;;  %13376 = vst [vmem:[#allocation45_spill] sm:$0xff] %v9174_v56  ;;  %v9200_v28 = vrot.slane %v1241_v7, %v8939_v14  ;;  %v752_v7 = vcombine.low %v8861_v41, %v8877_v48  ;;  %v1024_v41 = vcombine.low %v9027_v54, %v9043_v59 }
 0x32a   :  { %716 = vrot.lane.b32.xlu1 %v8849_v39, %s8471_s21  ;;  %714 = vrot.lane.b32.xlu0 %v8847_v0, %s8471_s21  ;;  %v1209_v39 = vcombine.high %v9187_v47, %v9179_v12  ;;  %v1176_v54 = vcombine.low %v9131_v46, %v9147_v9  ;;  %v1160_v46 = vcombine.low %v9123_v55, %v9139_v11  ;;  %s13614_s21 = smov 119  }
 0x32b   :  { %13380 = vst [vmem:[#allocation49_spill] sm:$0xff] %v9200_v28  ;;  %v9282_v9 = vrot.slane %v856_v10, %v8894_v53 }
 0x32c   :  { %v9191_v38 = vpop.permute.xlu0 %546  ;;  %v9195_v56 = vpop.permute.xlu1 %548  ;;  %v9203_v0 = vrot.slane %v1209_v39, %v8939_v14  ;;  %v720_v39 = vcombine.low %v8705_v27, %v8841_v60  ;;  %v872_v27 = vcombine.low %v8921_v43, %v8950_v18  ;;  %v888_v60 = vcombine.low %v8963_v20, %v8979_v25 }
 0x32d   :  { %13377 = vst [vmem:[#allocation46_spill] sm:$0xff] %v9191_v38  ;;  %13378 = vst [vmem:[#allocation47_spill] sm:$0xff] %v9195_v56  ;;  %v736_v56 = vcombine.low %v8831_v35, %v8853_v61  ;;  %v9232_v35 = vrot.slane %v752_v7, %v8894_v53  ;;  %v1008_v61 = vcombine.low %v9003_v36, %v9019_v49 }
 0x32e   :  { %13381 = vst [vmem:[#allocation50_spill] sm:$0xff] %v9203_v0  ;;  %v992_v36 = vcombine.low %v8995_v31, %v9011_v45  ;;  %v9257_v49 = vrot.slane %v1040_v51, %v8894_v53  ;;  %v9275_v31 = vrot.slane %v1024_v41, %v8894_v53  ;;  %v1144_v45 = vcombine.low %v9084_v58, %v9110_v1 }
 0x32f   :  { %v9229_v38 = vrot.slane %v736_v56, %v8894_v53  ;;  %v9245_v56 = vrot.slane %v720_v39, %v8894_v53  ;;  %v9266_v39 = vrot.slane %v872_v27, %v8894_v53  ;;  %v1128_v1 = vcombine.low %v9065_v63, %v9099_v19 }
 0x330   :  { %v9197_v16 = vpop.permute.xlu0 %552  ;;  %v9207_v22 = vpop.permute.xlu1 %554  ;;  %v9295_v58 = vrot.slane %v1176_v54, %v8894_v53  ;;  %v1168_v63 = vrot.slane %v1160_v46, %v8894_v53 }
 0x331   :  { %13379 = vst [vmem:[#allocation48_spill] sm:$0xff] %v9197_v16  ;;  %13382 = vst [vmem:[#allocation51_spill] sm:$0xff] %v9207_v22  ;;  %v9220_v16 = vrot.slane %v768_v15, %v8894_v53  ;;  %v9252_v15 = vrot.slane %v904_v44, %v8894_v53  ;;  %v784_v7 = vcombine.low %v9245_v56, %v9229_v38 }
 0x332   :  { %v9269_v44 = vrot.slane %v888_v60, %v8894_v53  ;;  %v9288_v60 = vrot.slane %v992_v36, %v8894_v53  ;;  %v9307_v36 = vrot.slane %v1144_v45, %v8894_v53  ;;  %v9311_v54 = vrot.slane %v1128_v1, %v8894_v53 }
 0x333   :  { %v816_v33 = vcombine.low %v9232_v35, %v9220_v16  ;;  %v792_v41 = vrot.slane %v784_v7, %v8939_v14 }
 0x334   :  { %v9209_v24 = vpop.permute.xlu0 %558  ;;  %v9242_v48 = vpop.permute.xlu1 %560  ;;  %v952_v51 = vcombine.low %v9269_v44, %v9252_v15 }
 0x335   :  { %13383 = vst [vmem:[#allocation52_spill] sm:$0xff] %v9209_v24  ;;  %13385 = vst [vmem:[#allocation54_spill] sm:$0xff] %v9242_v48  ;;  %v9272_v48 = vrot.slane %v1008_v61, %v8894_v53  ;;  %v824_v27 = vrot.slane %v816_v33, %v8939_v14  ;;  %v1088_v61 = vcombine.low %v9275_v31, %v9257_v49 }
 0x336   :  { %v920_v33 = vcombine.low %v9282_v9, %v9266_v39  ;;  %v1192_v24 = vcombine.low %v9311_v54, %v9307_v36 }
 0x337   :  { %v1056_v10 = vcombine.low %v9288_v60, %v9272_v48  ;;  %v848_v19 = vcombine.low %v792_v41, %v824_v27  ;;  %v1096_v7 = vrot.slane %v1088_v61, %v8939_v14 }
 0x338   :  { %v9226_v22 = vpop.permute.xlu0 %564  ;;  %v9297_v55 = vpop.permute.xlu1 %566 }
 0x339   :  { %13384 = vst [vmem:[#allocation53_spill] sm:$0xff] %v9226_v22  ;;  %13387 = vst [vmem:[#allocation56_spill] sm:$0xff] %v9297_v55  ;;  %v1224_v55 = vcombine.low %v1168_v63, %v9295_v58  ;;  %v960_v22 = vrot.slane %v952_v51, %v8939_v14  ;;  %v1064_v46 = vrot.slane %v1056_v10, %v8939_v14  ;;  %v2897_v0 = vsel %vm2896_vm5, %v848_v19, -inf }
 0x33a   :  { %v1200_v51 = vrot.slane %v1192_v24, %v8939_v14  ;;  %v849_v19 = vcombine.high %v792_v41, %v824_v27  ;;  %v953_v24 = vcombine.high %v9269_v44, %v9252_v15  ;;  %v1057_v15 = vcombine.high %v9288_v60, %v9272_v48 }
 0x33b   :  { %v1120_v28 = vcombine.low %v1064_v46, %v1096_v7  ;;  %v1232_v61 = vrot.slane %v1224_v55, %v8939_v14  ;;  %v1193_v48 = vcombine.high %v9311_v54, %v9307_v36 }
 0x33c   :  { %v9261_v59 = vpop.permute.xlu0 %570  ;;  %v9320_v45 = vpop.permute.xlu1 %572 }
 0x33d   :  { %13386 = vst [vmem:[#allocation55_spill] sm:$0xff] %v9261_v59  ;;  %13390 = vst [vmem:[#allocation59_spill] sm:$0xff] %v9320_v45  ;;  %v928_v59 = vrot.slane %v920_v33, %v8939_v14  ;;  %v2903_v45 = vsel %vm2896_vm5, %v1120_v28, -inf  ;;  %v1256_v33 = vcombine.low %v1200_v51, %v1232_v61  ;;  %v1257_v44 = vcombine.high %v1200_v51, %v1232_v61 }
 0x33e   :  { %v873_v51 = vcombine.high %v8921_v43, %v8950_v18  ;;  %v832_v43 = vcombine.low %v8917_v5, %v8907_v3 }
 0x33f   :  { %v985_v28 = vcombine.high %v928_v59, %v960_v22 }
 0x340   :  { %v9299_v11 = vpop.permute.xlu0 %576  ;;  %v9329_v6 = vpop.permute.xlu1 %578 }
 0x341   :  { %13388 = vst [vmem:[#allocation57_spill] sm:$0xff] %v9299_v11  ;;  %13392 = vst [vmem:[#allocation61_spill] sm:$0xff] %v9329_v6  ;;  %v2906_v6 = vsel %vm2896_vm5, %v1256_v33, -inf }
 0x344   :  { %v9314_v11 = vpop.permute.xlu0 %582 }
 0x345   :  { %13389 = vst [vmem:[#allocation58_spill] sm:$0xff] %v9314_v11  ;;  %v984_v11 = vcombine.low %v928_v59, %v960_v22  ;;  %v1225_v59 = vcombine.high %v1168_v63, %v9295_v58  ;;  %v1071_v58 = vrot.slane %v1057_v15, %v8939_v14  ;;  %v905_v63 = vcombine.high %v8971_v23, %v8987_v29 }
 0x346   :  { %v1207_v23 = vrot.slane %v1193_v48, %v8939_v14  ;;  %v857_v29 = vcombine.high %v8902_v57, %v8936_v13 }
 0x347   :  { %v2900_v10 = vsel %vm2896_vm5, %v984_v11, -inf  ;;  %v1089_v11 = vcombine.high %v9275_v31, %v9257_v49  ;;  %v967_v31 = vrot.slane %v953_v24, %v8939_v14  ;;  %v1239_v61 = vrot.slane %v1225_v59, %v8939_v14 }
 0x348   :  { %v9324_v1 = vpop.permute.xlu0 %588  ;;  %v9383_v33 = vrot.slane %v905_v63, %v8894_v53 }
 0x349   :  { %13391 = vst [vmem:[#allocation60_spill] sm:$0xff] %v9324_v1  ;;  %2898 = vmax.xlane.f32.xlu0 %v2897_v0  ;;  %v817_v1 = vcombine.high %v9232_v35, %v9220_v16  ;;  %v785_v0 = vcombine.high %v9245_v56, %v9229_v38  ;;  %v2921_v16 = vsel %vm2896_vm5, %v849_v19, -inf  ;;  %v1121_v35 = vcombine.high %v1064_v46, %v1096_v7  ;;  %v9350_v56 = vpop.permute.xlu1 %584 }
 0x34a   :  { %v921_v38 = vcombine.high %v9282_v9, %v9266_v39  ;;  %13395 = vst [vmem:[#allocation64_spill] sm:$0xff] %v9350_v56  ;;  %v1103_v41 = vrot.slane %v1089_v11, %v8939_v14  ;;  %v2930_v46 = vsel %vm2896_vm5, %v1257_v44, -inf  ;;  %v1258_v24 = vcombine.low %v1207_v23, %v1239_v61  ;;  %v13431_v56 = vld [vmem:[#allocation26_spill] sm:$0xff] }
 0x34b   :  { %v831_v27 = vrot.slane %v817_v1, %v8939_v14  ;;  %v799_v22 = vrot.slane %v785_v0, %v8939_v14  ;;  %v2927_v39 = vsel %vm2896_vm5, %v1121_v35, -inf  ;;  %v9402_v11 = vrot.slane %v857_v29, %v8894_v53 }
 0x34c   :  { %v9331_v17 = vpop.permute.xlu0 %594  ;;  %v935_v60 = vrot.slane %v921_v38, %v8939_v14  ;;  %v1122_v54 = vcombine.low %v1071_v58, %v1103_v41  ;;  %v1123_v15 = vcombine.high %v1071_v58, %v1103_v41 }
 0x34d   :  { %13393 = vst [vmem:[#allocation62_spill] sm:$0xff] %v9331_v17  ;;  %2904 = vmax.xlane.f32.xlu0 %v2903_v45  ;;  %v850_v9 = vcombine.low %v799_v22, %v831_v27  ;;  %v9368_v7 = vpop.permute.xlu1 %590 }
 0x34e   :  { %2901 = vmax.xlane.f32.xlu1 %v2900_v10  ;;  %13397 = vst [vmem:[#allocation66_spill] sm:$0xff] %v9368_v7  ;;  %v986_v1 = vcombine.low %v935_v60, %v967_v31  ;;  %v889_v10 = vcombine.high %v8963_v20, %v8979_v25  ;;  %v2951_v18 = vsel %vm2896_vm5, %v1122_v54, -inf  ;;  %v851_v20 = vcombine.high %v799_v22, %v831_v27 }
 0x34f   :  { %v2945_v36 = vsel %vm2896_vm5, %v850_v9, -inf  ;;  %v9392_v25 = vrot.slane %v873_v51, %v8894_v53  ;;  %v987_v35 = vcombine.high %v935_v60, %v967_v31  ;;  %v1104_v27 = vcombine.low %v9080_v52, %v9070_v30 }
 0x350   :  { %v9341_v55 = vpop.permute.xlu0 %600  ;;  %v2948_v0 = vsel %vm2896_vm5, %v986_v1, -inf  ;;  %v9395_v57 = vrot.slane %v889_v10, %v8894_v53  ;;  %v2969_v38 = vsel %vm2896_vm5, %v851_v20, -inf  ;;  %v1072_v22 = vcombine.low %v9087_v32, %v9077_v37  ;;  %v13408_v20 = vld [vmem:[#allocation16_spill] sm:$0xff] }
 0x351   :  { %13394 = vst [vmem:[#allocation63_spill] sm:$0xff] %v9341_v55  ;;  %2907 = vmax.xlane.f32.xlu0 %v2906_v6  ;;  %v2924_v6 = vsel %vm2896_vm5, %v985_v28, -inf  ;;  %v9397_v13 = vpop.permute.xlu1 %596  ;;  %v800_v28 = vcombine.low %v8924_v8, %v8914_v4  ;;  %v840_v4 = vrot.slane %v832_v43, %v8939_v14  ;;  %v936_v8 = vcombine.low %v9402_v11, %v9392_v25  ;;  %v13435_v55 = vld [vmem:[#allocation37_spill] sm:$0xff] }
 0x352   :  { %2922 = vmax.xlane.f32.xlu1 %v2921_v16  ;;  %13400 = vst [vmem:[#allocation69_spill] sm:$0xff] %v9397_v13  ;;  %v968_v3 = vcombine.low %v9395_v57, %v9383_v33  ;;  %v2954_v16 = vsel %vm2896_vm5, %v1258_v24, -inf  ;;  %v2972_v52 = vsel %vm2896_vm5, %v987_v35, -inf  ;;  %v1259_v31 = vcombine.high %v1207_v23, %v1239_v61  ;;  %v13432_v13 = vld [vmem:[#allocation24_spill] sm:$0xff] }
 0x353   :  { %v808_v59 = vrot.slane %v800_v28, %v8939_v14  ;;  %v2975_v9 = vsel %vm2896_vm5, %v1123_v15, -inf  ;;  %v1112_v32 = vrot.slane %v1104_v27, %v8939_v14  ;;  %v1208_v37 = vcombine.low %v9187_v47, %v9179_v12  ;;  %v13411_v27 = vld [vmem:[#allocation13_spill] sm:$0xff] }
 0x354   :  { %v9356_v49 = vpop.permute.xlu0 %606  ;;  %v2978_v60 = vsel %vm2896_vm5, %v1259_v31, -inf  ;;  %v1824_v24 = vcombine.low %v8829_v34, %v8851_v40  ;;  %v1856_v43 = vcombine.low %v8867_v42, %v8883_v50  ;;  %v969_v31 = vcombine.high %v9395_v57, %v9383_v33 }
 0x355   :  { %13396 = vst [vmem:[#allocation65_spill] sm:$0xff] %v9356_v49  ;;  %2925 = vmax.xlane.f32.xlu0 %v2924_v6  ;;  %v1240_v6 = vcombine.low %v9182_v62, %v9170_v2  ;;  %v9420_v44 = vpop.permute.xlu1 %602  ;;  %v852_v41 = vcombine.low %v808_v59, %v840_v4  ;;  %v944_v62 = vrot.slane %v936_v8, %v8939_v14  ;;  %v13413_v8 = vld [vmem:[#allocation17_spill] sm:$0xff] }
 0x356   :  { %2928 = vmax.xlane.f32.xlu1 %v2927_v39  ;;  %13402 = vst [vmem:[#allocation71_spill] sm:$0xff] %v9420_v44  ;;  %v976_v39 = vrot.slane %v968_v3, %v8939_v14  ;;  %v1080_v2 = vrot.slane %v1072_v22, %v8939_v14  ;;  %v1216_v47 = vrot.slane %v1208_v37, %v8939_v14  ;;  %v13409_v3 = vld [vmem:[#allocation23_spill] sm:$0xff]  ;;  %v13430_v44 = vld [vmem:[#allocation28_spill] sm:$0xff] }
 0x357   :  { %v9436_v63 = vrot.slane %v1240_v6, %v8939_v14  ;;  %v13414_v22 = vld [vmem:[#allocation15_spill] sm:$0xff]  ;;  %v937_v57 = vcombine.high %v9402_v11, %v9392_v25 }
 0x358   :  { %v9370_v45 = vpop.permute.xlu0 %612  ;;  %v988_v58 = vcombine.low %v944_v62, %v976_v39  ;;  %v1124_v1 = vcombine.low %v1080_v2, %v1112_v32  ;;  %v1944_v6 = vcombine.low %v13414_v22, %v13413_v8 }
 0x359   :  { %13398 = vst [vmem:[#allocation67_spill] sm:$0xff] %v9370_v45  ;;  %2931 = vmax.xlane.f32.xlu0 %v2930_v46  ;;  %v2993_v46 = vsel %vm2896_vm5, %v852_v41, -inf  ;;  %v9439_v61 = vpop.permute.xlu1 %608  ;;  %v1260_v10 = vcombine.low %v1216_v47, %v9436_v63  ;;  %v1261_v11 = vcombine.high %v1216_v47, %v9436_v63  ;;  %v13425_v47 = vld [vmem:[#allocation27_spill] sm:$0xff]  ;;  %v9532_v7 = vrot.slane %v937_v57, %v8939_v14 }
 0x35a   :  { %2946 = vmax.xlane.f32.xlu1 %v2945_v36  ;;  %13405 = vst [vmem:[#allocation74_spill] sm:$0xff] %v9439_v61  ;;  %v1992_v36 = vcombine.low %v8969_v21, %v8985_v26  ;;  %v2996_v51 = vsel %vm2896_vm5, %v988_v58, -inf  ;;  %v2999_v29 = vsel %vm2896_vm5, %v1124_v1, -inf  ;;  %v13417_v58 = vld [vmem:[#allocation9_spill] sm:$0xff]  ;;  %v2080_v61 = vcombine.low %v13432_v13, %v13431_v56 }
 0x35b   :  { %v3002_v37 = vsel %vm2896_vm5, %v1260_v10, -inf }
 0x35c   :  { %v9385_v19 = vpop.permute.xlu0 %618 }
 0x35d   :  { %13399 = vst [vmem:[#allocation68_spill] sm:$0xff] %v9385_v19  ;;  %2949 = vmax.xlane.f32.xlu0 %v2948_v0  ;;  %v853_v0 = vcombine.high %v808_v59, %v840_v4 }
 0x35e   :  { %2952 = vmax.xlane.f32.xlu1 %v2951_v18  ;;  %v13407_v18 = vld [vmem:[#allocation20_spill] sm:$0xff] }
 0x35f   :  { %v1960_v28 = vcombine.low %v13408_v20, %v13407_v18 }
 0x360   :  { %v9406_v5 = vpop.permute.xlu0 %624 }
 0x361   :  { %13401 = vst [vmem:[#allocation70_spill] sm:$0xff] %v9406_v5  ;;  %2955 = vmax.xlane.f32.xlu0 %v2954_v16  ;;  %v13410_v16 = vld [vmem:[#allocation22_spill] sm:$0xff]  ;;  %v9490_v33 = vrot.slane %v1960_v28, %v8894_v53  ;;  %v13422_v28 = vld [vmem:[#allocation29_spill] sm:$0xff] }
 0x362   :  { %2970 = vmax.xlane.f32.xlu1 %v2969_v38  ;;  %v1976_v35 = vcombine.low %v13410_v16, %v13409_v3  ;;  %v13412_v38 = vld [vmem:[#allocation12_spill] sm:$0xff] }
 0x363   :  { %v1840_v15 = vcombine.low %v13412_v38, %v13411_v27  ;;  %13428 = vst [vmem:[#allocation12_spill] sm:$0xff] %v9532_v7 }
 0x364   :  { %v9422_v30 = vpop.permute.xlu0 %630 }
 0x365   :  { %13403 = vst [vmem:[#allocation72_spill] sm:$0xff] %v9422_v30  ;;  %2973 = vmax.xlane.f32.xlu0 %v2972_v52  ;;  %v9472_v52 = vrot.slane %v1992_v36, %v8894_v53  ;;  %v3017_v36 = vsel %vm2896_vm5, %v853_v0, -inf  ;;  %v9501_v10 = vrot.slane %v1840_v15, %v8894_v53  ;;  %v9513_v0 = vrot.slane %v969_v31, %v8939_v14  ;;  %v13426_v31 = vld [vmem:[#allocation25_spill] sm:$0xff] }
 0x366   :  { %2976 = vmax.xlane.f32.xlu1 %v2975_v9  ;;  %v9476_v9 = vpop.permute.xlu1 %614 }
 0x367   :  { %13415 = vst [vmem:[#allocation20_spill] sm:$0xff] %v9476_v9  ;;  %13420 = vst [vmem:[#allocation22_spill] sm:$0xff] %v9513_v0 }
 0x368   :  { %v9432_v48 = vpop.permute.xlu0 %636 }
 0x369   :  { %13404 = vst [vmem:[#allocation73_spill] sm:$0xff] %v9432_v48  ;;  %2979 = vmax.xlane.f32.xlu0 %v2978_v60  ;;  %v1537_v12 = vcombine.high %v9406_v5, %v9432_v48  ;;  %v989_v60 = vcombine.high %v944_v62, %v976_v39  ;;  %v9495_v39 = vrot.slane %v1976_v35, %v8894_v53  ;;  %v3026_v48 = vsel %vm2896_vm5, %v1261_v11, -inf }
 0x36a   :  { %2994 = vmax.xlane.f32.xlu1 %v2993_v46  ;;  %v13418_v46 = vld [vmem:[#allocation8_spill] sm:$0xff]  ;;  %v9498_v62 = vrot.slane %v1824_v24, %v8894_v53 }
 0x36b   :  { %v9466_v4 = vrot.slane %v1537_v12, %v8894_v53  ;;  %v1808_v1 = vcombine.low %v13418_v46, %v13417_v58  ;;  %v3020_v25 = vsel %vm2896_vm5, %v989_v60, -inf  ;;  %v2096_v12 = vcombine.low %v13426_v31, %v13425_v47 }
 0x36c   :  { %v9446_v54 = vpop.permute.xlu0 %642 }
 0x36d   :  { %13406 = vst [vmem:[#allocation75_spill] sm:$0xff] %v9446_v54  ;;  %v1553_v23 = vcombine.high %v9422_v30, %v9446_v54  ;;  %2997 = vmax.xlane.f32.xlu0 %v2996_v51  ;;  %v1125_v51 = vcombine.high %v1080_v2, %v1112_v32  ;;  %v9504_v32 = vrot.slane %v1944_v6, %v8894_v53  ;;  %v13423_v6 = vld [vmem:[#allocation19_spill] sm:$0xff] }
 0x36e   :  { %3000 = vmax.xlane.f32.xlu1 %v2999_v29  ;;  %v2040_v2 = vcombine.low %v9495_v39, %v9472_v52  ;;  %v9516_v24 = vrot.slane %v1808_v1, %v8894_v53  ;;  %v9529_v1 = vpop.permute.xlu1 %620  ;;  %v13434_v54 = vld [vmem:[#allocation35_spill] sm:$0xff]  ;;  %v9553_v17 = vrot.slane %v2096_v12, %v8894_v53 }
 0x36f   :  { %v9469_v59 = vrot.slane %v1553_v23, %v8894_v53  ;;  %v9487_v23 = vrot.slane %v1856_v43, %v8894_v53  ;;  %v13421_v43 = vld [vmem:[#allocation31_spill] sm:$0xff]  ;;  %v3023_v15 = vsel %vm2896_vm5, %v1125_v51, -inf  ;;  %v2008_v63 = vcombine.low %v9504_v32, %v9490_v33  ;;  %13427 = vst [vmem:[#allocation13_spill] sm:$0xff] %v9529_v1 }
 0x370   :  { %v9478_v41 = vpop.permute.xlu0 %648  ;;  %v2128_v35 = vcombine.low %v13422_v28, %v13421_v43  ;;  %v1872_v51 = vcombine.low %v9516_v24, %v9498_v62  ;;  %v990_v1 = vcombine.low %v9532_v7, %v9513_v0  ;;  %v1126_v45 = vcombine.low %v13435_v55, %v13434_v54  ;;  %v13439_v54 = vld [vmem:[#allocation50_spill] sm:$0xff]  ;;  %v13444_v7 = vld [vmem:[#allocation40_spill] sm:$0xff] }
 0x371   :  { %13416 = vst [vmem:[#allocation16_spill] sm:$0xff] %v9478_v41  ;;  %3003 = vmax.xlane.f32.xlu0 %v3002_v37  ;;  %v13424_v37 = vld [vmem:[#allocation21_spill] sm:$0xff]  ;;  %v1904_v60 = vcombine.low %v9501_v10, %v9487_v23  ;;  %v2016_v11 = vrot.slane %v2008_v63, %v8939_v14  ;;  %v13445_v0 = vld [vmem:[#allocation38_spill] sm:$0xff] }
 0x372   :  { %3018 = vmax.xlane.f32.xlu1 %v3017_v36  ;;  %v854_v36 = vcombine.low %v13424_v37, %v13423_v6  ;;  %v9547_v57 = vrot.slane %v2128_v35, %v8894_v53  ;;  %v9564_v35 = vrot.slane %v2080_v61, %v8894_v53  ;;  %v13438_v63 = vld [vmem:[#allocation49_spill] sm:$0xff]  ;;  %v13442_v37 = vld [vmem:[#allocation36_spill] sm:$0xff]  ;;  %v2248_v22 = vcombine.low %v13445_v0, %v13444_v7 }
 0x373   :  { %v1912_v49 = vrot.slane %v1904_v60, %v8939_v14  ;;  %v1262_v60 = vcombine.low %v13439_v54, %v13438_v63  ;;  %v13440_v6 = vld [vmem:[#allocation41_spill] sm:$0xff] }
 0x374   :  { %v9508_v29 = vpop.permute.xlu0 %654  ;;  %v3041_v30 = vsel %vm2896_vm5, %v854_v36, -inf  ;;  %v9566_v36 = vpop.permute.xlu1 %626  ;;  %v13443_v63 = vld [vmem:[#allocation33_spill] sm:$0xff] }
 0x375   :  { %13419 = vst [vmem:[#allocation23_spill] sm:$0xff] %v9508_v29  ;;  %3021 = vmax.xlane.f32.xlu0 %v3020_v25  ;;  %v13429_v25 = vld [vmem:[#allocation30_spill] sm:$0xff]  ;;  %13436 = vst [vmem:[#allocation8_spill] sm:$0xff] %v9566_v36  ;;  %v2144_v36 = vcombine.low %v9564_v35, %v9553_v17  ;;  %v2232_v54 = vcombine.low %v13443_v63, %v13442_v37  ;;  %v13447_v37 = vld [vmem:[#allocation32_spill] sm:$0xff] }
 0x376   :  { %3024 = vmax.xlane.f32.xlu1 %v3023_v15  ;;  %v2112_v9 = vcombine.low %v13430_v44, %v13429_v25  ;;  %v2048_v15 = vrot.slane %v2040_v2, %v8939_v14  ;;  %v13446_v63 = vld [vmem:[#allocation34_spill] sm:$0xff] }
 0x378   :  { %v9540_v5 = vpop.permute.xlu0 %660  ;;  %v9558_v19 = vrot.slane %v2112_v9, %v8894_v53  ;;  %v2072_v55 = vcombine.low %v2016_v11, %v2048_v15 }
 0x379   :  { %13433 = vst [vmem:[#allocation9_spill] sm:$0xff] %v9540_v5  ;;  %3027 = vmax.xlane.f32.xlu0 %v3026_v48  ;;  %v1569_v2 = vcombine.high %v9478_v41, %v9540_v5  ;;  %v1880_v48 = vrot.slane %v1872_v51, %v8939_v14  ;;  %v13441_v41 = vld [vmem:[#allocation39_spill] sm:$0xff]  ;;  %v3047_v51 = vsel %vm2896_vm5, %v1126_v45, -inf  ;;  %v2041_v45 = vcombine.high %v9495_v39, %v9472_v52 }
 0x37a   :  { %3042 = vmax.xlane.f32.xlu1 %v3041_v30  ;;  %v3044_v30 = vsel %vm2896_vm5, %v990_v1, -inf  ;;  %v2176_v9 = vcombine.low %v9558_v19, %v9547_v57  ;;  %v2264_v5 = vcombine.low %v13441_v41, %v13440_v6  ;;  %v2216_v6 = vcombine.low %v13447_v37, %v13446_v63 }
 0x37b   :  { %v1936_v1 = vcombine.low %v1880_v48, %v1912_v49  ;;  %v9587_v8 = vrot.slane %v1569_v2, %v8894_v53  ;;  %v1873_v52 = vcombine.high %v9516_v24, %v9498_v62  ;;  %v1905_v39 = vcombine.high %v9501_v10, %v9487_v23 }
 0x37c   :  { %v9568_v12 = vpop.permute.xlu0 %666  ;;  %v9601_v0 = vrot.slane %v2264_v5, %v8894_v53  ;;  %v1857_v5 = vcombine.high %v8867_v42, %v8883_v50  ;;  %v2152_v62 = vrot.slane %v2144_v36, %v8939_v14  ;;  %v1841_v23 = vcombine.high %v13412_v38, %v13411_v27 }
 0x37d   :  { %13437 = vst [vmem:[#allocation31_spill] sm:$0xff] %v9568_v12  ;;  %v1585_v61 = vcombine.high %v9508_v29, %v9568_v12  ;;  %3045 = vmax.xlane.f32.xlu0 %v3044_v30  ;;  %v3092_v29 = vsel %vm2896_vm5, %v2072_v55, -inf  ;;  %v2073_v12 = vcombine.high %v2016_v11, %v2048_v15  ;;  %v2009_v55 = vcombine.high %v9504_v32, %v9490_v33  ;;  %v9612_v15 = vpop.permute.xlu1 %632 }
 0x37e   :  { %3048 = vmax.xlane.f32.xlu1 %v3047_v51  ;;  %v3050_v51 = vsel %vm2896_vm5, %v1262_v60, -inf  ;;  %13448 = vst [vmem:[#allocation29_spill] sm:$0xff] %v9612_v15  ;;  %v9617_v11 = vrot.slane %v2232_v54, %v8894_v53  ;;  %v9620_v60 = vrot.slane %v2248_v22, %v8894_v53  ;;  %v3089_v33 = vsel %vm2896_vm5, %v1936_v1, -inf  ;;  %v13508_v15 = vld [vmem:[#allocation49_spill] sm:$0xff] }
 0x37f   :  { %v9590_v41 = vrot.slane %v1585_v61, %v8894_v53  ;;  %v2184_v61 = vrot.slane %v2176_v9, %v8939_v14  ;;  %v1937_v32 = vcombine.high %v1880_v48, %v1912_v49  ;;  %v9632_v42 = vrot.slane %v2216_v6, %v8894_v53 }
 0x380   :  { %v9594_v30 = vpop.permute.xlu0 %672  ;;  %v2312_v50 = vcombine.low %v9620_v60, %v9601_v0  ;;  %v3116_v54 = vsel %vm2896_vm5, %v2073_v12, -inf  ;;  %v1809_v27 = vcombine.high %v13418_v46, %v13417_v58  ;;  %v1825_v38 = vcombine.high %v8829_v34, %v8851_v40 }
 0x381   :  { %v1649_v2 = vcombine.high %v9587_v8, %v9590_v41  ;;  %3051 = vmax.xlane.f32.xlu0 %v3050_v51  ;;  %v2209_v22 = vcombine.high %v2152_v62, %v2184_v61  ;;  %v9642_v49 = vrot.slane %v2009_v55, %v8939_v14  ;;  %v9645_v24 = vrot.slane %v1905_v39, %v8939_v14  ;;  %v9655_v58 = vpop.permute.xlu1 %638 }
 0x382   :  { %3093 = vmax.xlane.f32.xlu1 %v3092_v29  ;;  %v9629_v29 = vrot.slane %v2041_v45, %v8939_v14  ;;  %v9648_v6 = vrot.slane %v1857_v5, %v8894_v53  ;;  %v2280_v48 = vcombine.low %v9632_v42, %v9617_v11  ;;  %13450 = vst [vmem:[#allocation25_spill] sm:$0xff] %v9655_v58  ;;  %v3113_v34 = vsel %vm2896_vm5, %v1937_v32, -inf  ;;  %v13501_v58 = vld [vmem:[#allocation60_spill] sm:$0xff] }
 0x383   :  { %v9653_v36 = vrot.slane %v1649_v2, %v8939_v14  ;;  %v2208_v40 = vcombine.low %v2152_v62, %v2184_v61  ;;  %v9663_v9 = vrot.slane %v1873_v52, %v8939_v14  ;;  %v9666_v1 = vrot.slane %v1841_v23, %v8894_v53 }
 0x384   :  { %v9625_v10 = vpop.permute.xlu0 %678  ;;  %v2074_v12 = vcombine.low %v9642_v49, %v9629_v29  ;;  %v3119_v45 = vsel %vm2896_vm5, %v2209_v22, -inf  ;;  %v2320_v51 = vrot.slane %v2312_v50, %v8939_v14  ;;  %v13451_v2 = vcombine.high %v9466_v4, %v9469_v59 }
 0x385   :  { %3090 = vmax.xlane.f32.xlu0 %v3089_v33  ;;  %13449 = vst [vmem:[#allocation27_spill] sm:$0xff] %v9653_v36  ;;  %v9677_v61 = vrot.slane %v1809_v27, %v8894_v53  ;;  %v9680_v52 = vrot.slane %v1825_v38, %v8894_v53  ;;  %v1938_v55 = vcombine.low %v9663_v9, %v9645_v24  ;;  %v13495_v36 = vld [vmem:[#allocation67_spill] sm:$0xff] }
 0x386   :  { %3117 = vmax.xlane.f32.xlu1 %v3116_v54  ;;  %v9674_v39 = vrot.slane %v13451_v2, %v8939_v14  ;;  %v1920_v5 = vcombine.low %v9666_v1, %v9648_v6  ;;  %v2288_v23 = vrot.slane %v2280_v48, %v8939_v14  ;;  %v2177_v32 = vcombine.high %v9558_v19, %v9547_v57 }
 0x387   :  { %v3095_v54 = vsel %vm2896_vm5, %v2208_v40, -inf  ;;  %v3140_v22 = vsel %vm2896_vm5, %v2074_v12, -inf  ;;  %v1939_v27 = vcombine.high %v9663_v9, %v9645_v24  ;;  %v2129_v38 = vcombine.high %v13422_v28, %v13421_v43  ;;  %v9709_v12 = vpop.permute.xlu1 %644  ;;  %v13462_v43 = vld [vmem:[#allocation36_spill] sm:$0xff] }
 0x388   :  { %v9657_v46 = vpop.permute.xlu0 %684  ;;  %13452 = vst [vmem:[#allocation30_spill] sm:$0xff] %v9674_v39  ;;  %v2313_v48 = vcombine.high %v9620_v60, %v9601_v0  ;;  %v2345_v19 = vcombine.high %v2288_v23, %v2320_v51  ;;  %v2097_v57 = vcombine.high %v13426_v31, %v13425_v47  ;;  %v2145_v40 = vcombine.high %v9564_v35, %v9553_v17 }
 0x389   :  { %3114 = vmax.xlane.f32.xlu0 %v3113_v34  ;;  %v1673_v62 = vcombine.high %v9594_v30, %v9657_v46  ;;  %13453 = vst [vmem:[#allocation28_spill] sm:$0xff] %v9709_v12  ;;  %v3137_v24 = vsel %vm2896_vm5, %v1938_v55, -inf  ;;  %v2113_v0 = vcombine.high %v13430_v44, %v13429_v25  ;;  %v2281_v28 = vcombine.high %v9632_v42, %v9617_v11 }
 0x38a   :  { %3120 = vmax.xlane.f32.xlu1 %v3119_v45  ;;  %v1993_v17 = vcombine.high %v8969_v21, %v8985_v26  ;;  %v2081_v31 = vcombine.high %v13432_v13, %v13431_v56  ;;  %v2344_v9 = vcombine.low %v2288_v23, %v2320_v51  ;;  %v9731_v44 = vrot.slane %v2177_v32, %v8939_v14  ;;  %v13456_v23 = vld [vmem:[#allocation17_spill] sm:$0xff] }
 0x38b   :  { %v9719_v60 = vrot.slane %v1673_v62, %v8894_v53  ;;  %v9734_v25 = vrot.slane %v2129_v38, %v8894_v53  ;;  %v3122_v42 = vsel %vm2896_vm5, %v2345_v19, -inf  ;;  %v9740_v21 = vrot.slane %v2313_v48, %v8939_v14 }
 0x38c   :  { %v9693_v50 = vpop.permute.xlu0 %690  ;;  %v1888_v26 = vcombine.low %v9677_v61, %v9680_v52  ;;  %v1961_v56 = vcombine.high %v13408_v20, %v13407_v18  ;;  %v1977_v13 = vcombine.high %v13410_v16, %v13409_v3  ;;  %v2159_v45 = vrot.slane %v2145_v40, %v8939_v14  ;;  %v13457_v18 = vld [vmem:[#allocation15_spill] sm:$0xff]  ;;  %v9766_v16 = vpop.permute.xlu1 %650 }
 0x38d   :  { %v1689_v34 = vcombine.high %v9625_v10, %v9693_v50  ;;  %3096 = vmax.xlane.f32.xlu0 %v3095_v54  ;;  %13454 = vst [vmem:[#allocation26_spill] sm:$0xff] %v9719_v60  ;;  %v9750_v51 = vrot.slane %v2097_v57, %v8894_v53  ;;  %v9753_v2 = vrot.slane %v2113_v0, %v8894_v53  ;;  %13458 = vst [vmem:[#allocation40_spill] sm:$0xff] %v9766_v16  ;;  %v13502_v16 = vld [vmem:[#allocation57_spill] sm:$0xff] }
 0x38e   :  { %3141 = vmax.xlane.f32.xlu1 %v3140_v22  ;;  %v9756_v55 = vrot.slane %v2281_v28, %v8939_v14  ;;  %v9759_v62 = vrot.slane %v1920_v5, %v8939_v14  ;;  %v1945_v20 = vcombine.high %v13457_v18, %v13456_v23  ;;  %v9764_v3 = vrot.slane %v1993_v17, %v8894_v53 }
 0x38f   :  { %v9722_v47 = vrot.slane %v1689_v34, %v8894_v53  ;;  %v3098_v54 = vsel %vm2896_vm5, %v2344_v9, -inf  ;;  %v2210_v22 = vcombine.low %v2159_v45, %v9731_v44  ;;  %v9773_v38 = vrot.slane %v2081_v31, %v8894_v53 }
 0x390   :  { %v9728_v35 = vpop.permute.xlu0 %696  ;;  %v2192_v5 = vcombine.low %v9753_v2, %v9734_v25  ;;  %v3161_v48 = vsel %vm2896_vm5, %v1939_v27, -inf  ;;  %v2346_v34 = vcombine.low %v9756_v55, %v9740_v21  ;;  %v1975_v19 = vrot.slane %v1961_v56, %v8894_v53 }
 0x391   :  { %13455 = vst [vmem:[#allocation24_spill] sm:$0xff] %v9722_v47  ;;  %v1753_v11 = vcombine.high %v9719_v60, %v9722_v47  ;;  %3138 = vmax.xlane.f32.xlu0 %v3137_v24  ;;  %v1991_v57 = vrot.slane %v1977_v13, %v8894_v53  ;;  %v2160_v40 = vcombine.low %v9773_v38, %v9750_v51  ;;  %v3143_v27 = vsel %vm2896_vm5, %v2210_v22, -inf  ;;  %v9798_v13 = vpop.permute.xlu1 %656 }
 0x392   :  { %3123 = vmax.xlane.f32.xlu1 %v3122_v42  ;;  %v9785_v24 = vrot.slane %v1888_v26, %v8939_v14  ;;  %v1959_v0 = vrot.slane %v1945_v20, %v8894_v53  ;;  %v2075_v31 = vcombine.high %v9642_v49, %v9629_v29  ;;  %v3146_v9 = vsel %vm2896_vm5, %v2346_v34, -inf  ;;  %13459 = vst [vmem:[#allocation34_spill] sm:$0xff] %v9798_v13  ;;  %v13460_v20 = vld [vmem:[#allocation41_spill] sm:$0xff] }
 0x393   :  { %v2056_v28 = vcombine.low %v1991_v57, %v9764_v3  ;;  %v2200_v26 = vrot.slane %v2192_v5, %v8939_v14  ;;  %v2168_v18 = vrot.slane %v2160_v40, %v8939_v14  ;;  %v13463_v40 = vld [vmem:[#allocation33_spill] sm:$0xff] }
 0x394   :  { %v9768_v32 = vpop.permute.xlu0 %702  ;;  %v1940_v42 = vcombine.low %v9785_v24, %v9759_v62  ;;  %v2024_v56 = vcombine.low %v1959_v0, %v1975_v19  ;;  %v3164_v22 = vsel %vm2896_vm5, %v2075_v31, -inf  ;;  %v2233_v33 = vcombine.high %v13463_v40, %v13462_v43 }
 0x395   :  { %3099 = vmax.xlane.f32.xlu0 %v3098_v54  ;;  %v13461_v54 = vld [vmem:[#allocation39_spill] sm:$0xff]  ;;  %v2064_v5 = vrot.slane %v2056_v28, %v8939_v14  ;;  %v2217_v28 = vcombine.high %v13447_v37, %v13446_v63  ;;  %v2025_v63 = vcombine.high %v1959_v0, %v1975_v19 }
 0x396   :  { %3162 = vmax.xlane.f32.xlu1 %v3161_v48  ;;  %v2265_v29 = vcombine.high %v13461_v54, %v13460_v20  ;;  %v2211_v48 = vcombine.high %v2159_v45, %v9731_v44  ;;  %v13464_v20 = vld [vmem:[#allocation38_spill] sm:$0xff]  ;;  %v2032_v31 = vrot.slane %v2024_v56, %v8939_v14  ;;  %v9837_v40 = vrot.slane %v2233_v33, %v8894_v53 }
 0x397   :  { %v2249_v54 = vcombine.high %v13464_v20, %v13444_v7 }
 0x398   :  { %v9789_v17 = vpop.permute.xlu0 %708  ;;  %v3167_v43 = vsel %vm2896_vm5, %v2211_v48, -inf  ;;  %v2076_v7 = vcombine.low %v2032_v31, %v2064_v5  ;;  %v2347_v48 = vcombine.high %v9756_v55, %v9740_v21  ;;  %v9864_v21 = vrot.slane %v1753_v11, %v8939_v14 }
 0x399   :  { %3144 = vmax.xlane.f32.xlu0 %v3143_v27  ;;  %v1705_v23 = vcombine.high %v9728_v35, %v9789_v17  ;;  %v3185_v27 = vsel %vm2896_vm5, %v1940_v42, -inf  ;;  %v9827_v42 = vrot.slane %v2265_v29, %v8894_v53  ;;  %v9840_v37 = vrot.slane %v2249_v54, %v8894_v53 }
 0x39a   :  { %3147 = vmax.xlane.f32.xlu1 %v3146_v9  ;;  %v2212_v9 = vcombine.low %v2168_v18, %v2200_v26  ;;  %v9843_v29 = vrot.slane %v2217_v28, %v8894_v53  ;;  %v2039_v54 = vrot.slane %v2025_v63, %v8939_v14  ;;  %13469 = vst [vmem:[#allocation39_spill] sm:$0xff] %v9864_v21  ;;  %v13494_v21 = vld [vmem:[#allocation58_spill] sm:$0xff] }
 0x39b   :  { %v9819_v44 = vrot.slane %v1705_v23, %v8894_v53  ;;  %v1921_v55 = vcombine.high %v9666_v1, %v9648_v6  ;;  %v1889_v11 = vcombine.high %v9677_v61, %v9680_v52  ;;  %v13471_v61 = vld [vmem:[#allocation22_spill] sm:$0xff]  ;;  %v13472_v52 = vld [vmem:[#allocation12_spill] sm:$0xff] }
 0x39c   :  { %v9805_v49 = vpop.permute.xlu0 %714  ;;  %v3191_v23 = vsel %vm2896_vm5, %v2212_v9, -inf  ;;  %v2296_v19 = vcombine.low %v9843_v29, %v9837_v40  ;;  %v991_v63 = vcombine.high %v13472_v52, %v13471_v61  ;;  %v13478_v61 = vld [vmem:[#allocation53_spill] sm:$0xff] }
 0x39d   :  { %v1721_v34 = vcombine.high %v9768_v32, %v9805_v49  ;;  %3165 = vmax.xlane.f32.xlu0 %v3164_v22  ;;  %13465 = vst [vmem:[#allocation32_spill] sm:$0xff] %v9819_v44  ;;  %v9829_v22 = vpop.permute.xlu1 %662 }
 0x39e   :  { %3186 = vmax.xlane.f32.xlu1 %v3185_v27  ;;  %13466 = vst [vmem:[#allocation17_spill] sm:$0xff] %v9829_v22  ;;  %v2057_v27 = vcombine.high %v1991_v57, %v9764_v3  ;;  %v2328_v3 = vcombine.low %v9840_v37, %v9827_v42  ;;  %v3188_v57 = vsel %vm2896_vm5, %v2076_v7, -inf  ;;  %v2304_v6 = vrot.slane %v2296_v19, %v8939_v14 }
 0x39f   :  { %v9822_v45 = vrot.slane %v1721_v34, %v8894_v53  ;;  %v2077_v34 = vcombine.high %v2032_v31, %v2064_v5  ;;  %v2213_v5 = vcombine.high %v2168_v18, %v2200_v26  ;;  %v3170_v26 = vsel %vm2896_vm5, %v2347_v48, -inf }
 0x3a0   :  { %v2071_v9 = vrot.slane %v2057_v27, %v8939_v14  ;;  %v1941_v18 = vcombine.high %v9785_v24, %v9759_v62  ;;  %v2336_v31 = vrot.slane %v2328_v3, %v8939_v14  ;;  %v2193_v62 = vcombine.high %v9753_v2, %v9734_v25 }
 0x3a1   :  { %v1785_v56 = vcombine.high %v9819_v44, %v9822_v45  ;;  %3168 = vmax.xlane.f32.xlu0 %v3167_v43  ;;  %v3212_v33 = vsel %vm2896_vm5, %v2077_v34, -inf  ;;  %v9857_v0 = vpop.permute.xlu1 %668  ;;  %v3215_v28 = vsel %vm2896_vm5, %v2213_v5, -inf  ;;  %v2161_v3 = vcombine.high %v9773_v38, %v9750_v51 }
 0x3a2   :  { %3192 = vmax.xlane.f32.xlu1 %v3191_v23  ;;  %13468 = vst [vmem:[#allocation41_spill] sm:$0xff] %v9857_v0  ;;  %v2078_v43 = vcombine.low %v2039_v54, %v2071_v9  ;;  %v3209_v27 = vsel %vm2896_vm5, %v1941_v18, -inf  ;;  %v1935_v23 = vrot.slane %v1921_v55, %v8939_v14  ;;  %v2207_v48 = vrot.slane %v2193_v62, %v8939_v14 }
 0x3a3   :  { %v9853_v20 = vrot.slane %v1785_v56, %v8939_v14  ;;  %v2348_v56 = vcombine.low %v2304_v6, %v2336_v31  ;;  %v2349_v5 = vcombine.high %v2304_v6, %v2336_v31  ;;  %v2175_v55 = vrot.slane %v2161_v3, %v8939_v14  ;;  %v13476_v6 = vld [vmem:[#allocation46_spill] sm:$0xff]  ;;  %v13481_v3 = vld [vmem:[#allocation19_spill] sm:$0xff] }
 0x3a4   :  { %v3236_v34 = vsel %vm2896_vm5, %v2078_v43, -inf  ;;  %v2079_v18 = vcombine.high %v2039_v54, %v2071_v9  ;;  %v13475_v43 = vld [vmem:[#allocation52_spill] sm:$0xff]  ;;  %v1400_v22 = vcombine.low %v13502_v16, %v13501_v58 }
 0x3a5   :  { %3189 = vmax.xlane.f32.xlu0 %v3188_v57  ;;  %13467 = vst [vmem:[#allocation15_spill] sm:$0xff] %v9853_v20  ;;  %v9882_v24 = vpop.permute.xlu1 %674  ;;  %v1903_v57 = vrot.slane %v1889_v11, %v8939_v14  ;;  %v3194_v25 = vsel %vm2896_vm5, %v2348_v56, -inf  ;;  %v2214_v38 = vcombine.low %v2175_v55, %v2207_v48  ;;  %v3218_v62 = vsel %vm2896_vm5, %v2349_v5, -inf  ;;  %v13477_v56 = vld [vmem:[#allocation43_spill] sm:$0xff]  ;;  %v13493_v20 = vld [vmem:[#allocation62_spill] sm:$0xff] }
 0x3a6   :  { %3213 = vmax.xlane.f32.xlu1 %v3212_v33  ;;  %13470 = vst [vmem:[#allocation36_spill] sm:$0xff] %v9882_v24  ;;  %v3068_v33 = vsel %vm2896_vm5, %v991_v63, -inf  ;;  %v2215_v31 = vcombine.high %v2175_v55, %v2207_v48  ;;  %v13480_v63 = vld [vmem:[#allocation21_spill] sm:$0xff]  ;;  %v3260_v5 = vsel %vm2896_vm5, %v2079_v18, -inf  ;;  %v13496_v18 = vld [vmem:[#allocation63_spill] sm:$0xff] }
 0x3a7   :  { %v1942_v2 = vcombine.low %v1903_v57, %v1935_v23  ;;  %v13482_v9 = vcombine.high %v13480_v63, %v13481_v3  ;;  %v13486_v55 = vld [vmem:[#allocation45_spill] sm:$0xff]  ;;  %v13488_v3 = vld [vmem:[#allocation31_spill] sm:$0xff]  ;;  %v1432_v39 = vcombine.low %v13496_v18, %v13495_v36 }
 0x3a8   :  { %v3263_v24 = vsel %vm2896_vm5, %v2215_v31, -inf }
 0x3a9   :  { %3171 = vmax.xlane.f32.xlu0 %v3170_v26  ;;  %v9895_v19 = vpop.permute.xlu1 %680  ;;  %v1943_v26 = vcombine.high %v1903_v57, %v1935_v23  ;;  %v3233_v51 = vsel %vm2896_vm5, %v1942_v2, -inf  ;;  %v13479_v23 = vld [vmem:[#allocation48_spill] sm:$0xff]  ;;  %v3065_v54 = vsel %vm2896_vm5, %v13482_v9, -inf }
 0x3aa   :  { %3216 = vmax.xlane.f32.xlu1 %v3215_v28  ;;  %13473 = vst [vmem:[#allocation33_spill] sm:$0xff] %v9895_v19  ;;  %v13474_v28 = vld [vmem:[#allocation55_spill] sm:$0xff]  ;;  %v1296_v52 = vcombine.low %v13479_v23, %v13478_v61  ;;  %v13483_v2 = vld [vmem:[#allocation68_spill] sm:$0xff] }
 0x3ab   :  { %v1312_v11 = vcombine.low %v13475_v43, %v13474_v28  ;;  %v3257_v57 = vsel %vm2896_vm5, %v1943_v26, -inf  ;;  %v13489_v26 = vld [vmem:[#allocation23_spill] sm:$0xff] }
 0x3ac   :  { %v1584_v9 = vcombine.low %v13489_v26, %v13488_v3  ;;  %v13497_v3 = vld [vmem:[#allocation75_spill] sm:$0xff]  ;;  %v13498_v26 = vld [vmem:[#allocation72_spill] sm:$0xff] }
 0x3ad   :  { %3210 = vmax.xlane.f32.xlu0 %v3209_v27  ;;  %v2329_v27 = vcombine.high %v9840_v37, %v9827_v42  ;;  %v13484_v42 = vld [vmem:[#allocation65_spill] sm:$0xff]  ;;  %v9917_v48 = vpop.permute.xlu1 %686  ;;  %v9924_v63 = vrot.slane %v1312_v11, %v8894_v53 }
 0x3ae   :  { %3237 = vmax.xlane.f32.xlu1 %v3236_v34  ;;  %v1280_v34 = vcombine.low %v13477_v56, %v13476_v6  ;;  %v1448_v37 = vcombine.low %v13484_v42, %v13483_v2  ;;  %13485 = vst [vmem:[#allocation38_spill] sm:$0xff] %v9917_v48 }
 0x3af   :  { %v2343_v11 = vrot.slane %v2329_v27, %v8939_v14  ;;  %v1720_v27 = vcombine.low %v9768_v32, %v9805_v49  ;;  %v9970_v32 = vrot.slane %v1432_v39, %v8894_v53 }
 0x3b0   :  { %v9939_v48 = vrot.slane %v1280_v34, %v8894_v53 }
 0x3b1   :  { %3195 = vmax.xlane.f32.xlu0 %v3194_v25  ;;  %v2297_v25 = vcombine.high %v9843_v29, %v9837_v40  ;;  %v13490_v40 = vld [vmem:[#allocation37_spill] sm:$0xff]  ;;  %v13491_v29 = vld [vmem:[#allocation35_spill] sm:$0xff]  ;;  %v9972_v49 = vpop.permute.xlu1 %692 }
 0x3b2   :  { %3069 = vmax.xlane.f32.xlu1 %v3068_v33  ;;  %v3239_v33 = vsel %vm2896_vm5, %v2214_v38, -inf  ;;  %v13492_v1 = vcombine.high %v13490_v40, %v13491_v29  ;;  %v1416_v38 = vcombine.low %v13494_v21, %v13493_v20  ;;  %v13499_v40 = vld [vmem:[#allocation9_spill] sm:$0xff]  ;;  %v13500_v29 = vld [vmem:[#allocation16_spill] sm:$0xff]  ;;  %13505 = vst [vmem:[#allocation22_spill] sm:$0xff] %v9972_v49  ;;  %v13507_v49 = vld [vmem:[#allocation50_spill] sm:$0xff] }
 0x3b3   :  { %v1568_v19 = vcombine.low %v13500_v29, %v13499_v40  ;;  %v2311_v31 = vrot.slane %v2297_v25, %v8939_v14  ;;  %v9964_v29 = vrot.slane %v1584_v9, %v8894_v53  ;;  %v1688_v25 = vcombine.low %v9625_v10, %v9693_v50 }
 0x3b4   :  { %v3071_v7 = vsel %vm2896_vm5, %v13492_v1, -inf  ;;  %v1552_v1 = vcombine.low %v13498_v26, %v13497_v3  ;;  %v13503_v3 = vld [vmem:[#allocation73_spill] sm:$0xff]  ;;  %v13504_v26 = vld [vmem:[#allocation70_spill] sm:$0xff]  ;;  %v1672_v50 = vcombine.low %v9594_v30, %v9657_v46  ;;  %v13509_v12 = vcombine.high %v13507_v49, %v13508_v15 }
 0x3b5   :  { %3234 = vmax.xlane.f32.xlu0 %v3233_v51  ;;  %v13487_v51 = vld [vmem:[#allocation10_spill] sm:$0xff]  ;;  %v1536_v40 = vcombine.low %v13504_v26, %v13503_v3  ;;  %v2350_v39 = vcombine.low %v2311_v31, %v2343_v11  ;;  %v9987_v3 = vrot.slane %v1400_v22, %v8894_v53  ;;  %v10005_v26 = vrot.slane %v1688_v25, %v8894_v53 }
 0x3b6   :  { %3219 = vmax.xlane.f32.xlu1 %v3218_v62  ;;  %v1264_v62 = vcombine.low %v13487_v51, %v13486_v55  ;;  %v1265_v15 = vcombine.high %v13487_v51, %v13486_v55  ;;  %v13514_v49 = vld [vmem:[#allocation42_spill] sm:$0xff]  ;;  %v1313_v51 = vcombine.high %v13475_v43, %v13474_v28 }
 0x3b8   :  { %v9957_v34 = vrot.slane %v1264_v62, %v8894_v53  ;;  %v1704_v62 = vcombine.low %v9728_v35, %v9789_v17  ;;  %v9994_v35 = vrot.slane %v1720_v27, %v8894_v53  ;;  %v9997_v17 = vrot.slane %v1536_v40, %v8894_v53 }
 0x3b9   :  { %3066 = vmax.xlane.f32.xlu0 %v3065_v54  ;;  %v9942_v54 = vrot.slane %v1296_v52, %v8894_v53 }
 0x3ba   :  { %3258 = vmax.xlane.f32.xlu1 %v3257_v57  ;;  %v9951_v57 = vrot.slane %v1448_v37, %v8894_v53  ;;  %v9967_v37 = vrot.slane %v1416_v38, %v8894_v53  ;;  %v1328_v9 = vcombine.low %v9957_v34, %v9939_v48  ;;  %v9984_v38 = vrot.slane %v1568_v19, %v8894_v53 }
 0x3bb   :  { %v1360_v52 = vcombine.low %v9942_v54, %v9924_v63  ;;  %v2351_v19 = vcombine.high %v2311_v31, %v2343_v11  ;;  %v10008_v30 = vrot.slane %v1704_v62, %v8894_v53  ;;  %v10016_v11 = vpop.permute.xlu1 %698  ;;  %v1329_v55 = vcombine.high %v9957_v34, %v9939_v48 }
 0x3bc   :  { %v1496_v10 = vcombine.low %v9970_v32, %v9951_v57  ;;  %v1336_v27 = vrot.slane %v1328_v9, %v8939_v14  ;;  %13506 = vst [vmem:[#allocation12_spill] sm:$0xff] %v10016_v11  ;;  %v1497_v28 = vcombine.high %v9970_v32, %v9951_v57 }
 0x3bd   :  { %3240 = vmax.xlane.f32.xlu0 %v3239_v33  ;;  %v9981_v33 = vrot.slane %v1552_v1, %v8894_v53  ;;  %v1368_v22 = vrot.slane %v1360_v52, %v8939_v14  ;;  %v1464_v1 = vcombine.low %v9987_v3, %v9967_v37  ;;  %v1768_v31 = vcombine.low %v10008_v30, %v9994_v35 }
 0x3be   :  { %3072 = vmax.xlane.f32.xlu1 %v3071_v7  ;;  %v1632_v7 = vcombine.low %v9984_v38, %v9964_v29  ;;  %v3242_v52 = vsel %vm2896_vm5, %v2350_v39, -inf  ;;  %v1504_v40 = vrot.slane %v1496_v10, %v8939_v14  ;;  %v3074_v39 = vsel %vm2896_vm5, %v13509_v12, -inf  ;;  %v13513_v12 = vld [vmem:[#allocation47_spill] sm:$0xff] }
 0x3bf   :  { %v1600_v46 = vcombine.low %v9997_v17, %v9981_v33  ;;  %v1392_v25 = vcombine.low %v1336_v27, %v1368_v22  ;;  %v10036_v13 = vpop.permute.xlu1 %704  ;;  %v2368_v60 = vcombine.low %v13514_v49, %v13513_v12  ;;  %v10090_v32 = vrot.slane %v1329_v55, %v8939_v14 }
 0x3c0   :  { %v1640_v62 = vrot.slane %v1632_v7, %v8939_v14  ;;  %13510 = vst [vmem:[#allocation55_spill] sm:$0xff] %v10036_v13 }
 0x3c1   :  { %3261 = vmax.xlane.f32.xlu0 %v3260_v5  ;;  %v10014_v5 = vrot.slane %v1672_v50, %v8894_v53  ;;  %v1472_v50 = vrot.slane %v1464_v1, %v8939_v14  ;;  %v1608_v11 = vrot.slane %v1600_v46, %v8939_v14  ;;  %v2909_v7 = vsel %vm2896_vm5, %v1392_v25, -inf  ;;  %v13512_v46 = vld [vmem:[#allocation11_spill] sm:$0xff] }
 0x3c2   :  { %3264 = vmax.xlane.f32.xlu1 %v3263_v24  ;;  %v3266_v24 = vsel %vm2896_vm5, %v2351_v19, -inf  ;;  %v1361_v25 = vcombine.high %v9942_v54, %v9924_v63  ;;  %v10063_v63 = vrot.slane %v1265_v15, %v8894_v53  ;;  %v1281_v54 = vcombine.high %v13477_v56, %v13476_v6 }
 0x3c3   :  { %v1736_v9 = vcombine.low %v10014_v5, %v10005_v26  ;;  %v1528_v10 = vcombine.low %v1472_v50, %v1504_v40  ;;  %v1664_v19 = vcombine.low %v1608_v11, %v1640_v62  ;;  %v10070_v48 = vrot.slane %v2368_v60, %v8894_v53  ;;  %v10074_v43 = vpop.permute.xlu1 %710 }
 0x3c4   :  { %v1529_v34 = vcombine.high %v1472_v50, %v1504_v40  ;;  %v1665_v56 = vcombine.high %v1608_v11, %v1640_v62  ;;  %v10084_v60 = vrot.slane %v1313_v51, %v8894_v53  ;;  %v1769_v62 = vcombine.high %v10008_v30, %v9994_v35 }
 0x3c5   :  { %3243 = vmax.xlane.f32.xlu0 %v3242_v52  ;;  %v10033_v52 = vrot.slane %v1768_v31, %v8939_v14  ;;  %v1744_v1 = vrot.slane %v1736_v9, %v8939_v14  ;;  %v2912_v31 = vsel %vm2896_vm5, %v1528_v10, -inf  ;;  %v1393_v9 = vcombine.high %v1336_v27, %v1368_v22 }
 0x3c6   :  { %3267 = vmax.xlane.f32.xlu1 %v3266_v24  ;;  %v13511_v24 = vld [vmem:[#allocation44_spill] sm:$0xff]  ;;  %v13515_v10 = vlaneseq  ;;  %v1297_v22 = vcombine.high %v13479_v23, %v13478_v61  ;;  %v1633_v27 = vcombine.high %v9984_v38, %v9964_v29  ;;  %v10081_v61 = vrot.slane %v1361_v25, %v8939_v14 }
 0x3c7   :  { %v2352_v0 = vcombine.low %v13512_v46, %v13511_v24  ;;  %v2353_v13 = vcombine.high %v13512_v46, %v13511_v24  ;;  %v2933_v6 = vsel %vm2896_vm5, %v1393_v9, -inf  ;;  %v1465_v23 = vcombine.high %v9987_v3, %v9967_v37 }
 0x3c8   :  { %v10057_v47 = vand.u32 127, %v13515_v10  ;;  %v10093_v29 = vrot.slane %v1297_v22, %v8894_v53  ;;  %v1601_v38 = vcombine.high %v9997_v17, %v9981_v33  ;;  %v2936_v37 = vsel %vm2896_vm5, %v1529_v34, -inf }
 0x3c9   :  { %3075 = vmax.xlane.f32.xlu0 %v3074_v39  ;;  %v1800_v39 = vcombine.low %v1744_v1, %v10033_v52  ;;  %v10060_v44 = vrot.slane %v2352_v0, %v8894_v53  ;;  %v1801_v3 = vcombine.high %v1744_v1, %v10033_v52  ;;  %v10104_v50 = vrot.slane %v1497_v28, %v8939_v14  ;;  %v10119_v52 = vpop.permute.xlu1 %716  ;;  %v13517_v1 = vld [vmem:[#allocation6_spill] sm:$0xff] }
 0x3ca   :  { %2910 = vmax.xlane.f32.xlu1 %v2909_v7  ;;  %v2915_v7 = vsel %vm2896_vm5, %v1664_v19, -inf  ;;  %13516 = vst [vmem:[#allocation52_spill] sm:$0xff] %v10057_v47  ;;  %v3411_v57 = vadd.s32 4294967291, %v10057_v47  ;;  %v3423_v11 = vadd.s32 4294967275, %v10057_v47  ;;  %v3416_v40 = vadd.s32 4294967283, %v10057_v47 }
 0x3cb   :  { %v2918_v0 = vsel %vm2896_vm5, %v1800_v39, -inf  ;;  %v10107_v19 = vrot.slane %v1281_v54, %v8894_v53  ;;  %v2939_v33 = vsel %vm2896_vm5, %v1665_v56, -inf  ;;  %v1394_v17 = vcombine.low %v10090_v32, %v10081_v61 }
 0x3cc   :  { %v10113_v15 = vrot.slane %v1633_v27, %v8939_v14  ;;  %v1376_v35 = vcombine.low %v10093_v29, %v10084_v60  ;;  %v1737_v30 = vcombine.high %v10014_v5, %v10005_v26  ;;  %v10125_v25 = vrot.slane %v1465_v23, %v8939_v14 }
 0x3cd   :  { %2913 = vmax.xlane.f32.xlu0 %v2912_v31  ;;  %v10122_v31 = vsub.s32 %v3411_v57, %v13517_v1  ;;  %v10130_v9 = vsub.s32 %v3416_v40, %v13517_v1  ;;  %v10133_v55 = vrot.slane %v1601_v38, %v8939_v14  ;;  %v3430_v26 = vadd.s32 4294967267, %v10057_v47 }
 0x3ce   :  { %2916 = vmax.xlane.f32.xlu1 %v2915_v7  ;;  %v1449_v7 = vcombine.high %v13484_v42, %v13483_v2  ;;  %v2942_v5 = vsel %vm2896_vm5, %v1801_v3, -inf  ;;  %v10138_v51 = vsub.s32 %v3423_v11, %v13517_v1  ;;  %v1530_v10 = vcombine.low %v10125_v25, %v10104_v50 }
 0x3cf   :  { %v10143_v54 = vrot.slane %v1769_v62, %v8939_v14  ;;  %v1433_v2 = vcombine.high %v13496_v18, %v13495_v36  ;;  %v2957_v42 = vsel %vm2896_vm5, %v1394_v17, -inf  ;;  %v1666_v22 = vcombine.low %v10133_v55, %v10113_v15 }
 0x3d0   :  { %v1395_v28 = vcombine.high %v10090_v32, %v10081_v61  ;;  %v10158_v36 = vrot.slane %v1449_v7, %v8894_v53  ;;  %v10163_v61 = vsub.s32 %v3430_v26, %v13517_v1  ;;  %v2960_v23 = vsel %vm2896_vm5, %v1530_v10, -inf }
 0x3d1   :  { %2919 = vmax.xlane.f32.xlu0 %v2918_v0  ;;  %v1417_v0 = vcombine.high %v13494_v21, %v13493_v20  ;;  %v1401_v20 = vcombine.high %v13502_v16, %v13501_v58  ;;  %v10172_v32 = vrot.slane %v1433_v2, %v8894_v53  ;;  %v2963_v11 = vsel %vm2896_vm5, %v1666_v22, -inf }
 0x3d2   :  { %2934 = vmax.xlane.f32.xlu1 %v2933_v6  ;;  %v10155_v6 = vrot.slane %v1737_v30, %v8939_v14  ;;  %13518 = vst [vmem:[#allocation46_spill] sm:$0xff] %v10158_v36  ;;  %v1344_v40 = vcombine.low %v10063_v63, %v10107_v19  ;;  %v2416_v3 = vcombine.low %v10060_v44, %v10070_v48  ;;  %v2981_v2 = vsel %vm2896_vm5, %v1395_v28, -inf }
 0x3d3   :  { %13519 = vst [vmem:[#allocation43_spill] sm:$0xff] %v10172_v32  ;;  %v10179_v58 = vrot.slane %v1417_v0, %v8894_v53  ;;  %v10190_v7 = vrot.slane %v1401_v20, %v8894_v53  ;;  %v1345_v22 = vcombine.high %v10063_v63, %v10107_v19  ;;  %v13523_v0 = vld [vmem:[#allocation56_spill] sm:$0xff]  ;;  %v1616_v28 = vcombine.low %v9466_v4, %v9469_v59 }
 0x3d4   :  { %v1802_v57 = vcombine.low %v10155_v6, %v10143_v54  ;;  %v13525_v19 = vld [vmem:[#allocation32_spill] sm:$0xff]  ;;  %v1803_v20 = vcombine.high %v10155_v6, %v10143_v54 }
 0x3d5   :  { %2937 = vmax.xlane.f32.xlu0 %v2936_v37  ;;  %13520 = vst [vmem:[#allocation53_spill] sm:$0xff] %v10179_v58  ;;  %v2369_v37 = vcombine.high %v13514_v49, %v13513_v12  ;;  %13521 = vst [vmem:[#allocation48_spill] sm:$0xff] %v10190_v7  ;;  %v10196_v12 = vrot.slane %v1376_v35, %v8939_v14  ;;  %v1648_v49 = vcombine.low %v9587_v8, %v9590_v41 }
 0x3d6   :  { %2940 = vmax.xlane.f32.xlu1 %v2939_v33  ;;  %v2899_v39 = vpop.xlane.xlu0 %2898  ;;  %v1512_v33 = vcombine.low %v10172_v32, %v10158_v36  ;;  %v2966_v26 = vsel %vm2896_vm5, %v1802_v57, -inf  ;;  %v1480_v35 = vcombine.low %v10190_v7, %v10179_v58  ;;  %v10213_v41 = vrot.slane %v1344_v40, %v8939_v14  ;;  %v13526_v57 = vld [vmem:[#allocation59_spill] sm:$0xff]  ;;  %v13529_v40 = vld [vmem:[#allocation26_spill] sm:$0xff]  ;;  %v13554_v58 = vld [vmem:[#allocation12_spill] sm:$0xff] }
 0x3d7   :  { %v3415_v18 = vrot.slane %v2899_v39, %v10122_v31  ;;  %v8474_v39 = vmov 15   ;;  %v2792_v32 = vcombine.low %v13554_v58, %v10074_v43 }
 0x3d8   :  { %8344 = vset.pattern.permute.xlu1 %v8474_v39  ;;  %v10220_v63 = vrot.slane %v1512_v33, %v8939_v14  ;;  %v10241_v6 = vrot.slane %v1480_v35, %v8939_v14  ;;  %v10247_v33 = vrot.slane %v2353_v13, %v8894_v53 }
 0x3d9   :  { %2943 = vmax.xlane.f32.xlu0 %v2942_v5  ;;  %v1531_v5 = vcombine.high %v10125_v25, %v10104_v50  ;;  %v13524_v50 = vld [vmem:[#allocation51_spill] sm:$0xff] }
 0x3da   :  { %2958 = vmax.xlane.f32.xlu1 %v2957_v42  ;;  %v2905_v34 = vpop.xlane.xlu0 %2904  ;;  %v1667_v42 = vcombine.high %v10133_v55, %v10113_v15  ;;  %v2384_v25 = vcombine.low %v13524_v50, %v13523_v0 }
 0x3db   :  { %v2902_v27 = vpop.xlane.xlu1 %2901  ;;  %v3427_v21 = vrot.slane %v2905_v34, %v10138_v51 }
 0x3dc   :  { %v3420_v56 = vrot.slane %v2902_v27, %v10130_v9  ;;  %v1784_v27 = vcombine.low %v13525_v19, %v9822_v45  ;;  %v2987_v59 = vsel %vm2896_vm5, %v1667_v42, -inf  ;;  %v13527_v45 = vld [vmem:[#allocation54_spill] sm:$0xff]  ;;  %v10271_v42 = vrot.slane %v1345_v22, %v8939_v14 }
 0x3dd   :  { %2961 = vmax.xlane.f32.xlu0 %v2960_v23  ;;  %v10233_v23 = vrot.slane %v1648_v49, %v8939_v14  ;;  %v2990_v49 = vsel %vm2896_vm5, %v1803_v20, -inf  ;;  %v13533_v22 = vld [vmem:[#allocation74_spill] sm:$0xff] }
 0x3de   :  { %v3422_v38 = vsel %vm3421_vm6, %v3420_v56, %v3415_v18  ;;  %2964 = vmax.xlane.f32.xlu1 %v2963_v11  ;;  %v2908_v62 = vpop.xlane.xlu0 %2907  ;;  %v2984_v56 = vsel %vm2896_vm5, %v1531_v5, -inf  ;;  %v13528_v11 = vld [vmem:[#allocation24_spill] sm:$0xff]  ;;  %v2417_v5 = vcombine.high %v10060_v44, %v10070_v48  ;;  %v10262_v13 = vrot.slane %v1784_v27, %v8939_v14  ;;  %13531 = vst [vmem:[#allocation68_spill] sm:$0xff] %v10271_v42 }
 0x3df   :  { %v3429_v16 = vsel %vm3428_vm7, %v3427_v21, %v3422_v38  ;;  %v3434_v17 = vrot.slane %v2908_v62, %v10163_v61  ;;  %v2923_v30 = vpop.xlane.xlu1 %2922  ;;  %v1396_v21 = vcombine.low %v10213_v41, %v10196_v12  ;;  %v2400_v38 = vcombine.low %v13527_v45, %v13526_v57 }
 0x3e0   :  { %v3468_v34 = vrot.slane %v2923_v30, %v10122_v31  ;;  %v10274_v44 = vrot.slane %v2384_v25, %v8894_v53 }
 0x3e1   :  { %v10201_v10 = vsel %vm3435_vm8, %v3434_v17, %v3429_v16  ;;  %2967 = vmax.xlane.f32.xlu0 %v2966_v26  ;;  %v1752_v16 = vcombine.low %v13529_v40, %v13528_v11  ;;  %v10250_v17 = vrot.slane %v2369_v37, %v8894_v53  ;;  %v10254_v26 = vrot.slane %v1616_v28, %v8939_v14 }
 0x3e2   :  { %13522 = vst [vmem:[#allocation21_spill] sm:$0xff] %v10201_v10  ;;  %2982 = vmax.xlane.f32.xlu1 %v2981_v2  ;;  %v2926_v8 = vpop.xlane.xlu0 %2925  ;;  %v1532_v2 = vcombine.low %v10241_v6, %v10220_v63  ;;  %v3005_v46 = vsel %vm2896_vm5, %v1396_v21, -inf  ;;  %v10277_v48 = vrot.slane %v2400_v38, %v8894_v53  ;;  %v10283_v28 = vrot.slane %v2416_v3, %v8939_v14  ;;  %v13537_v21 = vld [vmem:[#allocation71_spill] sm:$0xff] }
 0x3e3   :  { %v3472_v15 = vrot.slane %v2926_v8, %v10130_v9  ;;  %v2929_v55 = vpop.xlane.xlu1 %2928  ;;  %v1668_v37 = vcombine.low %v10254_v26, %v10233_v23  ;;  %v10280_v8 = vrot.slane %v1752_v16, %v8939_v14  ;;  %v1397_v3 = vcombine.high %v10213_v41, %v10196_v12 }
 0x3e4   :  { %v3477_v18 = vrot.slane %v2929_v55, %v10138_v51  ;;  %v2448_v16 = vcombine.low %v10274_v44, %v10277_v48  ;;  %v10309_v41 = vrot.slane %v2417_v5, %v8939_v14 }
 0x3e5   :  { %v3473_v4 = vsel %vm3421_vm6, %v3472_v15, %v3468_v34  ;;  %2985 = vmax.xlane.f32.xlu0 %v2984_v56  ;;  %v1377_v34 = vcombine.high %v10093_v29, %v10084_v60  ;;  %v13532_v15 = vld [vmem:[#allocation13_spill] sm:$0xff]  ;;  %v3008_v56 = vsel %vm2896_vm5, %v1532_v2, -inf  ;;  %v1804_v20 = vcombine.low %v10280_v8, %v10262_v13  ;;  %v13535_v60 = vld [vmem:[#allocation64_spill] sm:$0xff] }
 0x3e6   :  { %v3478_v62 = vsel %vm3428_vm7, %v3477_v18, %v3473_v4  ;;  %2988 = vmax.xlane.f32.xlu1 %v2987_v59  ;;  %v2932_v54 = vpop.xlane.xlu0 %2931  ;;  %v2536_v55 = vcombine.low %v13533_v22, %v13532_v15  ;;  %v13534_v4 = vld [vmem:[#allocation69_spill] sm:$0xff]  ;;  %v13536_v59 = vld [vmem:[#allocation20_spill] sm:$0xff]  ;;  %v3011_v40 = vsel %vm2896_vm5, %v1668_v37, -inf  ;;  %v3029_v5 = vsel %vm2896_vm5, %v1397_v3, -inf }
 0x3e7   :  { %v3482_v30 = vrot.slane %v2932_v54, %v10163_v61  ;;  %v2947_v39 = vpop.xlane.xlu1 %2946  ;;  %v2504_v29 = vcombine.low %v13535_v60, %v13534_v4  ;;  %v2520_v38 = vcombine.low %v13537_v21, %v13536_v59  ;;  %v13539_v54 = vld [vmem:[#allocation61_spill] sm:$0xff]  ;;  %v13544_v3 = vld [vmem:[#allocation28_spill] sm:$0xff] }
 0x3e8   :  { %v3507_v25 = vrot.slane %v2947_v39, %v10122_v31  ;;  %v10314_v2 = vrot.slane %v2536_v55, %v8894_v53 }
 0x3e9   :  { %v10265_v24 = vsel %vm3435_vm8, %v3482_v30, %v3478_v62  ;;  %2991 = vmax.xlane.f32.xlu0 %v2990_v49  ;;  %v13538_v62 = vld [vmem:[#allocation66_spill] sm:$0xff]  ;;  %v2449_v49 = vcombine.high %v10274_v44, %v10277_v48  ;;  %v10327_v44 = vrot.slane %v2504_v29, %v8894_v53  ;;  %v10330_v48 = vrot.slane %v2520_v38, %v8894_v53 }
 0x3ea   :  { %13530 = vst [vmem:[#allocation19_spill] sm:$0xff] %v10265_v24  ;;  %3006 = vmax.xlane.f32.xlu1 %v3005_v46  ;;  %v2950_v35 = vpop.xlane.xlu0 %2949  ;;  %v2488_v30 = vcombine.low %v13539_v54, %v13538_v62  ;;  %v2456_v38 = vrot.slane %v2448_v16, %v8939_v14  ;;  %v1805_v16 = vcombine.high %v10280_v8, %v10262_v13 }
 0x3eb   :  { %v3511_v19 = vrot.slane %v2950_v35, %v10130_v9  ;;  %v2953_v27 = vpop.xlane.xlu1 %2952  ;;  %v10318_v35 = vrot.slane %v1377_v34, %v8939_v14  ;;  %v1669_v34 = vcombine.high %v10254_v26, %v10233_v23 }
 0x3ec   :  { %v3516_v18 = vrot.slane %v2953_v27, %v10138_v51  ;;  %v2481_v8 = vcombine.high %v10283_v28, %v2456_v38 }
 0x3ed   :  { %v3512_v11 = vsel %vm3421_vm6, %v3511_v19, %v3507_v25  ;;  %3009 = vmax.xlane.f32.xlu0 %v3008_v56  ;;  %13540 = vst [vmem:[#allocation65_spill] sm:$0xff] %v10318_v35  ;;  %v13541_v25 = vld [vmem:[#allocation41_spill] sm:$0xff]  ;;  %v13542_v19 = vld [vmem:[#allocation34_spill] sm:$0xff]  ;;  %v1533_v56 = vcombine.high %v10241_v6, %v10220_v63  ;;  %v13547_v6 = vld [vmem:[#allocation40_spill] sm:$0xff] }
 0x3ee   :  { %v3517_v39 = vsel %vm3428_vm7, %v3516_v18, %v3512_v11  ;;  %3012 = vmax.xlane.f32.xlu1 %v3011_v40  ;;  %v2956_v12 = vpop.xlane.xlu0 %2955  ;;  %v2672_v27 = vcombine.low %v13542_v19, %v13541_v25  ;;  %v3014_v18 = vsel %vm2896_vm5, %v1804_v20, -inf  ;;  %v10338_v20 = vrot.slane %v2488_v30, %v8894_v53  ;;  %v13545_v11 = vld [vmem:[#allocation29_spill] sm:$0xff] }
 0x3ef   :  { %v3521_v46 = vrot.slane %v2956_v12, %v10163_v61  ;;  %v2971_v37 = vpop.xlane.xlu1 %2970  ;;  %v2640_v40 = vcombine.low %v13545_v11, %v13544_v3  ;;  %v13546_v63 = vld [vmem:[#allocation17_spill] sm:$0xff] }
 0x3f0   :  { %v2656_v29 = vcombine.low %v13547_v6, %v13546_v63  ;;  %v3546_v23 = vrot.slane %v2971_v37, %v10122_v31  ;;  %v10352_v24 = vrot.slane %v2672_v27, %v8894_v53  ;;  %v2552_v1 = vcombine.low %v10338_v20, %v10327_v44 }
 0x3f1   :  { %v10333_v55 = vsel %vm3435_vm8, %v3521_v46, %v3517_v39  ;;  %3015 = vmax.xlane.f32.xlu0 %v3014_v18  ;;  %v2584_v39 = vcombine.low %v10330_v48, %v10314_v2  ;;  %v13548_v46 = vld [vmem:[#allocation25_spill] sm:$0xff]  ;;  %v13549_v18 = vld [vmem:[#allocation8_spill] sm:$0xff]  ;;  %v3035_v37 = vsel %vm2896_vm5, %v1669_v34, -inf  ;;  %v10365_v27 = vrot.slane %v2640_v40, %v8894_v53 }
 0x3f2   :  { %13543 = vst [vmem:[#allocation45_spill] sm:$0xff] %v10333_v55  ;;  %3030 = vmax.xlane.f32.xlu1 %v3029_v5  ;;  %v2974_v12 = vpop.xlane.xlu0 %2973  ;;  %v2624_v55 = vcombine.low %v13549_v18, %v13548_v46  ;;  %v3032_v5 = vsel %vm2896_vm5, %v1533_v56, -inf  ;;  %v10377_v40 = vrot.slane %v2449_v49, %v8939_v14  ;;  %v2480_v49 = vcombine.low %v10283_v28, %v2456_v38 }
 0x3f3   :  { %v3550_v26 = vrot.slane %v2974_v12, %v10130_v9  ;;  %v2977_v30 = vpop.xlane.xlu1 %2976  ;;  %v1398_v12 = vcombine.low %v10271_v42, %v10318_v35  ;;  %v3038_v42 = vsel %vm2896_vm5, %v1805_v16, -inf  ;;  %v13553_v35 = vld [vmem:[#allocation33_spill] sm:$0xff] }
 0x3f4   :  { %v3555_v10 = vrot.slane %v2977_v30, %v10138_v51  ;;  %v10368_v30 = vrot.slane %v2656_v29, %v8894_v53  ;;  %v10380_v29 = vrot.slane %v2624_v55, %v8894_v53 }
 0x3f5   :  { %v3551_v47 = vsel %vm3421_vm6, %v3550_v26, %v3546_v23  ;;  %3033 = vmax.xlane.f32.xlu0 %v3032_v5  ;;  %v2401_v23 = vcombine.high %v13527_v45, %v13526_v57  ;;  %v2592_v5 = vrot.slane %v2584_v39, %v8939_v14  ;;  %v3053_v45 = vsel %vm2896_vm5, %v1398_v12, -inf }
 0x3f6   :  { %v3556_v56 = vsel %vm3428_vm7, %v3555_v10, %v3551_v47  ;;  %3036 = vmax.xlane.f32.xlu1 %v3035_v37  ;;  %v2980_v13 = vpop.xlane.xlu0 %2979  ;;  %v2720_v47 = vcombine.low %v10368_v30, %v10352_v24  ;;  %v13550_v10 = vld [vmem:[#allocation55_spill] sm:$0xff]  ;;  %v2560_v39 = vrot.slane %v2552_v1, %v8939_v14  ;;  %v2688_v55 = vcombine.low %v10380_v29, %v10365_v27 }
 0x3f7   :  { %v3560_v34 = vrot.slane %v2980_v13, %v10163_v61  ;;  %v2995_v26 = vpop.xlane.xlu1 %2994  ;;  %v2808_v37 = vcombine.low %v13550_v10, %v10119_v52  ;;  %v13552_v13 = vld [vmem:[#allocation22_spill] sm:$0xff] }
 0x3f8   :  { %v2776_v7 = vcombine.low %v13553_v35, %v13552_v13  ;;  %v3585_v28 = vrot.slane %v2995_v26, %v10122_v31  ;;  %v2617_v12 = vcombine.high %v2560_v39, %v2592_v5  ;;  %v2728_v58 = vrot.slane %v2720_v47, %v8939_v14 }
 0x3f9   :  { %v10388_v57 = vsel %vm3435_vm8, %v3560_v34, %v3556_v56  ;;  %3039 = vmax.xlane.f32.xlu0 %v3038_v42  ;;  %v3125_v56 = vsel %vm2896_vm5, %v2481_v8, -inf  ;;  %v2585_v42 = vcombine.high %v10330_v48, %v10314_v2  ;;  %v13555_v34 = vld [vmem:[#allocation38_spill] sm:$0xff]  ;;  %v10407_v35 = vrot.slane %v2808_v37, %v8894_v53 }
 0x3fa   :  { %13551 = vst [vmem:[#allocation10_spill] sm:$0xff] %v10388_v57  ;;  %3054 = vmax.xlane.f32.xlu1 %v3053_v45  ;;  %v2998_v16 = vpop.xlane.xlu0 %2997  ;;  %v13556_v57 = vld [vmem:[#allocation36_spill] sm:$0xff]  ;;  %v2553_v8 = vcombine.high %v10338_v20, %v10327_v44  ;;  %v3101_v48 = vsel %vm2896_vm5, %v2480_v49, -inf  ;;  %v2616_v26 = vcombine.low %v2560_v39, %v2592_v5  ;;  %v2696_v47 = vrot.slane %v2688_v55, %v8939_v14 }
 0x3fb   :  { %v3589_v1 = vrot.slane %v2998_v16, %v10130_v9  ;;  %v3001_v38 = vpop.xlane.xlu1 %3000  ;;  %v2760_v36 = vcombine.low %v13556_v57, %v13555_v34  ;;  %v10416_v16 = vrot.slane %v2776_v7, %v8894_v53  ;;  %v10419_v57 = vrot.slane %v2792_v32, %v8894_v53 }
 0x3fc   :  { %v3594_v45 = vrot.slane %v3001_v38, %v10138_v51  ;;  %v2385_v44 = vcombine.high %v13524_v50, %v13523_v0  ;;  %v10426_v20 = vrot.slane %v2401_v23, %v8894_v53  ;;  %v10430_v7 = vrot.slane %v2585_v42, %v8939_v14 }
 0x3fd   :  { %v3590_v2 = vsel %vm3421_vm6, %v3589_v1, %v3585_v28  ;;  %3126 = vmax.xlane.f32.xlu0 %v3125_v56  ;;  %v10433_v32 = vrot.slane %v2760_v36, %v8894_v53  ;;  %v2856_v39 = vcombine.low %v10419_v57, %v10407_v35  ;;  %v3128_v55 = vsel %vm2896_vm5, %v2617_v12, -inf }
 0x3fe   :  { %v3595_v37 = vsel %vm3428_vm7, %v3594_v45, %v3590_v2  ;;  %3102 = vmax.xlane.f32.xlu1 %v3101_v48  ;;  %v3004_v38 = vpop.xlane.xlu0 %3003  ;;  %v2752_v56 = vcombine.low %v2696_v47, %v2728_v58  ;;  %v3104_v50 = vsel %vm2896_vm5, %v2616_v26, -inf  ;;  %v2482_v23 = vcombine.low %v10309_v41, %v10377_v40 }
 0x3ff   :  { %v3599_v5 = vrot.slane %v3004_v38, %v10163_v61  ;;  %v3019_v49 = vpop.xlane.xlu1 %3018  ;;  %v10445_v42 = vrot.slane %v2553_v8, %v8939_v14  ;;  %v2432_v36 = vcombine.low %v10247_v33, %v10250_v17  ;;  %v2824_v28 = vcombine.low %v10433_v32, %v10416_v16 }
 0x400   :  { %v10452_v12 = vrot.slane %v2385_v44, %v8894_v53  ;;  %v3624_v45 = vrot.slane %v3019_v49, %v10122_v31  ;;  %v2721_v26 = vcombine.high %v10368_v30, %v10352_v24  ;;  %v3107_v38 = vsel %vm2896_vm5, %v2752_v56, -inf }
 0x401   :  { %v10439_v0 = vsel %vm3435_vm8, %v3599_v5, %v3595_v37  ;;  %3129 = vmax.xlane.f32.xlu0 %v3128_v55  ;;  %v2618_v8 = vcombine.low %v10445_v42, %v10430_v7  ;;  %v2864_v5 = vrot.slane %v2856_v39, %v8939_v14  ;;  %v3149_v55 = vsel %vm2896_vm5, %v2482_v23, -inf }
 0x402   :  { %3105 = vmax.xlane.f32.xlu1 %v3104_v50  ;;  %v3022_v1 = vpop.xlane.xlu0 %3021  ;;  %v2464_v44 = vcombine.low %v10452_v12, %v10426_v20  ;;  %v2753_v50 = vcombine.high %v2696_v47, %v2728_v58  ;;  %v2832_v56 = vrot.slane %v2824_v28, %v8939_v14  ;;  %v2483_v39 = vcombine.high %v10309_v41, %v10377_v40 }
 0x403   :  { %v3628_v2 = vrot.slane %v3022_v1, %v10130_v9  ;;  %v3025_v48 = vpop.xlane.xlu1 %3024  ;;  %v2689_v1 = vcombine.high %v10380_v29, %v10365_v27  ;;  %v3152_v58 = vsel %vm2896_vm5, %v2618_v8, -inf  ;;  %v10478_v27 = vrot.slane %v2721_v26, %v8939_v14 }
 0x404   :  { %v3633_v37 = vrot.slane %v3025_v48, %v10138_v51  ;;  %v2537_v48 = vcombine.high %v13533_v22, %v13532_v15  ;;  %v2888_v47 = vcombine.low %v2832_v56, %v2864_v5  ;;  %v10481_v29 = vrot.slane %v2432_v36, %v8939_v14 }
 0x405   :  { %v3629_v49 = vsel %vm3421_vm6, %v3628_v2, %v3624_v45  ;;  %3108 = vmax.xlane.f32.xlu0 %v3107_v38  ;;  %v2505_v23 = vcombine.high %v13535_v60, %v13534_v4  ;;  %v2521_v41 = vcombine.high %v13537_v21, %v13536_v59  ;;  %v3131_v22 = vsel %vm2896_vm5, %v2753_v50, -inf }
 0x406   :  { %v3634_v24 = vsel %vm3428_vm7, %v3633_v37, %v3629_v49  ;;  %3150 = vmax.xlane.f32.xlu1 %v3149_v55  ;;  %v3028_v30 = vpop.xlane.xlu0 %3027  ;;  %v2489_v40 = vcombine.high %v13539_v54, %v13538_v62  ;;  %v3173_v36 = vsel %vm2896_vm5, %v2483_v39, -inf  ;;  %v10495_v8 = vrot.slane %v2689_v1, %v8939_v14 }
 0x407   :  { %v3638_v45 = vrot.slane %v3028_v30, %v10163_v61  ;;  %v3043_v2 = vpop.xlane.xlu1 %3042  ;;  %v10498_v4 = vrot.slane %v2464_v44, %v8939_v14  ;;  %v10501_v60 = vrot.slane %v2537_v48, %v8894_v53  ;;  %v2673_v59 = vcombine.high %v13542_v19, %v13541_v25 }
 0x408   :  { %v3663_v21 = vrot.slane %v3043_v2, %v10122_v31  ;;  %v2857_v26 = vcombine.high %v10419_v57, %v10407_v35  ;;  %v3110_v38 = vsel %vm2896_vm5, %v2888_v47, -inf  ;;  %v2754_v44 = vcombine.low %v10495_v8, %v10478_v27 }
 0x409   :  { %v10488_v15 = vsel %vm3435_vm8, %v3638_v45, %v3634_v24  ;;  %3153 = vmax.xlane.f32.xlu0 %v3152_v58  ;;  %v10514_v49 = vrot.slane %v2505_v23, %v8894_v53  ;;  %v10517_v25 = vrot.slane %v2521_v41, %v8894_v53  ;;  %v2889_v55 = vcombine.high %v2832_v56, %v2864_v5 }
 0x40a   :  { %3132 = vmax.xlane.f32.xlu1 %v3131_v22  ;;  %v3046_v28 = vpop.xlane.xlu0 %3045  ;;  %v2641_v35 = vcombine.high %v13545_v11, %v13544_v3  ;;  %v2657_v57 = vcombine.high %v13547_v6, %v13546_v63  ;;  %v2825_v50 = vcombine.high %v10433_v32, %v10416_v16  ;;  %v10528_v30 = vrot.slane %v2489_v40, %v8894_v53 }
 0x40b   :  { %v3667_v62 = vrot.slane %v3046_v28, %v10130_v9  ;;  %v3049_v54 = vpop.xlane.xlu1 %3048  ;;  %v2600_v39 = vcombine.low %v10517_v25, %v10501_v60  ;;  %v2484_v3 = vcombine.low %v10481_v29, %v10498_v4  ;;  %v2625_v11 = vcombine.high %v13549_v18, %v13548_v46 }
 0x40c   :  { %v3672_v37 = vrot.slane %v3049_v54, %v10138_v51  ;;  %v10538_v63 = vrot.slane %v2673_v59, %v8894_v53  ;;  %v3155_v6 = vsel %vm2896_vm5, %v2754_v44, -inf  ;;  %v10542_v16 = vrot.slane %v2857_v26, %v8939_v14 }
 0x40d   :  { %v3668_v19 = vsel %vm3421_vm6, %v3667_v62, %v3663_v21  ;;  %3111 = vmax.xlane.f32.xlu0 %v3110_v38  ;;  %v3134_v48 = vsel %vm2896_vm5, %v2889_v55, -inf  ;;  %v2619_v45 = vcombine.high %v10445_v42, %v10430_v7  ;;  %v2568_v46 = vcombine.low %v10528_v30, %v10514_v49 }
 0x40e   :  { %v3673_v1 = vsel %vm3428_vm7, %v3672_v37, %v3668_v19  ;;  %3174 = vmax.xlane.f32.xlu1 %v3173_v36  ;;  %v3052_v24 = vpop.xlane.xlu0 %3051  ;;  %v10553_v18 = vrot.slane %v2641_v35, %v8894_v53  ;;  %v10556_v2 = vrot.slane %v2657_v57, %v8894_v53  ;;  %v2839_v47 = vrot.slane %v2825_v50, %v8939_v14 }
 0x40f   :  { %v3677_v5 = vrot.slane %v3052_v24, %v10163_v61  ;;  %v3094_v56 = vpop.xlane.xlu1 %3093  ;;  %v3197_v7 = vsel %vm2896_vm5, %v2484_v3, -inf  ;;  %v10565_v42 = vrot.slane %v2625_v11, %v8894_v53  ;;  %v2608_v36 = vrot.slane %v2600_v39, %v8939_v14  ;;  %v13560_v39 = vld [vmem:[#allocation46_spill] sm:$0xff] }
 0x410   :  { %v3745_v23 = vrot.slane %v3094_v56, %v10130_v9  ;;  %v2736_v40 = vcombine.low %v10556_v2, %v10538_v63  ;;  %v2890_v28 = vcombine.low %v2839_v47, %v10542_v16  ;;  %v3176_v21 = vsel %vm2896_vm5, %v2619_v45, -inf  ;;  %v13563_v45 = vld [vmem:[#allocation53_spill] sm:$0xff] }
 0x411   :  { %v10545_v32 = vsel %vm3435_vm8, %v3677_v5, %v3673_v1  ;;  %3156 = vmax.xlane.f32.xlu0 %v3155_v6  ;;  %v2755_v62 = vcombine.high %v10495_v8, %v10478_v27  ;;  %v2704_v54 = vcombine.low %v10565_v42, %v10553_v18  ;;  %v2576_v37 = vrot.slane %v2568_v46, %v8939_v14  ;;  %v13561_v5 = vld [vmem:[#allocation43_spill] sm:$0xff]  ;;  %v13564_v46 = vld [vmem:[#allocation48_spill] sm:$0xff] }
 0x412   :  { %13557 = vst [vmem:[#allocation31_spill] sm:$0xff] %v10545_v32  ;;  %3135 = vmax.xlane.f32.xlu1 %v3134_v48  ;;  %v3091_v58 = vpop.xlane.xlu0 %3090  ;;  %v2465_v38 = vcombine.high %v10452_v12, %v10426_v20  ;;  %v2809_v19 = vcombine.high %v13550_v10, %v10119_v52  ;;  %v3158_v55 = vsel %vm2896_vm5, %v2890_v28, -inf  ;;  %v10590_v27 = vrot.slane %v2736_v40, %v8939_v14  ;;  %v13558_v12 = vld [vmem:[#allocation33_spill] sm:$0xff]  ;;  %v13559_v52 = vld [vmem:[#allocation12_spill] sm:$0xff] }
 0x413   :  { %v3741_v41 = vrot.slane %v3091_v58, %v10122_v31  ;;  %v10561_v22 = vpop.xlane.xlu1 %3117  ;;  %v2620_v35 = vcombine.low %v2576_v37, %v2608_v36  ;;  %v2433_v8 = vcombine.high %v10247_v33, %v10250_v17  ;;  %v3179_v57 = vsel %vm2896_vm5, %v2755_v62, -inf }
 0x414   :  { %v2485_v20 = vcombine.high %v10481_v29, %v10498_v4  ;;  %v2777_v50 = vcombine.high %v13558_v12, %v13552_v13  ;;  %v2793_v10 = vcombine.high %v13559_v52, %v10074_v43  ;;  %v2712_v24 = vrot.slane %v2704_v54, %v8939_v14  ;;  %v13562_v29 = vld [vmem:[#allocation36_spill] sm:$0xff] }
 0x415   :  { %v10572_v59 = vsel %vm3421_vm6, %v3745_v23, %v3741_v41  ;;  %3198 = vmax.xlane.f32.xlu0 %v3197_v7  ;;  %v1513_v33 = vcombine.high %v13561_v5, %v13560_v39  ;;  %v10609_v56 = vrot.slane %v2465_v38, %v8939_v14  ;;  %v2761_v4 = vcombine.high %v13562_v29, %v13555_v34 }
 0x416   :  { %3177 = vmax.xlane.f32.xlu1 %v3176_v21  ;;  %v10579_v26 = vpop.xlane.xlu0 %3114  ;;  %v10614_v13 = vrot.slane %v2809_v19, %v8894_v53  ;;  %v3200_v43 = vsel %vm2896_vm5, %v2620_v35, -inf  ;;  %v2756_v3 = vcombine.low %v2712_v24, %v10590_v27  ;;  %v3221_v11 = vsel %vm2896_vm5, %v2485_v20, -inf }
 0x417   :  { %v10584_v44 = vpop.xlane.xlu1 %3120  ;;  %v2891_v6 = vcombine.high %v2839_v47, %v10542_v16  ;;  %v2447_v48 = vrot.slane %v2433_v8, %v8939_v14  ;;  %v1481_v58 = vcombine.high %v13564_v46, %v13563_v45  ;;  %v10624_v23 = vrot.slane %v2777_v50, %v8894_v53  ;;  %v13566_v50 = vld [vmem:[#allocation68_spill] sm:$0xff] }
 0x418   :  { %v10627_v34 = vrot.slane %v2793_v10, %v8894_v53  ;;  %v10635_v16 = vrot.slane %v2761_v4, %v8894_v53  ;;  %v3203_v28 = vsel %vm2896_vm5, %v2756_v3, -inf  ;;  %v1527_v21 = vrot.slane %v1513_v33, %v8939_v14 }
 0x419   :  { %3159 = vmax.xlane.f32.xlu0 %v3158_v55  ;;  %v2486_v40 = vcombine.low %v2447_v48, %v10609_v56  ;;  %v3182_v62 = vsel %vm2896_vm5, %v2891_v6, -inf  ;;  %v2621_v54 = vcombine.high %v2576_v37, %v2608_v36  ;;  %v1495_v55 = vrot.slane %v1481_v58, %v8939_v14  ;;  %v13565_v37 = vld [vmem:[#allocation65_spill] sm:$0xff] }
 0x41a   :  { %3180 = vmax.xlane.f32.xlu1 %v3179_v57  ;;  %v10601_v1 = vpop.xlane.xlu0 %3096  ;;  %v2872_v47 = vcombine.low %v10627_v34, %v10614_v13  ;;  %v2840_v38 = vcombine.low %v10635_v16, %v10624_v23  ;;  %v2601_v8 = vcombine.high %v10517_v25, %v10501_v60  ;;  %v1399_v52 = vcombine.high %v13566_v50, %v13565_v37 }
 0x41b   :  { %v10606_v17 = vpop.xlane.xlu1 %3141  ;;  %v3245_v57 = vsel %vm2896_vm5, %v2486_v40, -inf  ;;  %v1534_v20 = vcombine.low %v1495_v55, %v1527_v21  ;;  %v3224_v36 = vsel %vm2896_vm5, %v2621_v54, -inf  ;;  %v2569_v10 = vcombine.high %v10528_v30, %v10514_v49  ;;  %v13567_v54 = vld [vmem:[#allocation30_spill] sm:$0xff] }
 0x41c   :  { %v2880_v12 = vrot.slane %v2872_v47, %v8939_v14  ;;  %v2848_v5 = vrot.slane %v2840_v38, %v8939_v14  ;;  %v2615_v29 = vrot.slane %v2601_v8, %v8939_v14  ;;  %v3077_v4 = vsel %vm2896_vm5, %v1399_v52, -inf  ;;  %v13568_v38 = vld [vmem:[#allocation27_spill] sm:$0xff] }
 0x41d   :  { %3201 = vmax.xlane.f32.xlu0 %v3200_v43  ;;  %v3056_v25 = vsel %vm2896_vm5, %v1534_v20, -inf  ;;  %v2757_v43 = vcombine.high %v2712_v24, %v10590_v27  ;;  %v2583_v49 = vrot.slane %v2569_v10, %v8939_v14  ;;  %v2737_v45 = vcombine.high %v10556_v2, %v10538_v63 }
 0x41e   :  { %3222 = vmax.xlane.f32.xlu1 %v3221_v11  ;;  %v10629_v41 = vpop.xlane.xlu0 %3138  ;;  %v2892_v33 = vcombine.low %v2848_v5, %v2880_v12  ;;  %v2487_v58 = vcombine.high %v2447_v48, %v10609_v56  ;;  %v2705_v24 = vcombine.high %v10565_v42, %v10553_v18  ;;  %v13569_v18 = vcombine.low %v13567_v54, %v13568_v38 }
 0x41f   :  { %v10631_v7 = vpop.xlane.xlu1 %3123  ;;  %v2622_v6 = vcombine.low %v2583_v49, %v2615_v29  ;;  %v3227_v46 = vsel %vm2896_vm5, %v2757_v43, -inf  ;;  %v2751_v63 = vrot.slane %v2737_v45, %v8939_v14  ;;  %v2893_v8 = vcombine.high %v2848_v5, %v2880_v12 }
 0x420   :  { %v3206_v11 = vsel %vm2896_vm5, %v2892_v33, -inf  ;;  %v2719_v48 = vrot.slane %v2705_v24, %v8939_v14  ;;  %v3059_v42 = vsel %vm2896_vm5, %v13569_v18, -inf  ;;  %v2623_v52 = vcombine.high %v2583_v49, %v2615_v29 }
 0x421   :  { %3204 = vmax.xlane.f32.xlu0 %v3203_v28  ;;  %v3248_v47 = vsel %vm2896_vm5, %v2622_v6, -inf  ;;  %v3269_v28 = vsel %vm2896_vm5, %v2487_v58, -inf  ;;  %v3230_v50 = vsel %vm2896_vm5, %v2893_v8, -inf  ;;  %v8476_v32 = vmov 18  }
 0x422   :  { %3183 = vmax.xlane.f32.xlu1 %v3182_v62  ;;  %v10644_v19 = vpop.xlane.xlu0 %3099  ;;  %v1535_v62 = vcombine.high %v1495_v55, %v1527_v21  ;;  %v2758_v55 = vcombine.low %v2719_v48, %v2751_v63  ;;  %v2759_v45 = vcombine.high %v2719_v48, %v2751_v63 }
 0x423   :  { %v10647_v35 = vpop.xlane.xlu1 %3162 }
 0x424   :  { %v3080_v21 = vsel %vm2896_vm5, %v1535_v62, -inf  ;;  %v3251_v12 = vsel %vm2896_vm5, %v2758_v55, -inf }
 0x425   :  { %3246 = vmax.xlane.f32.xlu0 %v3245_v57  ;;  %v2873_v57 = vcombine.high %v10627_v34, %v10614_v13 }
 0x426   :  { %3225 = vmax.xlane.f32.xlu1 %v3224_v36  ;;  %v10658_v39 = vpop.xlane.xlu0 %3144  ;;  %v2841_v36 = vcombine.high %v10635_v16, %v10624_v23  ;;  %v13570_v23 = vld [vmem:[#allocation39_spill] sm:$0xff] }
 0x427   :  { %v10661_v60 = vpop.xlane.xlu1 %3147  ;;  %v2887_v13 = vrot.slane %v2873_v57, %v8939_v14  ;;  %v13571_v16 = vld [vmem:[#allocation15_spill] sm:$0xff] }
 0x428   :  { %v2855_v5 = vrot.slane %v2841_v36, %v8939_v14  ;;  %v13572_v33 = vcombine.low %v13570_v23, %v13571_v16  ;;  %v13574_v62 = vcombine.high %v13570_v23, %v13571_v16 }
 0x429   :  { %3057 = vmax.xlane.f32.xlu0 %v3056_v25  ;;  %v3272_v25 = vsel %vm2896_vm5, %v2623_v52, -inf }
 0x42a   :  { %3078 = vmax.xlane.f32.xlu1 %v3077_v4  ;;  %v10667_v3 = vpop.xlane.xlu0 %3165  ;;  %v3062_v29 = vsel %vm2896_vm5, %v13572_v33, -inf  ;;  %v2894_v4 = vcombine.low %v2855_v5, %v2887_v13  ;;  %v10764_v33 = vld [vmem:[%s13161_s1] sm:$0xff] }
 0x42b   :  { %v10670_v30 = vpop.xlane.xlu1 %3186  ;;  %13577 = vst [vmem:[#allocation23_spill] sm:$0xff] %v10764_v33 }
 0x42d   :  { %3207 = vmax.xlane.f32.xlu0 %v3206_v11  ;;  %v13573_v11 = vcombine.high %v13567_v54, %v13568_v38  ;;  %v3086_v54 = vsel %vm2896_vm5, %v13574_v62, -inf }
 0x42e   :  { %3228 = vmax.xlane.f32.xlu1 %v3227_v46  ;;  %v10677_v27 = vpop.xlane.xlu0 %3168  ;;  %v3254_v46 = vsel %vm2896_vm5, %v2894_v4, -inf  ;;  %v10771_v4 = vld [vmem:[%s13161_s1 + $0x8] sm:$0xff] }
 0x42f   :  { %v10681_v40 = vpop.xlane.xlu1 %3192  ;;  %v3083_v6 = vsel %vm2896_vm5, %v13573_v11, -inf  ;;  %13578 = vst [vmem:[#allocation37_spill] sm:$0xff] %v10771_v4 }
 0x431   :  { %3249 = vmax.xlane.f32.xlu0 %v3248_v47  ;;  %v3275_v47 = vsel %vm2896_vm5, %v2759_v45, -inf }
 0x432   :  { %3270 = vmax.xlane.f32.xlu1 %v3269_v28  ;;  %v10686_v2 = vpop.xlane.xlu0 %3189  ;;  %v2895_v28 = vcombine.high %v2855_v5, %v2887_v13 }
 0x433   :  { %v10688_v56 = vpop.xlane.xlu1 %3213 }
 0x434   :  { %v3278_v48 = vsel %vm2896_vm5, %v2895_v28, -inf }
 0x435   :  { %3060 = vmax.xlane.f32.xlu0 %v3059_v42 }
 0x436   :  { %3081 = vmax.xlane.f32.xlu1 %v3080_v21  ;;  %v10698_v20 = vpop.xlane.xlu0 %3171 }
 0x437   :  { %v10702_v37 = vpop.xlane.xlu1 %3216 }
 0x439   :  { %3231 = vmax.xlane.f32.xlu0 %v3230_v50  ;;  %v13575_v50 = vld [vmem:[#allocation52_spill] sm:$0xff] }
 0x43a   :  { %3252 = vmax.xlane.f32.xlu1 %v3251_v12  ;;  %v10707_v34 = vpop.xlane.xlu0 %3210  ;;  %v3437_v52 = vadd.s32 4294967259, %v13575_v50  ;;  %v3444_v13 = vadd.s32 4294967251, %v13575_v50 }
 0x43b   :  { %v10709_v10 = vpop.xlane.xlu1 %3237 }
 0x43d   :  { %3273 = vmax.xlane.f32.xlu0 %v3272_v25  ;;  %v13576_v25 = vld [vmem:[#allocation6_spill] sm:$0xff] }
 0x43e   :  { %3063 = vmax.xlane.f32.xlu1 %v3062_v29  ;;  %v10717_v43 = vpop.xlane.xlu0 %3195  ;;  %v10759_v23 = vsub.s32 %v3437_v52, %v13576_v25  ;;  %v3451_v29 = vadd.s32 4294967243, %v13575_v50  ;;  %v10774_v11 = vsub.s32 %v3444_v13, %v13576_v25  ;;  %v13579_v13 = vld [vmem:[#allocation21_spill] sm:$0xff] }
 0x43f   :  { %v10719_v49 = vpop.xlane.xlu1 %3069 }
 0x440   :  { %v10781_v28 = vsub.s32 %v3451_v29, %v13576_v25 }
 0x441   :  { %3084 = vmax.xlane.f32.xlu0 %v3083_v6  ;;  %v3458_v6 = vadd.s32 4294967235, %v13575_v50 }
 0x442   :  { %3255 = vmax.xlane.f32.xlu1 %v3254_v46  ;;  %v10726_v58 = vpop.xlane.xlu0 %3234 }
 0x443   :  { %v10728_v24 = vpop.xlane.xlu1 %3219 }
 0x445   :  { %3276 = vmax.xlane.f32.xlu0 %v3275_v47 }
 0x446   :  { %3087 = vmax.xlane.f32.xlu1 %v3086_v54  ;;  %v10735_v38 = vpop.xlane.xlu0 %3066 }
 0x447   :  { %v10737_v63 = vpop.xlane.xlu1 %3258 }
 0x449   :  { %3279 = vmax.xlane.f32.xlu0 %v3278_v48  ;;  %v10786_v48 = vsub.s32 %v3458_v6, %v13576_v25 }
 0x44a   :  { %v10740_v18 = vpop.xlane.xlu0 %3240 }
 0x44b   :  { %v10742_v42 = vpop.xlane.xlu1 %3072 }
 0x44e   :  { %v10744_v8 = vpop.xlane.xlu0 %3261 }
 0x44f   :  { %v10746_v57 = vpop.xlane.xlu1 %3264 }
 0x452   :  { %v10748_v21 = vpop.xlane.xlu0 %3243 }
 0x453   :  { %v10750_v55 = vpop.xlane.xlu1 %3267 }
 0x456   :  { %v10752_v36 = vpop.xlane.xlu0 %3075 }
 0x457   :  { %v2911_v12 = vpop.xlane.xlu1 %2910  ;;  %4079 = vrot.lane.b32.xlu1 %v13575_v50, %s13362_s23  ;;  %v8475_v50 = vmov 16   ;;  %s13610_s23 = smov 127  }
 0x458   :  { %v3441_v46 = vrot.slane %v2911_v12, %v10759_v23 }
 0x45a   :  { %v2914_v5 = vpop.xlane.xlu0 %2913  ;;  %v3443_v12 = vsel %vm3442_vm9, %v3441_v46, %v13579_v13 }
 0x45b   :  { %v2917_v16 = vpop.xlane.xlu1 %2916  ;;  %4093 = vperm.xlu1 %8344, %v10764_v33   ;;  %v3448_v54 = vrot.slane %v2914_v5, %v10774_v11 }
 0x45c   :  { %v3455_v29 = vrot.slane %v2917_v16, %v10781_v28 }
 0x45d   :  { %v3450_v46 = vsel %vm3449_vm10, %v3448_v54, %v3443_v12  ;;  %v13317_v54 = vmov 21  }
 0x45e   :  { %v2920_v45 = vpop.xlane.xlu0 %2919 }
 0x45f   :  { %v2935_v47 = vpop.xlane.xlu1 %2934  ;;  %4210 = vperm.xlu0 %8343, %v10771_v4   ;;  %4098 = vperm.xlu1 %8344, %v10771_v4  }
 0x460   :  { %v3487_v62 = vrot.slane %v2935_v47, %v10759_v23  ;;  %v13580_v47 = vld [vmem:[#allocation19_spill] sm:$0xff] }
 0x462   :  { %v2938_v52 = vpop.xlane.xlu0 %2937  ;;  %v3488_v5 = vsel %vm3442_vm9, %v3487_v62, %v13580_v47  ;;  %v3457_v62 = vsel %vm3456_vm11, %v3455_v29, %v3450_v46 }
 0x463   :  { %v3492_v14 = vrot.slane %v2938_v52, %v10774_v11  ;;  %v2941_v53 = vpop.xlane.xlu1 %2940  ;;  %8345 = vset.pattern.permute.xlu1 %v8475_v50  ;;  %8348 = vset.pattern.permute.xlu0 %v8476_v32  ;;  %v3462_v52 = vrot.slane %v2920_v45, %v10786_v48 }
 0x464   :  { %v3497_v6 = vrot.slane %v2941_v53, %v10781_v28  ;;  %4121 = vperm.xlu1 %8345, %v10764_v33   ;;  %4175 = vperm.xlu0 %8348, %v10771_v4  }
 0x465   :  { %v3493_v50 = vsel %vm3449_vm10, %v3492_v14, %v3488_v5  ;;  %v3464_v45 = vsel %vm3463_vm12, %v3462_v52, %v3457_v62  ;;  %v8479_v52 = vmov 22  }
 0x466   :  { %v2944_v13 = vpop.xlane.xlu0 %2943  ;;  %v3498_v53 = vsel %vm3456_vm11, %v3497_v6, %v3493_v50  ;;  %v13581_v6 = vld [vmem:[#allocation45_spill] sm:$0xff] }
 0x467   :  { %v3502_v16 = vrot.slane %v2944_v13, %v10786_v48  ;;  %v2959_v25 = vpop.xlane.xlu1 %2958  ;;  %v8478_v13 = vmov 17  }
 0x468   :  { %v3526_v47 = vrot.slane %v2959_v25, %v10759_v23  ;;  %4125 = vperm.xlu1 %8345, %v10771_v4   ;;  %8350 = vset.pattern.permute.xlu0 %v13317_v54 }
 0x469   :  { %v3503_v14 = vsel %vm3463_vm12, %v3502_v16, %v3498_v53  ;;  %4231 = vperm.xlu0 %8350, %v10764_v33  }
 0x46a   :  { %v4051_v12 = vsel %vm4050_vm13, %v3503_v14, %v3464_v45  ;;  %v2962_v5 = vpop.xlane.xlu0 %2961  ;;  %v3527_v25 = vsel %vm3442_vm9, %v3526_v47, %v13581_v6 }
 0x46b   :  { %v3531_v29 = vrot.slane %v2962_v5, %v10774_v11  ;;  %v2965_v46 = vpop.xlane.xlu1 %2964 }
 0x46c   :  { %v3536_v50 = vrot.slane %v2965_v46, %v10781_v28  ;;  %8346 = vset.pattern.permute.xlu1 %v8478_v13  ;;  %v13318_v46 = vmov 24   ;;  %v13582_v13 = vld [vmem:[#allocation10_spill] sm:$0xff] }
 0x46d   :  { %v3532_v54 = vsel %vm3449_vm10, %v3531_v29, %v3527_v25  ;;  %4146 = vperm.xlu1 %8346, %v10764_v33   ;;  %8353 = vset.pattern.permute.xlu0 %v8479_v52 }
 0x46e   :  { %v2968_v16 = vpop.xlane.xlu0 %2967  ;;  %4260 = vperm.xlu0 %8353, %v10771_v4   ;;  %v3537_v47 = vsel %vm3456_vm11, %v3536_v50, %v3532_v54 }
 0x46f   :  { %v3541_v62 = vrot.slane %v2968_v16, %v10786_v48  ;;  %v2983_v53 = vpop.xlane.xlu1 %2982 }
 0x470   :  { %v3565_v45 = vrot.slane %v2983_v53, %v10759_v23 }
 0x471   :  { %v3542_v14 = vsel %vm3463_vm12, %v3541_v62, %v3537_v47  ;;  %4150 = vperm.xlu1 %8346, %v10771_v4   ;;  %v8481_v47 = vmov 25  }
 0x472   :  { %v4053_v5 = vsel %vm4052_vm14, %v3542_v14, %v4051_v12  ;;  %v2986_v29 = vpop.xlane.xlu0 %2985  ;;  %8355 = vset.pattern.permute.xlu0 %v13318_v46  ;;  %v3566_v54 = vsel %vm3442_vm9, %v3565_v45, %v13582_v13 }
 0x473   :  { %v3570_v6 = vrot.slane %v2986_v29, %v10774_v11  ;;  %v2989_v25 = vpop.xlane.xlu1 %2988  ;;  %4306 = vperm.xlu0 %8355, %v10764_v33  }
 0x474   :  { %v3575_v50 = vrot.slane %v2989_v25, %v10781_v28  ;;  %v8482_v25 = vmov 19  }
 0x475   :  { %v3571_v16 = vsel %vm3449_vm10, %v3570_v6, %v3566_v54  ;;  %8347 = vset.pattern.permute.xlu1 %v8476_v32 }
 0x476   :  { %v2992_v62 = vpop.xlane.xlu0 %2991  ;;  %4171 = vperm.xlu1 %8347, %v10764_v33   ;;  %v3576_v14 = vsel %vm3456_vm11, %v3575_v50, %v3571_v16  ;;  %v8483_v16 = vmov 3  }
 0x477   :  { %v3580_v12 = vrot.slane %v2992_v62, %v10786_v48  ;;  %v3007_v53 = vpop.xlane.xlu1 %3006  ;;  %8358 = vset.pattern.permute.xlu0 %v8481_v47 }
 0x478   :  { %v3604_v29 = vrot.slane %v3007_v53, %v10759_v23  ;;  %4335 = vperm.xlu0 %8358, %v10771_v4  }
 0x479   :  { %v3581_v45 = vsel %vm3463_vm12, %v3580_v12, %v3576_v14 }
 0x47a   :  { %v4055_v6 = vsel %vm4054_vm15, %v3581_v45, %v4053_v5  ;;  %v3010_v32 = vpop.xlane.xlu0 %3009  ;;  %8349 = vset.pattern.permute.xlu1 %v8482_v25  ;;  %v3605_v62 = vsel %vm3442_vm9, %v3604_v29, %v10439_v0 }
 0x47b   :  { %v3609_v13 = vrot.slane %v3010_v32, %v10774_v11  ;;  %v3013_v54 = vpop.xlane.xlu1 %3012  ;;  %4196 = vperm.xlu1 %8349, %v10764_v33  }
 0x47c   :  { %v3614_v50 = vrot.slane %v3013_v54, %v10781_v28  ;;  %8359 = vset.pattern.permute.xlu0 %v8483_v16 }
 0x47d   :  { %v3610_v53 = vsel %vm3449_vm10, %v3609_v13, %v3605_v62  ;;  %v13583_v13 = vmov 21  }
 0x47e   :  { %v3016_v12 = vpop.xlane.xlu0 %3015  ;;  %v3615_v45 = vsel %vm3456_vm11, %v3614_v50, %v3610_v53 }
 0x47f   :  { %v3619_v5 = vrot.slane %v3016_v12, %v10786_v48  ;;  %v3031_v14 = vpop.xlane.xlu1 %3030  ;;  %4200 = vperm.xlu1 %8349, %v10771_v4  }
 0x480   :  { %v3643_v32 = vrot.slane %v3031_v14, %v10759_v23 }
 0x481   :  { %v3620_v25 = vsel %vm3463_vm12, %v3619_v5, %v3615_v45 }
 0x482   :  { %v4057_v0 = vsel %vm4056_vm0, %v3620_v25, %v4055_v6  ;;  %v3034_v29 = vpop.xlane.xlu0 %3033  ;;  %v3644_v62 = vsel %vm3442_vm9, %v3643_v32, %v10488_v15  ;;  %v10872_v32 = vld [vmem:[%s13163_s3 + $0x10] sm:$0xff] }
 0x483   :  { %v3648_v54 = vrot.slane %v3034_v29, %v10774_v11  ;;  %v3037_v46 = vpop.xlane.xlu1 %3036  ;;  %8351 = vset.pattern.permute.xlu1 %v13583_v13  ;;  %13585 = vst [vmem:[#allocation62_spill] sm:$0xff] %v10872_v32  ;;  %8208 = vmatprep.mubr.msk.f32.mxu1 %vm4081_vm2, %v10872_v32 }
 0x484   :  { %v3653_v12 = vrot.slane %v3037_v46, %v10781_v28  ;;  %4235 = vperm.xlu1 %8351, %v10771_v4  }
 0x485   :  { %v3649_v50 = vsel %vm3449_vm10, %v3648_v54, %v3644_v62 }
 0x486   :  { %v3040_v53 = vpop.xlane.xlu0 %3039  ;;  %v3654_v14 = vsel %vm3456_vm11, %v3653_v12, %v3649_v50  ;;  %v13586_v12 = vmov 24  }
 0x487   :  { %v3658_v5 = vrot.slane %v3040_v53, %v10786_v48  ;;  %v10858_v6 = vpop.xlane.xlu1 %3054 }
 0x488   :  { %8352 = vset.pattern.permute.xlu1 %v8479_v52  ;;  %v8484_v52 = vmov 23  }
 0x489   :  { %v3659_v45 = vsel %vm3463_vm12, %v3658_v5, %v3654_v14  ;;  %4256 = vperm.xlu1 %8352, %v10764_v33  }
 0x48a   :  { %v10865_v15 = vsel %vm4058_vm1, %v3659_v45, %v4057_v0  ;;  %v10867_v46 = vpop.xlane.xlu0 %3126 }
 0x48b   :  { %13584 = vst [vmem:[#allocation35_spill] sm:$0xff] %v10865_v15  ;;  %v10874_v25 = vpop.xlane.xlu1 %3102 }
 0x48d   :  { %8354 = vset.pattern.permute.xlu1 %v8484_v52 }
 0x48e   :  { %v10878_v29 = vpop.xlane.xlu0 %3129  ;;  %4281 = vperm.xlu1 %8354, %v10764_v33  }
 0x48f   :  { %v10881_v0 = vpop.xlane.xlu1 %3105 }
 0x492   :  { %v10883_v54 = vpop.xlane.xlu0 %3108  ;;  %4285 = vperm.xlu1 %8354, %v10771_v4  }
 0x493   :  { %v10886_v13 = vpop.xlane.xlu1 %3150 }
 0x496   :  { %v10888_v62 = vpop.xlane.xlu0 %3153  ;;  %8356 = vset.pattern.permute.xlu1 %v13586_v12 }
 0x497   :  { %v10891_v50 = vpop.xlane.xlu1 %3132  ;;  %4310 = vperm.xlu1 %8356, %v10771_v4  }
 0x49a   :  { %v10894_v53 = vpop.xlane.xlu0 %3111 }
 0x49b   :  { %13587 = vst [vmem:[#allocation58_spill] sm:$0xff] %v10894_v53  ;;  %v10896_v5 = vpop.xlane.xlu1 %3174  ;;  %8357 = vset.pattern.permute.xlu1 %v8481_v47 }
 0x49c   :  { %4331 = vperm.xlu1 %8357, %v10764_v33  }
 0x49e   :  { %v10899_v14 = vpop.xlane.xlu0 %3156 }
 0x49f   :  { %13588 = vst [vmem:[#allocation67_spill] sm:$0xff] %v10899_v14  ;;  %v10901_v45 = vpop.xlane.xlu1 %3135  ;;  %v3780_v14 = vrot.slane %v10579_v26, %v10122_v31 }
 0x4a0   :  { %8360 = vset.pattern.permute.xlu1 %v8483_v16  ;;  %v3819_v16 = vrot.slane %v10629_v41, %v10122_v31  ;;  %v3750_v41 = vrot.slane %v10601_v1, %v10138_v51  ;;  %v3897_v1 = vrot.slane %v10670_v30, %v10122_v31 }
 0x4a2   :  { %v10903_v52 = vpop.xlane.xlu0 %3198 }
 0x4a3   :  { %13589 = vst [vmem:[#allocation63_spill] sm:$0xff] %v10903_v52  ;;  %v10905_v32 = vpop.xlane.xlu1 %3177 }
 0x4a6   :  { %v10907_v12 = vpop.xlane.xlu0 %3159 }
 0x4a7   :  { %13590 = vst [vmem:[#allocation75_spill] sm:$0xff] %v10907_v12  ;;  %v10909_v15 = vpop.xlane.xlu1 %3180  ;;  %v3784_v12 = vrot.slane %v10561_v22, %v10130_v9 }
 0x4a8   :  { %13591 = vst [vmem:[#allocation72_spill] sm:$0xff] %v10909_v15 }
 0x4a9   :  { %v3785_v26 = vsel %vm3421_vm6, %v3784_v12, %v3780_v14  ;;  %v3833_v14 = vrot.slane %v10661_v60, %v10163_v61  ;;  %v3751_v60 = vsel %vm3428_vm7, %v3750_v41, %v10572_v59  ;;  %v3945_v41 = vrot.slane %v10702_v37, %v10138_v51 }
 0x4aa   :  { %v10911_v4 = vpop.xlane.xlu0 %3201 }
 0x4ab   :  { %v10913_v53 = vpop.xlane.xlu1 %3222 }
 0x4ac   :  { %13592 = vst [vmem:[#allocation9_spill] sm:$0xff] %v10913_v53  ;;  %v3789_v53 = vrot.slane %v10584_v44, %v10138_v51  ;;  %v3755_v44 = vrot.slane %v10644_v19, %v10163_v61 }
 0x4ae   :  { %v10915_v47 = vpop.xlane.xlu0 %3204  ;;  %v3790_v19 = vsel %vm3428_vm7, %v3789_v53, %v3785_v26  ;;  %v3756_v53 = vsel %vm3435_vm8, %v3755_v44, %v3751_v60  ;;  %v3975_v44 = vrot.slane %v10726_v58, %v10122_v31  ;;  %v4023_v58 = vrot.slane %v10746_v57, %v10138_v51 }
 0x4af   :  { %13593 = vst [vmem:[#allocation16_spill] sm:$0xff] %v10915_v47  ;;  %v10917_v33 = vpop.xlane.xlu1 %3183  ;;  %v3823_v47 = vrot.slane %v10606_v17, %v10130_v9  ;;  %v3862_v17 = vrot.slane %v10667_v3, %v10130_v9  ;;  %v3858_v3 = vrot.slane %v10647_v35, %v10122_v31  ;;  %v3906_v35 = vrot.slane %v10681_v40, %v10138_v51 }
 0x4b0   :  { %13594 = vst [vmem:[#allocation60_spill] sm:$0xff] %v10917_v33  ;;  %v3828_v33 = vrot.slane %v10658_v39, %v10138_v51  ;;  %v3911_v40 = vrot.slane %v10717_v43, %v10163_v61  ;;  %v3984_v43 = vrot.slane %v10740_v18, %v10138_v51  ;;  %v3706_v18 = vrot.slane %v10719_v49, %v10130_v9 }
 0x4b1   :  { %v3824_v22 = vsel %vm3421_vm6, %v3823_v47, %v3819_v16  ;;  %v3863_v26 = vsel %vm3421_vm6, %v3862_v17, %v3858_v3  ;;  %v3804_v3 = vrot.slane %v10878_v29, %v10774_v11 }
 0x4b2   :  { %v10923_v52 = vpop.xlane.xlu0 %3246  ;;  %v3829_v47 = vsel %vm3428_vm7, %v3828_v33, %v3824_v22 }
 0x4b3   :  { %13595 = vst [vmem:[#allocation57_spill] sm:$0xff] %v10923_v52  ;;  %v10927_v15 = vpop.xlane.xlu1 %3225  ;;  %v3901_v52 = vrot.slane %v10686_v2, %v10130_v9  ;;  %v3867_v2 = vrot.slane %v10677_v27, %v10138_v51  ;;  %v3940_v27 = vrot.slane %v10688_v56, %v10130_v9  ;;  %v10978_v59 = vsel %vm3435_vm8, %v3833_v14, %v3829_v47 }
 0x4b4   :  { %13596 = vst [vmem:[#allocation73_spill] sm:$0xff] %v10927_v15  ;;  %v3794_v15 = vrot.slane %v10631_v7, %v10163_v61  ;;  %v3936_v7 = vrot.slane %v10707_v34, %v10122_v31  ;;  %v3872_v34 = vrot.slane %v10698_v20, %v10163_v61  ;;  %v4018_v20 = vrot.slane %v10744_v8, %v10130_v9 }
 0x4b5   :  { %v3902_v30 = vsel %vm3421_vm6, %v3901_v52, %v3897_v1  ;;  %v3868_v52 = vsel %vm3428_vm7, %v3867_v2, %v3863_v26  ;;  %v3979_v14 = vrot.slane %v10709_v10, %v10130_v9  ;;  %v3950_v8 = vrot.slane %v10728_v24, %v10163_v61 }
 0x4b6   :  { %v10947_v39 = vpop.xlane.xlu0 %3057  ;;  %v3795_v16 = vsel %vm3435_vm8, %v3794_v15, %v3790_v19  ;;  %v3941_v56 = vsel %vm3421_vm6, %v3940_v27, %v3936_v7  ;;  %v3907_v22 = vsel %vm3428_vm7, %v3906_v35, %v3902_v30  ;;  %v3873_v17 = vsel %vm3435_vm8, %v3872_v34, %v3868_v52 }
 0x4b7   :  { %v10957_v12 = vpop.xlane.xlu1 %3078  ;;  %v4014_v1 = vrot.slane %v10737_v63, %v10122_v31  ;;  %v3946_v37 = vsel %vm3428_vm7, %v3945_v41, %v3941_v56  ;;  %v3702_v2 = vrot.slane %v10735_v38, %v10122_v31  ;;  %v3711_v10 = vrot.slane %v10742_v42, %v10138_v51 }
 0x4b8   :  { %v3989_v63 = vrot.slane %v10748_v21, %v10163_v61  ;;  %v4028_v19 = vrot.slane %v10750_v55, %v10163_v61  ;;  %v3912_v38 = vsel %vm3435_vm8, %v3911_v40, %v3907_v22  ;;  %v3980_v57 = vsel %vm3421_vm6, %v3979_v14, %v3975_v44  ;;  %v13598_v22 = vld [vmem:[#allocation67_spill] sm:$0xff] }
 0x4b9   :  { %v4019_v24 = vsel %vm3421_vm6, %v4018_v20, %v4014_v1  ;;  %v3799_v51 = vrot.slane %v10867_v46, %v10759_v23  ;;  %v11025_v42 = vsel %vm3435_vm8, %v3950_v8, %v3946_v37  ;;  %v3716_v21 = vrot.slane %v10752_v36, %v10163_v61  ;;  %v13600_v8 = vld [vmem:[#allocation31_spill] sm:$0xff] }
 0x4ba   :  { %v10975_v33 = vpop.xlane.xlu0 %3207  ;;  %v3760_v55 = vrot.slane %v10874_v25, %v10759_v23  ;;  %v3707_v47 = vsel %vm3421_vm6, %v3706_v18, %v3702_v2  ;;  %v3985_v9 = vsel %vm3428_vm7, %v3984_v43, %v3980_v57  ;;  %v4024_v49 = vsel %vm3428_vm7, %v4023_v58, %v4019_v24  ;;  %v13601_v58 = vld [vmem:[#allocation75_spill] sm:$0xff] }
 0x4bb   :  { %v10984_v15 = vpop.xlane.xlu1 %3228  ;;  %v3765_v46 = vrot.slane %v10881_v0, %v10774_v11  ;;  %v3712_v30 = vsel %vm3428_vm7, %v3711_v10, %v3707_v47  ;;  %v11040_v61 = vsel %vm3435_vm8, %v3989_v63, %v3985_v9  ;;  %v11043_v36 = vsel %vm3435_vm8, %v4028_v19, %v4024_v49  ;;  %v13603_v9 = vld [vmem:[#allocation9_spill] sm:$0xff] }
 0x4bc   :  { %v3809_v25 = vrot.slane %v10891_v50, %v10781_v28  ;;  %v3682_v27 = vrot.slane %v10858_v6, %v10759_v23  ;;  %v3800_v34 = vsel %vm3442_vm9, %v3799_v51, %v3795_v16  ;;  %v3770_v0 = vrot.slane %v10883_v54, %v10781_v28  ;;  %v13597_v54 = vld [vmem:[#allocation58_spill] sm:$0xff] }
 0x4bd   :  { %v3814_v26 = vrot.slane %v10901_v45, %v10786_v48  ;;  %v11057_v35 = vsel %vm3435_vm8, %v3716_v21, %v3712_v30  ;;  %v3761_v52 = vsel %vm3442_vm9, %v3760_v55, %v3756_v53  ;;  %v3805_v50 = vsel %vm3449_vm10, %v3804_v3, %v3800_v34 }
 0x4be   :  { %v11007_v7 = vpop.xlane.xlu0 %3249  ;;  %v3838_v56 = vrot.slane %v10886_v13, %v10759_v23  ;;  %v3766_v6 = vsel %vm3449_vm10, %v3765_v46, %v3761_v52  ;;  %v3843_v16 = vrot.slane %v10888_v62, %v10774_v11  ;;  %v3775_v20 = vrot.slane %v13597_v54, %v10786_v48  ;;  %v13599_v13 = vld [vmem:[#allocation63_spill] sm:$0xff]  ;;  %v13604_v46 = vld [vmem:[#allocation16_spill] sm:$0xff] }
 0x4bf   :  { %v11016_v31 = vpop.xlane.xlu1 %3270  ;;  %v3877_v45 = vrot.slane %v10896_v5, %v10759_v23  ;;  %v3810_v53 = vsel %vm3456_vm11, %v3809_v25, %v3805_v50  ;;  %v3848_v40 = vrot.slane %v13598_v22, %v10781_v28  ;;  %v3916_v44 = vrot.slane %v13599_v13, %v10759_v23  ;;  %v13607_v50 = vld [vmem:[#allocation73_spill] sm:$0xff] }
 0x4c0   :  { %v3882_v14 = vrot.slane %v10905_v32, %v10774_v11  ;;  %v3683_v1 = vsel %vm3442_vm9, %v3682_v27, %v13600_v8  ;;  %v3771_v5 = vsel %vm3456_vm11, %v3770_v0, %v3766_v6  ;;  %v3815_v37 = vsel %vm3463_vm12, %v3814_v26, %v3810_v53  ;;  %v13602_v32 = vld [vmem:[#allocation72_spill] sm:$0xff]  ;;  %v13606_v26 = vld [vmem:[#allocation57_spill] sm:$0xff]  ;;  %v13608_v53 = vld [vmem:[#allocation35_spill] sm:$0xff] }
 0x4c1   :  { %v3687_v2 = vrot.slane %v10947_v39, %v10774_v11  ;;  %v3839_v43 = vsel %vm3442_vm9, %v3838_v56, %v10978_v59  ;;  %v3853_v10 = vrot.slane %v13601_v58, %v10786_v48  ;;  %v3887_v24 = vrot.slane %v13602_v32, %v10781_v28 }
 0x4c2   :  { %v3061_v60 = vpop.xlane.xlu0 %3060  ;;  %v3844_v19 = vsel %vm3449_vm10, %v3843_v16, %v3839_v43  ;;  %v3776_v18 = vsel %vm3463_vm12, %v3775_v20, %v3771_v5  ;;  %v3878_v57 = vsel %vm3442_vm9, %v3877_v45, %v3873_v17  ;;  %v3921_v39 = vrot.slane %v10911_v4, %v10774_v11 }
 0x4c3   :  { %v11047_v29 = vpop.xlane.xlu1 %3081  ;;  %v3692_v63 = vrot.slane %v3061_v60, %v10781_v28  ;;  %v3849_v59 = vsel %vm3456_vm11, %v3848_v40, %v3844_v19  ;;  %v4064_v21 = vsel %vm4050_vm13, %v3815_v37, %v3776_v18  ;;  %v3917_v55 = vsel %vm3442_vm9, %v3916_v44, %v3912_v38  ;;  %v13605_v38 = vld [vmem:[#allocation60_spill] sm:$0xff] }
 0x4c4   :  { %v3883_v3 = vsel %vm3449_vm10, %v3882_v14, %v3878_v57  ;;  %v3955_v49 = vrot.slane %v13603_v9, %v10759_v23  ;;  %v3926_v60 = vrot.slane %v13604_v46, %v10781_v28  ;;  %v3688_v17 = vsel %vm3449_vm10, %v3687_v2, %v3683_v1 }
 0x4c5   :  { %v3854_v30 = vsel %vm3463_vm12, %v3853_v10, %v3849_v59  ;;  %v3888_v25 = vsel %vm3456_vm11, %v3887_v24, %v3883_v3  ;;  %v3892_v27 = vrot.slane %v13605_v38, %v10786_v48  ;;  %v3693_v34 = vsel %vm3456_vm11, %v3692_v63, %v3688_v17 }
 0x4c6   :  { %v11070_v41 = vpop.xlane.xlu0 %3231  ;;  %vm4073_vm6 = vcmask 39936   ;;  %v3922_v0 = vsel %vm3449_vm10, %v3921_v39, %v3917_v55  ;;  %v3994_v52 = vrot.slane %v13606_v26, %v10759_v23  ;;  %v3960_v56 = vrot.slane %v13607_v50, %v10774_v11  ;;  %v33_v50 = vld [vmem:[%s13163_s3 + $0x18] sm:$0xff] }
 0x4c7   :  { %v11079_v62 = vpop.xlane.xlu1 %3252  ;;  %vm4076_vm7 = vcmask 564224   ;;  %v3721_v54 = vrot.slane %v10957_v12, %v10759_v23  ;;  %v3931_v20 = vrot.slane %v10975_v33, %v10786_v48  ;;  %v3965_v45 = vrot.slane %v10984_v15, %v10781_v28 }
 0x4c8   :  { %v3956_v13 = vsel %vm3442_vm9, %v3955_v49, %v11025_v42  ;;  %v3927_v44 = vsel %vm3456_vm11, %v3926_v60, %v3922_v0  ;;  %v3999_v14 = vrot.slane %v11007_v7, %v10774_v11  ;;  %v3726_v12 = vrot.slane %v11047_v29, %v10774_v11  ;;  %v31_v0 = vld [vmem:[%s13163_s3 + $0x8] sm:$0xff] }
 0x4c9   :  { %v3893_v33 = vsel %vm3463_vm12, %v3892_v27, %v3888_v25  ;;  %v3970_v15 = vrot.slane %v11070_v41, %v10786_v48  ;;  %v4004_v8 = vrot.slane %v11079_v62, %v10781_v28  ;;  %v3995_v42 = vsel %vm3442_vm9, %v3994_v52, %v11040_v61  ;;  %v11228_v27 = vld [vmem:[%s13162_s2] sm:$0xff]  ;;  %v8391_v52 = vld [vmem:[%s13162_s2 + $0x8] sm:$0xff] }
 0x4ca   :  { %v3274_v51 = vpop.xlane.xlu0 %3273  ;;  %v3961_v5 = vsel %vm3449_vm10, %v3960_v56, %v3956_v13  ;;  %v4033_v7 = vrot.slane %v11016_v31, %v10759_v23  ;;  %v3722_v2 = vsel %vm3442_vm9, %v3721_v54, %v11057_v35  ;;  %v3932_v41 = vsel %vm3463_vm12, %v3931_v20, %v3927_v44  ;;  %v13618_v20 = vld [vmem:[#allocation62_spill] sm:$0xff] }
 0x4cb   :  { %v3064_v47 = vpop.xlane.xlu1 %3063  ;;  %v3966_v62 = vsel %vm3456_vm11, %v3965_v45, %v3961_v5  ;;  %v4038_v43 = vrot.slane %v3274_v51, %v10774_v11  ;;  %v4000_v61 = vsel %vm3449_vm10, %v3999_v14, %v3995_v42  ;;  %v3727_v10 = vsel %vm3449_vm10, %v3726_v12, %v3722_v2  ;;  %v24_v13 = vld [vmem:[%s13162_s2 + $0x10] sm:$0xff]  ;;  %v25_v14 = vld [vmem:[%s13162_s2 + $0x18] sm:$0xff]  ;;  %v13619_v12 = vld [vmem:[#allocation37_spill] sm:$0xff] }
 0x4cc   :  { %v3697_v4 = vrot.slane %v3064_v47, %v10786_v48  ;;  %v4065_v31 = vsel %vm4052_vm14, %v3854_v30, %v4064_v21  ;;  %v3971_v24 = vsel %vm3463_vm12, %v3970_v15, %v3966_v62  ;;  %v4005_v35 = vsel %vm3456_vm11, %v4004_v8, %v4000_v61  ;;  %v13616_v30 = vld [vmem:[#allocation5_spill] sm:$0xff]  ;;  %v11280_v15 = vld [vmem:[%s13161_s1 + $0x18] sm:$0xff]  ;;  %v11289_v5 = vld [vmem:[%s13161_s1 + $0x10] sm:$0xff]  ;;  %s13645_s1 = smov 100  }
 0x4cd   :  { %v4066_v19 = vsel %vm4054_vm15, %v3893_v33, %v4065_v31  ;;  %v4034_v11 = vsel %vm3442_vm9, %v4033_v7, %v11043_v36  ;;  %v8486_v44 = vmov 29   ;;  %v8487_v8 = vmov 26   ;;  %v13620_v42 = vld [vmem:[#allocation23_spill] sm:$0xff] }
 0x4ce   :  { %v3698_v6 = vsel %vm3463_vm12, %v3697_v4, %v3693_v34  ;;  %v3085_v16 = vpop.xlane.xlu0 %3084  ;;  %v4067_v39 = vsel %vm4056_vm0, %v3932_v41, %v4066_v19  ;;  %v4039_v51 = vsel %vm3449_vm10, %v4038_v43, %v4034_v11  ;;  %v8488_v7 = vmov 28   ;;  %v13621_v43 = vld [vmem:[#allocation52_spill] sm:$0xff] }
 0x4cf   :  { %v4061_v22 = vsel %vm4060_vm3, %v3698_v6, %v13608_v53  ;;  %v3256_v40 = vpop.xlane.xlu1 %3255  ;;  %v3731_v1 = vrot.slane %v3085_v16, %v10781_v28  ;;  %v4068_v55 = vsel %vm4058_vm1, %v3971_v24, %v4067_v39  ;;  %v11253_v16 = vld [vmem:[%s13163_s3] sm:$0xff]  ;;  %v8489_v2 = vmov 30  }
 0x4d0   :  { %v4009_v29 = vrot.slane %v3256_v40, %v10786_v48  ;;  %v8491_v31 = vmov 27   ;;  %v13329_v24 = vmov 5   ;;  %v8493_v39 = vmov 31  }
 0x4d1   :  { %v3732_v63 = vsel %vm3456_vm11, %v3731_v1, %v3727_v10  ;;  %v8490_v10 = vmov 32  }
 0x4d2   :  { %v3277_v37 = vpop.xlane.xlu0 %3276  ;;  %v4010_v18 = vsel %vm3463_vm12, %v4009_v29, %v4005_v35 }
 0x4d3   :  { %v3088_v58 = vpop.xlane.xlu1 %3087  ;;  %v4043_v32 = vrot.slane %v3277_v37, %v10781_v28  ;;  %v4069_v36 = vsel %vm4060_vm3, %v4010_v18, %v4068_v55 }
 0x4d4   :  { %v3736_v23 = vrot.slane %v3088_v58, %v10786_v48 }
 0x4d5   :  { %v4044_v3 = vsel %vm3456_vm11, %v4043_v32, %v4039_v51 }
 0x4d6   :  { %v3737_v57 = vsel %vm3463_vm12, %v3736_v23, %v3732_v63  ;;  %v3280_v28 = vpop.xlane.xlu0 %3279 }
 0x4d7   :  { %v4063_v59 = vsel %vm13328_vm4, %v3737_v57, %v4061_v22  ;;  %v4048_v21 = vrot.slane %v3280_v28, %v10786_v48  ;;  %v11202_v17 = vpop.permute.xlu1 %4079  ;;  %v8485_v22 = vmov 4  }
 0x4d8   :  { %v4074_v47 = vsel %vm4073_vm6, 0.0, %v4063_v59 }
 0x4d9   :  { %v11174_v9 = vsel %vm4076_vm7, %v4074_v47, 0.0  ;;  %v4049_v49 = vsel %vm3463_vm12, %v4048_v21, %v4044_v3 }
 0x4da   :  { %v4070_v46 = vsel %vm13328_vm4, %v4049_v49, %v4069_v36  ;;  %4137 = vrot.lane.b32.xlu0 %v11174_v9, %s13609_s10  ;;  %4112 = vrot.lane.b32.xlu1 %v11174_v9, %s13610_s23  ;;  %v4213_v25 = vmul.f32 %v13616_v30, %v11174_v9  ;;  %v4082_v36 = vsel %vm4081_vm2, %v13621_v43, %v11202_v17 }
 0x4db   :  { %v4075_v48 = vsel %vm4073_vm6, 0.0, %v4070_v46  ;;  %v11212_v4 = vpop.permute.xlu1 %4093  ;;  %vm4083_vm8 = vcmp.ge.s32.totalorder %v4082_v36, 5  ;;  %vm4103_vm9 = vcmp.ge.s32.totalorder %v4082_v36, 4  ;;  %vm4155_vm10 = vcmp.ge.s32.totalorder %v4082_v36, 2 }
 0x4dc   :  { %v11184_v60 = vsel %vm4076_vm7, %v4075_v48, 0.0  ;;  %v13330_v48 = vmov 0   ;;  %vm4130_vm11 = vcmp.ge.s32.totalorder %v4082_v36, 3  ;;  %vm4180_vm12 = vcmp.ge.s32.totalorder %v4082_v36, 1 }
 0x4dd   :  { %v4084_v30 = vsel %vm4083_vm8, 1, %v13330_v48  ;;  %vm4240_vm6 = vcmp.lt.s32.totalorder %v4082_v36, 30  ;;  %v4104_v17 = vsel %vm4103_vm9, 1, %v13330_v48  ;;  %vm4215_vm7 = vcmp.lt.s32.totalorder %v4082_v36, 31 }
 0x4de   :  { %4162 = vrot.lane.b32.xlu0 %v11174_v9, %s13611_s24  ;;  %4114 = vrot.lane.b32.xlu1 %v11184_v60, %s13610_s23  ;;  %v4211_v26 = vpop.permute.xlu0 %4210  ;;  %vm4265_vm8 = vcmp.lt.s32.totalorder %v4082_v36, 29  ;;  %vm4290_vm9 = vcmp.lt.s32.totalorder %v4082_v36, 28 }
 0x4df   :  { %v11220_v38 = vpop.permute.xlu1 %4098  ;;  %v4214_v56 = vmul.f32 %v4211_v26, %v11184_v60  ;;  %v4156_v26 = vsel %vm4155_vm10, 1, %v13330_v48  ;;  %vm4315_vm10 = vcmp.lt.s32.totalorder %v4082_v36, 27 }
 0x4e2   :  { %4187 = vrot.lane.b32.xlu0 %v11174_v9, %s8431_s0  ;;  %4139 = vrot.lane.b32.xlu1 %v11184_v60, %s13609_s10 }
 0x4e3   :  { %v11233_v34 = vpop.permute.xlu1 %4121  ;;  %v11296_v37 = vpop.permute.xlu0 %4175 }
 0x4e6   :  { %4222 = vrot.lane.b32.xlu0 %v11174_v9, %s13612_s26  ;;  %4164 = vrot.lane.b32.xlu1 %v11184_v60, %s13611_s24 }
 0x4e7   :  { %v11246_v6 = vpop.permute.xlu1 %4125 }
 0x4e8   :  { %v11304_v62 = vpop.permute.xlu0 %4231 }
 0x4ea   :  { %4247 = vrot.lane.b32.xlu0 %v11174_v9, %s13613_s22  ;;  %4189 = vrot.lane.b32.xlu1 %v11184_v60, %s8431_s0 }
 0x4ec   :  { %v11255_v54 = vpop.permute.xlu1 %4146 }
 0x4ed   :  { %v11312_v61 = vpop.permute.xlu0 %4260 }
 0x4ee   :  { %4272 = vrot.lane.b32.xlu0 %v11174_v9, %s8436_s27  ;;  %4224 = vrot.lane.b32.xlu1 %v11184_v60, %s13612_s26 }
 0x4f0   :  { %v11261_v45 = vpop.permute.xlu1 %4150 }
 0x4f2   :  { %4297 = vrot.lane.b32.xlu0 %v11174_v9, %s13614_s21  ;;  %4249 = vrot.lane.b32.xlu1 %v11184_v60, %s13613_s22  ;;  %v11319_v23 = vpop.permute.xlu0 %4306 }
 0x4f5   :  { %v11263_v53 = vpop.permute.xlu1 %4171 }
 0x4f6   :  { %4322 = vrot.lane.b32.xlu0 %v11174_v9, %s13615_s25  ;;  %4274 = vrot.lane.b32.xlu1 %v11184_v60, %s8436_s27 }
 0x4f7   :  { %v11327_v63 = vpop.permute.xlu0 %4335 }
 0x4fa   :  { %4346 = vrot.lane.b32.xlu0 %v4213_v25, %s13617_s29  ;;  %4299 = vrot.lane.b32.xlu1 %v11184_v60, %s13614_s21  ;;  %v11265_v40 = vpop.permute.xlu1 %4196  ;;  %v13622_v25 = vld [vmem:[#allocation7_spill] sm:$0xff] }
 0x4fe   :  { %4369 = vperm.xlu0 %8359, %v11228_v27   ;;  %4324 = vrot.lane.b32.xlu1 %v11184_v60, %s13615_s25  ;;  %v11275_v33 = vpop.permute.xlu1 %4200 }
 0x502   :  { %4373 = vperm.xlu1 %8360, %v8391_v52   ;;  %4402 = vrot.lane.b32.xlu0 %v31_v0, %s8448_s15  ;;  %v4088_v0 = vrot.slane %v4084_v30, %v13622_v25 }
 0x503   :  { %8362 = vset.pattern.permute.xlu0 %v8485_v22  ;;  %v11283_v1 = vpop.permute.xlu1 %4235 }
 0x504   :  { %vm11383_vm4 = vcmp.eq.s32.totalorder %v4088_v0, 1 }
 0x505   :  { %v4090_v30 = vsel %vm11383_vm4, %v11174_v9, 0.0  ;;  %v4091_v9 = vsel %vm11383_vm4, %v11184_v60, 0.0 }
 0x506   :  { %4348 = vrot.lane.b32.xlu1 %v4214_v56, %s13617_s29  ;;  %4406 = vrot.lane.b32.xlu0 %v33_v50, %s8448_s15 }
 0x507   :  { %8361 = vset.pattern.permute.xlu1 %v8485_v22  ;;  %v4241_v22 = vsel %vm4240_vm6, 1, %v13330_v48 }
 0x508   :  { %v11294_v29 = vpop.permute.xlu1 %4256 }
 0x50a   :  { %4400 = vrot.lane.b32.xlu1 %v11253_v16, %s8448_s15  ;;  %4383 = vperm.xlu0 %8362, %v8391_v52   ;;  %v4131_v52 = vsel %vm4130_vm11, 1, %v13330_v48 }
 0x50d   :  { %v11301_v41 = vpop.permute.xlu1 %4281 }
 0x50e   :  { %4404 = vrot.lane.b32.xlu1 %v13618_v20, %s8448_s15  ;;  %8364 = vset.pattern.permute.xlu0 %v8486_v44  ;;  %v4181_v20 = vsel %vm4180_vm12, 1, %v13330_v48 }
 0x50f   :  { %6499 = vperm.xlu0 %8364, %v13619_v12  }
 0x511   :  { %v11310_v58 = vpop.permute.xlu1 %4285 }
 0x512   :  { %4379 = vperm.xlu1 %8361, %v11228_v27  }
 0x513   :  { %8372 = vset.pattern.permute.xlu0 %v8487_v8 }
 0x514   :  { %6397 = vperm.xlu0 %8372, %v11280_v15  }
 0x516   :  { %4388 = vperm.xlu1 %8361, %v24_v13   ;;  %v11317_v32 = vpop.permute.xlu1 %4310 }
 0x518   :  { %8373 = vset.pattern.permute.xlu0 %v8488_v7 }
 0x519   :  { %6475 = vperm.xlu0 %8373, %v13620_v42  }
 0x51a   :  { %4393 = vperm.xlu1 %8361, %v25_v14   ;;  %v4160_v14 = vrot.slane %v4156_v26, %v13622_v25  ;;  %v4316_v26 = vsel %vm4315_vm10, 1, %v13330_v48 }
 0x51b   :  { %v11324_v35 = vpop.permute.xlu1 %4331 }
 0x51c   :  { %vm11403_vm12 = vcmp.eq.s32.totalorder %v4160_v14, 1  ;;  %v4101_v14 = vmul.f32 %v11212_v4, %v4090_v30 }
 0x51d   :  { %6483 = vperm.xlu0 %8373, %v11289_v5  }
 0x51e   :  { %8363 = vset.pattern.permute.xlu1 %v8486_v44  ;;  %v4108_v44 = vrot.slane %v4104_v17, %v13622_v25  ;;  %v4291_v17 = vsel %vm4290_vm9, 1, %v13330_v48 }
 0x51f   :  { %6495 = vperm.xlu1 %8363, %v13620_v42   ;;  %v4295_v13 = vrot.slane %v4291_v17, %v13622_v25 }
 0x520   :  { %vm11399_vm11 = vcmp.eq.s32.totalorder %v4108_v44, 1 }
 0x521   :  { %8375 = vset.pattern.permute.xlu0 %v8489_v2  ;;  %vm11479_vm10 = vcmp.eq.s32.totalorder %v4295_v13, 1 }
 0x522   :  { %6542 = vperm.xlu0 %8375, %v13619_v12  }
 0x523   :  { %6503 = vperm.xlu1 %8363, %v11289_v5  }
 0x526   :  { %6550 = vperm.xlu0 %8375, %v11280_v15  }
 0x527   :  { %6507 = vperm.xlu1 %8363, %v11280_v15  }
 0x52a   :  { %8378 = vset.pattern.permute.xlu0 %v8490_v10 }
 0x52b   :  { %6367 = vrot.lane.b32.xlu1 %v13621_v43, %s8470_s20  ;;  %6624 = vperm.xlu0 %8378, %v13620_v42   ;;  %s13647_s20 = smov 68  }
 0x52c   :  { %8365 = vset.pattern.permute.xlu1 %v8487_v8 }
 0x52f   :  { %6383 = vperm.xlu1 %8365, %v13620_v42   ;;  %6632 = vperm.xlu0 %8378, %v11289_v5  }
 0x533   :  { %6387 = vperm.xlu1 %8365, %v13619_v12   ;;  %8382 = vset.pattern.permute.xlu0 %v13329_v24 }
 0x537   :  { %8366 = vset.pattern.permute.xlu1 %v8491_v31 }
 0x538   :  { %6432 = vperm.xlu1 %8366, %v13620_v42  }
 0x53c   :  { %6436 = vperm.xlu1 %8366, %v13619_v12  }
 0x540   :  { %8367 = vset.pattern.permute.xlu1 %v8488_v7 }
 0x541   :  { %6479 = vperm.xlu1 %8367, %v13619_v12  }
 0x545   :  { %8368 = vset.pattern.permute.xlu1 %v8489_v2 }
 0x546   :  { %6538 = vperm.xlu1 %8368, %v13620_v42  }
 0x54a   :  { %8369 = vset.pattern.permute.xlu1 %v8493_v39 }
 0x54b   :  { %6581 = vperm.xlu1 %8369, %v13620_v42   ;;  %v4216_v42 = vsel %vm4215_vm7, 1, %v13330_v48 }
 0x54c   :  { %v11331_v19 = vpop.permute.xlu1 %4112  ;;  %v11333_v11 = vpop.permute.xlu0 %4137 }
 0x54f   :  { %6585 = vperm.xlu1 %8369, %v13619_v12  }
 0x550   :  { %v11336_v18 = vpop.permute.xlu1 %4114  ;;  %v11339_v57 = vpop.permute.xlu0 %4162 }
 0x553   :  { %8370 = vset.pattern.permute.xlu1 %v8490_v10 }
 0x554   :  { %v11341_v28 = vpop.permute.xlu1 %4139  ;;  %v11345_v51 = vpop.permute.xlu0 %4187  ;;  %6628 = vperm.xlu1 %8370, %v13619_v12   ;;  %v4135_v12 = vrot.slane %v4131_v52, %v13622_v25 }
 0x556   :  { %vm11420_vm6 = vcmp.eq.s32.totalorder %v4135_v12, 1  ;;  %v4320_v12 = vrot.slane %v4316_v26, %v13622_v25 }
 0x557   :  { %v4143_v4 = vsel %vm11420_vm6, %v11333_v11, 0.0 }
 0x558   :  { %v11347_v59 = vpop.permute.xlu1 %4164  ;;  %v11352_v21 = vpop.permute.xlu0 %4222  ;;  %8371 = vset.pattern.permute.xlu1 %v8487_v8  ;;  %v4185_v8 = vrot.slane %v4181_v20, %v13622_v25  ;;  %v4168_v20 = vsel %vm11403_vm12, %v11339_v57, 0.0  ;;  %v4118_v57 = vsel %vm11399_vm11, %v11331_v19, 0.0 }
 0x559   :  { %6392 = vperm.xlu1 %8371, %v11289_v5   ;;  %v4169_v19 = vsel %vm11403_vm12, %v11347_v59, 0.0  ;;  %v4128_v59 = vmul.f32 %v11233_v34, %v4118_v57  ;;  %vm4408_vm12 = vcmask 130048  }
 0x55a   :  { %vm11424_vm7 = vcmp.eq.s32.totalorder %v4185_v8, 1  ;;  %v4178_v8 = vmul.f32 %v11263_v53, %v4168_v20  ;;  %v4119_v53 = vsel %vm11399_vm11, %v11336_v18, 0.0  ;;  %v4179_v0 = vmul.f32 %v11296_v37, %v4169_v19 }
 0x55b   :  { %vm11483_vm11 = vcmp.eq.s32.totalorder %v4320_v12, 1 }
 0x55c   :  { %v11354_v55 = vpop.permute.xlu1 %4189  ;;  %v11357_v3 = vpop.permute.xlu0 %4247 }
 0x55d   :  { %8374 = vset.pattern.permute.xlu1 %v8491_v31  ;;  %v4266_v31 = vsel %vm4265_vm8, 1, %v13330_v48 }
 0x55e   :  { %6440 = vperm.xlu1 %8374, %v11289_v5   ;;  %v4270_v44 = vrot.slane %v4266_v31, %v13622_v25 }
 0x560   :  { %v11359_v47 = vpop.permute.xlu1 %4224  ;;  %v11365_v49 = vpop.permute.xlu0 %4272  ;;  %vm11460_vm9 = vcmp.eq.s32.totalorder %v4270_v44, 1 }
 0x562   :  { %6444 = vperm.xlu1 %8374, %v11280_v15  }
 0x564   :  { %v11367_v46 = vpop.permute.xlu1 %4249  ;;  %v11376_v50 = vpop.permute.xlu0 %4297 }
 0x565   :  { %v4303_v26 = vsel %vm11479_vm10, %v11376_v50, 0.0 }
 0x566   :  { %8376 = vset.pattern.permute.xlu1 %v8488_v7  ;;  %v4245_v7 = vrot.slane %v4241_v22, %v13622_v25  ;;  %v4220_v22 = vrot.slane %v4216_v42, %v13622_v25  ;;  %v4193_v42 = vsel %vm11424_vm7, %v11345_v51, 0.0  ;;  %v4313_v44 = vmul.f32 %v11319_v23, %v4303_v26 }
 0x567   :  { %6487 = vperm.xlu1 %8376, %v11280_v15   ;;  %v4203_v30 = vmul.f32 %v11265_v40, %v4193_v42 }
 0x568   :  { %v11378_v56 = vpop.permute.xlu1 %4274  ;;  %v11409_v52 = vpop.permute.xlu0 %4322  ;;  %vm11428_vm8 = vcmp.eq.s32.totalorder %v4245_v7, 1  ;;  %v4102_v7 = vmul.f32 %v11220_v38, %v4091_v9  ;;  %vm11456_vm4 = vcmp.eq.s32.totalorder %v4220_v22, 1  ;;  %v4144_v38 = vsel %vm11420_vm6, %v11341_v28, 0.0 }
 0x569   :  { %v4253_v11 = vsel %vm11428_vm8, %v11357_v3, 0.0  ;;  %v4153_v3 = vmul.f32 %v11255_v54, %v4143_v4  ;;  %v4254_v34 = vsel %vm11428_vm8, %v11367_v46, 0.0  ;;  %v4129_v54 = vmul.f32 %v11246_v6, %v4119_v53 }
 0x56a   :  { %v4263_v36 = vmul.f32 %v11294_v29, %v4253_v11  ;;  %v4154_v40 = vmul.f32 %v11261_v45, %v4144_v38  ;;  %v4229_v37 = vsel %vm11456_vm4, %v11359_v47, 0.0  ;;  %v4194_v46 = vsel %vm11424_vm7, %v11354_v55, 0.0 }
 0x56b   :  { %8377 = vset.pattern.permute.xlu1 %v8489_v2  ;;  %v4342_v24 = vadd.f32 %v4178_v8, %v4153_v3  ;;  %v4264_v17 = vmul.f32 %v11312_v61, %v4254_v34  ;;  %v4278_v47 = vsel %vm11460_vm9, %v11365_v49, 0.0  ;;  %v4239_v48 = vmul.f32 %v11283_v1, %v4229_v37 }
 0x56c   :  { %6546 = vperm.xlu1 %8377, %v11289_v5   ;;  %v4300_v2 = vpop.permute.xlu1 %4299  ;;  %v4347_v18 = vpop.permute.xlu0 %4346  ;;  %v4343_v20 = vadd.f32 %v4179_v0, %v4154_v40  ;;  %v4279_v61 = vsel %vm11460_vm9, %v11378_v56, 0.0  ;;  %v4328_v55 = vsel %vm11483_vm11, %v11409_v52, 0.0  ;;  %v4288_v60 = vmul.f32 %v11301_v41, %v4278_v47 }
 0x56d   :  { %v4352_v6 = vadd.f32 %v4347_v18, %v4203_v30  ;;  %v4304_v45 = vsel %vm11479_vm10, %v4300_v2, 0.0  ;;  %v4204_v2 = vmul.f32 %v11275_v33, %v4194_v46  ;;  %v4355_v57 = vadd.f32 %v4264_v17, %v4239_v48 }
 0x56e   :  { %v4314_v49 = vmul.f32 %v11317_v32, %v4304_v45  ;;  %v4289_v4 = vmul.f32 %v11310_v58, %v4279_v61  ;;  %v4338_v13 = vmul.f32 %v11324_v35, %v4328_v55  ;;  %v4356_v23 = vadd.f32 %v4313_v44, %v4288_v60 }
 0x56f   :  { %vm6357_vm6 = vcmask 23552   ;;  %vm6362_vm7 = vcmask 154624   ;;  %vm13667_vm8 = vcmask 1047559  }
 0x570   :  { %8379 = vset.pattern.permute.xlu1 %v8493_v39  ;;  %v4325_v31 = vpop.permute.xlu1 %4324  ;;  %v4357_v32 = vadd.f32 %v4314_v49, %v4289_v4  ;;  %v4362_v41 = vadd.f32 %v4356_v23, %v4338_v13 }
 0x571   :  { %6589 = vperm.xlu1 %8379, %v11289_v5   ;;  %v4228_v5 = vsel %vm11456_vm4, %v11352_v21, 0.0  ;;  %v4329_v50 = vsel %vm11483_vm11, %v4325_v31, 0.0  ;;  %vm13668_vm4 = vmmov %vm13667_vm8  ;;  %vm6369_vm11 = vcmask 64512  }
 0x572   :  { %v4238_v29 = vmul.f32 %v11304_v62, %v4228_v5  ;;  %v4340_v62 = vadd.f32 %v4128_v59, %v4101_v14  ;;  %v4341_v14 = vadd.f32 %v4129_v54, %v4102_v7  ;;  %vm13669_vm9 = vmmov %vm13668_vm4 }
 0x573   :  { %vm13670_vm10 = vmmov %vm13668_vm4 }
 0x574   :  { %v4354_v22 = vadd.f32 %v4263_v36, %v4238_v29  ;;  %v4358_v56 = vadd.f32 %v4342_v24, %v4340_v62  ;;  %v4359_v12 = vadd.f32 %v4343_v20, %v4341_v14 }
 0x575   :  { %6593 = vperm.xlu1 %8379, %v11280_v15  }
 0x576   :  { %v4360_v1 = vadd.f32 %v4354_v22, %v4352_v6 }
 0x578   :  { %v4364_v8 = vadd.f32 %v4360_v1, %v4358_v56 }
 0x579   :  { %8380 = vset.pattern.permute.xlu1 %v8490_v10  ;;  %v4339_v10 = vmul.f32 %v11327_v63, %v4329_v50 }
 0x57a   :  { %6636 = vperm.xlu1 %8380, %v11280_v15   ;;  %v13643_v15 = vmov 5   ;;  %v4366_v35 = vadd.f32 %v4364_v8, %v4362_v41 }
 0x57b   :  { %v4363_v11 = vadd.f32 %v4357_v32, %v4339_v10 }
 0x57d   :  { %v4370_v58 = vpop.permute.xlu0 %4369 }
 0x57e   :  { %8381 = vset.pattern.permute.xlu1 %v13643_v15  ;;  %v4376_v53 = vadd.f32 %v4370_v58, %v4366_v35 }
 0x57f   :  { %6684 = vperm.xlu1 %8381, %v11228_v27  }
 0x581   :  { %v4374_v9 = vpop.permute.xlu1 %4373  ;;  %v4403_v59 = vpop.permute.xlu0 %4402 }
 0x585   :  { %v4349_v52 = vpop.permute.xlu1 %4348  ;;  %v4407_v27 = vpop.permute.xlu0 %4406 }
 0x586   :  { %v4353_v33 = vadd.f32 %v4349_v52, %v4204_v2 }
 0x588   :  { %v4361_v42 = vadd.f32 %v4355_v57, %v4353_v33 }
 0x589   :  { %v4401_v19 = vpop.permute.xlu1 %4400  ;;  %v4384_v30 = vpop.permute.xlu0 %4383 }
 0x58a   :  { %v4365_v7 = vadd.f32 %v4361_v42, %v4359_v12  ;;  %8191 = vmatprep.mubr.msk.f32.mxu0 %vm4408_vm12, %v4401_v19 }
 0x58c   :  { %v4367_v63 = vadd.f32 %v4365_v7, %v4363_v11 }
 0x58d   :  { %v4405_v3 = vpop.permute.xlu1 %4404 }
 0x58e   :  { %v4377_v39 = vadd.f32 %v4374_v9, %v4367_v63  ;;  %v11635_v2 = vpop.permute.xlu0 %6499 }
 0x590   :  { %v8217_v51 = vpack.c.bf16 %v4377_v39, %v4376_v53 }
 0x591   :  { %v4380_v38 = vpop.permute.xlu1 %4379 }
 0x592   :  { %8218 = vmatprep.subr.bf16.mxu0 %v8217_v51 }
 0x593   :  { %8220 = vmatpush3.bf16.msra.mxu0 %v8217_v51  ;;  %v11647_v49 = vpop.permute.xlu0 %6397 }
 0x594   :  { %13652 = vst [vmem:[#allocation42_spill] sm:$0xff] %v11647_v49 }
 0x595   :  { %v4389_v5 = vpop.permute.xlu1 %4388 }
 0x596   :  { %8192 = vmatmul.mubr.msk.f32.vlgmr.msra.gmra.mrb[0].mxu0 %vm4408_vm12, %v4403_v59 }
 0x597   :  { %8194 = vmatprep.mubr.msk.f32.mxu0 %vm4408_vm12, %v4405_v3  ;;  %v13664_v3 = vld [vmem:[#allocation14_spill] sm:$0xff] }
 0x598   :  { %v11655_v14 = vpop.permute.xlu0 %6475 }
 0x599   :  { %v4394_v18 = vpop.permute.xlu1 %4393 }
 0x59a   :  { %8195 = vmatmul.mubr.msk.f32.gmra.mrb[2].mxu0 %vm4408_vm12, %v4407_v27 }
 0x59b   :  { %8205 = vmatprep.mubr.msk.f32.mxu0 %vm4081_vm2, %v11253_v16 }
 0x59c   :  { %v11667_v60 = vpop.permute.xlu0 %6483 }
 0x59d   :  { %13655 = vst [vmem:[#allocation32_spill] sm:$0xff] %v11667_v60 }
 0x59e   :  { %v11531_v31 = vpop.permute.xlu1 %6495 }
 0x5a1   :  { %v11675_v52 = vpop.permute.xlu0 %6542 }
 0x5a2   :  { %v11535_v24 = vpop.permute.xlu1 %6503 }
 0x5a5   :  { %v11687_v13 = vpop.permute.xlu0 %6550 }
 0x5a6   :  { %v11545_v21 = vpop.permute.xlu1 %6507  ;;  %13658 = vst [vmem:[#allocation24_spill] sm:$0xff] %v11687_v13 }
 0x5aa   :  { %v11551_v40 = vpop.permute.xlu1 %6367  ;;  %v11697_v12 = vpop.permute.xlu0 %6624 }
 0x5ab   :  { %13661 = vst [vmem:[#allocation74_spill] sm:$0xff] %v11697_v12 }
 0x5ae   :  { %v11557_v29 = vpop.permute.xlu1 %6383  ;;  %v11709_v32 = vpop.permute.xlu0 %6632 }
 0x5af   :  { %13644 = vst [vmem:[#allocation70_spill] sm:$0xff] %v11557_v29  ;;  %13663 = vst [vmem:[#allocation64_spill] sm:$0xff] %v11709_v32 }
 0x5b2   :  { %v11567_v37 = vpop.permute.xlu1 %6387 }
 0x5b7   :  { %v11575_v17 = vpop.permute.xlu1 %6432 }
 0x5b8   :  { %13646 = vst [vmem:[#allocation50_spill] sm:$0xff] %v11575_v17 }
 0x5bb   :  { %v11585_v26 = vpop.permute.xlu1 %6436 }
 0x5c0   :  { %v11591_v45 = vpop.permute.xlu1 %6479 }
 0x5c5   :  { %v11597_v9 = vpop.permute.xlu1 %6538 }
 0x5c6   :  { %13648 = vst [vmem:[#allocation49_spill] sm:$0xff] %v11597_v9 }
 0x5ca   :  { %v11607_v62 = vpop.permute.xlu1 %6581 }
 0x5cb   :  { %13649 = vst [vmem:[#allocation44_spill] sm:$0xff] %v11607_v62 }
 0x5ce   :  { %v11613_v47 = vpop.permute.xlu1 %6585 }
 0x5d3   :  { %v11623_v55 = vpop.permute.xlu1 %6628 }
 0x5d8   :  { %v11633_v50 = vpop.permute.xlu1 %6392 }
 0x5d9   :  { %13650 = vst [vmem:[#allocation11_spill] sm:$0xff] %v11633_v50  ;;  %v13665_v50 = vld [vmem:[#allocation18_spill] sm:$0xff] }
 0x5dd   :  { %v11641_v44 = vpop.permute.xlu1 %6440 }
 0x5de   :  { %13651 = vst [vmem:[#allocation47_spill] sm:$0xff] %v11641_v44 }
 0x5e1   :  { %v11653_v1 = vpop.permute.xlu1 %6444 }
 0x5e2   :  { %13653 = vst [vmem:[#allocation56_spill] sm:$0xff] %v11653_v1 }
 0x5e6   :  { %v11661_v56 = vpop.permute.xlu1 %6487 }
 0x5e7   :  { %13654 = vst [vmem:[#allocation51_spill] sm:$0xff] %v11661_v56 }
 0x5eb   :  { %v11669_v57 = vpop.permute.xlu1 %6546 }
 0x5ec   :  { %13656 = vst [vmem:[#allocation59_spill] sm:$0xff] %v11669_v57 }
 0x5f0   :  { %v11677_v4 = vpop.permute.xlu1 %6589 }
 0x5f1   :  { %13657 = vst [vmem:[#allocation54_spill] sm:$0xff] %v11677_v4 }
 0x5f4   :  { %v11689_v10 = vpop.permute.xlu1 %6593 }
 0x5f5   :  { %13659 = vst [vmem:[#allocation26_spill] sm:$0xff] %v11689_v10 }
 0x5f9   :  { %v11695_v33 = vpop.permute.xlu1 %6636 }
 0x5fa   :  { %13660 = vst [vmem:[#allocation13_spill] sm:$0xff] %v11695_v33 }
 0x5fe   :  { %v11707_v23 = vpop.permute.xlu1 %6684 }
 0x5ff   :  { %13662 = vst [vmem:[#allocation69_spill] sm:$0xff] %v11707_v23 }
 0x669   :  { %v8193_v0 = vpop.f32.mrb[0].mxu0 }
 0x66a   :  { %v4489_v36 = vadd.f32 %v8193_v0, %v4384_v30  ;;  %v4483_v34 = vpop.f32.mrb[1].mxu0 }
 0x66b   :  { %v4484_v6 = vadd.f32 %v4483_v34, %v4380_v38 }
 0x66c   :  { %v11533_v54 = vmax.f32 %v4489_v36, 0.0 }
 0x66d   :  { %v8196_v28 = vpop.f32.mrb[2].mxu0  ;;  %v11573_v46 = vmax.f32 %v4484_v6, 0.0 }
 0x66e   :  { %4596 = vrot.lane.b32.xlu0 %v11533_v54, %s8448_s15  ;;  %4512 = vrot.lane.b32.xlu1 %v11533_v54, %s8431_s0  ;;  %v4493_v16 = vpop.f32.mrb[3].mxu0  ;;  %v4499_v20 = vadd.f32 %v8196_v28, %v4394_v18 }
 0x66f   :  { %v4494_v22 = vadd.f32 %v4493_v16, %v4389_v5 }
 0x670   :  { %v11619_v48 = vmax.f32 %v4499_v20, 0.0 }
 0x671   :  { %v11621_v61 = vmax.f32 %v4494_v22, 0.0 }
 0x672   :  { %4608 = vrot.lane.b32.xlu0 %v11533_v54, %s8449_s16  ;;  %4524 = vrot.lane.b32.xlu1 %v11533_v54, %s8436_s27 }
 0x676   :  { %4620 = vrot.lane.b32.xlu0 %v11533_v54, %s8450_s17  ;;  %4536 = vrot.lane.b32.xlu1 %v11533_v54, %s8440_s5 }
 0x67a   :  { %4632 = vrot.lane.b32.xlu0 %v11533_v54, %s8451_s18  ;;  %4548 = vrot.lane.b32.xlu1 %v11533_v54, %s8444_s11 }
 0x67e   :  { %4644 = vrot.lane.b32.xlu0 %v11533_v54, %s8452_s19  ;;  %4560 = vrot.lane.b32.xlu1 %v11533_v54, %s8445_s12 }
 0x682   :  { %4656 = vrot.lane.b32.xlu0 %v11533_v54, %s8453_s28  ;;  %4572 = vrot.lane.b32.xlu1 %v11533_v54, %s8446_s13 }
 0x686   :  { %4668 = vrot.lane.b32.xlu0 %v11533_v54, %s8454_s30  ;;  %4584 = vrot.lane.b32.xlu1 %v11533_v54, %s13645_s1 }
 0x68a   :  { %4680 = vrot.lane.b32.xlu0 %v11533_v54, %s13647_s20  ;;  %4594 = vrot.lane.b32.xlu1 %v11573_v46, %s8448_s15 }
 0x68e   :  { %4510 = vrot.lane.b32.xlu0 %v11573_v46, %s8431_s0  ;;  %4606 = vrot.lane.b32.xlu1 %v11573_v46, %s8449_s16 }
 0x692   :  { %4522 = vrot.lane.b32.xlu0 %v11573_v46, %s8436_s27  ;;  %4618 = vrot.lane.b32.xlu1 %v11573_v46, %s8450_s17 }
 0x696   :  { %4534 = vrot.lane.b32.xlu0 %v11573_v46, %s8440_s5  ;;  %4630 = vrot.lane.b32.xlu1 %v11573_v46, %s8451_s18 }
 0x69a   :  { %4546 = vrot.lane.b32.xlu0 %v11573_v46, %s8444_s11  ;;  %4642 = vrot.lane.b32.xlu1 %v11573_v46, %s8452_s19 }
 0x69e   :  { %4558 = vrot.lane.b32.xlu0 %v11573_v46, %s8445_s12  ;;  %4654 = vrot.lane.b32.xlu1 %v11573_v46, %s8453_s28 }
 0x6a2   :  { %4570 = vrot.lane.b32.xlu0 %v11573_v46, %s8446_s13  ;;  %4666 = vrot.lane.b32.xlu1 %v11573_v46, %s8454_s30 }
 0x6a6   :  { %4582 = vrot.lane.b32.xlu0 %v11573_v46, %s13645_s1  ;;  %4678 = vrot.lane.b32.xlu1 %v11573_v46, %s13647_s20 }
 0x6aa   :  { %4514 = vrot.lane.b32.xlu0 %v11621_v61, %s8431_s0  ;;  %4516 = vrot.lane.b32.xlu1 %v11619_v48, %s8431_s0 }
 0x6ae   :  { %4526 = vrot.lane.b32.xlu0 %v11621_v61, %s8436_s27  ;;  %4528 = vrot.lane.b32.xlu1 %v11619_v48, %s8436_s27 }
 0x6b2   :  { %4538 = vrot.lane.b32.xlu0 %v11621_v61, %s8440_s5  ;;  %4540 = vrot.lane.b32.xlu1 %v11619_v48, %s8440_s5 }
 0x6b6   :  { %4550 = vrot.lane.b32.xlu0 %v11621_v61, %s8444_s11  ;;  %4552 = vrot.lane.b32.xlu1 %v11619_v48, %s8444_s11 }
 0x6ba   :  { %4562 = vrot.lane.b32.xlu0 %v11621_v61, %s8445_s12  ;;  %4564 = vrot.lane.b32.xlu1 %v11619_v48, %s8445_s12 }
 0x6be   :  { %4574 = vrot.lane.b32.xlu0 %v11621_v61, %s8446_s13  ;;  %4576 = vrot.lane.b32.xlu1 %v11619_v48, %s8446_s13 }
 0x6c2   :  { %4586 = vrot.lane.b32.xlu0 %v11621_v61, %s13645_s1  ;;  %4588 = vrot.lane.b32.xlu1 %v11619_v48, %s13645_s1 }
 0x6c6   :  { %4598 = vrot.lane.b32.xlu0 %v11621_v61, %s8448_s15  ;;  %4600 = vrot.lane.b32.xlu1 %v11619_v48, %s8448_s15 }
 0x6ca   :  { %4610 = vrot.lane.b32.xlu0 %v11621_v61, %s8449_s16  ;;  %4612 = vrot.lane.b32.xlu1 %v11619_v48, %s8449_s16 }
 0x6ce   :  { %4622 = vrot.lane.b32.xlu0 %v11621_v61, %s8450_s17  ;;  %4624 = vrot.lane.b32.xlu1 %v11619_v48, %s8450_s17 }
 0x6d2   :  { %4634 = vrot.lane.b32.xlu0 %v11621_v61, %s8451_s18  ;;  %4636 = vrot.lane.b32.xlu1 %v11619_v48, %s8451_s18 }
 0x6d6   :  { %4646 = vrot.lane.b32.xlu0 %v11621_v61, %s8452_s19  ;;  %4648 = vrot.lane.b32.xlu1 %v11619_v48, %s8452_s19 }
 0x6da   :  { %4658 = vrot.lane.b32.xlu0 %v11621_v61, %s8453_s28  ;;  %4660 = vrot.lane.b32.xlu1 %v11619_v48, %s8453_s28 }
 0x6de   :  { %4670 = vrot.lane.b32.xlu0 %v11621_v61, %s8454_s30  ;;  %4672 = vrot.lane.b32.xlu1 %v11619_v48, %s8454_s30 }
 0x6e0   :  { %v11715_v8 = vpop.permute.xlu1 %4512  ;;  %v11717_v42 = vpop.permute.xlu0 %4596 }
 0x6e2   :  { %4682 = vrot.lane.b32.xlu0 %v11621_v61, %s13647_s20  ;;  %4684 = vrot.lane.b32.xlu1 %v11619_v48, %s13647_s20 }
 0x6e4   :  { %v11723_v15 = vpop.permute.xlu1 %4524  ;;  %v11725_v19 = vpop.permute.xlu0 %4608 }
 0x6e5   :  { %v4962_v59 = vcombine.low %v11533_v54, %v11723_v15 }
 0x6e7   :  { %v4970_v0 = vrot.slane %v4962_v59, %v13664_v3 }
 0x6e8   :  { %v4537_v41 = vpop.permute.xlu1 %4536  ;;  %v11727_v11 = vpop.permute.xlu0 %4620 }
 0x6e9   :  { %v4978_v53 = vcombine.low %v11715_v8, %v4537_v41  ;;  %v5098_v34 = vcombine.low %v11717_v42, %v11727_v11 }
 0x6eb   :  { %v4986_v27 = vrot.slane %v4978_v53, %v13664_v3  ;;  %v5106_v60 = vrot.slane %v5098_v34, %v13664_v3  ;;  %v4963_v34 = vcombine.high %v11533_v54, %v11723_v15 }
 0x6ec   :  { %v4549_v7 = vpop.permute.xlu1 %4548  ;;  %v11729_v58 = vpop.permute.xlu0 %4632 }
 0x6ed   :  { %v5114_v5 = vcombine.low %v11725_v19, %v11729_v58  ;;  %v5026_v28 = vcombine.low %v4970_v0, %v4986_v27  ;;  %v5027_v23 = vcombine.high %v4970_v0, %v4986_v27 }
 0x6ef   :  { %v5122_v20 = vrot.slane %v5114_v5, %v13664_v3  ;;  %v5034_v4 = vrot.slane %v5026_v28, %v13665_v50  ;;  %v4979_v28 = vcombine.high %v11715_v8, %v4537_v41 }
 0x6f0   :  { %v4561_v35 = vpop.permute.xlu1 %4560  ;;  %v11731_v63 = vpop.permute.xlu0 %4644 }
 0x6f1   :  { %v5162_v33 = vcombine.low %v5106_v60, %v5122_v20  ;;  %v5163_v15 = vcombine.high %v5106_v60, %v5122_v20 }
 0x6f3   :  { %v5170_v9 = vrot.slane %v5162_v33, %v13665_v50  ;;  %v11775_v33 = vrot.slane %v4979_v28, %v13664_v3 }
 0x6f4   :  { %v4573_v39 = vpop.permute.xlu1 %4572  ;;  %v4657_v51 = vpop.permute.xlu0 %4656 }
 0x6f5   :  { %v4994_v38 = vcombine.low %v4549_v7, %v4573_v39 }
 0x6f7   :  { %v5002_v16 = vrot.slane %v4994_v38, %v13664_v3 }
 0x6f8   :  { %v4585_v18 = vpop.permute.xlu1 %4584  ;;  %v4669_v30 = vpop.permute.xlu0 %4668 }
 0x6f9   :  { %v5010_v36 = vcombine.low %v4561_v35, %v4585_v18  ;;  %v5130_v22 = vcombine.low %v11731_v63, %v4669_v30  ;;  %v5011_v10 = vcombine.high %v4561_v35, %v4585_v18  ;;  %v5131_v41 = vcombine.high %v11731_v63, %v4669_v30 }
 0x6fa   :  { %v4977_v63 = vrot.slane %v4963_v34, %v13664_v3 }
 0x6fb   :  { %v5018_v6 = vrot.slane %v5010_v36, %v13664_v3  ;;  %v5138_v38 = vrot.slane %v5130_v22, %v13664_v3  ;;  %v11767_v18 = vrot.slane %v5011_v10, %v13664_v3 }
 0x6fc   :  { %v11746_v53 = vpop.permute.xlu1 %4594  ;;  %v4681_v32 = vpop.permute.xlu0 %4680 }
 0x6fd   :  { %v5058_v57 = vcombine.low %v5002_v16, %v5018_v6  ;;  %v5146_v59 = vcombine.low %v4657_v51, %v4681_v32  ;;  %v5059_v49 = vcombine.high %v5002_v16, %v5018_v6  ;;  %v5147_v12 = vcombine.high %v4657_v51, %v4681_v32 }
 0x6fe   :  { %v5115_v32 = vcombine.high %v11725_v19, %v11729_v58  ;;  %v5177_v51 = vrot.slane %v5163_v15, %v13665_v50 }
 0x6ff   :  { %v5066_v44 = vrot.slane %v5058_v57, %v13665_v50  ;;  %v5154_v36 = vrot.slane %v5146_v59, %v13664_v3  ;;  %v4995_v57 = vcombine.high %v4549_v7, %v4573_v39  ;;  %v5073_v8 = vrot.slane %v5059_v49, %v13665_v50 }
 0x700   :  { %v11753_v13 = vpop.permute.xlu1 %4606  ;;  %v11755_v5 = vpop.permute.xlu0 %4510  ;;  %v11782_v49 = vrot.slane %v5147_v12, %v13664_v3  ;;  %v11794_v12 = vrot.slane %v5115_v32, %v13664_v3  ;;  %v5145_v39 = vrot.slane %v5131_v41, %v13664_v3 }
 0x701   :  { %v5090_v56 = vcombine.low %v5034_v4, %v5066_v44  ;;  %v5194_v1 = vcombine.low %v5138_v38, %v5154_v36  ;;  %v5195_v62 = vcombine.high %v5138_v38, %v5154_v36  ;;  %v5091_v54 = vcombine.high %v5034_v4, %v5066_v44 }
 0x702   :  { %v5009_v10 = vrot.slane %v4995_v57, %v13664_v3  ;;  %v5041_v44 = vrot.slane %v5027_v23, %v13665_v50  ;;  %v5210_v27 = vcombine.low %v5145_v39, %v11782_v49 }
 0x703   :  { %v5202_v35 = vrot.slane %v5194_v1, %v13665_v50  ;;  %v5826_v16 = vsel %vm2896_vm5, %v5090_v56, -inf  ;;  %v5099_v1 = vcombine.high %v11717_v42, %v11727_v11  ;;  %v5209_v58 = vrot.slane %v5195_v62, %v13665_v50 }
 0x704   :  { %v11760_v22 = vpop.permute.xlu1 %4618  ;;  %v11762_v59 = vpop.permute.xlu0 %4522  ;;  %v5074_v42 = vcombine.low %v5009_v10, %v11767_v18  ;;  %v5832_v11 = vsel %vm2896_vm5, %v5091_v54, -inf  ;;  %v5092_v23 = vcombine.low %v5041_v44, %v5073_v8  ;;  %v5093_v36 = vcombine.high %v5041_v44, %v5073_v8 }
 0x705   :  { %v5226_v7 = vcombine.low %v5170_v9, %v5202_v35  ;;  %v5227_v19 = vcombine.high %v5170_v9, %v5202_v35  ;;  %v5042_v9 = vcombine.low %v4977_v63, %v11775_v33  ;;  %v5113_v62 = vrot.slane %v5099_v1, %v13664_v3 }
 0x706   :  { %5827 = vmax.xlane.f32.xlu1 %v5826_v16  ;;  %v5228_v20 = vcombine.low %v5177_v51, %v5209_v58  ;;  %v5838_v38 = vsel %vm2896_vm5, %v5092_v23, -inf  ;;  %v5082_v34 = vrot.slane %v5074_v42, %v13665_v50  ;;  %v5229_v32 = vcombine.high %v5177_v51, %v5209_v58 }
 0x707   :  { %v5829_v60 = vsel %vm2896_vm5, %v5226_v7, -inf  ;;  %v5835_v0 = vsel %vm2896_vm5, %v5227_v19, -inf  ;;  %v5178_v28 = vcombine.low %v5113_v62, %v11794_v12  ;;  %v5050_v57 = vrot.slane %v5042_v9, %v13665_v50 }
 0x708   :  { %v11784_v56 = vpop.permute.xlu1 %4630  ;;  %v11787_v4 = vpop.permute.xlu0 %4534  ;;  %5830 = vmax.xlane.f32.xlu0 %v5829_v60  ;;  %v5841_v16 = vsel %vm2896_vm5, %v5228_v20, -inf  ;;  %v5218_v15 = vrot.slane %v5210_v27, %v13665_v50  ;;  %v5075_v41 = vcombine.high %v5009_v10, %v11767_v18  ;;  %v5844_v8 = vsel %vm2896_vm5, %v5093_v36, -inf }
 0x709   :  { %v5094_v7 = vcombine.low %v5050_v57, %v5082_v34  ;;  %v5186_v1 = vrot.slane %v5178_v28, %v13665_v50  ;;  %v5043_v44 = vcombine.high %v4977_v63, %v11775_v33  ;;  %v5211_v60 = vcombine.high %v5145_v39, %v11782_v49 }
 0x70a   :  { %5833 = vmax.xlane.f32.xlu1 %v5832_v11  ;;  %v4842_v19 = vcombine.low %v11753_v13, %v11784_v56  ;;  %v5847_v58 = vsel %vm2896_vm5, %v5229_v32, -inf  ;;  %v5095_v23 = vcombine.high %v5050_v57, %v5082_v34  ;;  %v5089_v51 = vrot.slane %v5075_v41, %v13665_v50 }
 0x70b   :  { %v5230_v18 = vcombine.low %v5186_v1, %v5218_v15  ;;  %v5850_v10 = vsel %vm2896_vm5, %v5094_v7, -inf  ;;  %v5179_v33 = vcombine.high %v5113_v62, %v11794_v12  ;;  %v4826_v49 = vcombine.low %v11746_v53, %v11760_v22 }
 0x70c   :  { %v11801_v30 = vpop.permute.xlu1 %4642  ;;  %v11804_v6 = vpop.permute.xlu0 %4546  ;;  %5836 = vmax.xlane.f32.xlu0 %v5835_v0  ;;  %v4706_v63 = vcombine.low %v11755_v5, %v11787_v4  ;;  %v4690_v39 = vcombine.low %v11573_v46, %v11762_v59  ;;  %v5231_v27 = vcombine.high %v5186_v1, %v5218_v15  ;;  %v5057_v0 = vrot.slane %v5043_v44, %v13665_v50 }
 0x70d   :  { %v11841_v20 = vrot.slane %v4842_v19, %v13664_v3  ;;  %v5225_v34 = vrot.slane %v5211_v60, %v13665_v50  ;;  %v11854_v15 = vrot.slane %v4826_v49, %v13664_v3 }
 0x70e   :  { %5839 = vmax.xlane.f32.xlu1 %v5838_v38  ;;  %v5853_v38 = vsel %vm2896_vm5, %v5230_v18, -inf  ;;  %v5096_v32 = vcombine.low %v5057_v0, %v5089_v51  ;;  %v4714_v41 = vrot.slane %v4706_v63, %v13664_v3  ;;  %v4698_v7 = vrot.slane %v4690_v39, %v13664_v3 }
 0x70f   :  { %v4890_v19 = vcombine.low %v11854_v15, %v11841_v20 }
 0x710   :  { %v11810_v35 = vpop.permute.xlu1 %4654  ;;  %v11813_v54 = vpop.permute.xlu0 %4558  ;;  %5842 = vmax.xlane.f32.xlu0 %v5841_v16  ;;  %v5856_v16 = vsel %vm2896_vm5, %v5095_v23, -inf  ;;  %v5862_v39 = vsel %vm2896_vm5, %v5096_v32, -inf }
 0x712   :  { %5845 = vmax.xlane.f32.xlu1 %v5844_v8  ;;  %v5193_v8 = vrot.slane %v5179_v33, %v13665_v50 }
 0x714   :  { %v11823_v42 = vpop.permute.xlu1 %4666  ;;  %v11826_v11 = vpop.permute.xlu0 %4570  ;;  %5848 = vmax.xlane.f32.xlu0 %v5847_v58  ;;  %v5232_v33 = vcombine.low %v5193_v8, %v5225_v34 }
 0x715   :  { %v4858_v9 = vcombine.low %v11801_v30, %v11823_v42  ;;  %v4722_v12 = vcombine.low %v11804_v6, %v11826_v11 }
 0x716   :  { %5851 = vmax.xlane.f32.xlu1 %v5850_v10  ;;  %v5859_v10 = vsel %vm2896_vm5, %v5231_v27, -inf  ;;  %v4755_v27 = vcombine.high %v4698_v7, %v4714_v41 }
 0x717   :  { %v11860_v1 = vrot.slane %v4858_v9, %v13664_v3  ;;  %v4730_v58 = vrot.slane %v4722_v12, %v13664_v3  ;;  %v5097_v9 = vcombine.high %v5057_v0, %v5089_v51  ;;  %v4707_v12 = vcombine.high %v11755_v5, %v11787_v4 }
 0x718   :  { %v11845_v62 = vpop.permute.xlu1 %4678  ;;  %v4583_v36 = vpop.permute.xlu0 %4582  ;;  %5854 = vmax.xlane.f32.xlu0 %v5853_v38  ;;  %v4754_v38 = vcombine.low %v4698_v7, %v4714_v41  ;;  %v5233_v51 = vcombine.high %v5193_v8, %v5225_v34  ;;  %v4898_v0 = vrot.slane %v4890_v19, %v13665_v50  ;;  %v4691_v5 = vcombine.high %v11573_v46, %v11762_v59 }
 0x719   :  { %v4874_v28 = vcombine.low %v11810_v35, %v11845_v62  ;;  %v4738_v57 = vcombine.low %v11813_v54, %v4583_v36  ;;  %v4739_v63 = vcombine.high %v11813_v54, %v4583_v36  ;;  %v5865_v54 = vsel %vm2896_vm5, %v5232_v33, -inf }
 0x71a   :  { %5857 = vmax.xlane.f32.xlu1 %v5856_v16  ;;  %v4723_v16 = vcombine.high %v11804_v6, %v11826_v11  ;;  %v5868_v6 = vsel %vm2896_vm5, %v5097_v9, -inf  ;;  %v4762_v34 = vrot.slane %v4754_v38, %v13665_v50  ;;  %v4721_v8 = vrot.slane %v4707_v12, %v13664_v3 }
 0x71b   :  { %v11863_v44 = vrot.slane %v4874_v28, %v13664_v3  ;;  %v4746_v60 = vrot.slane %v4738_v57, %v13664_v3  ;;  %v11895_v4 = vrot.slane %v4739_v63, %v13664_v3  ;;  %v5871_v59 = vsel %vm2896_vm5, %v5233_v51, -inf }
 0x71c   :  { %v11869_v18 = vpop.permute.xlu1 %4516  ;;  %v11872_v23 = vpop.permute.xlu0 %4514  ;;  %5860 = vmax.xlane.f32.xlu0 %v5859_v10  ;;  %v4737_v7 = vrot.slane %v4723_v16, %v13664_v3  ;;  %v4705_v10 = vrot.slane %v4691_v5, %v13664_v3  ;;  %v4875_v9 = vcombine.high %v11810_v35, %v11845_v62  ;;  %v4843_v5 = vcombine.high %v11753_v13, %v11784_v56 }
 0x71d   :  { %v4922_v49 = vcombine.low %v11860_v1, %v11863_v44  ;;  %v4786_v28 = vcombine.low %v4730_v58, %v4746_v60  ;;  %v4787_v57 = vcombine.high %v4730_v58, %v4746_v60  ;;  %v4769_v60 = vrot.slane %v4755_v27, %v13665_v50 }
 0x71e   :  { %5863 = vmax.xlane.f32.xlu1 %v5862_v39  ;;  %v4802_v33 = vcombine.low %v4737_v7, %v11895_v4  ;;  %v4770_v39 = vcombine.low %v4705_v10, %v4721_v8  ;;  %v4923_v38 = vcombine.high %v11860_v1, %v11863_v44  ;;  %v4891_v35 = vcombine.high %v11854_v15, %v11841_v20 }
 0x71f   :  { %v11883_v29 = vrot.slane %v4922_v49, %v13665_v50  ;;  %v4794_v32 = vrot.slane %v4786_v28, %v13665_v50  ;;  %v4801_v11 = vrot.slane %v4787_v57, %v13665_v50  ;;  %v4859_v62 = vcombine.high %v11801_v30, %v11823_v42 }
 0x720   :  { %v11885_v17 = vpop.permute.xlu1 %4528  ;;  %v11888_v36 = vpop.permute.xlu0 %4526  ;;  %5866 = vmax.xlane.f32.xlu0 %v5865_v54  ;;  %v4810_v51 = vrot.slane %v4802_v33, %v13665_v50  ;;  %v4827_v1 = vcombine.high %v11746_v53, %v11760_v22  ;;  %v4778_v44 = vrot.slane %v4770_v39, %v13665_v50  ;;  %v4937_v20 = vrot.slane %v4923_v38, %v13665_v50 }
 0x721   :  { %v4954_v41 = vcombine.low %v4898_v0, %v11883_v29  ;;  %v4818_v58 = vcombine.low %v4762_v34, %v4794_v32  ;;  %v4820_v63 = vcombine.low %v4769_v60, %v4801_v11  ;;  %v4819_v27 = vcombine.high %v4762_v34, %v4794_v32 }
 0x722   :  { %5869 = vmax.xlane.f32.xlu1 %v5868_v6  ;;  %v4821_v54 = vcombine.high %v4769_v60, %v4801_v11  ;;  %v11933_v32 = vrot.slane %v4875_v9, %v13664_v3  ;;  %v4955_v56 = vcombine.high %v4898_v0, %v11883_v29  ;;  %v4803_v30 = vcombine.high %v4737_v7, %v11895_v4 }
 0x723   :  { %v5781_v49 = vsel %vm2896_vm5, %v4954_v41, -inf  ;;  %v5778_v57 = vsel %vm2896_vm5, %v4818_v58, -inf  ;;  %v5790_v16 = vsel %vm2896_vm5, %v4820_v63, -inf  ;;  %v5784_v11 = vsel %vm2896_vm5, %v4819_v27, -inf }
 0x724   :  { %v11904_v46 = vpop.permute.xlu1 %4540  ;;  %v11907_v19 = vpop.permute.xlu0 %4538  ;;  %5872 = vmax.xlane.f32.xlu0 %v5871_v59  ;;  %v5796_v53 = vsel %vm2896_vm5, %v4821_v54, -inf  ;;  %v4822_v22 = vcombine.low %v4778_v44, %v4810_v51  ;;  %v4857_v42 = vrot.slane %v4843_v5, %v13664_v3  ;;  %v4873_v15 = vrot.slane %v4859_v62, %v13664_v3 }
 0x725   :  { %v4905_v41 = vrot.slane %v4891_v35, %v13665_v50  ;;  %v4771_v34 = vcombine.high %v4705_v10, %v4721_v8  ;;  %v5522_v60 = vcombine.low %v11869_v18, %v11904_v46  ;;  %v4841_v29 = vrot.slane %v4827_v1, %v13664_v3 }
 0x726   :  { %5782 = vmax.xlane.f32.xlu1 %v5781_v49  ;;  %v4938_v0 = vcombine.low %v4873_v15, %v11933_v32  ;;  %v5787_v7 = vsel %vm2896_vm5, %v4955_v56, -inf  ;;  %v5506_v58 = vcombine.low %v11619_v48, %v11885_v17  ;;  %v5802_v33 = vsel %vm2896_vm5, %v4822_v22, -inf }
 0x727   :  { %v4956_v59 = vcombine.low %v4905_v41, %v4937_v20  ;;  %v4823_v49 = vcombine.high %v4778_v44, %v4810_v51  ;;  %v4817_v8 = vrot.slane %v4803_v30, %v13665_v50  ;;  %v4906_v10 = vcombine.low %v4841_v29, %v4857_v42 }
 0x728   :  { %v11916_v28 = vpop.permute.xlu1 %4552  ;;  %v11919_v12 = vpop.permute.xlu0 %4550  ;;  %5779 = vmax.xlane.f32.xlu0 %v5778_v57  ;;  %v5530_v39 = vrot.slane %v5522_v60, %v13664_v3  ;;  %v4785_v38 = vrot.slane %v4771_v34, %v13665_v50  ;;  %v4946_v54 = vrot.slane %v4938_v0, %v13665_v50  ;;  %v5514_v51 = vrot.slane %v5506_v58, %v13664_v3 }
 0x729   :  { %v5793_v27 = vsel %vm2896_vm5, %v4956_v59, -inf  ;;  %v5808_v35 = vsel %vm2896_vm5, %v4823_v49, -inf  ;;  %v4914_v1 = vrot.slane %v4906_v10, %v13665_v50 }
 0x72a   :  { %5791 = vmax.xlane.f32.xlu1 %v5790_v16  ;;  %v4957_v16 = vcombine.high %v4905_v41, %v4937_v20  ;;  %v4824_v62 = vcombine.low %v4785_v38, %v4817_v8  ;;  %v5570_v44 = vcombine.low %v5514_v51, %v5530_v39  ;;  %v4939_v20 = vcombine.high %v4873_v15, %v11933_v32 }
 0x72b   :  { %v4958_v41 = vcombine.low %v4914_v1, %v4946_v54  ;;  %v4825_v0 = vcombine.high %v4785_v38, %v4817_v8  ;;  %v4959_v15 = vcombine.high %v4914_v1, %v4946_v54  ;;  %v5523_v38 = vcombine.high %v11869_v18, %v11904_v46 }
 0x72c   :  { %v11935_v6 = vpop.permute.xlu1 %4564  ;;  %v11938_v13 = vpop.permute.xlu0 %4562  ;;  %5785 = vmax.xlane.f32.xlu0 %v5784_v11  ;;  %v5799_v22 = vsel %vm2896_vm5, %v4957_v16, -inf  ;;  %v5814_v60 = vsel %vm2896_vm5, %v4824_v62, -inf  ;;  %v5578_v59 = vrot.slane %v5570_v44, %v13665_v50  ;;  %v4953_v49 = vrot.slane %v4939_v20, %v13665_v50 }
 0x72d   :  { %v5805_v32 = vsel %vm2896_vm5, %v4958_v41, -inf  ;;  %v5571_v16 = vcombine.high %v5514_v51, %v5530_v39  ;;  %v5537_v46 = vrot.slane %v5523_v38, %v13664_v3 }
 0x72e   :  { %5797 = vmax.xlane.f32.xlu1 %v5796_v53 }
 0x730   :  { %v11951_v4 = vpop.permute.xlu1 %4576  ;;  %5788 = vmax.xlane.f32.xlu0 %v5787_v7  ;;  %v11958_v63 = vpop.permute.xlu0 %4574  ;;  %v4907_v7 = vcombine.high %v4841_v29, %v4857_v42 }
 0x731   :  { %v5538_v9 = vcombine.low %v11916_v28, %v11951_v4  ;;  %v5539_v54 = vcombine.high %v11916_v28, %v11951_v4 }
 0x732   :  { %5803 = vmax.xlane.f32.xlu1 %v5802_v33  ;;  %v4921_v29 = vrot.slane %v4907_v7, %v13665_v50 }
 0x733   :  { %v5546_v11 = vrot.slane %v5538_v9, %v13664_v3  ;;  %v5553_v28 = vrot.slane %v5539_v54, %v13664_v3  ;;  %v5234_v54 = vcombine.low %v11621_v61, %v11888_v36 }
 0x734   :  { %v4589_v57 = vpop.permute.xlu1 %4588  ;;  %5794 = vmax.xlane.f32.xlu0 %v5793_v27  ;;  %v11973_v30 = vpop.permute.xlu0 %4586  ;;  %v5820_v27 = vsel %vm2896_vm5, %v4825_v0, -inf  ;;  %v4961_v51 = vcombine.high %v4921_v29, %v4953_v49 }
 0x735   :  { %v5554_v5 = vcombine.low %v11935_v6, %v4589_v57  ;;  %v5555_v10 = vcombine.high %v11935_v6, %v4589_v57  ;;  %v5507_v6 = vcombine.high %v11619_v48, %v11885_v17  ;;  %v5585_v17 = vrot.slane %v5571_v16, %v13665_v50 }
 0x736   :  { %5809 = vmax.xlane.f32.xlu1 %v5808_v35  ;;  %v4960_v35 = vcombine.low %v4921_v29, %v4953_v49  ;;  %v5266_v29 = vcombine.low %v11919_v12, %v11958_v63 }
 0x737   :  { %v5562_v56 = vrot.slane %v5554_v5, %v13664_v3  ;;  %v5811_v5 = vsel %vm2896_vm5, %v4959_v15, -inf  ;;  %v5569_v62 = vrot.slane %v5555_v10, %v13664_v3  ;;  %v5282_v15 = vcombine.low %v11938_v13, %v11973_v30 }
 0x738   :  { %v11975_v53 = vpop.permute.xlu1 %4600  ;;  %5800 = vmax.xlane.f32.xlu0 %v5799_v22  ;;  %v11987_v42 = vpop.permute.xlu0 %4598  ;;  %v5817_v39 = vsel %vm2896_vm5, %v4960_v35, -inf }
 0x739   :  { %v5602_v34 = vcombine.low %v5546_v11, %v5562_v56  ;;  %v5603_v9 = vcombine.high %v5546_v11, %v5562_v56  ;;  %v5521_v11 = vrot.slane %v5507_v6, %v13664_v3  ;;  %v5618_v56 = vcombine.low %v5553_v28, %v5569_v62 }
 0x73a   :  { %5815 = vmax.xlane.f32.xlu1 %v5814_v60  ;;  %v5823_v60 = vsel %vm2896_vm5, %v4961_v51, -inf  ;;  %v5619_v10 = vcombine.high %v5553_v28, %v5569_v62  ;;  %v5290_v6 = vrot.slane %v5282_v15, %v13664_v3  ;;  %v5274_v28 = vrot.slane %v5266_v29, %v13664_v3 }
 0x73b   :  { %v5610_v58 = vrot.slane %v5602_v34, %v13665_v50  ;;  %v5617_v18 = vrot.slane %v5603_v9, %v13665_v50  ;;  %v5586_v41 = vcombine.low %v5521_v11, %v5537_v46  ;;  %v5587_v38 = vcombine.high %v5521_v11, %v5537_v46 }
 0x73c   :  { %v11981_v33 = vpop.permute.xlu1 %4612  ;;  %5806 = vmax.xlane.f32.xlu0 %v5805_v32  ;;  %v12005_v48 = vpop.permute.xlu0 %4610  ;;  %v5242_v11 = vrot.slane %v5234_v54, %v13664_v3 }
 0x73d   :  { %v5634_v8 = vcombine.low %v5578_v59, %v5610_v58  ;;  %v5635_v44 = vcombine.high %v5578_v59, %v5610_v58  ;;  %v5636_v22 = vcombine.low %v5585_v17, %v5617_v18  ;;  %v5637_v7 = vcombine.high %v5585_v17, %v5617_v18 }
 0x73e   :  { %5821 = vmax.xlane.f32.xlu1 %v5820_v27  ;;  %v5626_v59 = vrot.slane %v5618_v56, %v13665_v50  ;;  %v5594_v32 = vrot.slane %v5586_v41, %v13665_v50  ;;  %v5633_v18 = vrot.slane %v5619_v10, %v13665_v50  ;;  %v5601_v51 = vrot.slane %v5587_v38, %v13665_v50 }
 0x73f   :  { %v5922_v1 = vsel %vm2896_vm5, %v5634_v8, -inf  ;;  %v5928_v20 = vsel %vm2896_vm5, %v5635_v44, -inf  ;;  %v5934_v0 = vsel %vm2896_vm5, %v5636_v22, -inf  ;;  %v5940_v9 = vsel %vm2896_vm5, %v5637_v7, -inf }
 0x740   :  { %v11996_v57 = vpop.permute.xlu1 %4624  ;;  %5812 = vmax.xlane.f32.xlu0 %v5811_v5  ;;  %v12017_v58 = vpop.permute.xlu0 %4622  ;;  %v5638_v27 = vcombine.low %v5594_v32, %v5626_v59  ;;  %v5250_v8 = vcombine.low %v11872_v23, %v11907_v19  ;;  %v5639_v44 = vcombine.high %v5594_v32, %v5626_v59  ;;  %v5330_v56 = vcombine.low %v5274_v28, %v5290_v6 }
 0x741   :  { %v5642_v62 = vcombine.low %v11975_v53, %v11996_v57 }
 0x742   :  { %5923 = vmax.xlane.f32.xlu1 %v5922_v1  ;;  %v5946_v1 = vsel %vm2896_vm5, %v5638_v27, -inf  ;;  %v5258_v46 = vrot.slane %v5250_v8, %v13664_v3  ;;  %v5338_v27 = vrot.slane %v5330_v56, %v13665_v50 }
 0x743   :  { %v5650_v22 = vrot.slane %v5642_v62, %v13664_v3 }
 0x744   :  { %v12007_v4 = vpop.permute.xlu1 %4636  ;;  %5818 = vmax.xlane.f32.xlu0 %v5817_v39  ;;  %v12032_v5 = vpop.permute.xlu0 %4634  ;;  %v5298_v7 = vcombine.low %v5242_v11, %v5258_v46 }
 0x745   :  { %v5658_v16 = vcombine.low %v11981_v33, %v12007_v4  ;;  %v5659_v56 = vcombine.high %v11981_v33, %v12007_v4 }
 0x746   :  { %5929 = vmax.xlane.f32.xlu1 %v5928_v20  ;;  %v5306_v38 = vrot.slane %v5298_v7, %v13665_v50  ;;  %v5299_v7 = vcombine.high %v5242_v11, %v5258_v46 }
 0x747   :  { %v5666_v17 = vrot.slane %v5658_v16, %v13664_v3 }
 0x748   :  { %v12012_v34 = vpop.permute.xlu1 %4648  ;;  %5824 = vmax.xlane.f32.xlu0 %v5823_v60  ;;  %v5952_v60 = vsel %vm2896_vm5, %v5639_v44, -inf  ;;  %v12046_v59 = vpop.permute.xlu0 %4646  ;;  %v5283_v44 = vcombine.high %v11938_v13, %v11973_v30  ;;  %v5267_v13 = vcombine.high %v11919_v12, %v11958_v63  ;;  %v5643_v30 = vcombine.high %v11975_v53, %v11996_v57 }
 0x749   :  { %v5706_v32 = vcombine.low %v5650_v22, %v5666_v17  ;;  %v5673_v63 = vrot.slane %v5659_v56, %v13664_v3 }
 0x74a   :  { %5935 = vmax.xlane.f32.xlu1 %v5934_v0  ;;  %v5640_v0 = vcombine.low %v5601_v51, %v5633_v18 }
 0x74b   :  { %v5714_v62 = vrot.slane %v5706_v32, %v13665_v50 }
 0x74c   :  { %v4661_v49 = vpop.permute.xlu1 %4660  ;;  %v5958_v29 = vsel %vm2896_vm5, %v5640_v0, -inf  ;;  %v5251_v0 = vcombine.high %v11872_v23, %v11907_v19  ;;  %v5297_v23 = vrot.slane %v5283_v44, %v13664_v3  ;;  %v5363_v19 = vcombine.high %v5306_v38, %v5338_v27 }
 0x74e   :  { %5941 = vmax.xlane.f32.xlu1 %v5940_v9  ;;  %v5641_v9 = vcombine.high %v5601_v51, %v5633_v18  ;;  %v5362_v51 = vcombine.low %v5306_v38, %v5338_v27  ;;  %v5265_v46 = vrot.slane %v5251_v0, %v13664_v3 }
 0x750   :  { %v4673_v35 = vpop.permute.xlu1 %4672  ;;  %v5964_v18 = vsel %vm2896_vm5, %v5641_v9, -inf  ;;  %v5874_v57 = vsel %vm2896_vm5, %v5362_v51, -inf }
 0x751   :  { %v5674_v39 = vcombine.low %v12012_v34, %v4673_v35 }
 0x752   :  { %5947 = vmax.xlane.f32.xlu1 %v5946_v1 }
 0x753   :  { %v5682_v15 = vrot.slane %v5674_v39, %v13664_v3  ;;  %v5331_v39 = vcombine.high %v5274_v28, %v5290_v6 }
 0x754   :  { %v4685_v20 = vpop.permute.xlu1 %4684 }
 0x755   :  { %v5690_v41 = vcombine.low %v4661_v49, %v4685_v20  ;;  %v5691_v16 = vcombine.high %v4661_v49, %v4685_v20  ;;  %v5675_v49 = vcombine.high %v12012_v34, %v4673_v35  ;;  %v5235_v34 = vcombine.high %v11621_v61, %v11888_v36 }
 0x756   :  { %5953 = vmax.xlane.f32.xlu1 %v5952_v60  ;;  %v5707_v60 = vcombine.high %v5650_v22, %v5666_v17  ;;  %v5345_v12 = vrot.slane %v5331_v39, %v13665_v50  ;;  %v5281_v17 = vrot.slane %v5267_v13, %v13664_v3  ;;  %v5313_v61 = vrot.slane %v5299_v7, %v13665_v50 }
 0x757   :  { %v5698_v10 = vrot.slane %v5690_v41, %v13664_v3  ;;  %v12057_v41 = vpop.permute.xlu0 %4658  ;;  %v5705_v6 = vrot.slane %v5691_v16, %v13664_v3  ;;  %v5689_v53 = vrot.slane %v5675_v49, %v13664_v3  ;;  %v5657_v36 = vrot.slane %v5643_v30, %v13664_v3 }
 0x758   :  { %v5721_v35 = vrot.slane %v5707_v60, %v13665_v50  ;;  %v5346_v9 = vcombine.low %v5281_v17, %v5297_v23  ;;  %v5365_v44 = vcombine.high %v5313_v61, %v5345_v12  ;;  %v5347_v7 = vcombine.high %v5281_v17, %v5297_v23 }
 0x759   :  { %v5738_v8 = vcombine.low %v5682_v15, %v5698_v10  ;;  %v5739_v54 = vcombine.high %v5682_v15, %v5698_v10  ;;  %v5754_v22 = vcombine.low %v5689_v53, %v5705_v6  ;;  %v5249_v10 = vrot.slane %v5235_v34, %v13664_v3 }
 0x75a   :  { %5959 = vmax.xlane.f32.xlu1 %v5958_v29  ;;  %v5722_v27 = vcombine.low %v5657_v36, %v5673_v63  ;;  %v5364_v29 = vcombine.low %v5313_v61, %v5345_v12  ;;  %v5354_v51 = vrot.slane %v5346_v9, %v13665_v50  ;;  %v5755_v60 = vcombine.high %v5689_v53, %v5705_v6 }
 0x75b   :  { %v5746_v1 = vrot.slane %v5738_v8, %v13665_v50  ;;  %v5753_v4 = vrot.slane %v5739_v54, %v13665_v50  ;;  %v12082_v11 = vpop.permute.xlu0 %4670  ;;  %v5880_v8 = vsel %vm2896_vm5, %v5363_v19, -inf  ;;  %v5314_v38 = vcombine.low %v5249_v10, %v5265_v46 }
 0x75c   :  { %v5886_v39 = vsel %vm2896_vm5, %v5364_v29, -inf  ;;  %v5892_v13 = vsel %vm2896_vm5, %v5365_v44, -inf  ;;  %v5723_v30 = vcombine.high %v5657_v36, %v5673_v63  ;;  %v5315_v34 = vcombine.high %v5249_v10, %v5265_v46 }
 0x75d   :  { %v5770_v20 = vcombine.low %v5714_v62, %v5746_v1  ;;  %v5771_v33 = vcombine.high %v5714_v62, %v5746_v1  ;;  %v5772_v15 = vcombine.low %v5721_v35, %v5753_v4  ;;  %v5773_v54 = vcombine.high %v5721_v35, %v5753_v4 }
 0x75e   :  { %5965 = vmax.xlane.f32.xlu1 %v5964_v18  ;;  %v5762_v62 = vrot.slane %v5754_v22, %v13665_v50  ;;  %v5730_v18 = vrot.slane %v5722_v27, %v13665_v50  ;;  %v5322_v56 = vrot.slane %v5314_v38, %v13665_v50  ;;  %v5370_v6 = vcombine.low %v11987_v42, %v12017_v58 }
 0x75f   :  { %v5925_v28 = vsel %vm2896_vm5, %v5770_v20, -inf  ;;  %v5931_v32 = vsel %vm2896_vm5, %v5771_v33, -inf  ;;  %v5937_v16 = vsel %vm2896_vm5, %v5772_v15, -inf  ;;  %v12091_v1 = vpop.permute.xlu0 %4682  ;;  %v5943_v20 = vsel %vm2896_vm5, %v5773_v54, -inf }
 0x760   :  { %5926 = vmax.xlane.f32.xlu0 %v5925_v28  ;;  %v5418_v49 = vcombine.low %v12057_v41, %v12091_v1  ;;  %v5774_v0 = vcombine.low %v5730_v18, %v5762_v62  ;;  %v5386_v28 = vcombine.low %v12005_v48, %v12032_v5  ;;  %v5402_v33 = vcombine.low %v12046_v59, %v12082_v11 }
 0x761   :  { %v5366_v4 = vcombine.low %v5322_v56, %v5354_v51  ;;  %v5775_v12 = vcombine.high %v5730_v18, %v5762_v62  ;;  %v5769_v53 = vrot.slane %v5755_v60, %v13665_v50  ;;  %v5367_v63 = vcombine.high %v5322_v56, %v5354_v51 }
 0x762   :  { %5875 = vmax.xlane.f32.xlu1 %v5874_v57  ;;  %v5426_v19 = vrot.slane %v5418_v49, %v13664_v3  ;;  %v5949_v23 = vsel %vm2896_vm5, %v5774_v0, -inf  ;;  %v5361_v57 = vrot.slane %v5347_v7, %v13665_v50  ;;  %v5394_v35 = vrot.slane %v5386_v28, %v13664_v3 }
 0x763   :  { %v5410_v17 = vrot.slane %v5402_v33, %v13664_v3  ;;  %v5898_v46 = vsel %vm2896_vm5, %v5366_v4, -inf  ;;  %v5737_v61 = vrot.slane %v5723_v30, %v13665_v50  ;;  %v5329_v36 = vrot.slane %v5315_v34, %v13665_v50 }
 0x764   :  { %5932 = vmax.xlane.f32.xlu0 %v5931_v32  ;;  %v5378_v22 = vrot.slane %v5370_v6, %v13664_v3  ;;  %v5955_v15 = vsel %vm2896_vm5, %v5775_v12, -inf  ;;  %v5904_v27 = vsel %vm2896_vm5, %v5367_v63, -inf  ;;  %v5387_v60 = vcombine.high %v12005_v48, %v12032_v5 }
 0x765   :  { %v5466_v32 = vcombine.low %v5410_v17, %v5426_v19  ;;  %v5776_v10 = vcombine.low %v5737_v61, %v5769_v53  ;;  %v5777_v38 = vcombine.high %v5737_v61, %v5769_v53  ;;  %v5369_v62 = vcombine.high %v5329_v36, %v5361_v57 }
 0x766   :  { %5881 = vmax.xlane.f32.xlu1 %v5880_v8  ;;  %v5434_v9 = vcombine.low %v5378_v22, %v5394_v35  ;;  %v5368_v8 = vcombine.low %v5329_v36, %v5361_v57  ;;  %v5467_v18 = vcombine.high %v5410_v17, %v5426_v19  ;;  %v5435_v49 = vcombine.high %v5378_v22, %v5394_v35  ;;  %v12148_v57 = vld [vmem:[%s13162_s2 + $0x18] sm:$0xff] }
 0x767   :  { %v5961_v29 = vsel %vm2896_vm5, %v5776_v10, -inf  ;;  %v5967_v51 = vsel %vm2896_vm5, %v5777_v38, -inf  ;;  %v5916_v0 = vsel %vm2896_vm5, %v5369_v62, -inf  ;;  %v5371_v7 = vcombine.high %v11987_v42, %v12017_v58 }
 0x768   :  { %5938 = vmax.xlane.f32.xlu0 %v5937_v16  ;;  %v5474_v16 = vrot.slane %v5466_v32, %v13665_v50  ;;  %v5910_v54 = vsel %vm2896_vm5, %v5368_v8, -inf  ;;  %v5442_v44 = vrot.slane %v5434_v9, %v13665_v50  ;;  %v5481_v30 = vrot.slane %v5467_v18, %v13665_v50 }
 0x769   :  { %v5401_v48 = vrot.slane %v5387_v60, %v13664_v3  ;;  %v6034_v18 = vadd.s32 4294967293, %v13621_v43 }
 0x76a   :  { %5887 = vmax.xlane.f32.xlu1 %v5886_v39  ;;  %v5419_v39 = vcombine.high %v12057_v41, %v12091_v1  ;;  %v5498_v56 = vcombine.low %v5442_v44, %v5474_v16 }
 0x76c   :  { %5944 = vmax.xlane.f32.xlu0 %v5943_v20  ;;  %v5403_v20 = vcombine.high %v12046_v59, %v12082_v11  ;;  %v5433_v41 = vrot.slane %v5419_v39, %v13664_v3  ;;  %v5877_v1 = vsel %vm2896_vm5, %v5498_v56, -inf  ;;  %v5449_v59 = vrot.slane %v5435_v49, %v13665_v50  ;;  %v13666_v56 = vld [vmem:[#allocation6_spill] sm:$0xff] }
 0x76d   :  { %v5385_v11 = vrot.slane %v5371_v7, %v13664_v3 }
 0x76e   :  { %5893 = vmax.xlane.f32.xlu1 %v5892_v13  ;;  %v5499_v13 = vcombine.high %v5442_v44, %v5474_v16  ;;  %v5417_v5 = vrot.slane %v5403_v20, %v13664_v3  ;;  %v5500_v58 = vcombine.low %v5449_v59, %v5481_v30  ;;  %v5501_v34 = vcombine.high %v5449_v59, %v5481_v30 }
 0x76f   :  { %v5450_v33 = vcombine.low %v5385_v11, %v5401_v48  ;;  %v5451_v63 = vcombine.high %v5385_v11, %v5401_v48  ;;  %v6039_v44 = vadd.s32 4294967285, %v13621_v43  ;;  %v12163_v20 = vsub.s32 %v6034_v18, %v13666_v56 }
 0x770   :  { %5950 = vmax.xlane.f32.xlu0 %v5949_v23  ;;  %v5482_v28 = vcombine.low %v5417_v5, %v5433_v41  ;;  %v5883_v42 = vsel %vm2896_vm5, %v5499_v13, -inf  ;;  %v5889_v4 = vsel %vm2896_vm5, %v5500_v58, -inf  ;;  %v5483_v23 = vcombine.high %v5417_v5, %v5433_v41 }
 0x771   :  { %v5458_v19 = vrot.slane %v5450_v33, %v13665_v50  ;;  %v5895_v12 = vsel %vm2896_vm5, %v5501_v34, -inf  ;;  %v5465_v61 = vrot.slane %v5451_v63, %v13665_v50  ;;  %v12160_v60 = vsub.s32 %v6039_v44, %v13666_v56  ;;  %v12205_v44 = vld [vmem:[%s13162_s2 + $0x10] sm:$0xff] }
 0x772   :  { %5899 = vmax.xlane.f32.xlu1 %v5898_v46  ;;  %v5490_v6 = vrot.slane %v5482_v28, %v13665_v50  ;;  %v5497_v46 = vrot.slane %v5483_v23, %v13665_v50 }
 0x774   :  { %5956 = vmax.xlane.f32.xlu0 %v5955_v15  ;;  %v5502_v53 = vcombine.low %v5458_v19, %v5490_v6  ;;  %v5503_v17 = vcombine.high %v5458_v19, %v5490_v6  ;;  %v5504_v32 = vcombine.low %v5465_v61, %v5497_v46 }
 0x776   :  { %5905 = vmax.xlane.f32.xlu1 %v5904_v27  ;;  %v5901_v35 = vsel %vm2896_vm5, %v5502_v53, -inf  ;;  %v5907_v22 = vsel %vm2896_vm5, %v5503_v17, -inf  ;;  %v5913_v9 = vsel %vm2896_vm5, %v5504_v32, -inf  ;;  %v5505_v27 = vcombine.high %v5465_v61, %v5497_v46 }
 0x778   :  { %5962 = vmax.xlane.f32.xlu0 %v5961_v29  ;;  %v5919_v38 = vsel %vm2896_vm5, %v5505_v27, -inf  ;;  %vm6044_vm5 = vcmask 154712  }
 0x77a   :  { %5911 = vmax.xlane.f32.xlu1 %v5910_v54 }
 0x77c   :  { %5968 = vmax.xlane.f32.xlu0 %v5967_v51 }
 0x77e   :  { %5917 = vmax.xlane.f32.xlu1 %v5916_v0 }
 0x780   :  { %5878 = vmax.xlane.f32.xlu0 %v5877_v1 }
 0x784   :  { %5884 = vmax.xlane.f32.xlu0 %v5883_v42 }
 0x788   :  { %5890 = vmax.xlane.f32.xlu0 %v5889_v4 }
 0x78c   :  { %5896 = vmax.xlane.f32.xlu0 %v5895_v12 }
 0x78f   :  { %6696 = vperm.xlu1 %8381, %v12148_v57  }
 0x790   :  { %5902 = vmax.xlane.f32.xlu0 %v5901_v35 }
 0x793   :  { %v5828_v36 = vpop.xlane.xlu1 %5827 }
 0x794   :  { %5908 = vmax.xlane.f32.xlu0 %v5907_v22  ;;  %v6112_v11 = vrot.slane %v5828_v36, %v12163_v20 }
 0x795   :  { %v5831_v15 = vpop.xlane.xlu0 %5830 }
 0x796   :  { %v6116_v1 = vrot.slane %v5831_v15, %v12160_v60  ;;  %v12192_v15 = vld [vmem:[%s13162_s2 + $0x8] sm:$0xff] }
 0x797   :  { %v5834_v10 = vpop.xlane.xlu1 %5833 }
 0x798   :  { %5914 = vmax.xlane.f32.xlu0 %v5913_v9  ;;  %v6121_v13 = vrot.slane %v5834_v10, %v12163_v20  ;;  %v6117_v6 = vsel %vm6044_vm5, %v6116_v1, %v6112_v11 }
 0x799   :  { %v5837_v8 = vpop.xlane.xlu0 %5836 }
 0x79a   :  { %v6125_v0 = vrot.slane %v5837_v8, %v12160_v60 }
 0x79b   :  { %v5840_v29 = vpop.xlane.xlu1 %5839 }
 0x79c   :  { %5920 = vmax.xlane.f32.xlu0 %v5919_v38  ;;  %v6130_v5 = vrot.slane %v5840_v29, %v12163_v20  ;;  %v6126_v28 = vsel %vm6044_vm5, %v6125_v0, %v6121_v13 }
 0x79d   :  { %v5843_v16 = vpop.xlane.xlu0 %5842  ;;  %v6332_v63 = vsel %vm4050_vm13, %v6126_v28, %v6117_v6 }
 0x79e   :  { %v6134_v7 = vrot.slane %v5843_v16, %v12160_v60 }
 0x79f   :  { %v5846_v54 = vpop.xlane.xlu1 %5845 }
 0x7a0   :  { %v6139_v42 = vrot.slane %v5846_v54, %v12163_v20  ;;  %v6135_v33 = vsel %vm6044_vm5, %v6134_v7, %v6130_v5 }
 0x7a1   :  { %v5849_v62 = vpop.xlane.xlu0 %5848  ;;  %v6333_v46 = vsel %vm4052_vm14, %v6135_v33, %v6332_v63 }
 0x7a2   :  { %v6143_v30 = vrot.slane %v5849_v62, %v12160_v60 }
 0x7a3   :  { %v5852_v39 = vpop.xlane.xlu1 %5851 }
 0x7a4   :  { %v6148_v4 = vrot.slane %v5852_v39, %v12163_v20  ;;  %v6144_v19 = vsel %vm6044_vm5, %v6143_v30, %v6139_v42 }
 0x7a5   :  { %v5855_v51 = vpop.xlane.xlu0 %5854  ;;  %v6334_v36 = vsel %vm4054_vm15, %v6144_v19, %v6333_v46 }
 0x7a6   :  { %v6152_v59 = vrot.slane %v5855_v51, %v12160_v60 }
 0x7a7   :  { %v5858_v49 = vpop.xlane.xlu1 %5857 }
 0x7a8   :  { %v6157_v23 = vrot.slane %v5858_v49, %v12163_v20  ;;  %v6153_v35 = vsel %vm6044_vm5, %v6152_v59, %v6148_v4 }
 0x7a9   :  { %v5861_v41 = vpop.xlane.xlu0 %5860  ;;  %v6335_v10 = vsel %vm4056_vm0, %v6153_v35, %v6334_v36 }
 0x7aa   :  { %v6161_v58 = vrot.slane %v5861_v41, %v12160_v60 }
 0x7ab   :  { %v5864_v48 = vpop.xlane.xlu1 %5863 }
 0x7ac   :  { %v6166_v17 = vrot.slane %v5864_v48, %v12163_v20  ;;  %v6162_v61 = vsel %vm6044_vm5, %v6161_v58, %v6157_v23 }
 0x7ad   :  { %v5867_v34 = vpop.xlane.xlu0 %5866  ;;  %v6336_v29 = vsel %vm4058_vm1, %v6162_v61, %v6335_v10 }
 0x7ae   :  { %v6170_v12 = vrot.slane %v5867_v34, %v12160_v60 }
 0x7af   :  { %v5870_v53 = vpop.xlane.xlu1 %5869 }
 0x7b0   :  { %v6171_v22 = vsel %vm6044_vm5, %v6170_v12, %v6166_v17  ;;  %v6175_v9 = vrot.slane %v5870_v53, %v12163_v20 }
 0x7b1   :  { %v5873_v32 = vpop.xlane.xlu0 %5872  ;;  %v6337_v38 = vsel %vm4060_vm3, %v6171_v22, %v6336_v29 }
 0x7b2   :  { %6688 = vperm.xlu0 %8382, %v12192_v15   ;;  %v6179_v27 = vrot.slane %v5873_v32, %v12160_v60 }
 0x7b3   :  { %v5783_v8 = vpop.xlane.xlu1 %5782 }
 0x7b4   :  { %v6180_v16 = vsel %vm6044_vm5, %v6179_v27, %v6175_v9  ;;  %v6043_v23 = vrot.slane %v5783_v8, %v12160_v60 }
 0x7b5   :  { %v6338_v54 = vsel %vm13667_vm8, %v6180_v16, %v6337_v38  ;;  %v5780_v62 = vpop.xlane.xlu0 %5779 }
 0x7b6   :  { %6692 = vperm.xlu0 %8382, %v12205_v44   ;;  %v6359_v39 = vsel %vm6357_vm6, 0.0, %v6338_v54  ;;  %v6038_v58 = vrot.slane %v5780_v62, %v12163_v20 }
 0x7b7   :  { %v5792_v18 = vpop.xlane.xlu1 %5791  ;;  %v12210_v51 = vsel %vm6362_vm7, %v6359_v39, 0.0 }
 0x7b8   :  { %6417 = vrot.lane.b32.xlu1 %v12210_v51, %s13610_s23  ;;  %v6058_v6 = vrot.slane %v5792_v18, %v12163_v20  ;;  %v6045_v61 = vsel %vm6044_vm5, %v6043_v23, %v6038_v58 }
 0x7b9   :  { %v5786_v49 = vpop.xlane.xlu0 %5785 }
 0x7ba   :  { %6609 = vrot.lane.b32.xlu0 %v12210_v51, %s13612_s26  ;;  %v6049_v33 = vrot.slane %v5786_v49, %v12163_v20 }
 0x7bb   :  { %v5798_v0 = vpop.xlane.xlu1 %5797 }
 0x7bc   :  { %6460 = vrot.lane.b32.xlu1 %v12210_v51, %s13609_s10  ;;  %v6067_v12 = vrot.slane %v5798_v0, %v12163_v20 }
 0x7bd   :  { %v5789_v7 = vpop.xlane.xlu0 %5788 }
 0x7be   :  { %v6053_v11 = vrot.slane %v5789_v7, %v12160_v60 }
 0x7bf   :  { %v5804_v41 = vpop.xlane.xlu1 %5803 }
 0x7c0   :  { %6523 = vrot.lane.b32.xlu1 %v12210_v51, %s8431_s0  ;;  %v6054_v53 = vsel %vm6044_vm5, %v6053_v11, %v6049_v33  ;;  %v6076_v35 = vrot.slane %v5804_v41, %v12163_v20 }
 0x7c1   :  { %v5795_v1 = vpop.xlane.xlu0 %5794  ;;  %v6325_v9 = vsel %vm4050_vm13, %v6054_v53, %v6045_v61 }
 0x7c2   :  { %v6062_v28 = vrot.slane %v5795_v1, %v12160_v60 }
 0x7c3   :  { %v5810_v13 = vpop.xlane.xlu1 %5809 }
 0x7c4   :  { %6566 = vrot.lane.b32.xlu1 %v12210_v51, %s13617_s29  ;;  %v6063_v17 = vsel %vm6044_vm5, %v6062_v28, %v6058_v6  ;;  %v6085_v36 = vrot.slane %v5810_v13, %v12163_v20 }
 0x7c5   :  { %v5801_v30 = vpop.xlane.xlu0 %5800  ;;  %v6326_v29 = vsel %vm4052_vm14, %v6063_v17, %v6325_v9 }
 0x7c6   :  { %v6071_v4 = vrot.slane %v5801_v30, %v12160_v60 }
 0x7c7   :  { %v5816_v48 = vpop.xlane.xlu1 %5815 }
 0x7c8   :  { %v6072_v22 = vsel %vm6044_vm5, %v6071_v4, %v6067_v12  ;;  %v6094_v27 = vrot.slane %v5816_v48, %v12163_v20 }
 0x7c9   :  { %v5807_v5 = vpop.xlane.xlu0 %5806  ;;  %v6327_v16 = vsel %vm4054_vm15, %v6072_v22, %v6326_v29 }
 0x7ca   :  { %v6080_v19 = vrot.slane %v5807_v5, %v12160_v60 }
 0x7cb   :  { %v5822_v59 = vpop.xlane.xlu1 %5821 }
 0x7cc   :  { %v6081_v8 = vsel %vm6044_vm5, %v6080_v19, %v6076_v35  ;;  %v6103_v18 = vrot.slane %v5822_v59, %v12163_v20  ;;  %v6511_v59 = vmul.f32 %v11635_v2, %v12210_v51 }
 0x7cd   :  { %v5813_v42 = vpop.xlane.xlu0 %5812  ;;  %v6328_v39 = vsel %vm4056_vm0, %v6081_v8, %v6327_v16 }
 0x7ce   :  { %v6089_v63 = vrot.slane %v5813_v42, %v12160_v60 }
 0x7cf   :  { %v12227_v34 = vpop.xlane.xlu1 %5923 }
 0x7d0   :  { %v6090_v38 = vsel %vm6044_vm5, %v6089_v63, %v6085_v36 }
 0x7d1   :  { %v5819_v46 = vpop.xlane.xlu0 %5818  ;;  %v6329_v0 = vsel %vm4058_vm1, %v6090_v38, %v6328_v39 }
 0x7d2   :  { %v6098_v32 = vrot.slane %v5819_v46, %v12160_v60 }
 0x7d3   :  { %v5930_v10 = vpop.xlane.xlu1 %5929 }
 0x7d4   :  { %v6099_v54 = vsel %vm6044_vm5, %v6098_v32, %v6094_v27  ;;  %v6265_v35 = vrot.slane %v5930_v10, %v12163_v20  ;;  %v6256_v32 = vrot.slane %v12227_v34, %v12163_v20 }
 0x7d5   :  { %v5825_v62 = vpop.xlane.xlu0 %5824  ;;  %v6330_v7 = vsel %vm4060_vm3, %v6099_v54, %v6329_v0 }
 0x7d6   :  { %v6107_v49 = vrot.slane %v5825_v62, %v12160_v60 }
 0x7d7   :  { %v5936_v1 = vpop.xlane.xlu1 %5935 }
 0x7d8   :  { %v6108_v41 = vsel %vm6044_vm5, %v6107_v49, %v6103_v18  ;;  %v6274_v61 = vrot.slane %v5936_v1, %v12163_v20 }
 0x7d9   :  { %v6331_v13 = vsel %vm13668_vm4, %v6108_v41, %v6330_v7 }
 0x7da   :  { %v6358_v30 = vsel %vm6357_vm6, 0.0, %v6331_v13 }
 0x7db   :  { %v12257_v48 = vsel %vm6362_vm7, %v6358_v30, 0.0  ;;  %v5942_v5 = vpop.xlane.xlu1 %5941 }
 0x7dc   :  { %6607 = vrot.lane.b32.xlu1 %v12257_v48, %s13612_s26  ;;  %6415 = vrot.lane.b32.xlu0 %v12257_v48, %s13610_s23  ;;  %v6510_v11 = vmul.f32 %v11531_v31, %v12257_v48  ;;  %v6283_v9 = vrot.slane %v5942_v5, %v12163_v20 }
 0x7df   :  { %v5948_v28 = vpop.xlane.xlu1 %5947 }
 0x7e0   :  { %6653 = vrot.lane.b32.xlu1 %v6511_v59, %s13611_s24  ;;  %6458 = vrot.lane.b32.xlu0 %v12257_v48, %s13609_s10  ;;  %v6292_v10 = vrot.slane %v5948_v28, %v12163_v20 }
 0x7e3   :  { %v5954_v42 = vpop.xlane.xlu1 %5953 }
 0x7e4   :  { %6521 = vrot.lane.b32.xlu0 %v12257_v48, %s8431_s0  ;;  %6651 = vrot.lane.b32.xlu1 %v6510_v11, %s13611_s24  ;;  %v6301_v16 = vrot.slane %v5954_v42, %v12163_v20 }
 0x7e7   :  { %v5960_v2 = vpop.xlane.xlu1 %5959 }
 0x7e8   :  { %6564 = vrot.lane.b32.xlu0 %v12257_v48, %s13617_s29  ;;  %v6310_v34 = vrot.slane %v5960_v2, %v12163_v20 }
 0x7eb   :  { %v5966_v6 = vpop.xlane.xlu1 %5965 }
 0x7ec   :  { %v6319_v5 = vrot.slane %v5966_v6, %v12163_v20 }
 0x7ed   :  { %v5927_v58 = vpop.xlane.xlu0 %5926 }
 0x7ee   :  { %v6260_v17 = vrot.slane %v5927_v58, %v12160_v60 }
 0x7ef   :  { %v12275_v23 = vpop.xlane.xlu1 %5875 }
 0x7f0   :  { %v6261_v54 = vsel %vm6044_vm5, %v6260_v17, %v6256_v32 }
 0x7f1   :  { %v5933_v33 = vpop.xlane.xlu0 %5932 }
 0x7f2   :  { %v6269_v31 = vrot.slane %v5933_v33, %v12160_v60 }
 0x7f3   :  { %v5882_v36 = vpop.xlane.xlu1 %5881 }
 0x7f4   :  { %v6270_v27 = vsel %vm6044_vm5, %v6269_v31, %v6265_v35 }
 0x7f5   :  { %v5939_v4 = vpop.xlane.xlu0 %5938  ;;  %v6346_v18 = vsel %vm4050_vm13, %v6270_v27, %v6261_v54 }
 0x7f6   :  { %v6278_v53 = vrot.slane %v5939_v4, %v12160_v60 }
 0x7f7   :  { %v5888_v41 = vpop.xlane.xlu1 %5887 }
 0x7f8   :  { %v6279_v29 = vsel %vm6044_vm5, %v6278_v53, %v6274_v61 }
 0x7f9   :  { %v5945_v19 = vpop.xlane.xlu0 %5944  ;;  %v6347_v0 = vsel %vm4052_vm14, %v6279_v29, %v6346_v18  ;;  %v6202_v29 = vrot.slane %v5888_v41, %v12163_v20 }
 0x7fa   :  { %v6287_v46 = vrot.slane %v5945_v19, %v12160_v60 }
 0x7fb   :  { %v5894_v19 = vpop.xlane.xlu1 %5893 }
 0x7fc   :  { %v6288_v62 = vsel %vm6044_vm5, %v6287_v46, %v6283_v9  ;;  %v6193_v9 = vrot.slane %v5882_v36, %v12163_v20  ;;  %v6211_v54 = vrot.slane %v5894_v19, %v12163_v20 }
 0x7fd   :  { %v5951_v12 = vpop.xlane.xlu0 %5950  ;;  %v6348_v1 = vsel %vm4054_vm15, %v6288_v62, %v6347_v0 }
 0x7fe   :  { %v6296_v22 = vrot.slane %v5951_v12, %v12160_v60 }
 0x7ff   :  { %v5900_v31 = vpop.xlane.xlu1 %5899 }
 0x800   :  { %v6297_v49 = vsel %vm6044_vm5, %v6296_v22, %v6292_v10 }
 0x801   :  { %v5957_v63 = vpop.xlane.xlu0 %5956  ;;  %v6349_v59 = vsel %vm4056_vm0, %v6297_v49, %v6348_v1 }
 0x802   :  { %v6305_v8 = vrot.slane %v5957_v63, %v12160_v60 }
 0x803   :  { %v5906_v35 = vpop.xlane.xlu1 %5905 }
 0x804   :  { %v6306_v7 = vsel %vm6044_vm5, %v6305_v8, %v6301_v16  ;;  %v6184_v16 = vrot.slane %v12275_v23, %v12163_v20  ;;  %v6229_v18 = vrot.slane %v5906_v35, %v12163_v20 }
 0x805   :  { %v5963_v38 = vpop.xlane.xlu0 %5962  ;;  %v6350_v28 = vsel %vm4058_vm1, %v6306_v7, %v6349_v59 }
 0x806   :  { %v6314_v39 = vrot.slane %v5963_v38, %v12160_v60 }
 0x807   :  { %v5912_v61 = vpop.xlane.xlu1 %5911 }
 0x808   :  { %v6315_v13 = vsel %vm6044_vm5, %v6314_v39, %v6310_v34  ;;  %v6220_v39 = vrot.slane %v5900_v31, %v12163_v20  ;;  %v6238_v7 = vrot.slane %v5912_v61, %v12163_v20 }
 0x809   :  { %v5969_v30 = vpop.xlane.xlu0 %5968  ;;  %v6351_v42 = vsel %vm4060_vm3, %v6315_v13, %v6350_v28 }
 0x80a   :  { %v6323_v11 = vrot.slane %v5969_v30, %v12160_v60 }
 0x80b   :  { %v5918_v41 = vpop.xlane.xlu1 %5917 }
 0x80c   :  { %v6324_v58 = vsel %vm6044_vm5, %v6323_v11, %v6319_v5 }
 0x80d   :  { %v6352_v2 = vsel %vm13669_vm9, %v6324_v58, %v6351_v42  ;;  %v5879_v33 = vpop.xlane.xlu0 %5878  ;;  %v6247_v42 = vrot.slane %v5918_v41, %v12163_v20 }
 0x80e   :  { %v6361_v4 = vsel %vm6357_vm6, 0.0, %v6352_v2  ;;  %v6188_v27 = vrot.slane %v5879_v33, %v12160_v60 }
 0x80f   :  { %v12311_v12 = vsel %vm6362_vm7, %v6361_v4, 0.0 }
 0x810   :  { %6421 = vrot.lane.b32.xlu1 %v12311_v12, %s13610_s23  ;;  %v6513_v10 = vmul.f32 %v11545_v21, %v12311_v12  ;;  %v6189_v49 = vsel %vm6044_vm5, %v6188_v27, %v6184_v16  ;;  %v8495_v16 = vmov 6  }
 0x811   :  { %v5885_v6 = vpop.xlane.xlu0 %5884  ;;  %8383 = vset.pattern.permute.xlu0 %v8495_v16  ;;  %8384 = vset.pattern.permute.xlu1 %v8495_v16 }
 0x812   :  { %v6197_v46 = vrot.slane %v5885_v6, %v12160_v60 }
 0x814   :  { %6464 = vrot.lane.b32.xlu1 %v12311_v12, %s13609_s10  ;;  %v6198_v62 = vsel %vm6044_vm5, %v6197_v46, %v6193_v9  ;;  %v6370_v46 = vsel %vm6369_vm11, %v13621_v43, %v11551_v40 }
 0x815   :  { %v5891_v53 = vpop.xlane.xlu0 %5890  ;;  %v6339_v1 = vsel %vm4050_vm13, %v6198_v62, %v6189_v49  ;;  %vm6404_vm12 = vcmp.ge.s32.totalorder %v6370_v46, 2  ;;  %vm6514_vm8 = vcmp.lt.s32.totalorder %v6370_v46, 7  ;;  %vm6600_vm4 = vcmp.lt.s32.totalorder %v6370_v46, 5 }
 0x816   :  { %v6206_v22 = vrot.slane %v5891_v53, %v12160_v60 }
 0x818   :  { %6527 = vrot.lane.b32.xlu1 %v12311_v12, %s8431_s0  ;;  %v6207_v34 = vsel %vm6044_vm5, %v6206_v22, %v6202_v29 }
 0x819   :  { %v5897_v63 = vpop.xlane.xlu0 %5896  ;;  %v6340_v30 = vsel %vm4052_vm14, %v6207_v34, %v6339_v1  ;;  %v12394_v34 = vld [vmem:[%s13162_s2] sm:$0xff] }
 0x81a   :  { %v6215_v8 = vrot.slane %v5897_v63, %v12160_v60 }
 0x81c   :  { %6570 = vrot.lane.b32.xlu1 %v12311_v12, %s13617_s29  ;;  %v6216_v0 = vsel %vm6044_vm5, %v6215_v8, %v6211_v54 }
 0x81d   :  { %v5903_v17 = vpop.xlane.xlu0 %5902  ;;  %v6341_v59 = vsel %vm4054_vm15, %v6216_v0, %v6340_v30  ;;  %v13695_v0 = vld [vmem:[#allocation13_spill] sm:$0xff] }
 0x81e   :  { %v6224_v38 = vrot.slane %v5903_v17, %v12160_v60 }
 0x820   :  { %6613 = vrot.lane.b32.xlu1 %v12311_v12, %s13612_s26  ;;  %v6225_v13 = vsel %vm6044_vm5, %v6224_v38, %v6220_v39 }
 0x821   :  { %v5909_v32 = vpop.xlane.xlu0 %5908  ;;  %v6342_v58 = vsel %vm4056_vm0, %v6225_v13, %v6341_v59 }
 0x822   :  { %v6233_v36 = vrot.slane %v5909_v32, %v12160_v60  ;;  %v13671_v32 = vmov 0  }
 0x823   :  { %v6405_v9 = vsel %vm6404_vm12, 1, %v13671_v32  ;;  %v6515_v38 = vsel %vm6514_vm8, 1, %v13671_v32 }
 0x824   :  { %6657 = vrot.lane.b32.xlu1 %v6513_v10, %s13611_s24  ;;  %v6234_v5 = vsel %vm6044_vm5, %v6233_v36, %v6229_v18  ;;  %v6409_v40 = vrot.slane %v6405_v9, %v13622_v25  ;;  %v6601_v18 = vsel %vm6600_vm4, 1, %v13671_v32  ;;  %v6519_v49 = vrot.slane %v6515_v38, %v13622_v25  ;;  %v13686_v38 = vld [vmem:[#allocation49_spill] sm:$0xff] }
 0x825   :  { %v5915_v21 = vpop.xlane.xlu0 %5914  ;;  %v6343_v33 = vsel %vm4058_vm1, %v6234_v5, %v6342_v58 }
 0x826   :  { %v6242_v23 = vrot.slane %v5915_v21, %v12160_v60  ;;  %vm12401_vm9 = vcmp.eq.s32.totalorder %v6409_v40, 1 }
 0x828   :  { %v6243_v11 = vsel %vm6044_vm5, %v6242_v23, %v6238_v7  ;;  %6708 = vperm.xlu1 %8384, %v12192_v15   ;;  %v6605_v15 = vrot.slane %v6601_v18, %v13622_v25 }
 0x829   :  { %v5921_v28 = vpop.xlane.xlu0 %5920  ;;  %v6344_v4 = vsel %vm4060_vm3, %v6243_v11, %v6343_v33  ;;  %v13701_v11 = vld [vmem:[#allocation64_spill] sm:$0xff] }
 0x82a   :  { %v6251_v2 = vrot.slane %v5921_v28, %v12160_v60  ;;  %v12366_v60 = vpop.permute.xlu1 %6696 }
 0x82c   :  { %v6252_v19 = vsel %vm6044_vm5, %v6251_v2, %v6247_v42  ;;  %vm6451_vm5 = vcmp.ge.s32.totalorder %v6370_v46, 1  ;;  %6712 = vperm.xlu1 %8384, %v12205_v44  }
 0x82d   :  { %v6345_v6 = vsel %vm13670_vm10, %v6252_v19, %v6344_v4  ;;  %v6452_v10 = vsel %vm6451_vm5, 1, %v13671_v32  ;;  %vm12439_vm5 = vcmp.eq.s32.totalorder %v6519_v49, 1 }
 0x82e   :  { %v6360_v31 = vsel %vm6357_vm6, 0.0, %v6345_v6  ;;  %v6418_v20 = vpop.permute.xlu1 %6417  ;;  %vm6557_vm6 = vcmp.lt.s32.totalorder %v6370_v46, 6  ;;  %v6456_v54 = vrot.slane %v6452_v10, %v13622_v25 }
 0x82f   :  { %v12360_v53 = vsel %vm6362_vm7, %v6360_v31, 0.0  ;;  %vm6371_vm7 = vcmp.ge.s32.totalorder %v6370_v46, 3  ;;  %v6428_v23 = vsel %vm12401_vm9, %v6418_v20, 0.0 }
 0x830   :  { %6419 = vrot.lane.b32.xlu0 %v12360_v53, %s13610_s23  ;;  %v6512_v17 = vmul.f32 %v11535_v24, %v12360_v53  ;;  %v6558_v24 = vsel %vm6557_vm6, 1, %v13671_v32  ;;  %v6372_v29 = vsel %vm6371_vm7, 1, %v13671_v32  ;;  %vm12407_vm10 = vcmp.eq.s32.totalorder %v6456_v54, 1 }
 0x831   :  { %v12372_v35 = vpop.permute.xlu0 %6688  ;;  %v6562_v62 = vrot.slane %v6558_v24, %v13622_v25  ;;  %v6376_v21 = vrot.slane %v6372_v29, %v13622_v25  ;;  %v12429_v25 = vld [vmem:[%s13162_s2 + $0x28] sm:$0xff]  ;;  %v6448_v28 = vmul.f32 %v11585_v26, %v6428_v23  ;;  %vm12450_vm6 = vcmp.eq.s32.totalorder %v6605_v15, 1 }
 0x832   :  { %v6461_v63 = vpop.permute.xlu1 %6460  ;;  %vm13702_vm7 = vcmask 1047559  }
 0x833   :  { %vm12411_vm11 = vcmp.eq.s32.totalorder %v6562_v62, 1  ;;  %vm12418_vm12 = vcmp.eq.s32.totalorder %v6376_v21, 1  ;;  %v6471_v30 = vsel %vm12407_vm10, %v6461_v63, 0.0  ;;  %vm13703_vm8 = vmmov %vm13702_vm7 }
 0x834   :  { %6462 = vrot.lane.b32.xlu0 %v12360_v53, %s13609_s10  ;;  %v6379_v44 = vsel %vm12418_vm12, %v12210_v51, 0.0  ;;  %v6491_v2 = vmul.f32 %v11591_v45, %v6471_v30  ;;  %v12464_v45 = vld [vmem:[%s13162_s2 + $0x38] sm:$0xff]  ;;  %vm13704_vm4 = vmmov %vm13702_vm7 }
 0x835   :  { %v12381_v22 = vpop.permute.xlu0 %6692  ;;  %v6401_v26 = vmul.f32 %v11567_v37, %v6379_v44  ;;  %v6378_v37 = vsel %vm12418_vm12, %v12257_v48, 0.0  ;;  %v13685_v48 = vld [vmem:[#allocation70_spill] sm:$0xff] }
 0x836   :  { %v6524_v61 = vpop.permute.xlu1 %6523 }
 0x837   :  { %v6534_v42 = vsel %vm12439_vm5, %v6524_v61, 0.0 }
 0x838   :  { %6525 = vrot.lane.b32.xlu0 %v12360_v53, %s8431_s0  ;;  %v6554_v31 = vmul.f32 %v11675_v52, %v6534_v42 }
 0x839   :  { %v6610_v8 = vpop.permute.xlu0 %6609 }
 0x83a   :  { %v6567_v27 = vpop.permute.xlu1 %6566  ;;  %v6620_v19 = vsel %vm12450_vm6, %v6610_v8, 0.0 }
 0x83b   :  { %v6577_v5 = vsel %vm12411_vm11, %v6567_v27, 0.0  ;;  %v6640_v9 = vmul.f32 %v11623_v55, %v6620_v19  ;;  %v13684_v27 = vld [vmem:[#allocation50_spill] sm:$0xff]  ;;  %v13687_v55 = vld [vmem:[#allocation44_spill] sm:$0xff] }
 0x83c   :  { %6568 = vrot.lane.b32.xlu0 %v12360_v53, %s13617_s29  ;;  %v6597_v33 = vmul.f32 %v11613_v47, %v6577_v5  ;;  %v12469_v47 = vld [vmem:[%s13162_s2 + $0x30] sm:$0xff]  ;;  %v13689_v5 = vld [vmem:[#allocation69_spill] sm:$0xff] }
 0x83e   :  { %v6668_v32 = vadd.f32 %v6597_v33, %v6554_v31  ;;  %v6381_v31 = vsel %vm12418_vm12, %v12311_v12, 0.0 }
 0x840   :  { %6611 = vrot.lane.b32.xlu0 %v12360_v53, %s13612_s26  ;;  %v6676_v62 = vadd.f32 %v6668_v32, %v6640_v9  ;;  %v13691_v32 = vld [vmem:[#allocation51_spill] sm:$0xff] }
 0x844   :  { %6655 = vrot.lane.b32.xlu0 %v6512_v17, %s13611_s24  ;;  %v6644_v17 = vadd.f32 %v6448_v28, %v6401_v26 }
 0x848   :  { %6704 = vperm.xlu0 %8383, %v12394_v34  }
 0x84c   :  { %6716 = vperm.xlu0 %8383, %v12148_v57   ;;  %v12434_v57 = vld [vmem:[%s13162_s2 + $0x20] sm:$0xff] }
 0x84d   :  { %6721 = vperm.xlu1 %8384, %v12434_v57  }
 0x84e   :  { %v6608_v36 = vpop.permute.xlu1 %6607  ;;  %v6416_v39 = vpop.permute.xlu0 %6415 }
 0x84f   :  { %v6427_v6 = vsel %vm12401_vm9, %v6416_v39, 0.0  ;;  %v6619_v52 = vsel %vm12450_vm6, %v6608_v36, 0.0  ;;  %v13688_v39 = vld [vmem:[#allocation74_spill] sm:$0xff] }
 0x850   :  { %6726 = vperm.xlu0 %8383, %v12429_v25   ;;  %v6447_v8 = vmul.f32 %v13684_v27, %v6427_v6  ;;  %v6639_v21 = vmul.f32 %v13688_v39, %v6619_v52  ;;  %v13692_v27 = vld [vmem:[#allocation42_spill] sm:$0xff] }
 0x851   :  { %6731 = vperm.xlu1 %8384, %v12469_v47  }
 0x852   :  { %v6459_v1 = vpop.permute.xlu0 %6458  ;;  %v6654_v59 = vpop.permute.xlu1 %6653 }
 0x853   :  { %v6470_v58 = vsel %vm12407_vm10, %v6459_v1, 0.0  ;;  %v6664_v20 = vadd.f32 %v6654_v59, %v6491_v2 }
 0x854   :  { %v6490_v63 = vmul.f32 %v11655_v14, %v6470_v58  ;;  %6736 = vperm.xlu0 %8383, %v12464_v45   ;;  %v6400_v14 = vmul.f32 %v13685_v48, %v6378_v37 }
 0x855   :  { %v6672_v29 = vadd.f32 %v6664_v20, %v6644_v17  ;;  %v13690_v20 = vld [vmem:[#allocation56_spill] sm:$0xff] }
 0x856   :  { %v6522_v51 = vpop.permute.xlu0 %6521  ;;  %v6652_v46 = vpop.permute.xlu1 %6651  ;;  %v6643_v18 = vadd.f32 %v6447_v8, %v6400_v14  ;;  %v6403_v8 = vmul.f32 %v13692_v27, %v6381_v31  ;;  %v34_v31 = vld [vmem:[%s13163_s3 + $0x20] sm:$0xff] }
 0x857   :  { %v6533_v61 = vsel %vm12439_vm5, %v6522_v51, 0.0  ;;  %v6663_v40 = vadd.f32 %v6652_v46, %v6490_v63  ;;  %v6680_v23 = vadd.f32 %v6676_v62, %v6672_v29  ;;  %v6380_v29 = vsel %vm12418_vm12, %v12360_v53, 0.0  ;;  %vm13707_vm12 = vmmov %vm13704_vm4 }
 0x858   :  { %v6553_v16 = vmul.f32 %v13686_v38, %v6533_v61 }
 0x859   :  { %v6671_v15 = vadd.f32 %v6663_v40, %v6643_v18  ;;  %v6700_v30 = vadd.f32 %v12372_v35, %v6680_v23  ;;  %v13694_v40 = vld [vmem:[#allocation24_spill] sm:$0xff]  ;;  %v13697_v18 = vld [vmem:[#allocation54_spill] sm:$0xff]  ;;  %v13698_v23 = vld [vmem:[#allocation11_spill] sm:$0xff] }
 0x85a   :  { %v6565_v10 = vpop.permute.xlu0 %6564 }
 0x85b   :  { %v6576_v24 = vsel %vm12411_vm11, %v6565_v10, 0.0  ;;  %v13693_v10 = vld [vmem:[#allocation26_spill] sm:$0xff] }
 0x85c   :  { %v6596_v54 = vmul.f32 %v13687_v55, %v6576_v24 }
 0x85e   :  { %v6667_v49 = vadd.f32 %v6596_v54, %v6553_v16 }
 0x860   :  { %v6675_v1 = vadd.f32 %v6667_v49, %v6639_v21  ;;  %v13696_v21 = vld [vmem:[#allocation47_spill] sm:$0xff] }
 0x862   :  { %v6679_v36 = vadd.f32 %v6675_v1, %v6671_v15  ;;  %v6402_v15 = vmul.f32 %v13698_v23, %v6380_v29 }
 0x864   :  { %v6699_v59 = vadd.f32 %v13689_v5, %v6679_v36  ;;  %v13699_v36 = vld [vmem:[#allocation32_spill] sm:$0xff] }
 0x866   :  { %v8221_v44 = vpack.c.bf16 %v6700_v30, %v6699_v59  ;;  %v13700_v30 = vld [vmem:[#allocation59_spill] sm:$0xff] }
 0x868   :  { %8222 = vmatprep.subr.bf16.mxu0 %v8221_v44  ;;  %8229 = vmatprep.subr.bf16.mxu1 %v8221_v44 }
 0x869   :  { %8224 = vmatpush3.bf16.msra.mxu0 %v8221_v44  ;;  %8231 = vmatpush3.bf16.msra.mxu1 %v8221_v44 }
 0x882   :  { %v6422_v28 = vpop.permute.xlu1 %6421 }
 0x883   :  { %v6430_v6 = vsel %vm12401_vm9, %v6422_v28, 0.0 }
 0x884   :  { %v6450_v63 = vmul.f32 %v13690_v20, %v6430_v6  ;;  %v36_v20 = vld [vmem:[%s13163_s3 + $0x30] sm:$0xff] }
 0x886   :  { %v6465_v42 = vpop.permute.xlu1 %6464  ;;  %v6646_v16 = vadd.f32 %v6450_v63, %v6403_v8  ;;  %v37_v63 = vld [vmem:[%s13163_s3 + $0x38] sm:$0xff] }
 0x887   :  { %v6473_v35 = vsel %vm12407_vm10, %v6465_v42, 0.0 }
 0x888   :  { %v6493_v9 = vmul.f32 %v13691_v32, %v6473_v35 }
 0x88a   :  { %v6528_v58 = vpop.permute.xlu1 %6527 }
 0x88b   :  { %v6536_v61 = vsel %vm12439_vm5, %v6528_v58, 0.0 }
 0x88c   :  { %v6556_v38 = vmul.f32 %v13694_v40, %v6536_v61 }
 0x88e   :  { %v6571_v2 = vpop.permute.xlu1 %6570 }
 0x88f   :  { %v6579_v37 = vsel %vm12411_vm11, %v6571_v2, 0.0 }
 0x890   :  { %v6599_v52 = vmul.f32 %v13693_v10, %v6579_v37  ;;  %v8396_v37 = vld [vmem:[%s13163_s3 + $0x8] sm:$0xff] }
 0x892   :  { %v6614_v26 = vpop.permute.xlu1 %6613  ;;  %v6670_v53 = vadd.f32 %v6599_v52, %v6556_v38 }
 0x893   :  { %v6622_v48 = vsel %vm12450_vm6, %v6614_v26, 0.0 }
 0x894   :  { %v6642_v39 = vmul.f32 %v13695_v0, %v6622_v48 }
 0x896   :  { %v6658_v17 = vpop.permute.xlu1 %6657  ;;  %v6678_v28 = vadd.f32 %v6670_v53, %v6642_v39 }
 0x897   :  { %v6666_v24 = vadd.f32 %v6658_v17, %v6493_v9 }
 0x899   :  { %v6674_v1 = vadd.f32 %v6666_v24, %v6646_v16 }
 0x8a2   :  { %v6420_v33 = vpop.permute.xlu0 %6419 }
 0x8a3   :  { %v6429_v12 = vsel %vm12401_vm9, %v6420_v33, 0.0  ;;  %v6682_v33 = vadd.f32 %v6678_v28, %v6674_v1  ;;  %vm13705_vm9 = vmmov %vm13704_vm4 }
 0x8a4   :  { %v6449_v41 = vmul.f32 %v13696_v21, %v6429_v12 }
 0x8a6   :  { %v6463_v51 = vpop.permute.xlu0 %6462  ;;  %v6645_v42 = vadd.f32 %v6449_v41, %v6402_v15 }
 0x8a7   :  { %v6472_v55 = vsel %vm12407_vm10, %v6463_v51, 0.0  ;;  %vm8114_vm10 = vcmask 15360  }
 0x8a8   :  { %v6492_v7 = vmul.f32 %v13699_v36, %v6472_v55 }
 0x8aa   :  { %v6526_v19 = vpop.permute.xlu0 %6525 }
 0x8ab   :  { %v6535_v54 = vsel %vm12439_vm5, %v6526_v19, 0.0  ;;  %v6702_v19 = vadd.f32 %v12366_v60, %v6682_v33  ;;  %v8397_v60 = vld [vmem:[%s13163_s3 + $0x18] sm:$0xff] }
 0x8ac   :  { %v6555_v5 = vmul.f32 %v13700_v30, %v6535_v54 }
 0x8ae   :  { %v6569_v46 = vpop.permute.xlu0 %6568 }
 0x8af   :  { %v6578_v14 = vsel %vm12411_vm11, %v6569_v46, 0.0  ;;  %v6709_v46 = vpop.permute.xlu1 %6708  ;;  %vm13706_vm11 = vmmov %vm13704_vm4 }
 0x8b0   :  { %v6598_v49 = vmul.f32 %v13697_v18, %v6578_v14 }
 0x8b2   :  { %v6612_v62 = vpop.permute.xlu0 %6611  ;;  %v6669_v58 = vadd.f32 %v6598_v49, %v6555_v5 }
 0x8b3   :  { %v6621_v13 = vsel %vm12450_vm6, %v6612_v62, 0.0  ;;  %v6713_v32 = vpop.permute.xlu1 %6712 }
 0x8b4   :  { %v6641_v59 = vmul.f32 %v13701_v11, %v6621_v13 }
 0x8b6   :  { %v6656_v44 = vpop.permute.xlu0 %6655  ;;  %v6677_v51 = vadd.f32 %v6669_v58, %v6641_v59 }
 0x8b7   :  { %v6665_v2 = vadd.f32 %v6656_v44, %v6492_v7  ;;  %v8496_v7 = vmov 0.0  }
 0x8b9   :  { %v6673_v26 = vadd.f32 %v6665_v2, %v6645_v42 }
 0x8bb   :  { %v6681_v4 = vadd.f32 %v6677_v51, %v6673_v26 }
 0x8bd   :  { %v6701_v6 = vadd.f32 %v12381_v22, %v6681_v4  ;;  %v35_v22 = vld [vmem:[%s13163_s3 + $0x28] sm:$0xff] }
 0x8bf   :  { %v8225_v35 = vpack.c.bf16 %v6702_v19, %v6701_v6 }
 0x8c1   :  { %8226 = vmatprep.subr.bf16.mxu0 %v8225_v35  ;;  %8230 = vmatprep.subr.bf16.mxu1 %v8225_v35 }
 0x8c2   :  { %8228 = vmatpush3.bf16.msra.mxu0 %v8225_v35  ;;  %8232 = vmatpush3.bf16.msra.mxu1 %v8225_v35 }
 0x8c5   :  { %8206 = vmatmul.mubr.msk.f32.vlgmr.msra.gmra.mrb[4].mxu0 %vm4081_vm2, %v8396_v37  ;;  %8209 = vmatmul.mubr.msk.f32.vlgmr.msra.gmra.mrb[0].mxu1 %vm4081_vm2, %v8397_v60 }
 0x8c6   :  { %8211 = vmatprep.mubr.msk.f32.mxu1 %vm4081_vm2, %v34_v31 }
 0x8c7   :  { %v6705_v17 = vpop.permute.xlu0 %6704 }
 0x8c9   :  { %8212 = vmatmul.mubr.msk.f32.gmra.mrb[2].mxu1 %vm4081_vm2, %v35_v22 }
 0x8ca   :  { %8214 = vmatprep.mubr.msk.f32.mxu1 %vm4081_vm2, %v36_v20 }
 0x8cb   :  { %v6717_v61 = vpop.permute.xlu0 %6716 }
 0x8cc   :  { %v6722_v16 = vpop.permute.xlu1 %6721 }
 0x8cd   :  { %8215 = vmatmul.mubr.msk.f32.gmra.mrb[4].mxu1 %vm4081_vm2, %v37_v63  ;;  %vm7432_vm2 = vcmask 58368  }
 0x8cf   :  { %v6727_v24 = vpop.permute.xlu0 %6726 }
 0x8d0   :  { %v6732_v49 = vpop.permute.xlu1 %6731 }
 0x8d3   :  { %v6737_v18 = vpop.permute.xlu0 %6736 }
 0x998   :  { %v8207_v9 = vpop.f32.mrb[4].mxu0  ;;  %v8210_v27 = vpop.f32.mrb[0].mxu1 }
 0x999   :  { %v6831_v8 = vadd.f32 %v8207_v9, %v6709_v46  ;;  %v6825_v10 = vpop.f32.mrb[5].mxu0  ;;  %v6835_v52 = vpop.f32.mrb[1].mxu1  ;;  %v6841_v14 = vadd.f32 %v8210_v27, %v6717_v61 }
 0x99a   :  { %v6826_v48 = vadd.f32 %v6825_v10, %v6705_v17  ;;  %v6836_v40 = vadd.f32 %v6835_v52, %v6713_v32 }
 0x99b   :  { %v6865_v12 = vmax.f32 %v6831_v8, 0.0  ;;  %v6867_v54 = vmax.f32 %v6841_v14, 0.0 }
 0x99c   :  { %v6864_v29 = vmax.f32 %v6826_v48, 0.0  ;;  %v8213_v38 = vpop.f32.mrb[2].mxu1  ;;  %v6866_v0 = vmax.f32 %v6836_v40, 0.0 }
 0x99d   :  { %v6845_v55 = vpop.f32.mrb[3].mxu1  ;;  %6882 = vrot.lane.b32.xlu0 %v6865_v12, %s8436_s27  ;;  %v6851_v62 = vadd.f32 %v8213_v38, %v6727_v24  ;;  %v6970_v30 = vcombine.high %v6865_v12, %v8496_v7  ;;  %v6977_v11 = vrot.slane %v6865_v12, %v13664_v3  ;;  %v7102_v59 = vcombine.high %v6867_v54, %v8496_v7 }
 0x99e   :  { %6880 = vrot.lane.b32.xlu1 %v6864_v29, %s8436_s27  ;;  %v6846_v39 = vadd.f32 %v6845_v55, %v6722_v16  ;;  %v6904_v42 = vcombine.high %v6864_v29, %v8496_v7  ;;  %v12570_v58 = vrot.slane %v6864_v29, %v13664_v3  ;;  %v7109_v33 = vrot.slane %v6867_v54, %v13664_v3 }
 0x99f   :  { %v6869_v13 = vmax.f32 %v6851_v62, 0.0  ;;  %v7036_v51 = vcombine.high %v6866_v0, %v8496_v7  ;;  %v12578_v19 = vrot.slane %v6970_v30, %v13664_v3  ;;  %v12581_v6 = vrot.slane %v6866_v0, %v13664_v3 }
 0x9a0   :  { %v8216_v21 = vpop.f32.mrb[4].mxu1  ;;  %v6868_v23 = vmax.f32 %v6846_v39, 0.0  ;;  %v12587_v60 = vrot.slane %v7102_v59, %v13664_v3  ;;  %v12593_v46 = vrot.slane %v6904_v42, %v13664_v3 }
 0x9a1   :  { %v6855_v41 = vpop.f32.mrb[5].mxu1  ;;  %6886 = vrot.lane.b32.xlu0 %v6867_v54, %s8436_s27  ;;  %v6861_v53 = vadd.f32 %v8216_v21, %v6737_v18  ;;  %v7234_v35 = vcombine.high %v6869_v13, %v8496_v7  ;;  %v12599_v27 = vrot.slane %v7036_v51, %v13664_v3  ;;  %v12602_v8 = vrot.slane %v6869_v13, %v13664_v3 }
 0x9a2   :  { %6884 = vrot.lane.b32.xlu1 %v6866_v0, %s8436_s27  ;;  %v6856_v15 = vadd.f32 %v6855_v41, %v6732_v49  ;;  %v7168_v22 = vcombine.high %v6868_v23, %v8496_v7  ;;  %v12610_v12 = vrot.slane %v6868_v23, %v13664_v3 }
 0x9a3   :  { %v6871_v1 = vmax.f32 %v6861_v53, 0.0  ;;  %v12607_v48 = vrot.slane %v7234_v35, %v13664_v3 }
 0x9a4   :  { %v6870_v36 = vmax.f32 %v6856_v15, 0.0  ;;  %v12617_v29 = vrot.slane %v7168_v22, %v13664_v3 }
 0x9a5   :  { %6890 = vrot.lane.b32.xlu0 %v6869_v13, %s8436_s27  ;;  %v7366_v61 = vcombine.high %v6871_v1, %v8496_v7  ;;  %v12620_v40 = vrot.slane %v6871_v1, %v13664_v3 }
 0x9a6   :  { %6888 = vrot.lane.b32.xlu1 %v6868_v23, %s8436_s27  ;;  %v7300_v32 = vcombine.high %v6870_v36, %v8496_v7  ;;  %v12623_v38 = vrot.slane %v6870_v36, %v13664_v3 }
 0x9a7   :  { %v12626_v54 = vrot.slane %v7366_v61, %v13664_v3 }
 0x9a8   :  { %v12629_v62 = vrot.slane %v7300_v32, %v13664_v3 }
 0x9a9   :  { %6894 = vrot.lane.b32.xlu0 %v6871_v1, %s8436_s27 }
 0x9aa   :  { %6892 = vrot.lane.b32.xlu1 %v6870_v36, %s8436_s27 }
 0xa0f   :  { %v6883_v5 = vpop.permute.xlu0 %6882 }
 0xa10   :  { %v6992_v44 = vrot.slane %v6883_v5, %v13664_v3  ;;  %v6881_v28 = vpop.permute.xlu1 %6880  ;;  %v6985_v14 = vcombine.high %v6883_v5, %v8496_v7 }
 0xa11   :  { %v12573_v2 = vrot.slane %v6881_v28, %v13664_v3  ;;  %v6919_v9 = vcombine.high %v6881_v28, %v8496_v7 }
 0xa12   :  { %v7000_v26 = vcombine.low %v6977_v11, %v6992_v44  ;;  %v7001_v4 = vcombine.high %v6977_v11, %v6992_v44  ;;  %v6999_v53 = vrot.slane %v6985_v14, %v13664_v3 }
 0xa13   :  { %v6934_v31 = vcombine.low %v12570_v58, %v12573_v2  ;;  %v6887_v37 = vpop.permute.xlu0 %6886  ;;  %v12632_v0 = vrot.slane %v6919_v9, %v13664_v3  ;;  %v6935_v23 = vcombine.high %v12570_v58, %v12573_v2 }
 0xa14   :  { %v7124_v20 = vrot.slane %v6887_v37, %v13664_v3  ;;  %v6885_v63 = vpop.permute.xlu1 %6884  ;;  %v7008_v17 = vrot.slane %v7000_v26, %v13665_v50  ;;  %v7015_v52 = vrot.slane %v7001_v4, %v13665_v50  ;;  %v7117_v15 = vcombine.high %v6887_v37, %v8496_v7 }
 0xa15   :  { %v12614_v24 = vrot.slane %v6934_v31, %v13665_v50  ;;  %v7058_v39 = vrot.slane %v6885_v63, %v13664_v3  ;;  %v7051_v1 = vcombine.high %v6885_v63, %v8496_v7  ;;  %v6950_v11 = vcombine.low %v12593_v46, %v12632_v0 }
 0xa16   :  { %v7457_v10 = vsel %vm7432_vm2, %v7008_v17, 0.0  ;;  %v7132_v16 = vcombine.low %v7109_v33, %v7124_v20  ;;  %v7133_v21 = vcombine.high %v7109_v33, %v7124_v20  ;;  %v7463_v49 = vsel %vm7432_vm2, %v7015_v52, 0.0 }
 0xa17   :  { %7458 = vadd.xlane.f32.xlu0 %v7457_v10  ;;  %v6891_v55 = vpop.permute.xlu0 %6890  ;;  %v7433_v18 = vsel %vm7432_vm2, %v12614_v24, 0.0  ;;  %v7032_v13 = vcombine.high %v7008_v17, %v8496_v7  ;;  %v6951_v59 = vcombine.high %v12593_v46, %v12632_v0  ;;  %v7033_v28 = vcombine.high %v7015_v52, %v8496_v7 }
 0xa18   :  { %v6889_v41 = vpop.permute.xlu1 %6888  ;;  %7434 = vadd.xlane.f32.xlu1 %v7433_v18  ;;  %v7249_v36 = vcombine.high %v6891_v55, %v8496_v7  ;;  %v12646_v30 = vrot.slane %v6891_v55, %v13664_v3  ;;  %v7140_v5 = vrot.slane %v7132_v16, %v13665_v50  ;;  %v7066_v42 = vcombine.low %v12581_v6, %v7058_v39 }
 0xa19   :  { %v7183_v44 = vcombine.high %v6889_v41, %v8496_v7  ;;  %v7460_v2 = vsel %vm7432_vm2, %v7032_v13, 0.0  ;;  %v7147_v51 = vrot.slane %v7133_v21, %v13665_v50  ;;  %v12660_v26 = vrot.slane %v7117_v15, %v13664_v3 }
 0xa1a   :  { %v7505_v33 = vsel %vm7432_vm2, %v7140_v5, 0.0  ;;  %v7067_v4 = vcombine.high %v12581_v6, %v7058_v39  ;;  %v12664_v35 = vrot.slane %v6889_v41, %v13664_v3  ;;  %v12667_v31 = vrot.slane %v7051_v1, %v13664_v3 }
 0xa1b   :  { %7464 = vadd.xlane.f32.xlu0 %v7463_v49  ;;  %v6895_v58 = vpop.permute.xlu0 %6894  ;;  %v12670_v37 = vrot.slane %v7249_v36, %v13664_v3  ;;  %v7264_v22 = vcombine.low %v12602_v8, %v12646_v30  ;;  %v7265_v20 = vcombine.high %v12602_v8, %v12646_v30  ;;  %v12677_v63 = vrot.slane %v7183_v44, %v13664_v3 }
 0xa1c   :  { %7461 = vadd.xlane.f32.xlu1 %v7460_v2  ;;  %v7381_v6 = vcombine.high %v6895_v58, %v8496_v7  ;;  %v6893_v17 = vpop.permute.xlu1 %6892  ;;  %v7466_v61 = vsel %vm7432_vm2, %v7033_v28, 0.0  ;;  %v6949_v32 = vrot.slane %v6935_v23, %v13665_v50  ;;  %v7511_v9 = vsel %vm7432_vm2, %v7147_v51, 0.0 }
 0xa1d   :  { %v7164_v10 = vcombine.high %v7140_v5, %v8496_v7  ;;  %v7074_v52 = vrot.slane %v7066_v42, %v13665_v50  ;;  %v7016_v14 = vcombine.low %v12578_v19, %v6999_v53  ;;  %v7198_v8 = vcombine.low %v12610_v12, %v12664_v35 }
 0xa1e   :  { %v12689_v16 = vrot.slane %v6895_v58, %v13664_v3  ;;  %v7081_v55 = vrot.slane %v7067_v4, %v13665_v50  ;;  %v7315_v39 = vcombine.high %v6893_v17, %v8496_v7  ;;  %v12694_v21 = vrot.slane %v6893_v17, %v13664_v3 }
 0xa1f   :  { %7506 = vadd.xlane.f32.xlu0 %v7505_v33  ;;  %v7017_v41 = vcombine.high %v12578_v19, %v6999_v53  ;;  %v7148_v18 = vcombine.low %v12587_v60, %v12660_v26  ;;  %v7199_v49 = vcombine.high %v12610_v12, %v12664_v35  ;;  %v12702_v13 = vrot.slane %v7381_v6, %v13664_v3 }
 0xa20   :  { %7467 = vadd.xlane.f32.xlu1 %v7466_v61  ;;  %v7439_v23 = vsel %vm7432_vm2, %v6949_v32, 0.0  ;;  %v7165_v15 = vcombine.high %v7147_v51, %v8496_v7  ;;  %v7508_v1 = vsel %vm7432_vm2, %v7164_v10, 0.0  ;;  %v6967_v36 = vcombine.high %v6949_v32, %v8496_v7 }
 0xa21   :  { %v7098_v30 = vcombine.high %v7074_v52, %v8496_v7  ;;  %v7024_v19 = vrot.slane %v7016_v14, %v13665_v50  ;;  %v7396_v53 = vcombine.low %v12620_v40, %v12689_v16  ;;  %v7397_v12 = vcombine.high %v12620_v40, %v12689_v16 }
 0xa22   :  { %v7099_v5 = vcombine.high %v7081_v55, %v8496_v7  ;;  %v12716_v44 = vrot.slane %v7315_v39, %v13664_v3  ;;  %v7330_v28 = vcombine.low %v12623_v38, %v12694_v21  ;;  %v7031_v42 = vrot.slane %v7017_v41, %v13665_v50 }
 0xa23   :  { %7512 = vadd.xlane.f32.xlu0 %v7511_v9  ;;  %v7156_v58 = vrot.slane %v7148_v18, %v13665_v50  ;;  %v7331_v2 = vcombine.high %v12623_v38, %v12694_v21  ;;  %v7514_v33 = vsel %vm7432_vm2, %v7165_v15, 0.0  ;;  %v7481_v40 = vsel %vm7432_vm2, %v7074_v52, 0.0 }
 0xa24   :  { %7509 = vadd.xlane.f32.xlu1 %v7508_v1  ;;  %v7149_v51 = vcombine.high %v12587_v60, %v12660_v26  ;;  %v7442_v3 = vsel %vm7432_vm2, %v6967_v36, 0.0  ;;  %v7487_v4 = vsel %vm7432_vm2, %v7081_v55, 0.0  ;;  %v7484_v35 = vsel %vm7432_vm2, %v7098_v30, 0.0 }
 0xa25   :  { %v7034_v6 = vcombine.high %v7024_v19, %v8496_v7  ;;  %v7469_v17 = vsel %vm7432_vm2, %v7024_v19, 0.0  ;;  %v7490_v61 = vsel %vm7432_vm2, %v7099_v5, 0.0  ;;  %v12736_v32 = vcombine.high %v12614_v24, %v8496_v7 }
 0xa26   :  { %v7213_v60 = vrot.slane %v7199_v49, %v13665_v50  ;;  %v7475_v26 = vsel %vm7432_vm2, %v7031_v42, 0.0  ;;  %v12741_v9 = vsel %vm7432_vm2, %v7156_v58, 0.0  ;;  %v12744_v10 = vcombine.high %v7031_v42, %v8496_v7 }
 0xa27   :  { %7440 = vadd.xlane.f32.xlu0 %v7439_v23  ;;  %v7166_v52 = vcombine.high %v7156_v58, %v8496_v7  ;;  %v12748_v14 = vrot.slane %v7149_v51, %v13665_v50  ;;  %v7272_v24 = vrot.slane %v7264_v22, %v13665_v50  ;;  %v7279_v55 = vrot.slane %v7265_v20, %v13665_v50 }
 0xa28   :  { %7515 = vadd.xlane.f32.xlu1 %v7514_v33  ;;  %v12751_v16 = vsel %vm7432_vm2, %v7213_v60, 0.0  ;;  %v7472_v39 = vsel %vm7432_vm2, %v7034_v6, 0.0  ;;  %v7280_v18 = vcombine.low %v12607_v48, %v12670_v37  ;;  %v7206_v49 = vrot.slane %v7198_v8, %v13665_v50 }
 0xa29   :  { %v12757_v41 = vsel %vm7432_vm2, %v7166_v52, 0.0  ;;  %v7296_v23 = vcombine.high %v7272_v24, %v8496_v7  ;;  %v12764_v15 = vsel %vm7432_vm2, %v7272_v24, 0.0  ;;  %v7297_v22 = vcombine.high %v7279_v55, %v8496_v7 }
 0xa2a   :  { %v12768_v20 = vsel %vm7432_vm2, %v7279_v55, 0.0  ;;  %v7288_v1 = vrot.slane %v7280_v18, %v13665_v50  ;;  %v12772_v36 = vsel %vm7432_vm2, %v7206_v49, 0.0  ;;  %v7230_v30 = vcombine.high %v7206_v49, %v8496_v7 }
 0xa2b   :  { %7482 = vadd.xlane.f32.xlu0 %v7481_v40  ;;  %v7281_v8 = vcombine.high %v12607_v48, %v12670_v37  ;;  %v12778_v19 = vsel %vm7432_vm2, %v7296_v23, 0.0  ;;  %v12781_v5 = vsel %vm7432_vm2, %v7297_v22, 0.0  ;;  %v7231_v42 = vcombine.high %v7213_v60, %v8496_v7 }
 0xa2c   :  { %7443 = vadd.xlane.f32.xlu1 %v7442_v3  ;;  %v7215_v58 = vcombine.high %v12617_v29, %v12677_v63  ;;  %v12787_v33 = vsel %vm7432_vm2, %v7288_v1, 0.0  ;;  %v12790_v40 = vsel %vm7432_vm2, %v7230_v30, 0.0  ;;  %v7214_v48 = vcombine.low %v12617_v29, %v12677_v63 }
 0xa2d   :  { %v7295_v51 = vrot.slane %v7281_v8, %v13665_v50  ;;  %v12796_v37 = vsel %vm7432_vm2, %v7231_v42, 0.0  ;;  %v7404_v6 = vrot.slane %v7396_v53, %v13665_v50  ;;  %v7411_v29 = vrot.slane %v7397_v12, %v13665_v50 }
 0xa2e   :  { %v7229_v3 = vrot.slane %v7215_v58, %v13665_v50  ;;  %v7222_v52 = vrot.slane %v7214_v48, %v13665_v50  ;;  %v7338_v30 = vrot.slane %v7330_v28, %v13665_v50  ;;  %v7412_v42 = vcombine.low %v12626_v54, %v12702_v13 }
 0xa2f   :  { %7488 = vadd.xlane.f32.xlu0 %v7487_v4  ;;  %v7298_v4 = vcombine.high %v7288_v1, %v8496_v7  ;;  %v12802_v60 = vsel %vm7432_vm2, %v7295_v51, 0.0  ;;  %v7299_v24 = vcombine.high %v7295_v51, %v8496_v7  ;;  %v12824_v49 = vsel %vm7432_vm2, %v7411_v29, 0.0 }
 0xa30   :  { %7485 = vadd.xlane.f32.xlu1 %v7484_v35  ;;  %v12808_v63 = vsel %vm7432_vm2, %v7229_v3, 0.0  ;;  %v7233_v53 = vcombine.high %v7229_v3, %v8496_v7  ;;  %v12818_v55 = vsel %vm7432_vm2, %v7222_v52, 0.0  ;;  %v7428_v12 = vcombine.high %v7404_v6, %v8496_v7 }
 0xa31   :  { %v12811_v35 = vsel %vm7432_vm2, %v7298_v4, 0.0  ;;  %v12821_v18 = vsel %vm7432_vm2, %v7299_v24, 0.0  ;;  %v7232_v22 = vcombine.high %v7222_v52, %v8496_v7  ;;  %v7429_v1 = vcombine.high %v7411_v29, %v8496_v7 }
 0xa32   :  { %v12828_v23 = vsel %vm7432_vm2, %v7233_v53, 0.0  ;;  %v12837_v8 = vsel %vm7432_vm2, %v7428_v12, 0.0  ;;  %v12854_v28 = vsel %vm7432_vm2, %v7338_v30, 0.0  ;;  %v7362_v48 = vcombine.high %v7338_v30, %v8496_v7 }
 0xa33   :  { %7470 = vadd.xlane.f32.xlu0 %v7469_v17  ;;  %v12814_v17 = vsel %vm7432_vm2, %v7404_v6, 0.0  ;;  %v12848_v58 = vsel %vm7432_vm2, %v7232_v22, 0.0  ;;  %v12851_v51 = vsel %vm7432_vm2, %v7429_v1, 0.0  ;;  %v7420_v3 = vrot.slane %v7412_v42, %v13665_v50 }
 0xa34   :  { %7491 = vadd.xlane.f32.xlu1 %v7490_v61  ;;  %v7345_v61 = vrot.slane %v7331_v2, %v13665_v50  ;;  %v12865_v21 = vsel %vm7432_vm2, %v7362_v48, 0.0  ;;  %v7346_v2 = vcombine.low %v12629_v62, %v12716_v44  ;;  %v6958_v29 = vrot.slane %v6950_v11, %v13665_v50 }
 0xa35   :  { %v12872_v6 = vsel %vm7432_vm2, %v7420_v3, 0.0  ;;  %v7478_v12 = vsel %vm7432_vm2, %v12744_v10, 0.0  ;;  %v7523_v22 = vsel %vm7432_vm2, %v12748_v14, 0.0  ;;  %v7167_v1 = vcombine.high %v12748_v14, %v8496_v7 }
 0xa36   :  { %v12859_v4 = vsel %vm7432_vm2, %v7345_v61, 0.0  ;;  %v7082_v48 = vcombine.low %v12599_v27, %v12667_v31 }
 0xa37   :  { %7476 = vadd.xlane.f32.xlu0 %v7475_v26  ;;  %v7413_v26 = vcombine.high %v12626_v54, %v12702_v13  ;;  %v7363_v54 = vcombine.high %v7345_v61, %v8496_v7  ;;  %v7347_v13 = vcombine.high %v12629_v62, %v12716_v44  ;;  %v7354_v44 = vrot.slane %v7346_v2, %v13665_v50 }
 0xa38   :  { %7473 = vadd.xlane.f32.xlu1 %v7472_v39  ;;  %v8497_v39 = vmov 7   ;;  %v6965_v2 = vrot.slane %v6951_v59, %v13665_v50 }
 0xa39   :  { %v7427_v38 = vrot.slane %v7413_v26, %v13665_v50  ;;  %v12878_v24 = vsel %vm7432_vm2, %v7363_v54, 0.0  ;;  %8386 = vset.pattern.permute.xlu1 %v8497_v39  ;;  %8385 = vset.pattern.permute.xlu0 %v8497_v39  ;;  %v7361_v62 = vrot.slane %v7347_v13, %v13665_v50  ;;  %v7589_v42 = vsel %vm7432_vm2, %v7354_v44, 0.0 }
 0xa3a   :  { %v7364_v61 = vcombine.high %v7354_v44, %v8496_v7  ;;  %v7436_v54 = vsel %vm7432_vm2, %v12736_v32, 0.0  ;;  %v6968_v13 = vcombine.high %v6958_v29, %v8496_v7  ;;  %v6969_v44 = vcombine.high %v6965_v2, %v8496_v7 }
 0xa3b   :  { %7518 = vadd.xlane.f32.xlu0 %v12741_v9  ;;  %v12875_v52 = vsel %vm7432_vm2, %v7427_v38, 0.0  ;;  %v7430_v9 = vcombine.high %v7420_v3, %v8496_v7  ;;  %v7431_v53 = vcombine.high %v7427_v38, %v8496_v7  ;;  %v7595_v11 = vsel %vm7432_vm2, %v7361_v62, 0.0 }
 0xa3c   :  { %7479 = vadd.xlane.f32.xlu1 %v7478_v12  ;;  %v7365_v26 = vcombine.high %v7361_v62, %v8496_v7  ;;  %v7592_v14 = vsel %vm7432_vm2, %v7364_v61, 0.0  ;;  %v7526_v38 = vsel %vm7432_vm2, %v7167_v1, 0.0  ;;  %v7448_v39 = vsel %vm7432_vm2, %v6968_v13, 0.0 }
 0xa3d   :  { %v12895_v30 = vsel %vm7432_vm2, %v7430_v9, 0.0  ;;  %v12902_v10 = vsel %vm7432_vm2, %v7431_v53, 0.0  ;;  %v7083_v9 = vcombine.high %v12599_v27, %v12667_v31  ;;  %v7445_v62 = vsel %vm7432_vm2, %v6958_v29, 0.0 }
 0xa3e   :  { %v7598_v3 = vsel %vm7432_vm2, %v7365_v26, 0.0  ;;  %v7090_v32 = vrot.slane %v7082_v48, %v13665_v50  ;;  %v7454_v53 = vsel %vm7432_vm2, %v6969_v44, 0.0  ;;  %v7451_v46 = vsel %vm7432_vm2, %v6965_v2, 0.0 }
 0xa3f   :  { %7524 = vadd.xlane.f32.xlu0 %v7523_v22  ;;  %v7097_v59 = vrot.slane %v7083_v9, %v13665_v50 }
 0xa40   :  { %7527 = vadd.xlane.f32.xlu1 %v7526_v38  ;;  %v7100_v0 = vcombine.high %v7090_v32, %v8496_v7  ;;  %v7493_v31 = vsel %vm7432_vm2, %v7090_v32, 0.0 }
 0xa41   :  { %v7101_v29 = vcombine.high %v7097_v59, %v8496_v7  ;;  %v7499_v22 = vsel %vm7432_vm2, %v7097_v59, 0.0 }
 0xa42   :  { %v7496_v27 = vsel %vm7432_vm2, %v7100_v0, 0.0 }
 0xa43   :  { %7437 = vadd.xlane.f32.xlu0 %v7436_v54  ;;  %v7502_v12 = vsel %vm7432_vm2, %v7101_v29, 0.0 }
 0xa44   :  { %7449 = vadd.xlane.f32.xlu1 %v7448_v39 }
 0xa47   :  { %7446 = vadd.xlane.f32.xlu0 %v7445_v62 }
 0xa48   :  { %7455 = vadd.xlane.f32.xlu1 %v7454_v53 }
 0xa4b   :  { %7452 = vadd.xlane.f32.xlu0 %v7451_v46 }
 0xa4c   :  { %7497 = vadd.xlane.f32.xlu1 %v7496_v27 }
 0xa4f   :  { %7494 = vadd.xlane.f32.xlu0 %v7493_v31 }
 0xa50   :  { %7503 = vadd.xlane.f32.xlu1 %v7502_v12 }
 0xa53   :  { %7500 = vadd.xlane.f32.xlu0 %v7499_v22 }
 0xa54   :  { %7536 = vadd.xlane.f32.xlu1 %v12751_v16  ;;  %v8398_v16 = vld [vmem:[%s13162_s2 + $0x8] sm:$0xff] }
 0xa57   :  { %7521 = vadd.xlane.f32.xlu0 %v12757_v41 }
 0xa58   :  { %7557 = vadd.xlane.f32.xlu1 %v12778_v19 }
 0xa5b   :  { %7554 = vadd.xlane.f32.xlu0 %v12764_v15  ;;  %v12968_v15 = vsub.s32 %v13621_v43, %v13666_v56  ;;  %v8400_v56 = vld [vmem:[%s13162_s2 + $0x18] sm:$0xff] }
 0xa5c   :  { %7563 = vadd.xlane.f32.xlu1 %v12781_v5  ;;  %v8399_v5 = vld [vmem:[%s13162_s2 + $0x10] sm:$0xff] }
 0xa5f   :  { %7560 = vadd.xlane.f32.xlu0 %v12768_v20 }
 0xa60   :  { %7566 = vadd.xlane.f32.xlu1 %v12787_v33 }
 0xa63   :  { %7530 = vadd.xlane.f32.xlu0 %v12772_v36 }
 0xa64   :  { %7533 = vadd.xlane.f32.xlu1 %v12790_v40 }
 0xa67   :  { %7572 = vadd.xlane.f32.xlu0 %v12802_v60 }
 0xa68   :  { %7539 = vadd.xlane.f32.xlu1 %v12796_v37  ;;  %v8498_v37 = vmov 8  }
 0xa6b   :  { %7548 = vadd.xlane.f32.xlu0 %v12808_v63 }
 0xa6c   :  { %7542 = vadd.xlane.f32.xlu1 %v12818_v55 }
 0xa6f   :  { %7569 = vadd.xlane.f32.xlu0 %v12811_v35 }
 0xa70   :  { %7575 = vadd.xlane.f32.xlu1 %v12821_v18 }
 0xa73   :  { %7602 = vadd.xlane.f32.xlu0 %v12814_v17 }
 0xa74   :  { %7551 = vadd.xlane.f32.xlu1 %v12828_v23 }
 0xa77   :  { %7608 = vadd.xlane.f32.xlu0 %v12824_v49 }
 0xa78   :  { %7605 = vadd.xlane.f32.xlu1 %v12837_v8 }
 0xa7b   :  { %7545 = vadd.xlane.f32.xlu0 %v12848_v58 }
 0xa7c   :  { %7611 = vadd.xlane.f32.xlu1 %v12851_v51 }
 0xa7f   :  { %7578 = vadd.xlane.f32.xlu0 %v12854_v28 }
 0xa80   :  { %7614 = vadd.xlane.f32.xlu1 %v12872_v6 }
 0xa83   :  { %7584 = vadd.xlane.f32.xlu0 %v12859_v4 }
 0xa84   :  { %7581 = vadd.xlane.f32.xlu1 %v12865_v21 }
 0xa87   :  { %7620 = vadd.xlane.f32.xlu0 %v12875_v52 }
 0xa88   :  { %7587 = vadd.xlane.f32.xlu1 %v12878_v24 }
 0xa8b   :  { %7596 = vadd.xlane.f32.xlu0 %v7595_v11 }
 0xa8c   :  { %7590 = vadd.xlane.f32.xlu1 %v7589_v42 }
 0xa8f   :  { %7593 = vadd.xlane.f32.xlu0 %v7592_v14 }
 0xa90   :  { %7617 = vadd.xlane.f32.xlu1 %v12895_v30 }
 0xa93   :  { %7599 = vadd.xlane.f32.xlu0 %v7598_v3 }
 0xa94   :  { %7623 = vadd.xlane.f32.xlu1 %v12902_v10 }
 0xaa4   :  { %v7459_v50 = vpop.xlane.xlu0 %7458 }
 0xaa5   :  { %v12960_v7 = vpop.xlane.xlu1 %7434  ;;  %7695 = vperm.xlu1 %8386, %v8398_v16   ;;  %v7634_v20 = vmul.f32 0.125, %v7459_v50 }
 0xaa7   :  { %v7821_v60 = vrot.slane %v7634_v20, %v12968_v15 }
 0xaa8   :  { %v7465_v41 = vpop.xlane.xlu0 %7464 }
 0xaa9   :  { %7691 = vperm.xlu0 %8385, %v12394_v34   ;;  %v7636_v36 = vmul.f32 0.125, %v7465_v41  ;;  %v7462_v19 = vpop.xlane.xlu1 %7461  ;;  %7699 = vperm.xlu1 %8386, %v8399_v5  }
 0xaaa   :  { %v7635_v40 = vmul.f32 0.125, %v7462_v19 }
 0xaab   :  { %v7829_v63 = vrot.slane %v7636_v36, %v12968_v15 }
 0xaac   :  { %v7507_v33 = vpop.xlane.xlu0 %7506  ;;  %v7825_v34 = vrot.slane %v7635_v40, %v12968_v15 }
 0xaad   :  { %8388 = vset.pattern.permute.xlu0 %v8498_v37  ;;  %v7468_v43 = vpop.xlane.xlu1 %7467  ;;  %7703 = vperm.xlu1 %8386, %v8400_v56   ;;  %v7650_v49 = vmul.f32 0.125, %v7507_v33 }
 0xaae   :  { %v8049_v17 = vsel %vm4050_vm13, %v7825_v34, %v7821_v60  ;;  %v7637_v55 = vmul.f32 0.125, %v7468_v43 }
 0xaaf   :  { %v8050_v18 = vsel %vm4052_vm14, %v7829_v63, %v8049_v17  ;;  %v7885_v21 = vrot.slane %v7650_v49, %v12968_v15 }
 0xab0   :  { %v7513_v35 = vpop.xlane.xlu0 %7512  ;;  %v7833_v23 = vrot.slane %v7637_v55, %v12968_v15 }
 0xab1   :  { %v7652_v8 = vmul.f32 0.125, %v7513_v35  ;;  %v7510_v58 = vpop.xlane.xlu1 %7509  ;;  %7707 = vperm.xlu1 %8386, %v12434_v57  }
 0xab2   :  { %v8051_v28 = vsel %vm4054_vm15, %v7833_v23, %v8050_v18  ;;  %v7651_v4 = vmul.f32 0.125, %v7510_v58 }
 0xab3   :  { %v7893_v52 = vrot.slane %v7652_v8, %v12968_v15 }
 0xab4   :  { %v7441_v51 = vpop.xlane.xlu0 %7440  ;;  %v7889_v6 = vrot.slane %v7651_v4, %v12968_v15 }
 0xab5   :  { %v7516_v24 = vpop.xlane.xlu1 %7515  ;;  %7711 = vperm.xlu1 %8386, %v12429_v25   ;;  %v7628_v34 = vmul.f32 0.125, %v7441_v51 }
 0xab6   :  { %v8063_v30 = vsel %vm4050_vm13, %v7889_v6, %v7885_v21  ;;  %v7653_v11 = vmul.f32 0.125, %v7516_v24 }
 0xab7   :  { %v8064_v42 = vsel %vm4052_vm14, %v7893_v52, %v8063_v30  ;;  %v7797_v49 = vrot.slane %v7628_v34, %v12968_v15 }
 0xab8   :  { %v7483_v1 = vpop.xlane.xlu0 %7482  ;;  %v7897_v57 = vrot.slane %v7653_v11, %v12968_v15 }
 0xab9   :  { %v7444_v61 = vpop.xlane.xlu1 %7443  ;;  %7715 = vperm.xlu1 %8386, %v12469_v47   ;;  %v7642_v48 = vmul.f32 0.125, %v7483_v1 }
 0xaba   :  { %v8065_v10 = vsel %vm4054_vm15, %v7897_v57, %v8064_v42  ;;  %v7629_v56 = vmul.f32 0.125, %v7444_v61 }
 0xabb   :  { %v7853_v13 = vrot.slane %v7642_v48, %v12968_v15 }
 0xabc   :  { %v7489_v26 = vpop.xlane.xlu0 %7488 }
 0xabd   :  { %v7644_v14 = vmul.f32 0.125, %v7489_v26  ;;  %v7486_v3 = vpop.xlane.xlu1 %7485  ;;  %7719 = vperm.xlu1 %8386, %v12464_v45   ;;  %v8401_v45 = vld [vmem:[%s13162_s2] sm:$0xff]  ;;  %s8499_s2 = smov [#allocation2]  }
 0xabe   :  { %v7643_v38 = vmul.f32 0.125, %v7486_v3  ;;  %s8149_s17 = sshll.u32 %s8499_s2, 4  ;;  %s8150_s17 = int_to_ptr.vmem [resolvable:$true] %s8149_s17 }
 0xabf   :  { %v7861_v39 = vrot.slane %v7644_v14, %v12968_v15  ;;  %s8402_s18 = scalar_lea.vmem %s8150_s17, 16  ;;  %s8406_s19 = scalar_lea.vmem %s8150_s17, 32 }
 0xac0   :  { %v7471_v25 = vpop.xlane.xlu0 %7470  ;;  %v7857_v2 = vrot.slane %v7643_v38, %v12968_v15  ;;  %p8403_p0 = scmp.ne.s32.totalorder %s8150_s17, %s8402_s18  ;;  %p8407_p1 = scmp.lt.s32.totalorder %s8150_s17, %s8150_s17 }
 0xac1   :  { %v7638_v54 = vmul.f32 0.125, %v7471_v25  ;;  %v7492_v47 = vpop.xlane.xlu1 %7491  ;;  %8387 = vset.pattern.permute.xlu1 %v8498_v37  ;;  %v7626_v37 = vmul.f32 0.125, %v12960_v7  ;;  %v7801_v7 = vrot.slane %v7629_v56, %v12968_v15  ;;  %p8408_p2 = scmp.lt.s32.totalorder %s8406_s19, %s8402_s18 }
 0xac2   :  { %v8056_v44 = vsel %vm4050_vm13, %v7857_v2, %v7853_v13  ;;  %v7645_v53 = vmul.f32 0.125, %v7492_v47  ;;  %8137 = vperm.xlu1 %8387, %v8401_v45  }
 0xac3   :  { %v7837_v9 = vrot.slane %v7638_v54, %v12968_v15  ;;  %v8057_v46 = vsel %vm4052_vm14, %v7861_v39, %v8056_v44  ;;  %v7789_v55 = vrot.slane %v7626_v37, %v12968_v15  ;;  %p8409_p3 = por %p8408_p2, %p8407_p1 }
 0xac4   :  { %v7477_v62 = vpop.xlane.xlu0 %7476  ;;  %v7865_v0 = vrot.slane %v7645_v53, %v12968_v15 }
 0xac5   :  { %v8052_v32 = vsel %vm4056_vm0, %v7837_v9, %v8051_v28  ;;  %v7640_v59 = vmul.f32 0.125, %v7477_v62  ;;  %v7474_v27 = vpop.xlane.xlu1 %7473  ;;  %p8410_p4 = pnand %p8409_p3, %p8403_p0 }
 0xac6   :  { %v8058_v29 = vsel %vm4054_vm15, %v7865_v0, %v8057_v46  ;;  %v7639_v12 = vmul.f32 0.125, %v7474_v27 }
 0xac7   :  { %v7845_v41 = vrot.slane %v7640_v59, %v12968_v15 }
 0xac8   :  { %v7519_v31 = vpop.xlane.xlu0 %7518  ;;  %v7841_v50 = vrot.slane %v7639_v12, %v12968_v15 }
 0xac9   :  { %v7654_v22 = vmul.f32 0.125, %v7519_v31  ;;  %v7480_v20 = vpop.xlane.xlu1 %7479 }
 0xaca   :  { %v7641_v5 = vmul.f32 0.125, %v7480_v20  ;;  %v8053_v33 = vsel %vm4058_vm1, %v7841_v50, %v8052_v32 }
 0xacb   :  { %v7901_v16 = vrot.slane %v7654_v22, %v12968_v15  ;;  %v8054_v40 = vsel %vm4060_vm3, %v7845_v41, %v8053_v33 }
 0xacc   :  { %v7525_v36 = vpop.xlane.xlu0 %7524  ;;  %v7849_v60 = vrot.slane %v7641_v5, %v12968_v15 }
 0xacd   :  { %v13010_v19 = vsel %vm4056_vm0, %v7901_v16, %v8065_v10  ;;  %v7528_v63 = vpop.xlane.xlu1 %7527  ;;  %v7656_v53 = vmul.f32 0.125, %v7525_v36 }
 0xace   :  { %v13017_v17 = vsel %vm13702_vm7, %v7849_v60, %v8054_v40  ;;  %v7657_v59 = vmul.f32 0.125, %v7528_v63 }
 0xacf   :  { %v7909_v22 = vrot.slane %v7656_v53, %v12968_v15 }
 0xad0   :  { %v7438_v43 = vpop.xlane.xlu0 %7437  ;;  %v7913_v41 = vrot.slane %v7657_v59, %v12968_v15 }
 0xad1   :  { %v7627_v35 = vmul.f32 0.125, %v7438_v43  ;;  %v7450_v23 = vpop.xlane.xlu1 %7449 }
 0xad2   :  { %v7631_v51 = vmul.f32 0.125, %v7450_v23 }
 0xad3   :  { %v7793_v18 = vrot.slane %v7627_v35, %v12968_v15 }
 0xad4   :  { %v7447_v8 = vpop.xlane.xlu0 %7446  ;;  %v7809_v52 = vrot.slane %v7631_v51, %v12968_v15 }
 0xad5   :  { %v8042_v58 = vsel %vm4050_vm13, %v7793_v18, %v7789_v55  ;;  %v7630_v28 = vmul.f32 0.125, %v7447_v8  ;;  %v7456_v24 = vpop.xlane.xlu1 %7455 }
 0xad6   :  { %v8043_v4 = vsel %vm4052_vm14, %v7797_v49, %v8042_v58  ;;  %v7633_v11 = vmul.f32 0.125, %v7456_v24 }
 0xad7   :  { %v8044_v21 = vsel %vm4054_vm15, %v7801_v7, %v8043_v4  ;;  %v7805_v6 = vrot.slane %v7630_v28, %v12968_v15 }
 0xad8   :  { %v7453_v1 = vpop.xlane.xlu0 %7452  ;;  %v7817_v26 = vrot.slane %v7633_v11, %v12968_v15 }
 0xad9   :  { %v8045_v30 = vsel %vm4056_vm0, %v7805_v6, %v8044_v21  ;;  %v7632_v42 = vmul.f32 0.125, %v7453_v1  ;;  %v7498_v10 = vpop.xlane.xlu1 %7497 }
 0xada   :  { %v8046_v57 = vsel %vm4058_vm1, %v7809_v52, %v8045_v30  ;;  %v7647_v14 = vmul.f32 0.125, %v7498_v10 }
 0xadb   :  { %v7813_v61 = vrot.slane %v7632_v42, %v12968_v15 }
 0xadc   :  { %v7495_v48 = vpop.xlane.xlu0 %7494  ;;  %v7873_v13 = vrot.slane %v7647_v14, %v12968_v15 }
 0xadd   :  { %v7646_v3 = vmul.f32 0.125, %v7495_v48  ;;  %v8047_v25 = vsel %vm4060_vm3, %v7813_v61, %v8046_v57  ;;  %v7504_v2 = vpop.xlane.xlu1 %7503 }
 0xade   :  { %v13034_v38 = vsel %vm13703_vm8, %v7817_v26, %v8047_v25  ;;  %v7649_v47 = vmul.f32 0.125, %v7504_v2 }
 0xadf   :  { %v7869_v54 = vrot.slane %v7646_v3, %v12968_v15 }
 0xae0   :  { %v7501_v9 = vpop.xlane.xlu0 %7500  ;;  %v7881_v45 = vrot.slane %v7649_v47, %v12968_v15 }
 0xae1   :  { %v8059_v39 = vsel %vm4056_vm0, %v7869_v54, %v8058_v29  ;;  %v7648_v62 = vmul.f32 0.125, %v7501_v9  ;;  %v7537_v46 = vpop.xlane.xlu1 %7536 }
 0xae2   :  { %v8060_v44 = vsel %vm4058_vm1, %v7873_v13, %v8059_v39  ;;  %v7660_v53 = vmul.f32 0.125, %v7537_v46 }
 0xae3   :  { %v7877_v32 = vrot.slane %v7648_v62, %v12968_v15 }
 0xae4   :  { %v7522_v0 = vpop.xlane.xlu0 %7521 }
 0xae5   :  { %v7655_v27 = vmul.f32 0.125, %v7522_v0  ;;  %v8061_v31 = vsel %vm4060_vm3, %v7877_v32, %v8060_v44  ;;  %v7558_v50 = vpop.xlane.xlu1 %7557 }
 0xae6   :  { %v13044_v12 = vsel %vm13704_vm4, %v7881_v45, %v8061_v31  ;;  %v7667_v5 = vmul.f32 0.125, %v7558_v50  ;;  %v7925_v50 = vrot.slane %v7660_v53, %v12968_v15 }
 0xae7   :  { %v7905_v29 = vrot.slane %v7655_v27, %v12968_v15 }
 0xae8   :  { %v7555_v16 = vpop.xlane.xlu0 %7554  ;;  %v7953_v56 = vrot.slane %v7667_v5, %v12968_v15 }
 0xae9   :  { %v7666_v20 = vmul.f32 0.125, %v7555_v16  ;;  %v8067_v36 = vsel %vm4058_vm1, %v7905_v29, %v13010_v19  ;;  %v7564_v60 = vpop.xlane.xlu1 %7563 }
 0xaea   :  { %v8068_v33 = vsel %vm4060_vm3, %v7909_v22, %v8067_v36  ;;  %v7669_v63 = vmul.f32 0.125, %v7564_v60 }
 0xaeb   :  { %v13053_v40 = vsel %vm13705_vm9, %v7913_v41, %v8068_v33  ;;  %v7949_v37 = vrot.slane %v7666_v20, %v12968_v15 }
 0xaec   :  { %v7561_v34 = vpop.xlane.xlu0 %7560  ;;  %v7961_v19 = vrot.slane %v7669_v63, %v12968_v15 }
 0xaed   :  { %v7668_v43 = vmul.f32 0.125, %v7561_v34  ;;  %v8077_v55 = vsel %vm4050_vm13, %v7953_v56, %v7949_v37  ;;  %v7567_v18 = vpop.xlane.xlu1 %7566 }
 0xaee   :  { %v7670_v8 = vmul.f32 0.125, %v7567_v18 }
 0xaef   :  { %v7957_v35 = vrot.slane %v7668_v43, %v12968_v15 }
 0xaf0   :  { %v7531_v49 = vpop.xlane.xlu0 %7530  ;;  %v7965_v58 = vrot.slane %v7670_v8, %v12968_v15 }
 0xaf1   :  { %v8078_v23 = vsel %vm4052_vm14, %v7957_v35, %v8077_v55  ;;  %v7534_v51 = vpop.xlane.xlu1 %7533  ;;  %v7658_v9 = vmul.f32 0.125, %v7531_v49 }
 0xaf2   :  { %v8079_v7 = vsel %vm4054_vm15, %v7961_v19, %v8078_v23  ;;  %v7659_v39 = vmul.f32 0.125, %v7534_v51 }
 0xaf3   :  { %v8080_v4 = vsel %vm4056_vm0, %v7965_v58, %v8079_v7  ;;  %v7917_v44 = vrot.slane %v7658_v9, %v12968_v15 }
 0xaf4   :  { %v7573_v28 = vpop.xlane.xlu0 %7572  ;;  %v7921_v32 = vrot.slane %v7659_v39, %v12968_v15 }
 0xaf5   :  { %v7540_v21 = vpop.xlane.xlu1 %7539  ;;  %v7672_v16 = vmul.f32 0.125, %v7573_v28 }
 0xaf6   :  { %v7661_v45 = vmul.f32 0.125, %v7540_v21  ;;  %v8070_v29 = vsel %vm4050_vm13, %v7921_v32, %v7917_v44 }
 0xaf7   :  { %v8071_v5 = vsel %vm4052_vm14, %v7925_v50, %v8070_v29  ;;  %v7973_v56 = vrot.slane %v7672_v16, %v12968_v15 }
 0xaf8   :  { %v7549_v6 = vpop.xlane.xlu0 %7548  ;;  %v7929_v41 = vrot.slane %v7661_v45, %v12968_v15 }
 0xaf9   :  { %v7543_v52 = vpop.xlane.xlu1 %7542  ;;  %v7664_v20 = vmul.f32 0.125, %v7549_v6 }
 0xafa   :  { %v7662_v59 = vmul.f32 0.125, %v7543_v52  ;;  %v8072_v35 = vsel %vm4054_vm15, %v7929_v41, %v8071_v5 }
 0xafb   :  { %v7941_v55 = vrot.slane %v7664_v20, %v12968_v15 }
 0xafc   :  { %v7570_v24 = vpop.xlane.xlu0 %7569  ;;  %v7933_v46 = vrot.slane %v7662_v59, %v12968_v15 }
 0xafd   :  { %v7576_v1 = vpop.xlane.xlu1 %7575  ;;  %v7671_v0 = vmul.f32 0.125, %v7570_v24 }
 0xafe   :  { %v7673_v19 = vmul.f32 0.125, %v7576_v1  ;;  %v8073_v7 = vsel %vm4056_vm0, %v7933_v46, %v8072_v35 }
 0xaff   :  { %v7969_v36 = vrot.slane %v7671_v0, %v12968_v15 }
 0xb00   :  { %v7603_v30 = vpop.xlane.xlu0 %7602 }
 0xb01   :  { %v7552_v11 = vpop.xlane.xlu1 %7551  ;;  %v8081_v8 = vsel %vm4058_vm1, %v7969_v36, %v8080_v4  ;;  %v7682_v58 = vmul.f32 0.125, %v7603_v30  ;;  %v7977_v4 = vrot.slane %v7673_v19, %v12968_v15 }
 0xb03   :  { %v8013_v9 = vrot.slane %v7682_v58, %v12968_v15 }
 0xb04   :  { %v13064_v42 = vpop.xlane.xlu0 %7608 }
 0xb05   :  { %v7606_v57 = vpop.xlane.xlu1 %7605 }
 0xb06   :  { %v7683_v24 = vmul.f32 0.125, %v7606_v57 }
 0xb08   :  { %v7546_v61 = vpop.xlane.xlu0 %7545 }
 0xb09   :  { %v13066_v26 = vpop.xlane.xlu1 %7611  ;;  %v7663_v22 = vmul.f32 0.125, %v7546_v61 }
 0xb0a   :  { %v7685_v53 = vmul.f32 0.125, %v13066_v26 }
 0xb0b   :  { %v7937_v60 = vrot.slane %v7663_v22, %v12968_v15 }
 0xb0c   :  { %v7579_v10 = vpop.xlane.xlu0 %7578  ;;  %v8025_v46 = vrot.slane %v7685_v53, %v12968_v15 }
 0xb0d   :  { %v13068_v48 = vpop.xlane.xlu1 %7614  ;;  %v7674_v18 = vmul.f32 0.125, %v7579_v10  ;;  %v8074_v52 = vsel %vm4058_vm1, %v7937_v60, %v8073_v7  ;;  %v8082_v10 = vsel %vm4060_vm3, %v7973_v56, %v8081_v8 }
 0xb0e   :  { %v8075_v44 = vsel %vm4060_vm3, %v7941_v55, %v8074_v52  ;;  %v7686_v0 = vmul.f32 0.125, %v13068_v48 }
 0xb10   :  { %v7585_v14 = vpop.xlane.xlu0 %7584 }
 0xb11   :  { %v7582_v3 = vpop.xlane.xlu1 %7581  ;;  %v7676_v1 = vmul.f32 0.125, %v7585_v14 }
 0xb12   :  { %v7675_v34 = vmul.f32 0.125, %v7582_v3  ;;  %v7981_v3 = vrot.slane %v7674_v18, %v12968_v15 }
 0xb13   :  { %v7989_v45 = vrot.slane %v7676_v1, %v12968_v15 }
 0xb14   :  { %v13070_v25 = vpop.xlane.xlu0 %7620  ;;  %v7985_v28 = vrot.slane %v7675_v34, %v12968_v15 }
 0xb15   :  { %v7588_v54 = vpop.xlane.xlu1 %7587  ;;  %v7688_v19 = vmul.f32 0.125, %v13070_v25 }
 0xb16   :  { %v7677_v21 = vmul.f32 0.125, %v7588_v54  ;;  %v7684_v54 = vmul.f32 0.125, %v13064_v42  ;;  %v8084_v14 = vsel %vm4050_vm13, %v7985_v28, %v7981_v3 }
 0xb17   :  { %v8085_v50 = vsel %vm4052_vm14, %v7989_v45, %v8084_v14  ;;  %v8037_v25 = vrot.slane %v7688_v19, %v12968_v15 }
 0xb18   :  { %v13072_v13 = vpop.xlane.xlu0 %7596  ;;  %v8021_v60 = vrot.slane %v7684_v54, %v12968_v15 }
 0xb19   :  { %v7591_v2 = vpop.xlane.xlu1 %7590  ;;  %v7680_v36 = vmul.f32 0.125, %v13072_v13 }
 0xb1a   :  { %v7678_v61 = vmul.f32 0.125, %v7591_v2  ;;  %v7993_v2 = vrot.slane %v7677_v21, %v12968_v15 }
 0xb1b   :  { %v8005_v18 = vrot.slane %v7680_v36, %v12968_v15 }
 0xb1c   :  { %v7594_v47 = vpop.xlane.xlu0 %7593  ;;  %v7997_v42 = vrot.slane %v7678_v61, %v12968_v15  ;;  %v8086_v26 = vsel %vm4054_vm15, %v7993_v2, %v8085_v50 }
 0xb1d   :  { %v13074_v62 = vpop.xlane.xlu1 %7617  ;;  %v7679_v30 = vmul.f32 0.125, %v7594_v47  ;;  %v8017_v47 = vrot.slane %v7683_v24, %v12968_v15 }
 0xb1f   :  { %v8001_v59 = vrot.slane %v7679_v30, %v12968_v15  ;;  %v8091_v48 = vsel %vm4050_vm13, %v8017_v47, %v8013_v9  ;;  %vm13708_vm13 = vmmov %vm13704_vm4 }
 0xb20   :  { %v7600_v27 = vpop.xlane.xlu0 %7599  ;;  %v8092_v55 = vsel %vm4052_vm14, %v8021_v60, %v8091_v48  ;;  %vm13709_vm14 = vmmov %vm13704_vm4 }
 0xb21   :  { %v13078_v31 = vpop.xlane.xlu1 %7623  ;;  %v7681_v16 = vmul.f32 0.125, %v7600_v27 }
 0xb23   :  { %v8009_v13 = vrot.slane %v7681_v16, %v12968_v15 }
 0xb25   :  { %v7696_v33 = vpop.permute.xlu1 %7695 }
 0xb26   :  { %v8107_v63 = vmul.f32 %v13017_v17, %v7696_v33  ;;  %v7665_v17 = vmul.f32 0.125, %v7552_v11  ;;  %v8087_v33 = vsel %vm4056_vm0, %v7997_v42, %v8086_v26 }
 0xb27   :  { %v8088_v34 = vsel %vm4058_vm1, %v8001_v59, %v8087_v33 }
 0xb28   :  { %v7692_v37 = vpop.permute.xlu0 %7691  ;;  %v8116_v49 = vsel %vm8114_vm10, %v8107_v63, 0.0  ;;  %v7945_v57 = vrot.slane %v7665_v17, %v12968_v15  ;;  %v8089_v58 = vsel %vm4060_vm3, %v8005_v18, %v8088_v34 }
 0xb29   :  { %v8106_v43 = vmul.f32 %v13034_v38, %v7692_v37  ;;  %v7700_v38 = vpop.permute.xlu1 %7699  ;;  %v8083_v37 = vsel %vm13707_vm12, %v7977_v4, %v8082_v10 }
 0xb2a   :  { %v8108_v6 = vmul.f32 %v13044_v12, %v7700_v38  ;;  %v8076_v22 = vsel %vm13706_vm11, %v7945_v57, %v8075_v44  ;;  %v8090_v38 = vsel %vm13708_vm13, %v8009_v13, %v8089_v58 }
 0xb2b   :  { %v8115_v23 = vsel %vm8114_vm10, %v8106_v43, 0.0  ;;  %v7689_v43 = vmul.f32 0.125, %v13078_v31 }
 0xb2c   :  { %v8117_v51 = vadd.f32 %v8116_v49, %v8115_v23  ;;  %v8118_v11 = vsel %vm8114_vm10, %v8108_v6, 0.0  ;;  %v8093_v23 = vsel %vm4054_vm15, %v8025_v46, %v8092_v55  ;;  %vm8141_vm15 = vcmask 8192  }
 0xb2d   :  { %v7704_v12 = vpop.permute.xlu1 %7703  ;;  %v8041_v17 = vrot.slane %v7689_v43, %v12968_v15 }
 0xb2e   :  { %v8119_v39 = vadd.f32 %v8118_v11, %v8117_v51  ;;  %v8109_v32 = vmul.f32 %v13053_v40, %v7704_v12  ;;  %v7687_v40 = vmul.f32 0.125, %v13074_v62  ;;  %v8029_v62 = vrot.slane %v7686_v0, %v12968_v15 }
 0xb30   :  { %v8120_v29 = vsel %vm8114_vm10, %v8109_v32, 0.0  ;;  %v8033_v63 = vrot.slane %v7687_v40, %v12968_v15  ;;  %v8094_v8 = vsel %vm4056_vm0, %v8029_v62, %v8093_v23 }
 0xb31   :  { %v8121_v41 = vadd.f32 %v8120_v29, %v8119_v39  ;;  %v7708_v20 = vpop.permute.xlu1 %7707 }
 0xb32   :  { %v8110_v5 = vmul.f32 %v8076_v22, %v7708_v20  ;;  %v8095_v28 = vsel %vm4058_vm1, %v8033_v63, %v8094_v8 }
 0xb33   :  { %v8096_v52 = vsel %vm4060_vm3, %v8037_v25, %v8095_v28 }
 0xb34   :  { %v8122_v27 = vsel %vm8114_vm10, %v8110_v5, 0.0  ;;  %v8097_v1 = vsel %vm13709_vm14, %v8041_v17, %v8096_v52 }
 0xb35   :  { %v8123_v56 = vadd.f32 %v8122_v27, %v8121_v41  ;;  %v7712_v35 = vpop.permute.xlu1 %7711 }
 0xb36   :  { %v8111_v49 = vmul.f32 %v8083_v37, %v7712_v35 }
 0xb38   :  { %v8124_v7 = vsel %vm8114_vm10, %v8111_v49, 0.0 }
 0xb39   :  { %v8125_v31 = vadd.f32 %v8124_v7, %v8123_v56  ;;  %v7716_v51 = vpop.permute.xlu1 %7715 }
 0xb3a   :  { %v8112_v21 = vmul.f32 %v8090_v38, %v7716_v51 }
 0xb3c   :  { %v8126_v6 = vsel %vm8114_vm10, %v8112_v21, 0.0 }
 0xb3d   :  { %v7720_v24 = vpop.permute.xlu1 %7719  ;;  %v8127_v10 = vadd.f32 %v8126_v6, %v8125_v31 }
 0xb3e   :  { %v8113_v61 = vmul.f32 %v8097_v1, %v7720_v24 }
 0xb40   :  { %v8128_v4 = vsel %vm8114_vm10, %v8113_v61, 0.0 }
 0xb41   :  { %v8129_v3 = vadd.f32 %v8128_v4, %v8127_v10  ;;  %v8138_v12 = vpop.permute.xlu1 %8137 }
 0xb43   :  { %v8130_v30 = vrot.slane %v8129_v3, 4 }
 0xb45   :  { %v8131_v11 = vadd.f32 %v8130_v30, %v8129_v3 }
 0xb47   :  { %v8132_v9 = vrot.slane %v8131_v11, 2 }
 0xb49   :  { %v8133_v54 = vadd.f32 %v8132_v9, %v8131_v11 }
 0xb4b   :  { %v8134_v39 = vrot.slane %v8133_v54, 1 }
 0xb4d   :  { %v8135_v15 = vadd.f32 %v8134_v39, %v8133_v54 }
 0xb4f   :  { %v8140_v44 = vadd.f32 %v8138_v12, %v8135_v15 }
 0xb51   :  { %8142 = vst.msk [vmem:[#allocation2] sm:$0x1] %vm8141_vm15, %v8140_v44 }
 0xb52   :  { %8413 = shalt.err (!%p8410_p4)
}
 0xb53   :  { %s8414_s10 = scalar_lea.hbm %s13164_s4, 16 }
 0xb54   :  { %p8415_p5 = scmp.ne.s32.totalorder %s13164_s4, %s8414_s10  ;;  %p8418_p6 = scmp.lt.u32.totalorder %s8414_s10, %s13164_s4 }
 0xb56   :  { %p8420_p7 = pnand %p8418_p6, %p8415_p5 }
 0xb58   :  { %8423 = shalt.err (!%p8420_p7)
}
 0xb59   :  { %8152 = dma.vmem_to_hbm [thread:$0]  %s8150_s17, 16, %s13164_s4, [#allocation3]  }
 0xb5a   :  { %8424 = dma.done.wait [#allocation3], 16  }
 0xb5b   :  { %8425 = vsyncadd [#allocation3], 4294967280 }
 0xb5c   :  { %8156 = vsyncpa [#allocation3], 1 }

</bundles_post_ra>
